<compile_context>
chip_gen: v7x
topology: tpu7x:2x2x1
jax: 0.10.0
libtpu: 0.0.40
codegen_flags: <defaults>
</compile_context>

<pallas_src>
import jax
import jax.numpy as jnp
from jax import lax
from jax.experimental import pallas as pl
from jax.experimental.pallas import tpu as pltpu
import numpy as np

# ---- Small config consistent with the PK module semantics -------------------
DIM = 32
HEADS = 4
DIM_KEY = DIM // 2                 # default dim_key = dim // 2
NUM_KEYS = 16
PRODUCT_KEYS = 2
TOPK = 4                           # product_key_topk (defaults to final_topk)
FINAL_TOPK = 4
assert FINAL_TOPK <= TOPK ** PRODUCT_KEYS

QOUT = DIM_KEY * PRODUCT_KEYS * HEADS            # query projection width
SIM_COLS = PRODUCT_KEYS * HEADS * NUM_KEYS       # folded similarity width (lane-dense)
NEG = -1e30                                      # sentinel; assumes |sim| << 1e30


# ---- Pallas kernel -----------------------------------------------------------
def pk_kernel(x_ref, wsim_ref, scores_ref, idx_ref):
    # x_ref      : (TM, DIM)
    # wsim_ref   : (DIM, SIM_COLS)   -- keys folded into the query projection
    # scores_ref : (HEADS*FINAL_TOPK, TM)  f32   (lane-dense, transposed)
    # idx_ref    : (HEADS*FINAL_TOPK, TM)  i32
    tm = x_ref.shape[0]

    # Single lane-dense MXU matmul producing every (product-key, head) sim block.
    sim = jnp.dot(x_ref[...], wsim_ref[...], preferred_element_type=jnp.float32)
    sim3 = sim.reshape(tm, PRODUCT_KEYS * HEADS, NUM_KEYS)   # segment s = p*HEADS + h

    # ---- Stage 1: top-k over keys, vectorized over all P*H segments ---------
    ids = lax.broadcasted_iota(jnp.int32, sim3.shape, 2)
    cur = sim3
    vs, ixs = [], []
    for _ in range(TOPK):
        m = jnp.max(cur, axis=-1, keepdims=True)                               # (TM, P*H, 1)
        idx = jnp.min(jnp.where(cur == m, ids, NUM_KEYS), axis=-1, keepdims=True)
        vs.append(m)
        ixs.append(idx)
        cur = jnp.where(ids == idx, NEG, cur)
    vals = jnp.concatenate(vs, axis=-1)      # (TM, P*H, TOPK)
    idxs = jnp.concatenate(ixs, axis=-1)     # (TM, P*H, TOPK) int32

    # ---- Stage 2: Cartesian-product combine across product keys (batched over heads)
    fs = vals[:, 0:HEADS, :]                 # (TM, H, TOPK)   stride num_keys**0
    fi = idxs[:, 0:HEADS, :]
    for p in range(1, PRODUCT_KEYS):
        vp = vals[:, p * HEADS:(p + 1) * HEADS, :]
        ip = idxs[:, p * HEADS:(p + 1) * HEADS, :] * (NUM_KEYS ** p)
        c = fs.shape[-1]
        fs = (fs[:, :, :, None] + vp[:, :, None, :]).reshape(tm, HEADS, c * TOPK)
        fi = (fi[:, :, :, None] + ip[:, :, None, :]).reshape(tm, HEADS, c * TOPK)

    # ---- Stage 3: final top-k with the index gather fused into the same mask -
    ncomb = fs.shape[-1]
    cids = lax.broadcasted_iota(jnp.int32, fs.shape, 2)
    cur = fs
    out_s, out_i = [], []
    for _ in range(FINAL_TOPK):
        m = jnp.max(cur, axis=-1, keepdims=True)                               # (TM, H, 1)
        pos = jnp.min(jnp.where(cur == m, cids, ncomb), axis=-1, keepdims=True)
        sel = cids == pos                                                      # first occurrence
        out_s.append(m)
        out_i.append(jnp.sum(jnp.where(sel, fi, 0), axis=-1, keepdims=True))
        cur = jnp.where(sel, NEG, cur)
    scores = jnp.concatenate(out_s, axis=-1)     # (TM, H, FINAL_TOPK) f32
    findx = jnp.concatenate(out_i, axis=-1)      # (TM, H, FINAL_TOPK) i32

    # Lane-dense stores: the last dim of the output tile is TM.
    scores_ref[...] = scores.reshape(tm, HEADS * FINAL_TOPK).T
    idx_ref[...] = findx.reshape(tm, HEADS * FINAL_TOPK).T


# ---- Wrapper -----------------------------------------------------------------
def pk_forward(x, wq, keys, *, tm=512):
    """x: (B, N, DIM); wq: (DIM, QOUT) with q = x @ wq; keys: (P, NUM_KEYS, H, DK)."""
    b, n, d = x.shape
    m = b * n
    tm = min(tm, m)
    assert m % tm == 0 and tm % 8 == 0
    assert tm == m or tm % 128 == 0, "output tile lane dim must be 128-aligned or cover m"
    xf = x.reshape(m, d)

    # Host-side fold of the key table into the query projection:
    #   Wsim[d, (p*H+h)*NUM_KEYS + k] = sum_dk Wq[d, (p*H+h)*DK + dk] * keys[p, k, h, dk]
    wq4 = wq.reshape(d, PRODUCT_KEYS, HEADS, DIM_KEY)
    kt = jnp.transpose(keys, (0, 2, 3, 1))                       # (P, H, DK, NUM_KEYS)
    wsim = jnp.einsum('dphc,phck->dphk', wq4, kt).reshape(d, SIM_COLS)

    hk = HEADS * FINAL_TOPK
    scores_t, idx_t = pl.pallas_call(
        pk_kernel,
        out_shape=(jax.ShapeDtypeStruct((hk, m), jnp.float32),
                   jax.ShapeDtypeStruct((hk, m), jnp.int32)),
        grid_spec=pltpu.PrefetchScalarGridSpec(
            num_scalar_prefetch=0,
            grid=(m // tm,),
            in_specs=[
                pl.BlockSpec((tm, d), lambda i: (i, 0)),
                pl.BlockSpec((d, SIM_COLS), lambda i: (0, 0)),   # grid-invariant weight block
            ],
            out_specs=[
                pl.BlockSpec((hk, tm), lambda i: (0, i)),
                pl.BlockSpec((hk, tm), lambda i: (0, i)),
            ],
        ),
        compiler_params=pltpu.CompilerParams(dimension_semantics=("parallel",)),
    )(xf, wsim)

    scores = scores_t.T.reshape(b, n, HEADS, FINAL_TOPK)
    indices = idx_t.T.reshape(b, n, HEADS, FINAL_TOPK)
    return scores, indices


# ---- Pure-JAX reference (mirrors the torch forward exactly) -------------------
def pk_reference(x, wq, keys):
    b, n, _ = x.shape
    q = x @ wq
    q = q.reshape(b, n, PRODUCT_KEYS, HEADS, DIM_KEY).transpose(2, 0, 1, 3, 4)
    k = keys.transpose(0, 2, 1, 3)                     # (P, H, K, DK)
    sim = jnp.einsum('pbnhd,phkd->pbnhk', q, k)
    scores, indices = lax.top_k(sim, TOPK)
    strides = (NUM_KEYS ** jnp.arange(PRODUCT_KEYS)).reshape(PRODUCT_KEYS, 1, 1, 1, 1)
    indices = indices * strides
    fi, fs = indices[0], scores[0]
    for i in range(1, PRODUCT_KEYS):
        fi = (fi[..., :, None] + indices[i][..., None, :]).reshape(*fi.shape[:-1], -1)
        fs = (fs[..., :, None] + scores[i][..., None, :]).reshape(*fs.shape[:-1], -1)
    fs, pk_pos = lax.top_k(fs, FINAL_TOPK)
    fi = jnp.take_along_axis(fi, pk_pos, axis=-1)
    return fs, fi


if __name__ == "__main__":
    B, N = 2, 8
    key = jax.random.PRNGKey(0)
    kx, kw, kk = jax.random.split(key, 3)

    x = jax.random.normal(kx, (B, N, DIM), dtype=jnp.float32)
    # to_queries: Linear(dim, dim_key*product_keys*heads, bias=False); stored as (in, out)
    wq = jax.random.normal(kw, (DIM, QOUT), dtype=jnp.float32) * (1.0 / np.sqrt(DIM))
    # keys: nn.Parameter (product_keys, num_keys, heads, dim_key), init normal std=0.02
    keys = jax.random.normal(kk, (PRODUCT_KEYS, NUM_KEYS, HEADS, DIM_KEY),
                             dtype=jnp.float32) * 0.02

    scores, indices = pk_forward(x, wq, keys)
    jax.block_until_ready((scores, indices))

    ref_scores, ref_indices = pk_reference(x, wq, keys)
    np.testing.assert_allclose(np.asarray(scores), np.asarray(ref_scores),
                               rtol=1e-3, atol=1e-3)
    np.testing.assert_array_equal(np.asarray(indices), np.asarray(ref_indices))

    print("KERNEL_OK")
</pallas_src>

<mosaic_0001>
module attributes {stable_mosaic.version = 11 : i64} {
  func.func @pk_kernel(%arg0: i32, %arg1: memref<16x32xf32, #tpu.memory_space<vmem>>, %arg2: memref<32x128xf32, #tpu.memory_space<vmem>>, %arg3: memref<16x16xf32, #tpu.memory_space<vmem>>, %arg4: memref<16x16xi32, #tpu.memory_space<vmem>>) attributes {dimension_semantics = [#tpu.dimension_semantics<parallel>], iteration_bounds = array<i64: 1>, scalar_prefetch = 0 : i64, scratch_operands = 0 : i64, tpu.core_type = #tpu.core_type<tc>, window_params = [{transform_indices = @transform_0, window_bounds = array<i64: 16, 32>}, {pipeline_mode = #tpu.pipeline_mode<synchronous>, transform_indices = @transform_1, window_bounds = array<i64: 32, 128>}, {transform_indices = @transform_2, window_bounds = array<i64: 16, 16>}, {transform_indices = @transform_3, window_bounds = array<i64: 16, 16>}]} {
    %c0 = arith.constant 0 : index
    %c0_0 = arith.constant 0 : index
    %0 = vector.load %arg1[%c0, %c0_0] : memref<16x32xf32, #tpu.memory_space<vmem>>, vector<16x32xf32>
    %c0_1 = arith.constant 0 : index
    %c0_2 = arith.constant 0 : index
    %1 = vector.load %arg2[%c0_1, %c0_2] : memref<32x128xf32, #tpu.memory_space<vmem>>, vector<32x128xf32>
    %cst = arith.constant dense<0.000000e+00> : vector<16x128xf32>
    %2 = tpu.matmul %0, %1, %cst {dimension_numbers = #tpu.dot_dimension_numbers<[1], [0], [0], [1], [0, 0, 1, 1], [], []>} : vector<16x32xf32>, vector<32x128xf32>, vector<16x128xf32> -> vector<16x128xf32>
    %3 = vector.shape_cast %2 : vector<16x128xf32> to vector<16x8x16xf32>
    %4 = tpu.iota {dimensions = array<i32: 2>} : vector<16x8x16xi32>
    %cst_3 = arith.constant dense<0xFF800000> : vector<16x8xf32>
    %5 = vector.multi_reduction <maximumf>, %3, %cst_3 [2] : vector<16x8x16xf32> to vector<16x8xf32>
    %6 = vector.shape_cast %5 : vector<16x8xf32> to vector<16x8x1xf32>
    %7 = vector.broadcast %6 : vector<16x8x1xf32> to vector<16x8x16xf32>
    %8 = arith.cmpf oeq, %3, %7 : vector<16x8x16xf32>
    %c16_i32 = arith.constant 16 : i32
    %9 = vector.broadcast %c16_i32 : i32 to vector<16x8x16xi32>
    %10 = arith.select %8, %4, %9 : vector<16x8x16xi1>, vector<16x8x16xi32>
    %cst_4 = arith.constant dense<2147483647> : vector<16x8xi32>
    %11 = vector.multi_reduction <minsi>, %10, %cst_4 [2] : vector<16x8x16xi32> to vector<16x8xi32>
    %12 = vector.shape_cast %11 : vector<16x8xi32> to vector<16x8x1xi32>
    %13 = vector.broadcast %12 : vector<16x8x1xi32> to vector<16x8x16xi32>
    %14 = arith.cmpi eq, %4, %13 : vector<16x8x16xi32>
    %cst_5 = arith.constant -1.000000e+30 : f32
    %15 = vector.broadcast %cst_5 : f32 to vector<16x8x16xf32>
    %16 = arith.select %14, %15, %3 : vector<16x8x16xi1>, vector<16x8x16xf32>
    %cst_6 = arith.constant dense<0xFF800000> : vector<16x8xf32>
    %17 = vector.multi_reduction <maximumf>, %16, %cst_6 [2] : vector<16x8x16xf32> to vector<16x8xf32>
    %18 = vector.shape_cast %17 : vector<16x8xf32> to vector<16x8x1xf32>
    %19 = vector.broadcast %18 : vector<16x8x1xf32> to vector<16x8x16xf32>
    %20 = arith.cmpf oeq, %16, %19 : vector<16x8x16xf32>
    %c16_i32_7 = arith.constant 16 : i32
    %21 = vector.broadcast %c16_i32_7 : i32 to vector<16x8x16xi32>
    %22 = arith.select %20, %4, %21 : vector<16x8x16xi1>, vector<16x8x16xi32>
    %cst_8 = arith.constant dense<2147483647> : vector<16x8xi32>
    %23 = vector.multi_reduction <minsi>, %22, %cst_8 [2] : vector<16x8x16xi32> to vector<16x8xi32>
    %24 = vector.shape_cast %23 : vector<16x8xi32> to vector<16x8x1xi32>
    %25 = vector.broadcast %24 : vector<16x8x1xi32> to vector<16x8x16xi32>
    %26 = arith.cmpi eq, %4, %25 : vector<16x8x16xi32>
    %cst_9 = arith.constant -1.000000e+30 : f32
    %27 = vector.broadcast %cst_9 : f32 to vector<16x8x16xf32>
    %28 = arith.select %26, %27, %16 : vector<16x8x16xi1>, vector<16x8x16xf32>
    %cst_10 = arith.constant dense<0xFF800000> : vector<16x8xf32>
    %29 = vector.multi_reduction <maximumf>, %28, %cst_10 [2] : vector<16x8x16xf32> to vector<16x8xf32>
    %30 = vector.shape_cast %29 : vector<16x8xf32> to vector<16x8x1xf32>
    %31 = vector.broadcast %30 : vector<16x8x1xf32> to vector<16x8x16xf32>
    %32 = arith.cmpf oeq, %28, %31 : vector<16x8x16xf32>
    %c16_i32_11 = arith.constant 16 : i32
    %33 = vector.broadcast %c16_i32_11 : i32 to vector<16x8x16xi32>
    %34 = arith.select %32, %4, %33 : vector<16x8x16xi1>, vector<16x8x16xi32>
    %cst_12 = arith.constant dense<2147483647> : vector<16x8xi32>
    %35 = vector.multi_reduction <minsi>, %34, %cst_12 [2] : vector<16x8x16xi32> to vector<16x8xi32>
    %36 = vector.shape_cast %35 : vector<16x8xi32> to vector<16x8x1xi32>
    %37 = vector.broadcast %36 : vector<16x8x1xi32> to vector<16x8x16xi32>
    %38 = arith.cmpi eq, %4, %37 : vector<16x8x16xi32>
    %cst_13 = arith.constant -1.000000e+30 : f32
    %39 = vector.broadcast %cst_13 : f32 to vector<16x8x16xf32>
    %40 = arith.select %38, %39, %28 : vector<16x8x16xi1>, vector<16x8x16xf32>
    %cst_14 = arith.constant dense<0xFF800000> : vector<16x8xf32>
    %41 = vector.multi_reduction <maximumf>, %40, %cst_14 [2] : vector<16x8x16xf32> to vector<16x8xf32>
    %42 = vector.shape_cast %41 : vector<16x8xf32> to vector<16x8x1xf32>
    %43 = vector.broadcast %42 : vector<16x8x1xf32> to vector<16x8x16xf32>
    %44 = arith.cmpf oeq, %40, %43 : vector<16x8x16xf32>
    %c16_i32_15 = arith.constant 16 : i32
    %45 = vector.broadcast %c16_i32_15 : i32 to vector<16x8x16xi32>
    %46 = arith.select %44, %4, %45 : vector<16x8x16xi1>, vector<16x8x16xi32>
    %cst_16 = arith.constant dense<2147483647> : vector<16x8xi32>
    %47 = vector.multi_reduction <minsi>, %46, %cst_16 [2] : vector<16x8x16xi32> to vector<16x8xi32>
    %48 = vector.shape_cast %47 : vector<16x8xi32> to vector<16x8x1xi32>
    %49 = tpu.concatenate %6, %18, %30, %42 in 2 : vector<16x8x1xf32>, vector<16x8x1xf32>, vector<16x8x1xf32>, vector<16x8x1xf32> -> vector<16x8x4xf32>
    %50 = tpu.concatenate %12, %24, %36, %48 in 2 : vector<16x8x1xi32>, vector<16x8x1xi32>, vector<16x8x1xi32>, vector<16x8x1xi32> -> vector<16x8x4xi32>
    %51 = vector.extract_strided_slice %49 {offsets = [0, 0, 0], sizes = [16, 4, 4], strides = [1, 1, 1]} : vector<16x8x4xf32> to vector<16x4x4xf32>
    %52 = vector.extract_strided_slice %50 {offsets = [0, 0, 0], sizes = [16, 4, 4], strides = [1, 1, 1]} : vector<16x8x4xi32> to vector<16x4x4xi32>
    %53 = vector.extract_strided_slice %49 {offsets = [0, 4, 0], sizes = [16, 4, 4], strides = [1, 1, 1]} : vector<16x8x4xf32> to vector<16x4x4xf32>
    %54 = vector.extract_strided_slice %50 {offsets = [0, 4, 0], sizes = [16, 4, 4], strides = [1, 1, 1]} : vector<16x8x4xi32> to vector<16x4x4xi32>
    %c16_i32_17 = arith.constant 16 : i32
    %55 = vector.broadcast %c16_i32_17 : i32 to vector<16x4x4xi32>
    %56 = arith.muli %54, %55 : vector<16x4x4xi32>
    %57 = vector.shape_cast %51 : vector<16x4x4xf32> to vector<16x4x4x1xf32>
    %58 = vector.shape_cast %53 : vector<16x4x4xf32> to vector<16x4x1x4xf32>
    %59 = vector.broadcast %57 : vector<16x4x4x1xf32> to vector<16x4x4x4xf32>
    %60 = vector.broadcast %58 : vector<16x4x1x4xf32> to vector<16x4x4x4xf32>
    %61 = arith.addf %59, %60 : vector<16x4x4x4xf32>
    %62 = vector.shape_cast %61 : vector<16x4x4x4xf32> to vector<16x4x16xf32>
    %63 = vector.shape_cast %52 : vector<16x4x4xi32> to vector<16x4x4x1xi32>
    %64 = vector.shape_cast %56 : vector<16x4x4xi32> to vector<16x4x1x4xi32>
    %65 = vector.broadcast %63 : vector<16x4x4x1xi32> to vector<16x4x4x4xi32>
    %66 = vector.broadcast %64 : vector<16x4x1x4xi32> to vector<16x4x4x4xi32>
    %67 = arith.addi %65, %66 : vector<16x4x4x4xi32>
    %68 = vector.shape_cast %67 : vector<16x4x4x4xi32> to vector<16x4x16xi32>
    %69 = tpu.iota {dimensions = array<i32: 2>} : vector<16x4x16xi32>
    %cst_18 = arith.constant dense<0xFF800000> : vector<16x4xf32>
    %70 = vector.multi_reduction <maximumf>, %62, %cst_18 [2] : vector<16x4x16xf32> to vector<16x4xf32>
    %71 = vector.shape_cast %70 : vector<16x4xf32> to vector<16x4x1xf32>
    %72 = vector.broadcast %71 : vector<16x4x1xf32> to vector<16x4x16xf32>
    %73 = arith.cmpf oeq, %62, %72 : vector<16x4x16xf32>
    %c16_i32_19 = arith.constant 16 : i32
    %74 = vector.broadcast %c16_i32_19 : i32 to vector<16x4x16xi32>
    %75 = arith.select %73, %69, %74 : vector<16x4x16xi1>, vector<16x4x16xi32>
    %cst_20 = arith.constant dense<2147483647> : vector<16x4xi32>
    %76 = vector.multi_reduction <minsi>, %75, %cst_20 [2] : vector<16x4x16xi32> to vector<16x4xi32>
    %77 = vector.shape_cast %76 : vector<16x4xi32> to vector<16x4x1xi32>
    %78 = vector.broadcast %77 : vector<16x4x1xi32> to vector<16x4x16xi32>
    %79 = arith.cmpi eq, %69, %78 : vector<16x4x16xi32>
    %c0_i32 = arith.constant 0 : i32
    %80 = vector.broadcast %c0_i32 : i32 to vector<16x4x16xi32>
    %81 = arith.select %79, %68, %80 : vector<16x4x16xi1>, vector<16x4x16xi32>
    %cst_21 = arith.constant dense<0> : vector<16x4xi32>
    %82 = vector.multi_reduction <add>, %81, %cst_21 [2] : vector<16x4x16xi32> to vector<16x4xi32>
    %83 = vector.shape_cast %82 : vector<16x4xi32> to vector<16x4x1xi32>
    %cst_22 = arith.constant -1.000000e+30 : f32
    %84 = vector.broadcast %cst_22 : f32 to vector<16x4x16xf32>
    %85 = arith.select %79, %84, %62 : vector<16x4x16xi1>, vector<16x4x16xf32>
    %cst_23 = arith.constant dense<0xFF800000> : vector<16x4xf32>
    %86 = vector.multi_reduction <maximumf>, %85, %cst_23 [2] : vector<16x4x16xf32> to vector<16x4xf32>
    %87 = vector.shape_cast %86 : vector<16x4xf32> to vector<16x4x1xf32>
    %88 = vector.broadcast %87 : vector<16x4x1xf32> to vector<16x4x16xf32>
    %89 = arith.cmpf oeq, %85, %88 : vector<16x4x16xf32>
    %c16_i32_24 = arith.constant 16 : i32
    %90 = vector.broadcast %c16_i32_24 : i32 to vector<16x4x16xi32>
    %91 = arith.select %89, %69, %90 : vector<16x4x16xi1>, vector<16x4x16xi32>
    %cst_25 = arith.constant dense<2147483647> : vector<16x4xi32>
    %92 = vector.multi_reduction <minsi>, %91, %cst_25 [2] : vector<16x4x16xi32> to vector<16x4xi32>
    %93 = vector.shape_cast %92 : vector<16x4xi32> to vector<16x4x1xi32>
    %94 = vector.broadcast %93 : vector<16x4x1xi32> to vector<16x4x16xi32>
    %95 = arith.cmpi eq, %69, %94 : vector<16x4x16xi32>
    %c0_i32_26 = arith.constant 0 : i32
    %96 = vector.broadcast %c0_i32_26 : i32 to vector<16x4x16xi32>
    %97 = arith.select %95, %68, %96 : vector<16x4x16xi1>, vector<16x4x16xi32>
    %cst_27 = arith.constant dense<0> : vector<16x4xi32>
    %98 = vector.multi_reduction <add>, %97, %cst_27 [2] : vector<16x4x16xi32> to vector<16x4xi32>
    %99 = vector.shape_cast %98 : vector<16x4xi32> to vector<16x4x1xi32>
    %cst_28 = arith.constant -1.000000e+30 : f32
    %100 = vector.broadcast %cst_28 : f32 to vector<16x4x16xf32>
    %101 = arith.select %95, %100, %85 : vector<16x4x16xi1>, vector<16x4x16xf32>
    %cst_29 = arith.constant dense<0xFF800000> : vector<16x4xf32>
    %102 = vector.multi_reduction <maximumf>, %101, %cst_29 [2] : vector<16x4x16xf32> to vector<16x4xf32>
    %103 = vector.shape_cast %102 : vector<16x4xf32> to vector<16x4x1xf32>
    %104 = vector.broadcast %103 : vector<16x4x1xf32> to vector<16x4x16xf32>
    %105 = arith.cmpf oeq, %101, %104 : vector<16x4x16xf32>
    %c16_i32_30 = arith.constant 16 : i32
    %106 = vector.broadcast %c16_i32_30 : i32 to vector<16x4x16xi32>
    %107 = arith.select %105, %69, %106 : vector<16x4x16xi1>, vector<16x4x16xi32>
    %cst_31 = arith.constant dense<2147483647> : vector<16x4xi32>
    %108 = vector.multi_reduction <minsi>, %107, %cst_31 [2] : vector<16x4x16xi32> to vector<16x4xi32>
    %109 = vector.shape_cast %108 : vector<16x4xi32> to vector<16x4x1xi32>
    %110 = vector.broadcast %109 : vector<16x4x1xi32> to vector<16x4x16xi32>
    %111 = arith.cmpi eq, %69, %110 : vector<16x4x16xi32>
    %c0_i32_32 = arith.constant 0 : i32
    %112 = vector.broadcast %c0_i32_32 : i32 to vector<16x4x16xi32>
    %113 = arith.select %111, %68, %112 : vector<16x4x16xi1>, vector<16x4x16xi32>
    %cst_33 = arith.constant dense<0> : vector<16x4xi32>
    %114 = vector.multi_reduction <add>, %113, %cst_33 [2] : vector<16x4x16xi32> to vector<16x4xi32>
    %115 = vector.shape_cast %114 : vector<16x4xi32> to vector<16x4x1xi32>
    %cst_34 = arith.constant -1.000000e+30 : f32
    %116 = vector.broadcast %cst_34 : f32 to vector<16x4x16xf32>
    %117 = arith.select %111, %116, %101 : vector<16x4x16xi1>, vector<16x4x16xf32>
    %cst_35 = arith.constant dense<0xFF800000> : vector<16x4xf32>
    %118 = vector.multi_reduction <maximumf>, %117, %cst_35 [2] : vector<16x4x16xf32> to vector<16x4xf32>
    %119 = vector.shape_cast %118 : vector<16x4xf32> to vector<16x4x1xf32>
    %120 = vector.broadcast %119 : vector<16x4x1xf32> to vector<16x4x16xf32>
    %121 = arith.cmpf oeq, %117, %120 : vector<16x4x16xf32>
    %c16_i32_36 = arith.constant 16 : i32
    %122 = vector.broadcast %c16_i32_36 : i32 to vector<16x4x16xi32>
    %123 = arith.select %121, %69, %122 : vector<16x4x16xi1>, vector<16x4x16xi32>
    %cst_37 = arith.constant dense<2147483647> : vector<16x4xi32>
    %124 = vector.multi_reduction <minsi>, %123, %cst_37 [2] : vector<16x4x16xi32> to vector<16x4xi32>
    %125 = vector.shape_cast %124 : vector<16x4xi32> to vector<16x4x1xi32>
    %126 = vector.broadcast %125 : vector<16x4x1xi32> to vector<16x4x16xi32>
    %127 = arith.cmpi eq, %69, %126 : vector<16x4x16xi32>
    %c0_i32_38 = arith.constant 0 : i32
    %128 = vector.broadcast %c0_i32_38 : i32 to vector<16x4x16xi32>
    %129 = arith.select %127, %68, %128 : vector<16x4x16xi1>, vector<16x4x16xi32>
    %cst_39 = arith.constant dense<0> : vector<16x4xi32>
    %130 = vector.multi_reduction <add>, %129, %cst_39 [2] : vector<16x4x16xi32> to vector<16x4xi32>
    %131 = vector.shape_cast %130 : vector<16x4xi32> to vector<16x4x1xi32>
    %132 = tpu.concatenate %71, %87, %103, %119 in 2 : vector<16x4x1xf32>, vector<16x4x1xf32>, vector<16x4x1xf32>, vector<16x4x1xf32> -> vector<16x4x4xf32>
    %133 = tpu.concatenate %83, %99, %115, %131 in 2 : vector<16x4x1xi32>, vector<16x4x1xi32>, vector<16x4x1xi32>, vector<16x4x1xi32> -> vector<16x4x4xi32>
    %134 = vector.shape_cast %132 : vector<16x4x4xf32> to vector<16x16xf32>
    %135 = tpu.transpose %134, [1, 0] : vector<16x16xf32> -> vector<16x16xf32>
    %c0_40 = arith.constant 0 : index
    %c0_41 = arith.constant 0 : index
    %136 = vector.load %arg3[%c0_40, %c0_41] : memref<16x16xf32, #tpu.memory_space<vmem>>, vector<16x16xf32>
    tpu.vector_store %arg3[%c0_40, %c0_41], %135 {strides = array<i32>} : memref<16x16xf32, #tpu.memory_space<vmem>>, vector<16x16xf32>,
    %137 = vector.shape_cast %133 : vector<16x4x4xi32> to vector<16x16xi32>
    %138 = tpu.transpose %137, [1, 0] : vector<16x16xi32> -> vector<16x16xi32>
    %c0_42 = arith.constant 0 : index
    %c0_43 = arith.constant 0 : index
    %139 = vector.load %arg4[%c0_42, %c0_43] : memref<16x16xi32, #tpu.memory_space<vmem>>, vector<16x16xi32>
    tpu.vector_store %arg4[%c0_42, %c0_43], %138 {strides = array<i32>} : memref<16x16xi32, #tpu.memory_space<vmem>>, vector<16x16xi32>,
    return
  }
  func.func @transform_0(%arg0: i32) -> (i32, i32) {
    %c0_i32 = arith.constant 0 : i32
    %c0_i32_0 = arith.constant 0 : i32
    return %arg0, %c0_i32 : i32, i32
  }
  func.func @transform_1(%arg0: i32) -> (i32, i32) {
    %c0_i32 = arith.constant 0 : i32
    %c0_i32_0 = arith.constant 0 : i32
    %c0_i32_1 = arith.constant 0 : i32
    return %c0_i32, %c0_i32_0 : i32, i32
  }
  func.func @transform_2(%arg0: i32) -> (i32, i32) {
    %c0_i32 = arith.constant 0 : i32
    %c0_i32_0 = arith.constant 0 : i32
    return %c0_i32, %arg0 : i32, i32
  }
  func.func @transform_3(%arg0: i32) -> (i32, i32) {
    %c0_i32 = arith.constant 0 : i32
    %c0_i32_0 = arith.constant 0 : i32
    return %c0_i32, %arg0 : i32, i32
  }
}

</mosaic_0001>

<bundles_post_ra>
// kernel: tpu_custom_call.1
= control target key start
LH: loop header
LB: loop body
LE: loop exit
PB: predicated region body
PF: predicated region fallthrough
CT: control target
= control target key end

     0   :  { %9 = vsyncpa [#allocation3], 0  ;;  %s15725_s0 = inlined_call_operand.hbm [shape: f32[16,32], index: 0, kind: input, shape index: {}]   ;;  %s15726_s1 = inlined_call_operand.hbm [shape: f32[32,128], index: 1, kind: input, shape index: {}]   ;;  %s15727_s2 = inlined_call_operand.hbm [shape: f32[16,16], index: 2, kind: output, shape index: {0}]   ;;  %s15728_s3 = inlined_call_operand.hbm [shape: s32[16,16], index: 3, kind: output, shape index: {1}]  }
   0x1   :  { %10 = vsyncpa [#allocation6], 0 }
   0x2   :  { %11 = vsyncpa [#allocation4], 0 }
   0x3   :  { %12 = vsyncpa [#allocation9], 0  ;;  %s8782_s12 = smov [#allocation2]   ;;  %s8686_s16 = scalar_lea.hbm %s15725_s0, 256 }
   0x4   :  { %s18_s13 = sshll.u32 %s8782_s12, 4  ;;  %p8687_p0 = scmp.ne.s32.totalorder %s15725_s0, %s8686_s16  ;;  %s19_s13 = int_to_ptr.vmem [resolvable:$true] %s18_s13 }
   0x5   :  { %p8690_p1 = scmp.lt.u32.totalorder %s8686_s16, %s15725_s0 }
   0x7   :  { %p8692_p2 = pnand %p8690_p1, %p8687_p0 }
   0x9   :  { %8695 = shalt.err (!%p8692_p2)
}
   0xa   :  { %s8696_s21 = scalar_lea.vmem %s19_s13, 256  ;;  %p8701_p4 = scmp.lt.s32.totalorder %s19_s13, %s19_s13 }
   0xb   :  { %p8697_p3 = scmp.ne.s32.totalorder %s19_s13, %s8696_s21  ;;  %p8702_p5 = scmp.lt.s32.totalorder %s8696_s21, %s8696_s21 }
   0xd   :  { %p8703_p6 = por %p8702_p5, %p8701_p4 }
   0xf   :  { %p8704_p7 = pnand %p8703_p6, %p8697_p3 }
  0x11   :  { %8707 = shalt.err (!%p8704_p7)
}
  0x12   :  { %s8783_s22 = smov 128   ;;  %s8784_s23 = smov 8  }
  0x13   :  { %24 = dma.hbm_to_vmem [thread:$0]  %s15725_s0, 256, %s19_s13, [#allocation3], %s8783_s22, %s8783_s22, %s8784_s23  }
  0x14   :  { %s8785_s26 = smov [#allocation5]   ;;  %s8708_s30 = scalar_lea.hbm %s15726_s1, 512 }
  0x15   :  { %s30_s27 = sshll.u32 %s8785_s26, 4  ;;  %p8709_p8 = scmp.ne.s32.totalorder %s15726_s1, %s8708_s30  ;;  %s31_s27 = int_to_ptr.vmem [resolvable:$true] %s30_s27 }
  0x16   :  { %p8712_p9 = scmp.lt.u32.totalorder %s8708_s30, %s15726_s1 }
  0x18   :  { %p8714_p10 = pnand %p8712_p9, %p8709_p8 }
  0x1a   :  { %8717 = shalt.err (!%p8714_p10)
}
  0x1b   :  { %s8718_s8 = scalar_lea.vmem %s31_s27, 512  ;;  %p8723_p12 = scmp.lt.s32.totalorder %s31_s27, %s31_s27 }
  0x1c   :  { %p8719_p11 = scmp.ne.s32.totalorder %s31_s27, %s8718_s8  ;;  %p8724_p13 = scmp.lt.s32.totalorder %s8718_s8, %s8718_s8 }
  0x1e   :  { %p8725_p0 = por %p8724_p13, %p8723_p12 }
  0x20   :  { %p8726_p1 = pnand %p8725_p0, %p8719_p11 }
  0x22   :  { %8729 = shalt.err (!%p8726_p1)
}
  0x23   :  { %36 = dma.hbm_to_vmem [thread:$0]  %s15726_s1, 512, %s31_s27, [#allocation6], %s8783_s22, %s8783_s22, %s8784_s23  }
  0x24   :  { %8774 = dma.done.wait [#allocation3], 256  }
  0x25   :  { %8775 = vsyncadd [#allocation3], 4294967040 }
  0x26   :  { %8776 = dma.done.wait [#allocation6], 512  }
  0x27   :  { %8777 = vsyncadd [#allocation6], 4294966784  ;;  %vm49_vm0 = vcmask 261120   ;;  %v45_v0 = vld [vmem:[#allocation5] sm:$0xff]  ;;  %v46_v1 = vld [vmem:[#allocation5 + $0x8] sm:$0xff]  ;;  %s8786_s1 = smov 96   ;;  %v180_v14 = vlaneseq }
  0x28   :  { %v47_v2 = vld [vmem:[#allocation5 + $0x10] sm:$0xff]  ;;  %v8658_v3 = vpack.c.bf16 %v46_v1, %v45_v0  ;;  %v48_v4 = vld [vmem:[#allocation5 + $0x18] sm:$0xff]  ;;  %s8787_s10 = smov 112   ;;  %s8788_s11 = smov 64   ;;  %v8793_v12 = vmov 1983009808  }
  0x29   :  { %v43_v5 = vld [vmem:[#allocation2] sm:$0xff]  ;;  %v8662_v6 = vpack.c.bf16 %v48_v4, %v47_v2  ;;  %v44_v7 = vld [vmem:[#allocation2 + $0x8] sm:$0xff]  ;;  %s8789_s12 = smov 80   ;;  %s8790_s13 = smov 32   ;;  %v178_v13 = vunpack.c.l.s4 %v8793_v12  ;;  %v8862_v18 = vshrl.u32 %v180_v14, 7  ;;  %vm15971_vm1 = vcmask 130048  }
  0x2a   :  { %8655 = vmatprep.mubr.msk.f32.mxu0 %vm49_vm0, %v43_v5  ;;  %8659 = vmatprep.subr.bf16.mxu0 %v8658_v3  ;;  %s8791_s14 = smov 48   ;;  %s8792_s15 = smov 16   ;;  %v8794_v19 = vmov 1934713408  }
  0x2b   :  { %8661 = vmatpush3.bf16.msra.mxu0 %v8658_v3  ;;  %v179_v17 = vunpack.c.0.s8 %v178_v13  ;;  %16143 = vst [vmem:[#allocation14_spill] sm:$0xff] %v8862_v18  ;;  %v242_v20 = vunpack.c.l.s4 %v8794_v19  ;;  %s8797_s16 = smov 4   ;;  %s8798_s17 = smov 12  }
  0x2c   :  { %8663 = vmatprep.subr.bf16.mxu0 %v8662_v6  ;;  %s8800_s18 = smov [#allocation7]   ;;  %s8801_s20 = smov [#allocation8]  }
  0x2d   :  { %v8865_v24 = vsub.s32 %v179_v17, %v8862_v18  ;;  %v243_v27 = vunpack.c.0.s8 %v242_v20  ;;  %s8610_s19 = sshll.u32 %s8800_s18, 4  ;;  %s8622_s21 = sshll.u32 %s8801_s20, 4  ;;  %s8611_s19 = int_to_ptr.vmem [resolvable:$true] %s8610_s19  ;;  %s8623_s21 = int_to_ptr.vmem [resolvable:$true] %s8622_s21 }
  0x2e   :  { %s8730_s24 = scalar_lea.vmem %s8611_s19, 256  ;;  %p8735_p3 = scmp.lt.s32.totalorder %s8611_s19, %s8611_s19 }
  0x2f   :  { %8665 = vmatpush3.bf16.msra.mxu0 %v8662_v6  ;;  %16144 = vst [vmem:[#allocation15_spill] sm:$0xff] %v8865_v24  ;;  %v8873_v38 = vsub.s32 %v243_v27, %v8862_v18  ;;  %p8731_p2 = scmp.ne.s32.totalorder %s8611_s19, %s8730_s24  ;;  %p8736_p4 = scmp.lt.s32.totalorder %s8730_s24, %s8730_s24 }
  0x31   :  { %16145 = vst [vmem:[#allocation16_spill] sm:$0xff] %v8873_v38  ;;  %p8737_p5 = por %p8736_p4, %p8735_p3 }
  0x32   :  { %8656 = vmatmul.mubr.msk.f32.vlgmr.msra.gmra.mrb[0].mxu0 %vm49_vm0, %v44_v7 }
  0x33   :  { %p8738_p6 = pnand %p8737_p5, %p8731_p2 }
 0x105   :  { %v8657_v8 = vpop.f32.mrb[0].mxu0 }
 0x106   :  { %141 = vrot.lane.b32.xlu0 %v8657_v8, %s8786_s1  ;;  %135 = vrot.lane.b32.xlu1 %v8657_v8, %s8787_s10  ;;  %v8852_v9 = vpop.f32.mrb[1].mxu0 }
 0x10a   :  { %153 = vrot.lane.b32.xlu0 %v8657_v8, %s8788_s11  ;;  %147 = vrot.lane.b32.xlu1 %v8657_v8, %s8789_s12 }
 0x10e   :  { %165 = vrot.lane.b32.xlu0 %v8657_v8, %s8790_s13  ;;  %159 = vrot.lane.b32.xlu1 %v8657_v8, %s8791_s14 }
 0x112   :  { %171 = vrot.lane.b32.xlu1 %v8657_v8, %s8792_s15  ;;  %133 = vrot.lane.b32.xlu0 %v8852_v9, %s8787_s10 }
 0x116   :  { %145 = vrot.lane.b32.xlu1 %v8852_v9, %s8789_s12  ;;  %139 = vrot.lane.b32.xlu0 %v8852_v9, %s8786_s1 }
 0x11a   :  { %151 = vrot.lane.b32.xlu1 %v8852_v9, %s8788_s11  ;;  %157 = vrot.lane.b32.xlu0 %v8852_v9, %s8791_s14 }
 0x11e   :  { %163 = vrot.lane.b32.xlu1 %v8852_v9, %s8790_s13  ;;  %169 = vrot.lane.b32.xlu0 %v8852_v9, %s8792_s15 }
 0x178   :  { %v142_v10 = vpop.permute.xlu0 %141  ;;  %v136_v11 = vpop.permute.xlu1 %135 }
 0x179   :  { %v311_v25 = vcombine.low %v8657_v8, %v142_v10  ;;  %v312_v30 = vcombine.high %v8657_v8, %v142_v10 }
 0x17b   :  { %v319_v34 = vrot.slane %v311_v25, %v8865_v24  ;;  %v326_v43 = vrot.slane %v312_v30, %v8865_v24 }
 0x17c   :  { %v154_v15 = vpop.permute.xlu0 %153  ;;  %v148_v16 = vpop.permute.xlu1 %147 }
 0x17d   :  { %v327_v21 = vcombine.low %v136_v11, %v148_v16  ;;  %v328_v26 = vcombine.high %v136_v11, %v148_v16 }
 0x17f   :  { %v335_v28 = vrot.slane %v327_v21, %v8865_v24  ;;  %v342_v37 = vrot.slane %v328_v26, %v8865_v24 }
 0x180   :  { %v166_v22 = vpop.permute.xlu0 %165  ;;  %v160_v23 = vpop.permute.xlu1 %159 }
 0x181   :  { %v343_v29 = vcombine.low %v154_v15, %v166_v22  ;;  %v344_v31 = vcombine.high %v154_v15, %v166_v22  ;;  %v375_v39 = vcombine.low %v319_v34, %v335_v28  ;;  %v376_v44 = vcombine.high %v319_v34, %v335_v28 }
 0x182   :  { %v391_v50 = vcombine.low %v326_v43, %v342_v37  ;;  %v392_v61 = vcombine.high %v326_v43, %v342_v37 }
 0x183   :  { %v351_v40 = vrot.slane %v343_v29, %v8865_v24  ;;  %v358_v45 = vrot.slane %v344_v31, %v8865_v24  ;;  %v383_v52 = vrot.slane %v375_v39, %v8873_v38  ;;  %v390_v60 = vrot.slane %v376_v44, %v8873_v38 }
 0x184   :  { %v172_v32 = vpop.permute.xlu1 %171  ;;  %v8868_v33 = vpop.permute.xlu0 %133  ;;  %v399_v2 = vrot.slane %v391_v50, %v8873_v38  ;;  %v406_v28 = vrot.slane %v392_v61, %v8873_v38 }
 0x185   :  { %v359_v35 = vcombine.low %v160_v23, %v172_v32  ;;  %v360_v36 = vcombine.high %v160_v23, %v172_v32 }
 0x187   :  { %v367_v41 = vrot.slane %v359_v35, %v8865_v24  ;;  %v374_v42 = vrot.slane %v360_v36, %v8865_v24 }
 0x188   :  { %v146_v46 = vpop.permute.xlu1 %145  ;;  %v140_v47 = vpop.permute.xlu0 %139 }
 0x189   :  { %v407_v48 = vcombine.low %v351_v40, %v367_v41  ;;  %v408_v49 = vcombine.high %v351_v40, %v367_v41  ;;  %v423_v51 = vcombine.low %v358_v45, %v374_v42  ;;  %v424_v55 = vcombine.high %v358_v45, %v374_v42 }
 0x18a   :  { %v191_v56 = vcombine.low %v8868_v33, %v146_v46  ;;  %v175_v57 = vcombine.low %v8852_v9, %v140_v47  ;;  %v192_v4 = vcombine.high %v8868_v33, %v146_v46  ;;  %v176_v5 = vcombine.high %v8852_v9, %v140_v47 }
 0x18b   :  { %v415_v53 = vrot.slane %v407_v48, %v8873_v38  ;;  %v422_v54 = vrot.slane %v408_v49, %v8873_v38  ;;  %v431_v3 = vrot.slane %v423_v51, %v8873_v38  ;;  %v438_v13 = vrot.slane %v424_v55, %v8873_v38 }
 0x18c   :  { %v152_v58 = vpop.permute.xlu1 %151  ;;  %v158_v59 = vpop.permute.xlu0 %157  ;;  %v199_v8 = vrot.slane %v191_v56, %v8865_v24  ;;  %v183_v10 = vrot.slane %v175_v57, %v8865_v24  ;;  %v206_v29 = vrot.slane %v192_v4, %v8865_v24  ;;  %v190_v30 = vrot.slane %v176_v5, %v8865_v24 }
 0x18d   :  { %v8886_v62 = vcombine.low %v383_v52, %v415_v53  ;;  %v8888_v63 = vcombine.high %v383_v52, %v415_v53  ;;  %v8890_v0 = vcombine.low %v390_v60, %v422_v54  ;;  %v8892_v1 = vcombine.high %v390_v60, %v422_v54 }
 0x18e   :  { %v8909_v21 = vcombine.low %v399_v2, %v431_v3  ;;  %v8911_v22 = vcombine.high %v399_v2, %v431_v3  ;;  %v239_v31 = vcombine.low %v183_v10, %v199_v8  ;;  %v8922_v34 = vcombine.low %v406_v28, %v438_v13 }
 0x18f   :  { %v474_v6 = vsel %vm15971_vm1, %v8886_v62, -inf  ;;  %v477_v7 = vsel %vm15971_vm1, %v8888_v63, -inf  ;;  %v480_v19 = vsel %vm15971_vm1, %v8890_v0, -inf  ;;  %v483_v20 = vsel %vm15971_vm1, %v8892_v1, -inf }
 0x190   :  { %475 = vmax.xlane.f32.xlu1 %v474_v6  ;;  %v164_v11 = vpop.permute.xlu1 %163  ;;  %478 = vmax.xlane.f32.xlu0 %v477_v7  ;;  %v170_v12 = vpop.permute.xlu0 %169  ;;  %v486_v33 = vsel %vm15971_vm1, %v8909_v21, -inf  ;;  %v8924_v35 = vcombine.high %v406_v28, %v438_v13  ;;  %v489_v39 = vsel %vm15971_vm1, %v8911_v22, -inf  ;;  %v240_v41 = vcombine.high %v183_v10, %v199_v8 }
 0x191   :  { %v207_v15 = vcombine.low %v152_v58, %v164_v11  ;;  %v208_v16 = vcombine.high %v152_v58, %v164_v11  ;;  %v223_v17 = vcombine.low %v158_v59, %v170_v12  ;;  %v224_v9 = vcombine.high %v158_v59, %v170_v12 }
 0x192   :  { %v255_v42 = vcombine.low %v190_v30, %v206_v29  ;;  %v247_v43 = vrot.slane %v239_v31, %v8873_v38  ;;  %v492_v45 = vsel %vm15971_vm1, %v8922_v34, -inf  ;;  %v495_v46 = vsel %vm15971_vm1, %v8924_v35, -inf }
 0x193   :  { %v215_v23 = vrot.slane %v207_v15, %v8865_v24  ;;  %v222_v25 = vrot.slane %v208_v16, %v8865_v24  ;;  %v231_v26 = vrot.slane %v223_v17, %v8865_v24  ;;  %v238_v27 = vrot.slane %v224_v9, %v8865_v24 }
 0x194   :  { %481 = vmax.xlane.f32.xlu1 %v480_v19  ;;  %484 = vmax.xlane.f32.xlu0 %v483_v20  ;;  %v256_v51 = vcombine.high %v190_v30, %v206_v29  ;;  %v263_v52 = vrot.slane %v255_v42, %v8873_v38  ;;  %v254_v53 = vrot.slane %v240_v41, %v8873_v38  ;;  %v8973_v11 = vand.u32 127, %v180_v14 }
 0x195   :  { %v271_v32 = vcombine.low %v215_v23, %v231_v26  ;;  %v272_v36 = vcombine.high %v215_v23, %v231_v26  ;;  %v287_v37 = vcombine.low %v222_v25, %v238_v27  ;;  %v288_v44 = vcombine.high %v222_v25, %v238_v27 }
 0x196   :  { %v270_v59 = vrot.slane %v256_v51, %v8873_v38  ;;  %16146 = vst [vmem:[#allocation17_spill] sm:$0xff] %v8973_v11 }
 0x197   :  { %v279_v40 = vrot.slane %v271_v32, %v8873_v38  ;;  %v295_v49 = vrot.slane %v287_v37, %v8873_v38  ;;  %v286_v50 = vrot.slane %v272_v36, %v8873_v38  ;;  %v302_v54 = vrot.slane %v288_v44, %v8873_v38 }
 0x198   :  { %487 = vmax.xlane.f32.xlu1 %v486_v33  ;;  %490 = vmax.xlane.f32.xlu0 %v489_v39 }
 0x199   :  { %v8934_v47 = vcombine.high %v247_v43, %v279_v40  ;;  %v8936_v48 = vcombine.low %v247_v43, %v279_v40  ;;  %v8947_v57 = vcombine.low %v263_v52, %v295_v49  ;;  %v8949_v58 = vcombine.low %v254_v53, %v286_v50 }
 0x19a   :  { %v8956_v2 = vcombine.low %v270_v59, %v302_v54  ;;  %v8958_v3 = vcombine.high %v254_v53, %v286_v50  ;;  %v8964_v6 = vcombine.high %v263_v52, %v295_v49  ;;  %v8968_v8 = vcombine.high %v270_v59, %v302_v54 }
 0x19b   :  { %v453_v55 = vsel %vm15971_vm1, %v8934_v47, -inf  ;;  %v450_v56 = vsel %vm15971_vm1, %v8936_v48, -inf  ;;  %v462_v60 = vsel %vm15971_vm1, %v8947_v57, -inf  ;;  %v456_v61 = vsel %vm15971_vm1, %v8949_v58, -inf }
 0x19c   :  { %493 = vmax.xlane.f32.xlu1 %v492_v45  ;;  %496 = vmax.xlane.f32.xlu0 %v495_v46  ;;  %v468_v4 = vsel %vm15971_vm1, %v8956_v2, -inf  ;;  %v459_v5 = vsel %vm15971_vm1, %v8958_v3, -inf  ;;  %v465_v7 = vsel %vm15971_vm1, %v8964_v6, -inf  ;;  %v471_v10 = vsel %vm15971_vm1, %v8968_v8, -inf }
 0x1a0   :  { %454 = vmax.xlane.f32.xlu1 %v453_v55  ;;  %451 = vmax.xlane.f32.xlu0 %v450_v56 }
 0x1a4   :  { %463 = vmax.xlane.f32.xlu1 %v462_v60  ;;  %457 = vmax.xlane.f32.xlu0 %v456_v61 }
 0x1a8   :  { %469 = vmax.xlane.f32.xlu1 %v468_v4  ;;  %460 = vmax.xlane.f32.xlu0 %v459_v5 }
 0x1ac   :  { %466 = vmax.xlane.f32.xlu0 %v465_v7 }
 0x1b0   :  { %472 = vmax.xlane.f32.xlu0 %v471_v10 }
 0x21d   :  { %v8975_v12 = vpop.xlane.xlu1 %475  ;;  %v8977_v13 = vpop.xlane.xlu0 %478 }
 0x21e   :  { %16147 = vst [vmem:[#allocation18_spill] sm:$0xff] %v8975_v12  ;;  %16148 = vst [vmem:[#allocation19_spill] sm:$0xff] %v8977_v13  ;;  %vm506_vm2 = vcmp.eq.f32.partialorder %v8886_v62, %v8975_v12  ;;  %vm507_vm3 = vcmp.eq.f32.partialorder %v8888_v63, %v8977_v13 }
 0x21f   :  { %v522_v15 = vsel %vm506_vm2, %v8973_v11, 16  ;;  %v523_v16 = vsel %vm507_vm3, %v8973_v11, 16 }
 0x220   :  { %v8986_v17 = vsel %vm15971_vm1, %v522_v15, 2147483647  ;;  %v8989_v14 = vsel %vm15971_vm1, %v523_v16, 2147483647 }
 0x221   :  { %v8991_v9 = vpop.xlane.xlu1 %481  ;;  %v8993_v19 = vpop.xlane.xlu0 %484  ;;  %v652_v20 = vshra.s32 %v8986_v17, 16  ;;  %v667_v23 = vshra.s32 %v8989_v14, 16 }
 0x222   :  { %16149 = vst [vmem:[#allocation20_spill] sm:$0xff] %v8991_v9  ;;  %16150 = vst [vmem:[#allocation21_spill] sm:$0xff] %v8993_v19  ;;  %vm508_vm4 = vcmp.eq.f32.partialorder %v8890_v0, %v8991_v9  ;;  %vm509_vm5 = vcmp.eq.f32.partialorder %v8892_v1, %v8993_v19 }
 0x223   :  { %v9001_v25 = vcvt.s32.f32 %v652_v20  ;;  %v9003_v26 = vcvt.s32.f32 %v667_v23  ;;  %v524_v27 = vsel %vm508_vm4, %v8973_v11, 16  ;;  %v525_v28 = vsel %vm509_vm5, %v8973_v11, 16 }
 0x224   :  { %v9008_v29 = vsel %vm15971_vm1, %v524_v27, 2147483647  ;;  %v9011_v30 = vsel %vm15971_vm1, %v525_v28, 2147483647 }
 0x225   :  { %v9013_v31 = vpop.xlane.xlu1 %487  ;;  %655 = vmin.xlane.f32.xlu1 %v9001_v25  ;;  %670 = vmin.xlane.f32.xlu0 %v9003_v26  ;;  %v9017_v32 = vpop.xlane.xlu0 %490  ;;  %v682_v33 = vshra.s32 %v9008_v29, 16  ;;  %v697_v36 = vshra.s32 %v9011_v30, 16 }
 0x226   :  { %16151 = vst [vmem:[#allocation22_spill] sm:$0xff] %v9013_v31  ;;  %16152 = vst [vmem:[#allocation23_spill] sm:$0xff] %v9017_v32  ;;  %vm510_vm6 = vcmp.eq.f32.partialorder %v8909_v21, %v9013_v31  ;;  %vm511_vm7 = vcmp.eq.f32.partialorder %v8911_v22, %v9017_v32  ;;  %v696_v32 = vand.u32 65535, %v9011_v30 }
 0x227   :  { %v9025_v37 = vcvt.s32.f32 %v682_v33  ;;  %v9027_v39 = vcvt.s32.f32 %v697_v36  ;;  %v526_v40 = vsel %vm510_vm6, %v8973_v11, 16  ;;  %v527_v41 = vsel %vm511_vm7, %v8973_v11, 16 }
 0x228   :  { %v9032_v42 = vsel %vm15971_vm1, %v526_v40, 2147483647  ;;  %v9035_v43 = vsel %vm15971_vm1, %v527_v41, 2147483647 }
 0x229   :  { %v9037_v44 = vpop.xlane.xlu1 %493  ;;  %685 = vmin.xlane.f32.xlu1 %v9025_v37  ;;  %700 = vmin.xlane.f32.xlu0 %v9027_v39  ;;  %v9041_v45 = vpop.xlane.xlu0 %496  ;;  %v712_v46 = vshra.s32 %v9032_v42, 16  ;;  %v727_v49 = vshra.s32 %v9035_v43, 16  ;;  %v726_v30 = vand.u32 65535, %v9035_v43 }
 0x22a   :  { %16153 = vst [vmem:[#allocation24_spill] sm:$0xff] %v9037_v44  ;;  %16154 = vst [vmem:[#allocation25_spill] sm:$0xff] %v9041_v45  ;;  %vm512_vm8 = vcmp.eq.f32.partialorder %v8922_v34, %v9037_v44  ;;  %vm513_vm9 = vcmp.eq.f32.partialorder %v8924_v35, %v9041_v45  ;;  %v681_v44 = vand.u32 65535, %v9008_v29  ;;  %v711_v29 = vand.u32 65535, %v9032_v42 }
 0x22b   :  { %v9049_v50 = vcvt.s32.f32 %v712_v46  ;;  %v9051_v51 = vcvt.s32.f32 %v727_v49  ;;  %v528_v52 = vsel %vm512_vm8, %v8973_v11, 16  ;;  %v529_v53 = vsel %vm513_vm9, %v8973_v11, 16 }
 0x22c   :  { %v9056_v54 = vsel %vm15971_vm1, %v528_v52, 2147483647  ;;  %v9059_v55 = vsel %vm15971_vm1, %v529_v53, 2147483647 }
 0x22d   :  { %715 = vmin.xlane.f32.xlu1 %v9049_v50  ;;  %v9062_v56 = vpop.xlane.xlu1 %454  ;;  %730 = vmin.xlane.f32.xlu0 %v9051_v51  ;;  %v9065_v59 = vpop.xlane.xlu0 %451  ;;  %v742_v60 = vshra.s32 %v9056_v54, 16  ;;  %v757_v61 = vshra.s32 %v9059_v55, 16  ;;  %v741_v42 = vand.u32 65535, %v9056_v54  ;;  %v756_v43 = vand.u32 65535, %v9059_v55 }
 0x22e   :  { %16155 = vst [vmem:[#allocation26_spill] sm:$0xff] %v9062_v56  ;;  %16156 = vst [vmem:[#allocation27_spill] sm:$0xff] %v9065_v59  ;;  %vm499_vm10 = vcmp.eq.f32.partialorder %v8934_v47, %v9062_v56  ;;  %vm498_vm11 = vcmp.eq.f32.partialorder %v8936_v48, %v9065_v59 }
 0x22f   :  { %v9073_v4 = vcvt.s32.f32 %v742_v60  ;;  %v9075_v5 = vcvt.s32.f32 %v757_v61  ;;  %v515_v7 = vsel %vm499_vm10, %v8973_v11, 16  ;;  %v514_v10 = vsel %vm498_vm11, %v8973_v11, 16 }
 0x230   :  { %v9080_v15 = vsel %vm15971_vm1, %v515_v7, 2147483647  ;;  %v9083_v16 = vsel %vm15971_vm1, %v514_v10, 2147483647 }
 0x231   :  { %745 = vmin.xlane.f32.xlu1 %v9073_v4  ;;  %v9086_v20 = vpop.xlane.xlu1 %463  ;;  %760 = vmin.xlane.f32.xlu0 %v9075_v5  ;;  %v9089_v23 = vpop.xlane.xlu0 %457  ;;  %v547_v27 = vshra.s32 %v9080_v15, 16  ;;  %v532_v28 = vshra.s32 %v9083_v16, 16  ;;  %v531_v54 = vand.u32 65535, %v9083_v16  ;;  %v546_v55 = vand.u32 65535, %v9080_v15 }
 0x232   :  { %16157 = vst [vmem:[#allocation28_spill] sm:$0xff] %v9086_v20  ;;  %16158 = vst [vmem:[#allocation29_spill] sm:$0xff] %v9089_v23  ;;  %vm502_vm12 = vcmp.eq.f32.partialorder %v8947_v57, %v9086_v20  ;;  %vm500_vm13 = vcmp.eq.f32.partialorder %v8949_v58, %v9089_v23 }
 0x233   :  { %v9097_v33 = vcvt.s32.f32 %v547_v27  ;;  %v9099_v36 = vcvt.s32.f32 %v532_v28  ;;  %v516_v40 = vsel %vm500_vm13, %v8973_v11, 16  ;;  %v518_v41 = vsel %vm502_vm12, %v8973_v11, 16 }
 0x234   :  { %v9104_v46 = vsel %vm15971_vm1, %v516_v40, 2147483647  ;;  %v9107_v49 = vsel %vm15971_vm1, %v518_v41, 2147483647 }
 0x235   :  { %v9109_v52 = vpop.xlane.xlu1 %469  ;;  %550 = vmin.xlane.f32.xlu0 %v9097_v33  ;;  %535 = vmin.xlane.f32.xlu1 %v9099_v36  ;;  %v9113_v53 = vpop.xlane.xlu0 %460  ;;  %v562_v60 = vshra.s32 %v9104_v46, 16  ;;  %v592_v7 = vshra.s32 %v9107_v49, 16  ;;  %v561_v16 = vand.u32 65535, %v9104_v46 }
 0x236   :  { %16159 = vst [vmem:[#allocation30_spill] sm:$0xff] %v9109_v52  ;;  %16160 = vst [vmem:[#allocation31_spill] sm:$0xff] %v9113_v53  ;;  %vm504_vm14 = vcmp.eq.f32.partialorder %v8956_v2, %v9109_v52  ;;  %vm501_vm15 = vcmp.eq.f32.partialorder %v8958_v3, %v9113_v53 }
 0x237   :  { %v9120_v61 = vcvt.s32.f32 %v562_v60  ;;  %v517_v10 = vsel %vm501_vm15, %v8973_v11, 16  ;;  %v520_v27 = vsel %vm504_vm14, %v8973_v11, 16  ;;  %v9137_v60 = vcvt.s32.f32 %v592_v7 }
 0x238   :  { %v9126_v28 = vsel %vm15971_vm1, %v517_v10, 2147483647  ;;  %v9129_v40 = vsel %vm15971_vm1, %v520_v27, 2147483647 }
 0x239   :  { %565 = vmin.xlane.f32.xlu1 %v9120_v61  ;;  %v9132_v41 = vpop.xlane.xlu0 %466  ;;  %v577_v38 = vshra.s32 %v9126_v28, 16  ;;  %v622_v52 = vshra.s32 %v9129_v40, 16 }
 0x23a   :  { %16161 = vst [vmem:[#allocation32_spill] sm:$0xff] %v9132_v41  ;;  %vm503_vm0 = vcmp.eq.f32.partialorder %v8964_v6, %v9132_v41 }
 0x23b   :  { %v9139_v24 = vcvt.s32.f32 %v577_v38  ;;  %v519_v10 = vsel %vm503_vm0, %v8973_v11, 16  ;;  %v9153_v38 = vcvt.s32.f32 %v622_v52  ;;  %v651_v52 = vand.u32 65535, %v8986_v17 }
 0x23c   :  { %v9144_v27 = vsel %vm15971_vm1, %v519_v10, 2147483647 }
 0x23d   :  { %595 = vmin.xlane.f32.xlu1 %v9137_v60  ;;  %580 = vmin.xlane.f32.xlu0 %v9139_v24  ;;  %v9148_v20 = vpop.xlane.xlu0 %472  ;;  %v607_v53 = vshra.s32 %v9144_v27, 16 }
 0x23e   :  { %16162 = vst [vmem:[#allocation33_spill] sm:$0xff] %v9148_v20  ;;  %vm505_vm2 = vcmp.eq.f32.partialorder %v8968_v8, %v9148_v20 }
 0x23f   :  { %v9155_v7 = vcvt.s32.f32 %v607_v53  ;;  %v521_v41 = vsel %vm505_vm2, %v8973_v11, 16  ;;  %v666_v53 = vand.u32 65535, %v8989_v14 }
 0x240   :  { %v9159_v10 = vsel %vm15971_vm1, %v521_v41, 2147483647  ;;  %v653_v41 = vcvt.s32.f32 %v651_v52  ;;  %v683_v52 = vcvt.s32.f32 %v681_v44  ;;  %v713_v44 = vcvt.s32.f32 %v711_v29 }
 0x241   :  { %625 = vmin.xlane.f32.xlu1 %v9153_v38  ;;  %610 = vmin.xlane.f32.xlu0 %v9155_v7  ;;  %v637_v23 = vshra.s32 %v9159_v10, 16  ;;  %v668_v45 = vcvt.s32.f32 %v666_v53  ;;  %v698_v53 = vcvt.s32.f32 %v696_v32  ;;  %v728_v32 = vcvt.s32.f32 %v726_v30 }
 0x243   :  { %v9164_v56 = vcvt.s32.f32 %v637_v23 }
 0x245   :  { %640 = vmin.xlane.f32.xlu0 %v9164_v56 }
 0x2b2   :  { %v9169_v20 = vpop.xlane.xlu1 %655  ;;  %v9171_v59 = vpop.xlane.xlu0 %670 }
 0x2b3   :  { %vm657_vm3 = vcmp.eq.f32.partialorder %v9001_v25, %v9169_v20  ;;  %vm672_vm4 = vcmp.eq.f32.partialorder %v9003_v26, %v9171_v59 }
 0x2b4   :  { %v658_v23 = vsel %vm657_vm3, %v653_v41, inf  ;;  %v673_v17 = vsel %vm672_vm4, %v668_v45, inf }
 0x2b5   :  { %659 = vmin.xlane.f32.xlu1 %v658_v23  ;;  %674 = vmin.xlane.f32.xlu0 %v673_v17 }
 0x2b6   :  { %v9179_v14 = vpop.xlane.xlu1 %685  ;;  %v9181_v31 = vpop.xlane.xlu0 %700 }
 0x2b7   :  { %vm687_vm5 = vcmp.eq.f32.partialorder %v9025_v37, %v9179_v14  ;;  %vm702_vm6 = vcmp.eq.f32.partialorder %v9027_v39, %v9181_v31 }
 0x2b8   :  { %v688_v25 = vsel %vm687_vm5, %v683_v52, inf  ;;  %v703_v26 = vsel %vm702_vm6, %v698_v53, inf  ;;  %v743_v52 = vcvt.s32.f32 %v741_v42  ;;  %v758_v53 = vcvt.s32.f32 %v756_v43 }
 0x2b9   :  { %689 = vmin.xlane.f32.xlu1 %v688_v25  ;;  %704 = vmin.xlane.f32.xlu0 %v703_v26  ;;  %v533_v25 = vcvt.s32.f32 %v531_v54  ;;  %v548_v26 = vcvt.s32.f32 %v546_v55  ;;  %v576_v42 = vand.u32 65535, %v9126_v28 }
 0x2ba   :  { %v9189_v45 = vpop.xlane.xlu1 %715  ;;  %v9191_v41 = vpop.xlane.xlu0 %730 }
 0x2bb   :  { %vm717_vm7 = vcmp.eq.f32.partialorder %v9049_v50, %v9189_v45  ;;  %vm732_vm8 = vcmp.eq.f32.partialorder %v9051_v51, %v9191_v41 }
 0x2bc   :  { %v718_v37 = vsel %vm717_vm7, %v713_v44, inf  ;;  %v733_v39 = vsel %vm732_vm8, %v728_v32, inf  ;;  %v563_v44 = vcvt.s32.f32 %v561_v16  ;;  %v591_v32 = vand.u32 65535, %v9107_v49 }
 0x2bd   :  { %719 = vmin.xlane.f32.xlu1 %v718_v37  ;;  %734 = vmin.xlane.f32.xlu0 %v733_v39  ;;  %v578_v37 = vcvt.s32.f32 %v576_v42  ;;  %v621_v39 = vand.u32 65535, %v9129_v40  ;;  %v636_v40 = vand.u32 65535, %v9159_v10  ;;  %v662_v10 = vcvt.f32.s32 %v9169_v20 }
 0x2be   :  { %v9199_v23 = vpop.xlane.xlu1 %745  ;;  %v9201_v17 = vpop.xlane.xlu0 %760  ;;  %v722_v20 = vcvt.f32.s32 %v9189_v45 }
 0x2bf   :  { %vm747_vm9 = vcmp.eq.f32.partialorder %v9073_v4, %v9199_v23  ;;  %vm762_vm10 = vcmp.eq.f32.partialorder %v9075_v5, %v9201_v17  ;;  %v623_v54 = vcvt.s32.f32 %v621_v39 }
 0x2c0   :  { %v748_v50 = vsel %vm747_vm9, %v743_v52, inf  ;;  %v763_v51 = vsel %vm762_vm10, %v758_v53, inf  ;;  %v606_v52 = vand.u32 65535, %v9144_v27 }
 0x2c1   :  { %749 = vmin.xlane.f32.xlu1 %v748_v50  ;;  %764 = vmin.xlane.f32.xlu0 %v763_v51  ;;  %v638_v50 = vcvt.s32.f32 %v636_v40 }
 0x2c2   :  { %v9209_v29 = vpop.xlane.xlu1 %535  ;;  %v9211_v30 = vpop.xlane.xlu0 %550  ;;  %v608_v55 = vcvt.s32.f32 %v606_v52 }
 0x2c3   :  { %vm537_vm11 = vcmp.eq.f32.partialorder %v9099_v36, %v9209_v29  ;;  %vm552_vm12 = vcmp.eq.f32.partialorder %v9097_v33, %v9211_v30  ;;  %v593_v33 = vcvt.s32.f32 %v591_v32 }
 0x2c4   :  { %v538_v4 = vsel %vm537_vm11, %v533_v25, inf  ;;  %v553_v5 = vsel %vm552_vm12, %v548_v26, inf  ;;  %v677_v25 = vcvt.f32.s32 %v9171_v59  ;;  %v737_v59 = vcvt.f32.s32 %v9191_v41 }
 0x2c5   :  { %539 = vmin.xlane.f32.xlu1 %v538_v4  ;;  %554 = vmin.xlane.f32.xlu0 %v553_v5  ;;  %v663_v4 = vshll.u32 %v662_v10, 16 }
 0x2c6   :  { %v9218_v15 = vpop.xlane.xlu1 %565  ;;  %v678_v5 = vshll.u32 %v677_v25, 16  ;;  %v738_v40 = vshll.u32 %v737_v59, 16 }
 0x2c7   :  { %vm567_vm13 = vcmp.eq.f32.partialorder %v9120_v61, %v9218_v15 }
 0x2c8   :  { %v568_v46 = vsel %vm567_vm13, %v563_v44, inf }
 0x2c9   :  { %569 = vmin.xlane.f32.xlu1 %v568_v46 }
 0x2ca   :  { %v9224_v36 = vpop.xlane.xlu1 %595  ;;  %v9226_v43 = vpop.xlane.xlu0 %580 }
 0x2cb   :  { %vm597_vm14 = vcmp.eq.f32.partialorder %v9137_v60, %v9224_v36  ;;  %vm582_vm15 = vcmp.eq.f32.partialorder %v9139_v24, %v9226_v43 }
 0x2cc   :  { %v598_v49 = vsel %vm597_vm14, %v593_v33, inf  ;;  %v583_v61 = vsel %vm582_vm15, %v578_v37, inf }
 0x2cd   :  { %599 = vmin.xlane.f32.xlu1 %v598_v49  ;;  %584 = vmin.xlane.f32.xlu0 %v583_v61 }
 0x2ce   :  { %v9234_v28 = vpop.xlane.xlu1 %625  ;;  %v9236_v53 = vpop.xlane.xlu0 %610 }
 0x2cf   :  { %vm627_vm0 = vcmp.eq.f32.partialorder %v9153_v38, %v9234_v28  ;;  %vm612_vm2 = vcmp.eq.f32.partialorder %v9155_v7, %v9236_v53  ;;  %v692_v38 = vcvt.f32.s32 %v9179_v14  ;;  %v707_v7 = vcvt.f32.s32 %v9181_v31 }
 0x2d0   :  { %v628_v60 = vsel %vm627_vm0, %v623_v54, inf  ;;  %v613_v24 = vsel %vm612_vm2, %v608_v55, inf  ;;  %v723_v55 = vshll.u32 %v722_v20, 16 }
 0x2d1   :  { %629 = vmin.xlane.f32.xlu1 %v628_v60  ;;  %614 = vmin.xlane.f32.xlu0 %v613_v24  ;;  %v708_v33 = vshll.u32 %v707_v7, 16  ;;  %v752_v60 = vcvt.f32.s32 %v9199_v23 }
 0x2d2   :  { %v9243_v27 = vpop.xlane.xlu0 %640 }
 0x2d3   :  { %vm642_vm3 = vcmp.eq.f32.partialorder %v9164_v56, %v9243_v27  ;;  %v693_v56 = vshll.u32 %v692_v38, 16 }
 0x2d4   :  { %v643_v51 = vsel %vm642_vm3, %v638_v50, inf }
 0x2d5   :  { %644 = vmin.xlane.f32.xlu0 %v643_v51 }
 0x342   :  { %v660_v26 = vpop.xlane.xlu1 %659  ;;  %v675_v16 = vpop.xlane.xlu0 %674 }
 0x343   :  { %v661_v44 = vcvt.f32.s32 %v660_v26  ;;  %v676_v32 = vcvt.f32.s32 %v675_v16  ;;  %v753_v26 = vshll.u32 %v752_v60, 16 }
 0x345   :  { %v9251_v42 = vadd.s32 %v663_v4, %v661_v44  ;;  %v9253_v46 = vadd.s32 %v678_v5, %v676_v32  ;;  %v542_v4 = vcvt.f32.s32 %v9209_v29 }
 0x346   :  { %v690_v37 = vpop.xlane.xlu1 %689  ;;  %v705_v14 = vpop.xlane.xlu0 %704 }
 0x347   :  { %v691_v39 = vcvt.f32.s32 %v690_v37  ;;  %v706_v31 = vcvt.f32.s32 %v705_v14  ;;  %vm778_vm4 = vcmp.eq.s32.totalorder %v8973_v11, %v9251_v42  ;;  %vm779_vm5 = vcmp.eq.s32.totalorder %v8973_v11, %v9253_v46 }
 0x348   :  { %v9262_v52 = vsel %vm778_vm4, -1e+30, %v8886_v62  ;;  %v9265_v49 = vsel %vm779_vm5, -1e+30, %v8888_v63  ;;  %v767_v62 = vcvt.f32.s32 %v9201_v17  ;;  %v543_v37 = vshll.u32 %v542_v4, 16 }
 0x349   :  { %v9267_v61 = vadd.s32 %v693_v56, %v691_v39  ;;  %v9269_v45 = vadd.s32 %v708_v33, %v706_v31  ;;  %v826_v41 = vsel %vm15971_vm1, %v9262_v52, -inf  ;;  %v829_v54 = vsel %vm15971_vm1, %v9265_v49, -inf }
 0x34a   :  { %v720_v24 = vpop.xlane.xlu1 %719  ;;  %827 = vmax.xlane.f32.xlu1 %v826_v41  ;;  %830 = vmax.xlane.f32.xlu0 %v829_v54  ;;  %v735_v63 = vpop.xlane.xlu0 %734  ;;  %v768_v16 = vshll.u32 %v767_v62, 16  ;;  %v572_v39 = vcvt.f32.s32 %v9218_v15  ;;  %v617_v4 = vcvt.f32.s32 %v9236_v53 }
 0x34b   :  { %v721_v50 = vcvt.f32.s32 %v720_v24  ;;  %v736_v51 = vcvt.f32.s32 %v735_v63  ;;  %vm780_vm6 = vcmp.eq.s32.totalorder %v8973_v11, %v9267_v61  ;;  %vm781_vm7 = vcmp.eq.s32.totalorder %v8973_v11, %v9269_v45 }
 0x34c   :  { %v9282_v10 = vsel %vm780_vm6, -1e+30, %v8890_v0  ;;  %v9285_v25 = vsel %vm781_vm7, -1e+30, %v8892_v1  ;;  %v557_v0 = vcvt.f32.s32 %v9211_v30  ;;  %v573_v24 = vshll.u32 %v572_v39, 16 }
 0x34d   :  { %v9287_v23 = vadd.s32 %v723_v55, %v721_v50  ;;  %v9289_v17 = vadd.s32 %v738_v40, %v736_v51  ;;  %v832_v38 = vsel %vm15971_vm1, %v9282_v10, -inf  ;;  %v835_v7 = vsel %vm15971_vm1, %v9285_v25, -inf }
 0x34e   :  { %v750_v5 = vpop.xlane.xlu1 %749  ;;  %833 = vmax.xlane.f32.xlu1 %v832_v38  ;;  %836 = vmax.xlane.f32.xlu0 %v835_v7  ;;  %v765_v1 = vpop.xlane.xlu0 %764  ;;  %v558_v14 = vshll.u32 %v557_v0, 16  ;;  %v602_v63 = vcvt.f32.s32 %v9224_v36 }
 0x34f   :  { %16163 = vst [vmem:[#allocation34_spill] sm:$0xff] %v9289_v17  ;;  %v751_v44 = vcvt.f32.s32 %v750_v5  ;;  %v766_v32 = vcvt.f32.s32 %v765_v1  ;;  %vm782_vm8 = vcmp.eq.s32.totalorder %v8973_v11, %v9287_v23  ;;  %vm783_vm9 = vcmp.eq.s32.totalorder %v8973_v11, %v9289_v17 }
 0x350   :  { %v9302_v56 = vsel %vm782_vm8, -1e+30, %v8909_v21  ;;  %v9305_v33 = vsel %vm783_vm9, -1e+30, %v8911_v22 }
 0x351   :  { %v9307_v29 = vadd.s32 %v753_v26, %v751_v44  ;;  %v9309_v30 = vadd.s32 %v768_v16, %v766_v32  ;;  %v838_v20 = vsel %vm15971_vm1, %v9302_v56, -inf  ;;  %v841_v59 = vsel %vm15971_vm1, %v9305_v33, -inf }
 0x352   :  { %v540_v31 = vpop.xlane.xlu1 %539  ;;  %839 = vmax.xlane.f32.xlu1 %v838_v20  ;;  %842 = vmax.xlane.f32.xlu0 %v841_v59  ;;  %v555_v21 = vpop.xlane.xlu0 %554  ;;  %v603_v26 = vshll.u32 %v602_v63, 16  ;;  %v632_v16 = vcvt.f32.s32 %v9234_v28  ;;  %v618_v59 = vshll.u32 %v617_v4, 16 }
 0x353   :  { %16164 = vst [vmem:[#allocation35_spill] sm:$0xff] %v9307_v29  ;;  %16165 = vst [vmem:[#allocation36_spill] sm:$0xff] %v9309_v30  ;;  %v541_v22 = vcvt.f32.s32 %v540_v31  ;;  %v556_v41 = vcvt.f32.s32 %v555_v21  ;;  %vm784_vm10 = vcmp.eq.s32.totalorder %v8973_v11, %v9307_v29  ;;  %vm785_vm11 = vcmp.eq.s32.totalorder %v8973_v11, %v9309_v30 }
 0x354   :  { %v9321_v54 = vsel %vm784_vm10, -1e+30, %v8922_v34  ;;  %v9324_v55 = vsel %vm785_vm11, -1e+30, %v8924_v35  ;;  %v587_v34 = vcvt.f32.s32 %v9226_v43  ;;  %v633_v53 = vshll.u32 %v632_v16, 16 }
 0x355   :  { %v9326_v40 = vadd.s32 %v543_v37, %v541_v22  ;;  %v9328_v15 = vadd.s32 %v558_v14, %v556_v41  ;;  %v844_v60 = vsel %vm15971_vm1, %v9321_v54, -inf  ;;  %v847_v62 = vsel %vm15971_vm1, %v9324_v55, -inf }
 0x356   :  { %845 = vmax.xlane.f32.xlu1 %v844_v60  ;;  %v570_v50 = vpop.xlane.xlu1 %569  ;;  %848 = vmax.xlane.f32.xlu0 %v847_v62  ;;  %v588_v5 = vshll.u32 %v587_v34, 16  ;;  %v647_v37 = vcvt.f32.s32 %v9243_v27 }
 0x357   :  { %16166 = vst [vmem:[#allocation37_spill] sm:$0xff] %v9326_v40  ;;  %16167 = vst [vmem:[#allocation38_spill] sm:$0xff] %v9328_v15  ;;  %v571_v35 = vcvt.f32.s32 %v570_v50  ;;  %vm770_vm12 = vcmp.eq.s32.totalorder %v8973_v11, %v9326_v40  ;;  %vm771_vm13 = vcmp.eq.s32.totalorder %v8973_v11, %v9328_v15 }
 0x358   :  { %v9341_v51 = vsel %vm770_vm12, -1e+30, %v8936_v48  ;;  %v9344_v38 = vsel %vm771_vm13, -1e+30, %v8934_v47  ;;  %v648_v63 = vshll.u32 %v647_v37, 16 }
 0x359   :  { %v9346_v7 = vadd.s32 %v573_v24, %v571_v35  ;;  %v802_v36 = vsel %vm15971_vm1, %v9341_v51, -inf  ;;  %v805_v43 = vsel %vm15971_vm1, %v9344_v38, -inf }
 0x35a   :  { %803 = vmax.xlane.f32.xlu1 %v802_v36  ;;  %v600_v0 = vpop.xlane.xlu1 %599  ;;  %806 = vmax.xlane.f32.xlu0 %v805_v43  ;;  %v585_v48 = vpop.xlane.xlu0 %584 }
 0x35b   :  { %16168 = vst [vmem:[#allocation39_spill] sm:$0xff] %v9346_v7  ;;  %v601_v47 = vcvt.f32.s32 %v600_v0  ;;  %v586_v1 = vcvt.f32.s32 %v585_v48  ;;  %vm772_vm14 = vcmp.eq.s32.totalorder %v8973_v11, %v9346_v7 }
 0x35c   :  { %v9357_v44 = vsel %vm772_vm14, -1e+30, %v8949_v58 }
 0x35d   :  { %v9359_v32 = vadd.s32 %v603_v26, %v601_v47  ;;  %v9361_v20 = vadd.s32 %v588_v5, %v586_v1  ;;  %v808_v28 = vsel %vm15971_vm1, %v9357_v44, -inf }
 0x35e   :  { %809 = vmax.xlane.f32.xlu1 %v808_v28  ;;  %v630_v14 = vpop.xlane.xlu1 %629  ;;  %v615_v39 = vpop.xlane.xlu0 %614 }
 0x35f   :  { %16169 = vst [vmem:[#allocation40_spill] sm:$0xff] %v9359_v32  ;;  %16170 = vst [vmem:[#allocation41_spill] sm:$0xff] %v9361_v20  ;;  %v631_v31 = vcvt.f32.s32 %v630_v14  ;;  %v616_v21 = vcvt.f32.s32 %v615_v39  ;;  %vm774_vm15 = vcmp.eq.s32.totalorder %v8973_v11, %v9359_v32  ;;  %vm773_vm0 = vcmp.eq.s32.totalorder %v8973_v11, %v9361_v20 }
 0x360   :  { %v9371_v58 = vsel %vm774_vm15, -1e+30, %v8947_v57  ;;  %v9374_v22 = vsel %vm773_vm0, -1e+30, %v8958_v3 }
 0x361   :  { %v9376_v41 = vadd.s32 %v633_v53, %v631_v31  ;;  %v9378_v27 = vadd.s32 %v618_v59, %v616_v21  ;;  %v814_v60 = vsel %vm15971_vm1, %v9371_v58, -inf  ;;  %v811_v62 = vsel %vm15971_vm1, %v9374_v22, -inf }
 0x362   :  { %815 = vmax.xlane.f32.xlu1 %v814_v60  ;;  %812 = vmax.xlane.f32.xlu0 %v811_v62  ;;  %v645_v24 = vpop.xlane.xlu0 %644 }
 0x363   :  { %16171 = vst [vmem:[#allocation42_spill] sm:$0xff] %v9376_v41  ;;  %16172 = vst [vmem:[#allocation43_spill] sm:$0xff] %v9378_v27  ;;  %v646_v50 = vcvt.f32.s32 %v645_v24  ;;  %vm776_vm2 = vcmp.eq.s32.totalorder %v8973_v11, %v9376_v41  ;;  %vm775_vm3 = vcmp.eq.s32.totalorder %v8973_v11, %v9378_v27 }
 0x364   :  { %v9389_v57 = vsel %vm776_vm2, -1e+30, %v8956_v2  ;;  %v9392_v3 = vsel %vm775_vm3, -1e+30, %v8964_v6 }
 0x365   :  { %v9394_v34 = vadd.s32 %v648_v63, %v646_v50  ;;  %v820_v35 = vsel %vm15971_vm1, %v9389_v57, -inf  ;;  %v817_v36 = vsel %vm15971_vm1, %v9392_v3, -inf }
 0x366   :  { %821 = vmax.xlane.f32.xlu1 %v820_v35  ;;  %818 = vmax.xlane.f32.xlu0 %v817_v36 }
 0x367   :  { %16173 = vst [vmem:[#allocation44_spill] sm:$0xff] %v9394_v34  ;;  %vm777_vm4 = vcmp.eq.s32.totalorder %v8973_v11, %v9394_v34 }
 0x368   :  { %v9403_v43 = vsel %vm777_vm4, -1e+30, %v8968_v8 }
 0x369   :  { %v823_v2 = vsel %vm15971_vm1, %v9403_v43, -inf }
 0x36a   :  { %824 = vmax.xlane.f32.xlu0 %v823_v2 }
 0x3d7   :  { %v9407_v6 = vpop.xlane.xlu1 %827  ;;  %v9409_v26 = vpop.xlane.xlu0 %830 }
 0x3d8   :  { %16174 = vst [vmem:[#allocation45_spill] sm:$0xff] %v9407_v6  ;;  %16175 = vst [vmem:[#allocation46_spill] sm:$0xff] %v9409_v26  ;;  %vm858_vm5 = vcmp.eq.f32.partialorder %v9262_v52, %v9407_v6  ;;  %vm859_vm6 = vcmp.eq.f32.partialorder %v9265_v49, %v9409_v26 }
 0x3d9   :  { %v874_v16 = vsel %vm858_vm5, %v8973_v11, 16  ;;  %v875_v4 = vsel %vm859_vm6, %v8973_v11, 16 }
 0x3da   :  { %v9418_v8 = vsel %vm15971_vm1, %v874_v16, 2147483647  ;;  %v9421_v0 = vsel %vm15971_vm1, %v875_v4, 2147483647 }
 0x3db   :  { %v9423_v48 = vpop.xlane.xlu1 %833  ;;  %v9425_v5 = vpop.xlane.xlu0 %836  ;;  %v1004_v47 = vshra.s32 %v9418_v8, 16  ;;  %v1019_v1 = vshra.s32 %v9421_v0, 16 }
 0x3dc   :  { %16176 = vst [vmem:[#allocation47_spill] sm:$0xff] %v9423_v48  ;;  %16177 = vst [vmem:[#allocation48_spill] sm:$0xff] %v9425_v5  ;;  %vm860_vm7 = vcmp.eq.f32.partialorder %v9282_v10, %v9423_v48  ;;  %vm861_vm8 = vcmp.eq.f32.partialorder %v9285_v25, %v9425_v5 }
 0x3dd   :  { %v9433_v28 = vcvt.s32.f32 %v1004_v47  ;;  %v9435_v53 = vcvt.s32.f32 %v1019_v1  ;;  %v876_v59 = vsel %vm860_vm7, %v8973_v11, 16  ;;  %v877_v37 = vsel %vm861_vm8, %v8973_v11, 16 }
 0x3de   :  { %v9440_v14 = vsel %vm15971_vm1, %v876_v59, 2147483647  ;;  %v9443_v39 = vsel %vm15971_vm1, %v877_v37, 2147483647 }
 0x3df   :  { %1007 = vmin.xlane.f32.xlu1 %v9433_v28  ;;  %v9446_v31 = vpop.xlane.xlu1 %839  ;;  %1022 = vmin.xlane.f32.xlu0 %v9435_v53  ;;  %v9449_v21 = vpop.xlane.xlu0 %842  ;;  %v1034_v60 = vshra.s32 %v9440_v14, 16  ;;  %v1049_v62 = vshra.s32 %v9443_v39, 16  ;;  %v1033_v29 = vand.u32 65535, %v9440_v14 }
 0x3e0   :  { %16178 = vst [vmem:[#allocation49_spill] sm:$0xff] %v9446_v31  ;;  %16179 = vst [vmem:[#allocation50_spill] sm:$0xff] %v9449_v21  ;;  %vm862_vm9 = vcmp.eq.f32.partialorder %v9302_v56, %v9446_v31  ;;  %vm863_vm10 = vcmp.eq.f32.partialorder %v9305_v33, %v9449_v21 }
 0x3e1   :  { %v9457_v24 = vcvt.s32.f32 %v1034_v60  ;;  %v9459_v63 = vcvt.s32.f32 %v1049_v62  ;;  %v878_v50 = vsel %vm862_vm9, %v8973_v11, 16  ;;  %v879_v35 = vsel %vm863_vm10, %v8973_v11, 16 }
 0x3e2   :  { %v9464_v36 = vsel %vm15971_vm1, %v878_v50, 2147483647  ;;  %v9467_v2 = vsel %vm15971_vm1, %v879_v35, 2147483647 }
 0x3e3   :  { %1037 = vmin.xlane.f32.xlu1 %v9457_v24  ;;  %v9470_v16 = vpop.xlane.xlu1 %845  ;;  %1052 = vmin.xlane.f32.xlu0 %v9459_v63  ;;  %v9473_v4 = vpop.xlane.xlu0 %848  ;;  %v1064_v47 = vshra.s32 %v9464_v36, 16  ;;  %v1079_v1 = vshra.s32 %v9467_v2, 16  ;;  %v1063_v14 = vand.u32 65535, %v9464_v36 }
 0x3e4   :  { %16180 = vst [vmem:[#allocation51_spill] sm:$0xff] %v9470_v16  ;;  %16181 = vst [vmem:[#allocation52_spill] sm:$0xff] %v9473_v4  ;;  %vm864_vm11 = vcmp.eq.f32.partialorder %v9321_v54, %v9470_v16  ;;  %vm865_vm12 = vcmp.eq.f32.partialorder %v9324_v55, %v9473_v4 }
 0x3e5   :  { %v9481_v59 = vcvt.s32.f32 %v1064_v47  ;;  %v9483_v37 = vcvt.s32.f32 %v1079_v1  ;;  %v880_v60 = vsel %vm864_vm11, %v8973_v11, 16  ;;  %v881_v62 = vsel %vm865_vm12, %v8973_v11, 16 }
 0x3e6   :  { %v9488_v50 = vsel %vm15971_vm1, %v880_v60, 2147483647  ;;  %v9491_v35 = vsel %vm15971_vm1, %v881_v62, 2147483647 }
 0x3e7   :  { %1067 = vmin.xlane.f32.xlu1 %v9481_v59  ;;  %v9494_v16 = vpop.xlane.xlu1 %803  ;;  %1082 = vmin.xlane.f32.xlu0 %v9483_v37  ;;  %v9497_v47 = vpop.xlane.xlu0 %806  ;;  %v1094_v1 = vshra.s32 %v9488_v50, 16  ;;  %v1109_v4 = vshra.s32 %v9491_v35, 16 }
 0x3e8   :  { %16182 = vst [vmem:[#allocation53_spill] sm:$0xff] %v9494_v16  ;;  %16183 = vst [vmem:[#allocation54_spill] sm:$0xff] %v9497_v47  ;;  %vm850_vm13 = vcmp.eq.f32.partialorder %v9341_v51, %v9494_v16  ;;  %vm851_vm14 = vcmp.eq.f32.partialorder %v9344_v38, %v9497_v47 }
 0x3e9   :  { %v9505_v60 = vcvt.s32.f32 %v1094_v1  ;;  %v9507_v62 = vcvt.s32.f32 %v1109_v4  ;;  %v866_v21 = vsel %vm850_vm13, %v8973_v11, 16  ;;  %v867_v31 = vsel %vm851_vm14, %v8973_v11, 16 }
 0x3ea   :  { %v9512_v19 = vsel %vm15971_vm1, %v866_v21, 2147483647  ;;  %v9515_v5 = vsel %vm15971_vm1, %v867_v31, 2147483647 }
 0x3eb   :  { %1097 = vmin.xlane.f32.xlu1 %v9505_v60  ;;  %v9518_v16 = vpop.xlane.xlu1 %809  ;;  %1112 = vmin.xlane.f32.xlu0 %v9507_v62  ;;  %v884_v1 = vshra.s32 %v9512_v19, 16  ;;  %v899_v4 = vshra.s32 %v9515_v5, 16 }
 0x3ec   :  { %16184 = vst [vmem:[#allocation55_spill] sm:$0xff] %v9518_v16  ;;  %vm852_vm15 = vcmp.eq.f32.partialorder %v9357_v44, %v9518_v16 }
 0x3ed   :  { %v9525_v47 = vcvt.s32.f32 %v884_v1  ;;  %v9527_v21 = vcvt.s32.f32 %v899_v4  ;;  %v868_v31 = vsel %vm852_vm15, %v8973_v11, 16 }
 0x3ee   :  { %v9531_v9 = vsel %vm15971_vm1, %v868_v31, 2147483647 }
 0x3ef   :  { %887 = vmin.xlane.f32.xlu1 %v9525_v47  ;;  %v9534_v48 = vpop.xlane.xlu1 %815  ;;  %902 = vmin.xlane.f32.xlu0 %v9527_v21  ;;  %v9537_v13 = vpop.xlane.xlu0 %812  ;;  %v914_v26 = vshra.s32 %v9531_v9, 16 }
 0x3f0   :  { %16185 = vst [vmem:[#allocation56_spill] sm:$0xff] %v9534_v48  ;;  %16186 = vst [vmem:[#allocation57_spill] sm:$0xff] %v9537_v13  ;;  %vm854_vm0 = vcmp.eq.f32.partialorder %v9371_v58, %v9534_v48  ;;  %vm853_vm2 = vcmp.eq.f32.partialorder %v9374_v22, %v9537_v13 }
 0x3f1   :  { %v9544_v1 = vcvt.s32.f32 %v914_v26  ;;  %v870_v4 = vsel %vm854_vm0, %v8973_v11, 16  ;;  %v869_v31 = vsel %vm853_vm2, %v8973_v11, 16 }
 0x3f2   :  { %v9549_v16 = vsel %vm15971_vm1, %v870_v4, 2147483647  ;;  %v9552_v12 = vsel %vm15971_vm1, %v869_v31, 2147483647 }
 0x3f3   :  { %917 = vmin.xlane.f32.xlu1 %v9544_v1  ;;  %v9555_v6 = vpop.xlane.xlu1 %821  ;;  %v9557_v48 = vpop.xlane.xlu0 %818  ;;  %v944_v13 = vshra.s32 %v9549_v16, 16  ;;  %v929_v26 = vshra.s32 %v9552_v12, 16 }
 0x3f4   :  { %16187 = vst [vmem:[#allocation58_spill] sm:$0xff] %v9555_v6  ;;  %16188 = vst [vmem:[#allocation59_spill] sm:$0xff] %v9557_v48  ;;  %vm856_vm3 = vcmp.eq.f32.partialorder %v9389_v57, %v9555_v6  ;;  %vm855_vm4 = vcmp.eq.f32.partialorder %v9392_v3, %v9557_v48 }
 0x3f5   :  { %v9565_v4 = vcvt.s32.f32 %v944_v13  ;;  %v9567_v31 = vcvt.s32.f32 %v929_v26  ;;  %v872_v18 = vsel %vm856_vm3, %v8973_v11, 16  ;;  %v871_v34 = vsel %vm855_vm4, %v8973_v11, 16 }
 0x3f6   :  { %v9572_v27 = vsel %vm15971_vm1, %v872_v18, 2147483647  ;;  %v9575_v41 = vsel %vm15971_vm1, %v871_v34, 2147483647 }
 0x3f7   :  { %947 = vmin.xlane.f32.xlu1 %v9565_v4  ;;  %932 = vmin.xlane.f32.xlu0 %v9567_v31  ;;  %v9579_v6 = vpop.xlane.xlu0 %824  ;;  %v974_v13 = vshra.s32 %v9572_v27, 16  ;;  %v959_v26 = vshra.s32 %v9575_v41, 16 }
 0x3f8   :  { %16189 = vst [vmem:[#allocation60_spill] sm:$0xff] %v9579_v6  ;;  %vm857_vm5 = vcmp.eq.f32.partialorder %v9403_v43, %v9579_v6  ;;  %v1048_v6 = vand.u32 65535, %v9443_v39 }
 0x3f9   :  { %v9585_v48 = vcvt.s32.f32 %v974_v13  ;;  %v9587_v18 = vcvt.s32.f32 %v959_v26  ;;  %v873_v34 = vsel %vm857_vm5, %v8973_v11, 16  ;;  %v1003_v13 = vand.u32 65535, %v9418_v8 }
 0x3fa   :  { %v9591_v20 = vsel %vm15971_vm1, %v873_v34, 2147483647  ;;  %v1018_v26 = vand.u32 65535, %v9421_v0  ;;  %v1078_v0 = vand.u32 65535, %v9467_v2 }
 0x3fb   :  { %977 = vmin.xlane.f32.xlu1 %v9585_v48  ;;  %962 = vmin.xlane.f32.xlu0 %v9587_v18  ;;  %v989_v32 = vshra.s32 %v9591_v20, 16  ;;  %v1005_v40 = vcvt.s32.f32 %v1003_v13  ;;  %v1035_v13 = vcvt.s32.f32 %v1033_v29 }
 0x3fc   :  { %v1020_v30 = vcvt.s32.f32 %v1018_v26  ;;  %v1050_v26 = vcvt.s32.f32 %v1048_v6  ;;  %v1065_v6 = vcvt.s32.f32 %v1063_v14  ;;  %v1080_v36 = vcvt.s32.f32 %v1078_v0 }
 0x3fd   :  { %v9596_v7 = vcvt.s32.f32 %v989_v32 }
 0x3ff   :  { %992 = vmin.xlane.f32.xlu0 %v9596_v7 }
 0x46c   :  { %v9602_v15 = vpop.xlane.xlu1 %1007  ;;  %v9604_v34 = vpop.xlane.xlu0 %1022 }
 0x46d   :  { %vm1009_vm6 = vcmp.eq.f32.partialorder %v9433_v28, %v9602_v15  ;;  %vm1024_vm7 = vcmp.eq.f32.partialorder %v9435_v53, %v9604_v34  ;;  %v1093_v28 = vand.u32 65535, %v9488_v50  ;;  %v1108_v53 = vand.u32 65535, %v9491_v35 }
 0x46e   :  { %v1010_v32 = vsel %vm1009_vm6, %v1005_v40, inf  ;;  %v1025_v8 = vsel %vm1024_vm7, %v1020_v30, inf  ;;  %v883_v50 = vand.u32 65535, %v9512_v19  ;;  %v898_v35 = vand.u32 65535, %v9515_v5 }
 0x46f   :  { %1011 = vmin.xlane.f32.xlu1 %v1010_v32  ;;  %1026 = vmin.xlane.f32.xlu0 %v1025_v8  ;;  %v1110_v0 = vcvt.s32.f32 %v1108_v53  ;;  %v913_v19 = vand.u32 65535, %v9531_v9  ;;  %v928_v9 = vand.u32 65535, %v9552_v12 }
 0x470   :  { %v9612_v39 = vpop.xlane.xlu1 %1037  ;;  %v9614_v17 = vpop.xlane.xlu0 %1052  ;;  %v885_v14 = vcvt.s32.f32 %v883_v50 }
 0x471   :  { %vm1039_vm8 = vcmp.eq.f32.partialorder %v9457_v24, %v9612_v39  ;;  %vm1054_vm9 = vcmp.eq.f32.partialorder %v9459_v63, %v9614_v17  ;;  %v915_v53 = vcvt.s32.f32 %v913_v19  ;;  %v1029_v19 = vcvt.f32.s32 %v9604_v34 }
 0x472   :  { %v1040_v40 = vsel %vm1039_vm8, %v1035_v13, inf  ;;  %v1055_v30 = vsel %vm1054_vm9, %v1050_v26, inf  ;;  %v1095_v13 = vcvt.s32.f32 %v1093_v28 }
 0x473   :  { %1041 = vmin.xlane.f32.xlu1 %v1040_v40  ;;  %1056 = vmin.xlane.f32.xlu0 %v1055_v30  ;;  %v900_v40 = vcvt.s32.f32 %v898_v35  ;;  %v943_v30 = vand.u32 65535, %v9549_v16  ;;  %v930_v16 = vcvt.s32.f32 %v928_v9 }
 0x474   :  { %v9623_v2 = vpop.xlane.xlu1 %1067  ;;  %v9625_v29 = vpop.xlane.xlu0 %1082 }
 0x475   :  { %vm1069_vm10 = vcmp.eq.f32.partialorder %v9481_v59, %v9623_v2  ;;  %vm1084_vm11 = vcmp.eq.f32.partialorder %v9483_v37, %v9625_v29 }
 0x476   :  { %v1070_v24 = vsel %vm1069_vm10, %v1065_v6, inf  ;;  %v1085_v63 = vsel %vm1084_vm11, %v1080_v36, inf }
 0x477   :  { %1071 = vmin.xlane.f32.xlu1 %v1070_v24  ;;  %1086 = vmin.xlane.f32.xlu0 %v1085_v63  ;;  %v945_v63 = vcvt.s32.f32 %v943_v30 }
 0x478   :  { %v9633_v32 = vpop.xlane.xlu1 %1097  ;;  %v9635_v8 = vpop.xlane.xlu0 %1112 }
 0x479   :  { %vm1099_vm12 = vcmp.eq.f32.partialorder %v9505_v60, %v9633_v32  ;;  %vm1114_vm13 = vcmp.eq.f32.partialorder %v9507_v62, %v9635_v8 }
 0x47a   :  { %v1100_v59 = vsel %vm1099_vm12, %v1095_v13, inf  ;;  %v1115_v37 = vsel %vm1114_vm13, %v1110_v0, inf }
 0x47b   :  { %1101 = vmin.xlane.f32.xlu1 %v1100_v59  ;;  %1116 = vmin.xlane.f32.xlu0 %v1115_v37  ;;  %v1014_v37 = vcvt.f32.s32 %v9602_v15 }
 0x47c   :  { %v9642_v26 = vpop.xlane.xlu1 %887  ;;  %v9644_v5 = vpop.xlane.xlu0 %902 }
 0x47d   :  { %vm889_vm14 = vcmp.eq.f32.partialorder %v9525_v47, %v9642_v26  ;;  %vm904_vm15 = vcmp.eq.f32.partialorder %v9527_v21, %v9644_v5  ;;  %v973_v47 = vand.u32 65535, %v9572_v27  ;;  %v958_v21 = vand.u32 65535, %v9575_v41 }
 0x47e   :  { %v890_v60 = vsel %vm889_vm14, %v885_v14, inf  ;;  %v905_v62 = vsel %vm904_vm15, %v900_v40, inf  ;;  %v988_v27 = vand.u32 65535, %v9591_v20  ;;  %v1044_v14 = vcvt.f32.s32 %v9612_v39 }
 0x47f   :  { %891 = vmin.xlane.f32.xlu1 %v890_v60  ;;  %906 = vmin.xlane.f32.xlu0 %v905_v62  ;;  %v975_v35 = vcvt.s32.f32 %v973_v47  ;;  %v960_v13 = vcvt.s32.f32 %v958_v21  ;;  %v1030_v60 = vshll.u32 %v1029_v19, 16  ;;  %v1059_v62 = vcvt.f32.s32 %v9614_v17 }
 0x480   :  { %v9652_v28 = vpop.xlane.xlu1 %917  ;;  %v990_v59 = vcvt.s32.f32 %v988_v27  ;;  %v1074_v47 = vcvt.f32.s32 %v9623_v2 }
 0x481   :  { %vm919_vm0 = vcmp.eq.f32.partialorder %v9544_v1, %v9652_v28  ;;  %v1060_v34 = vshll.u32 %v1059_v62, 16 }
 0x482   :  { %v920_v6 = vsel %vm919_vm0, %v915_v53, inf  ;;  %v1075_v27 = vshll.u32 %v1074_v47, 16 }
 0x483   :  { %921 = vmin.xlane.f32.xlu1 %v920_v6 }
 0x484   :  { %v9658_v36 = vpop.xlane.xlu1 %947  ;;  %v9660_v24 = vpop.xlane.xlu0 %932 }
 0x485   :  { %vm949_vm2 = vcmp.eq.f32.partialorder %v9565_v4, %v9658_v36  ;;  %vm934_vm3 = vcmp.eq.f32.partialorder %v9567_v31, %v9660_v24 }
 0x486   :  { %v950_v12 = vsel %vm949_vm2, %v945_v63, inf  ;;  %v935_v1 = vsel %vm934_vm3, %v930_v16, inf  ;;  %v1089_v63 = vcvt.f32.s32 %v9625_v29  ;;  %v1104_v29 = vcvt.f32.s32 %v9633_v32 }
 0x487   :  { %951 = vmin.xlane.f32.xlu1 %v950_v12  ;;  %936 = vmin.xlane.f32.xlu0 %v935_v1 }
 0x488   :  { %v9667_v50 = vpop.xlane.xlu1 %977  ;;  %v9669_v41 = vpop.xlane.xlu0 %962 }
 0x489   :  { %vm979_vm4 = vcmp.eq.f32.partialorder %v9585_v48, %v9667_v50  ;;  %vm964_vm5 = vcmp.eq.f32.partialorder %v9587_v18, %v9669_v41  ;;  %v1015_v48 = vshll.u32 %v1014_v37, 16 }
 0x48a   :  { %v980_v4 = vsel %vm979_vm4, %v975_v35, inf  ;;  %v965_v31 = vsel %vm964_vm5, %v960_v13, inf }
 0x48b   :  { %981 = vmin.xlane.f32.xlu1 %v980_v4  ;;  %966 = vmin.xlane.f32.xlu0 %v965_v31 }
 0x48c   :  { %v9675_v0 = vpop.xlane.xlu0 %992 }
 0x48d   :  { %vm994_vm6 = vcmp.eq.f32.partialorder %v9596_v7, %v9675_v0  ;;  %v1045_v7 = vshll.u32 %v1044_v14, 16  ;;  %v894_v14 = vcvt.f32.s32 %v9642_v26 }
 0x48e   :  { %v995_v20 = vsel %vm994_vm6, %v990_v59, inf  ;;  %v1090_v59 = vshll.u32 %v1089_v63, 16 }
 0x48f   :  { %996 = vmin.xlane.f32.xlu0 %v995_v20  ;;  %v1119_v20 = vcvt.f32.s32 %v9635_v8  ;;  %v1105_v8 = vshll.u32 %v1104_v29, 16 }
 0x4fc   :  { %v1012_v18 = vpop.xlane.xlu1 %1011  ;;  %v1027_v40 = vpop.xlane.xlu0 %1026 }
 0x4fd   :  { %v1013_v30 = vcvt.f32.s32 %v1012_v18  ;;  %v1028_v9 = vcvt.f32.s32 %v1027_v40 }
 0x4ff   :  { %v9683_v53 = vadd.s32 %v1015_v48, %v1013_v30  ;;  %v9685_v6 = vadd.s32 %v1030_v60, %v1028_v9  ;;  %v1120_v30 = vshll.u32 %v1119_v20, 16  ;;  %v909_v9 = vcvt.f32.s32 %v9644_v5 }
 0x500   :  { %v1042_v15 = vpop.xlane.xlu1 %1041  ;;  %v1057_v21 = vpop.xlane.xlu0 %1056  ;;  %v895_v5 = vshll.u32 %v894_v14, 16 }
 0x501   :  { %v1043_v39 = vcvt.f32.s32 %v1042_v15  ;;  %v1058_v16 = vcvt.f32.s32 %v1057_v21  ;;  %vm1130_vm7 = vcmp.eq.s32.totalorder %v8973_v11, %v9683_v53  ;;  %vm1131_vm8 = vcmp.eq.s32.totalorder %v8973_v11, %v9685_v6 }
 0x502   :  { %v9698_v1 = vsel %vm1130_vm7, -1e+30, %v9262_v52  ;;  %v9701_v2 = vsel %vm1131_vm8, -1e+30, %v9265_v49 }
 0x503   :  { %v9693_v17 = vadd.s32 %v1045_v7, %v1043_v39  ;;  %v9695_v12 = vadd.s32 %v1060_v34, %v1058_v16  ;;  %v1178_v35 = vsel %vm15971_vm1, %v9698_v1, -inf  ;;  %v1181_v4 = vsel %vm15971_vm1, %v9701_v2, -inf }
 0x504   :  { %v1072_v13 = vpop.xlane.xlu1 %1071  ;;  %v1087_v31 = vpop.xlane.xlu0 %1086  ;;  %1179 = vmax.xlane.f32.xlu1 %v1178_v35  ;;  %1182 = vmax.xlane.f32.xlu0 %v1181_v4  ;;  %v910_v16 = vshll.u32 %v909_v9, 16 }
 0x505   :  { %v1073_v52 = vcvt.f32.s32 %v1072_v13  ;;  %v1088_v37 = vcvt.f32.s32 %v1087_v31  ;;  %vm1132_vm9 = vcmp.eq.s32.totalorder %v8973_v11, %v9693_v17  ;;  %vm1133_vm10 = vcmp.eq.s32.totalorder %v8973_v11, %v9695_v12 }
 0x506   :  { %v9718_v19 = vsel %vm1132_vm9, -1e+30, %v9282_v10  ;;  %v9721_v48 = vsel %vm1133_vm10, -1e+30, %v9285_v25  ;;  %v939_v31 = vcvt.f32.s32 %v9660_v24 }
 0x507   :  { %v9713_v49 = vadd.s32 %v1075_v27, %v1073_v52  ;;  %v9715_v32 = vadd.s32 %v1090_v59, %v1088_v37  ;;  %v1184_v18 = vsel %vm15971_vm1, %v9718_v19, -inf  ;;  %v1187_v60 = vsel %vm15971_vm1, %v9721_v48, -inf }
 0x508   :  { %v1102_v40 = vpop.xlane.xlu1 %1101  ;;  %v1117_v62 = vpop.xlane.xlu0 %1116  ;;  %1185 = vmax.xlane.f32.xlu1 %v1184_v18  ;;  %1188 = vmax.xlane.f32.xlu0 %v1187_v60  ;;  %v924_v27 = vcvt.f32.s32 %v9652_v28  ;;  %v954_v28 = vcvt.f32.s32 %v9658_v36  ;;  %v940_v18 = vshll.u32 %v939_v31, 16 }
 0x509   :  { %v1103_v10 = vcvt.f32.s32 %v1102_v40  ;;  %v1118_v7 = vcvt.f32.s32 %v1117_v62  ;;  %vm1134_vm11 = vcmp.eq.s32.totalorder %v8973_v11, %v9713_v49  ;;  %vm1135_vm12 = vcmp.eq.s32.totalorder %v8973_v11, %v9715_v32 }
 0x50a   :  { %v9738_v47 = vsel %vm1134_vm11, -1e+30, %v9302_v56  ;;  %v9741_v15 = vsel %vm1135_vm12, -1e+30, %v9305_v33  ;;  %v925_v37 = vshll.u32 %v924_v27, 16  ;;  %v955_v14 = vshll.u32 %v954_v28, 16 }
 0x50b   :  { %v9733_v25 = vadd.s32 %v1105_v8, %v1103_v10  ;;  %v9735_v26 = vadd.s32 %v1120_v30, %v1118_v7  ;;  %v1190_v21 = vsel %vm15971_vm1, %v9738_v47, -inf  ;;  %v1193_v63 = vsel %vm15971_vm1, %v9741_v15, -inf }
 0x50c   :  { %v892_v34 = vpop.xlane.xlu1 %891  ;;  %v907_v39 = vpop.xlane.xlu0 %906  ;;  %1191 = vmax.xlane.f32.xlu1 %v1190_v21  ;;  %1194 = vmax.xlane.f32.xlu0 %v1193_v63  ;;  %v984_v40 = vcvt.f32.s32 %v9667_v50  ;;  %v969_v30 = vcvt.f32.s32 %v9669_v41 }
 0x50d   :  { %v893_v29 = vcvt.f32.s32 %v892_v34  ;;  %v908_v56 = vcvt.f32.s32 %v907_v39  ;;  %vm1136_vm13 = vcmp.eq.s32.totalorder %v8973_v11, %v9733_v25  ;;  %vm1137_vm14 = vcmp.eq.s32.totalorder %v8973_v11, %v9735_v26 }
 0x50e   :  { %v9757_v13 = vsel %vm1136_vm13, -1e+30, %v9321_v54  ;;  %v9760_v4 = vsel %vm1137_vm14, -1e+30, %v9324_v55  ;;  %v985_v21 = vshll.u32 %v984_v40, 16  ;;  %v970_v63 = vshll.u32 %v969_v30, 16 }
 0x50f   :  { %v9752_v33 = vadd.s32 %v895_v5, %v893_v29  ;;  %v9754_v35 = vadd.s32 %v910_v16, %v908_v56  ;;  %16190 = vst [vmem:[#allocation61_spill] sm:$0xff] %v9757_v13  ;;  %16191 = vst [vmem:[#allocation62_spill] sm:$0xff] %v9760_v4  ;;  %v1196_v59 = vsel %vm15971_vm1, %v9757_v13, -inf  ;;  %v1199_v52 = vsel %vm15971_vm1, %v9760_v4, -inf }
 0x510   :  { %v922_v20 = vpop.xlane.xlu1 %921  ;;  %1197 = vmax.xlane.f32.xlu1 %v1196_v59  ;;  %1200 = vmax.xlane.f32.xlu0 %v1199_v52  ;;  %v999_v39 = vcvt.f32.s32 %v9675_v0 }
 0x511   :  { %v923_v8 = vcvt.f32.s32 %v922_v20  ;;  %vm1122_vm15 = vcmp.eq.s32.totalorder %v8973_v11, %v9752_v33  ;;  %vm1123_vm0 = vcmp.eq.s32.totalorder %v8973_v11, %v9754_v35 }
 0x512   :  { %v9771_v54 = vsel %vm1122_vm15, -1e+30, %v9341_v51  ;;  %v9780_v24 = vsel %vm1123_vm0, -1e+30, %v9344_v38  ;;  %v1000_v20 = vshll.u32 %v999_v39, 16 }
 0x513   :  { %16192 = vst [vmem:[#allocation63_spill] sm:$0xff] %v9771_v54  ;;  %v9775_v55 = vadd.s32 %v925_v37, %v923_v8  ;;  %v1154_v36 = vsel %vm15971_vm1, %v9771_v54, -inf  ;;  %16194 = vst [vmem:[#allocation65_spill] sm:$0xff] %v9780_v24  ;;  %v1157_v51 = vsel %vm15971_vm1, %v9780_v24, -inf }
 0x514   :  { %v952_v60 = vpop.xlane.xlu1 %951  ;;  %v937_v62 = vpop.xlane.xlu0 %936  ;;  %1155 = vmax.xlane.f32.xlu1 %v1154_v36  ;;  %1158 = vmax.xlane.f32.xlu0 %v1157_v51 }
 0x515   :  { %16193 = vst [vmem:[#allocation64_spill] sm:$0xff] %v9775_v55  ;;  %v953_v9 = vcvt.f32.s32 %v952_v60  ;;  %v938_v10 = vcvt.f32.s32 %v937_v62  ;;  %vm1124_vm2 = vcmp.eq.s32.totalorder %v8973_v11, %v9775_v55 }
 0x516   :  { %v9789_v38 = vsel %vm1124_vm2, -1e+30, %v9357_v44 }
 0x517   :  { %16195 = vst [vmem:[#allocation66_spill] sm:$0xff] %v9789_v38  ;;  %v9791_v7 = vadd.s32 %v955_v14, %v953_v9  ;;  %v9793_v50 = vadd.s32 %v940_v18, %v938_v10  ;;  %v1160_v5 = vsel %vm15971_vm1, %v9789_v38, -inf }
 0x518   :  { %v982_v34 = vpop.xlane.xlu1 %981  ;;  %v967_v41 = vpop.xlane.xlu0 %966  ;;  %1161 = vmax.xlane.f32.xlu1 %v1160_v5 }
 0x519   :  { %16196 = vst [vmem:[#allocation67_spill] sm:$0xff] %v9791_v7  ;;  %16197 = vst [vmem:[#allocation68_spill] sm:$0xff] %v9793_v50  ;;  %v983_v16 = vcvt.f32.s32 %v982_v34  ;;  %v968_v27 = vcvt.f32.s32 %v967_v41  ;;  %vm1126_vm3 = vcmp.eq.s32.totalorder %v8973_v11, %v9791_v7  ;;  %vm1125_vm4 = vcmp.eq.s32.totalorder %v8973_v11, %v9793_v50 }
 0x51a   :  { %v9807_v56 = vsel %vm1126_vm3, -1e+30, %v9371_v58  ;;  %v9810_v28 = vsel %vm1125_vm4, -1e+30, %v9374_v22 }
 0x51b   :  { %v9802_v44 = vadd.s32 %v985_v21, %v983_v16  ;;  %v9804_v29 = vadd.s32 %v970_v63, %v968_v27  ;;  %16200 = vst [vmem:[#allocation71_spill] sm:$0xff] %v9807_v56  ;;  %16201 = vst [vmem:[#allocation72_spill] sm:$0xff] %v9810_v28  ;;  %v1166_v0 = vsel %vm15971_vm1, %v9807_v56, -inf  ;;  %v1163_v31 = vsel %vm15971_vm1, %v9810_v28, -inf }
 0x51c   :  { %v997_v59 = vpop.xlane.xlu0 %996  ;;  %1167 = vmax.xlane.f32.xlu1 %v1166_v0  ;;  %1164 = vmax.xlane.f32.xlu0 %v1163_v31 }
 0x51d   :  { %16198 = vst [vmem:[#allocation69_spill] sm:$0xff] %v9802_v44  ;;  %16199 = vst [vmem:[#allocation70_spill] sm:$0xff] %v9804_v29  ;;  %v998_v52 = vcvt.f32.s32 %v997_v59  ;;  %vm1128_vm5 = vcmp.eq.s32.totalorder %v8973_v11, %v9802_v44  ;;  %vm1127_vm6 = vcmp.eq.s32.totalorder %v8973_v11, %v9804_v29 }
 0x51e   :  { %v9819_v58 = vsel %vm1128_vm5, -1e+30, %v9389_v57  ;;  %v9828_v8 = vsel %vm1127_vm6, -1e+30, %v9392_v3 }
 0x51f   :  { %16202 = vst [vmem:[#allocation73_spill] sm:$0xff] %v9819_v58  ;;  %v9823_v22 = vadd.s32 %v1000_v20, %v998_v52  ;;  %v1172_v37 = vsel %vm15971_vm1, %v9819_v58, -inf  ;;  %16204 = vst [vmem:[#allocation75_spill] sm:$0xff] %v9828_v8  ;;  %v1169_v36 = vsel %vm15971_vm1, %v9828_v8, -inf }
 0x520   :  { %1173 = vmax.xlane.f32.xlu1 %v1172_v37  ;;  %1170 = vmax.xlane.f32.xlu0 %v1169_v36 }
 0x521   :  { %16203 = vst [vmem:[#allocation74_spill] sm:$0xff] %v9823_v22  ;;  %vm1129_vm7 = vcmp.eq.s32.totalorder %v8973_v11, %v9823_v22 }
 0x522   :  { %v9835_v57 = vsel %vm1129_vm7, -1e+30, %v9403_v43 }
 0x523   :  { %16205 = vst [vmem:[#allocation76_spill] sm:$0xff] %v9835_v57  ;;  %v1175_v14 = vsel %vm15971_vm1, %v9835_v57, -inf }
 0x524   :  { %1176 = vmax.xlane.f32.xlu0 %v1175_v14 }
 0x591   :  { %v9839_v18 = vpop.xlane.xlu1 %1179  ;;  %v9841_v40 = vpop.xlane.xlu0 %1182 }
 0x592   :  { %16206 = vst [vmem:[#allocation77_spill] sm:$0xff] %v9839_v18  ;;  %16207 = vst [vmem:[#allocation78_spill] sm:$0xff] %v9841_v40  ;;  %vm1210_vm8 = vcmp.eq.f32.partialorder %v9698_v1, %v9839_v18  ;;  %vm1211_vm9 = vcmp.eq.f32.partialorder %v9701_v2, %v9841_v40 }
 0x593   :  { %v1226_v3 = vsel %vm1210_vm8, %v8973_v11, 16  ;;  %v1227_v60 = vsel %vm1211_vm9, %v8973_v11, 16 }
 0x594   :  { %v9850_v43 = vsel %vm15971_vm1, %v1226_v3, 2147483647  ;;  %v9853_v51 = vsel %vm15971_vm1, %v1227_v60, 2147483647 }
 0x595   :  { %v9855_v62 = vpop.xlane.xlu1 %1185  ;;  %v9857_v30 = vpop.xlane.xlu0 %1188  ;;  %v1356_v9 = vshra.s32 %v9850_v43, 16  ;;  %v1371_v10 = vshra.s32 %v9853_v51, 16 }
 0x596   :  { %16208 = vst [vmem:[#allocation79_spill] sm:$0xff] %v9855_v62  ;;  %16209 = vst [vmem:[#allocation80_spill] sm:$0xff] %v9857_v30  ;;  %vm1212_vm10 = vcmp.eq.f32.partialorder %v9718_v19, %v9855_v62  ;;  %vm1213_vm11 = vcmp.eq.f32.partialorder %v9721_v48, %v9857_v30 }
 0x597   :  { %v1228_v5 = vsel %vm1212_vm10, %v8973_v11, 16  ;;  %v1229_v21 = vsel %vm1213_vm11, %v8973_v11, 16  ;;  %v9867_v34 = vcvt.s32.f32 %v1356_v9  ;;  %v9869_v41 = vcvt.s32.f32 %v1371_v10 }
 0x598   :  { %v9872_v63 = vsel %vm15971_vm1, %v1228_v5, 2147483647  ;;  %v9875_v39 = vsel %vm15971_vm1, %v1229_v21, 2147483647 }
 0x599   :  { %1359 = vmin.xlane.f32.xlu1 %v9867_v34  ;;  %v9878_v16 = vpop.xlane.xlu1 %1191  ;;  %1374 = vmin.xlane.f32.xlu0 %v9869_v41  ;;  %v9881_v27 = vpop.xlane.xlu0 %1194  ;;  %v1386_v0 = vshra.s32 %v9872_v63, 16  ;;  %v1401_v31 = vshra.s32 %v9875_v39, 16  ;;  %v1385_v55 = vand.u32 65535, %v9872_v63 }
 0x59a   :  { %16210 = vst [vmem:[#allocation81_spill] sm:$0xff] %v9878_v16  ;;  %16211 = vst [vmem:[#allocation82_spill] sm:$0xff] %v9881_v27  ;;  %vm1214_vm12 = vcmp.eq.f32.partialorder %v9738_v47, %v9878_v16  ;;  %vm1215_vm13 = vcmp.eq.f32.partialorder %v9741_v15, %v9881_v27 }
 0x59b   :  { %v1230_v59 = vsel %vm1214_vm12, %v8973_v11, 16  ;;  %v1231_v20 = vsel %vm1215_vm13, %v8973_v11, 16  ;;  %v9891_v52 = vcvt.s32.f32 %v1386_v0  ;;  %v9893_v37 = vcvt.s32.f32 %v1401_v31 }
 0x59c   :  { %v9896_v36 = vsel %vm15971_vm1, %v1230_v59, 2147483647  ;;  %v9899_v14 = vsel %vm15971_vm1, %v1231_v20, 2147483647 }
 0x59d   :  { %1389 = vmin.xlane.f32.xlu1 %v9891_v52  ;;  %v9902_v3 = vpop.xlane.xlu1 %1197  ;;  %1404 = vmin.xlane.f32.xlu0 %v9893_v37  ;;  %v9905_v60 = vpop.xlane.xlu0 %1200  ;;  %v1416_v9 = vshra.s32 %v9896_v36, 16  ;;  %v1431_v10 = vshra.s32 %v9899_v14, 16  ;;  %v1415_v63 = vand.u32 65535, %v9896_v36 }
 0x59e   :  { %16212 = vst [vmem:[#allocation83_spill] sm:$0xff] %v9902_v3  ;;  %16213 = vst [vmem:[#allocation84_spill] sm:$0xff] %v9905_v60  ;;  %vm1216_vm14 = vcmp.eq.f32.partialorder %v9757_v13, %v9902_v3  ;;  %vm1217_vm15 = vcmp.eq.f32.partialorder %v9760_v4, %v9905_v60  ;;  %v1400_v4 = vand.u32 65535, %v9875_v39  ;;  %v1430_v39 = vand.u32 65535, %v9899_v14 }
 0x59f   :  { %v1232_v5 = vsel %vm1216_vm14, %v8973_v11, 16  ;;  %v1233_v21 = vsel %vm1217_vm15, %v8973_v11, 16  ;;  %v9915_v0 = vcvt.s32.f32 %v1416_v9  ;;  %v9917_v31 = vcvt.s32.f32 %v1431_v10 }
 0x5a0   :  { %v9920_v59 = vsel %vm15971_vm1, %v1232_v5, 2147483647  ;;  %v9923_v20 = vsel %vm15971_vm1, %v1233_v21, 2147483647 }
 0x5a1   :  { %1419 = vmin.xlane.f32.xlu1 %v9915_v0  ;;  %v9926_v3 = vpop.xlane.xlu1 %1155  ;;  %1434 = vmin.xlane.f32.xlu0 %v9917_v31  ;;  %v9929_v60 = vpop.xlane.xlu0 %1158  ;;  %v1446_v27 = vshra.s32 %v9920_v59, 16  ;;  %v1461_v9 = vshra.s32 %v9923_v20, 16  ;;  %v1445_v36 = vand.u32 65535, %v9920_v59  ;;  %v1460_v14 = vand.u32 65535, %v9923_v20 }
 0x5a2   :  { %16214 = vst [vmem:[#allocation85_spill] sm:$0xff] %v9926_v3  ;;  %16215 = vst [vmem:[#allocation86_spill] sm:$0xff] %v9929_v60  ;;  %vm1202_vm0 = vcmp.eq.f32.partialorder %v9771_v54, %v9926_v3  ;;  %vm1203_vm2 = vcmp.eq.f32.partialorder %v9780_v24, %v9929_v60 }
 0x5a3   :  { %v1218_v10 = vsel %vm1202_vm0, %v8973_v11, 16  ;;  %v1219_v5 = vsel %vm1203_vm2, %v8973_v11, 16  ;;  %v9939_v21 = vcvt.s32.f32 %v1446_v27  ;;  %v9941_v16 = vcvt.s32.f32 %v1461_v9 }
 0x5a4   :  { %v9944_v30 = vsel %vm15971_vm1, %v1218_v10, 2147483647  ;;  %v9947_v62 = vsel %vm15971_vm1, %v1219_v5, 2147483647 }
 0x5a5   :  { %1449 = vmin.xlane.f32.xlu1 %v9939_v21  ;;  %v9950_v3 = vpop.xlane.xlu1 %1161  ;;  %1464 = vmin.xlane.f32.xlu0 %v9941_v16  ;;  %v1236_v60 = vshra.s32 %v9944_v30, 16  ;;  %v1251_v40 = vshra.s32 %v9947_v62, 16  ;;  %v1235_v59 = vand.u32 65535, %v9944_v30  ;;  %v1250_v20 = vand.u32 65535, %v9947_v62 }
 0x5a6   :  { %16216 = vst [vmem:[#allocation87_spill] sm:$0xff] %v9950_v3  ;;  %vm1204_vm3 = vcmp.eq.f32.partialorder %v9789_v38, %v9950_v3 }
 0x5a7   :  { %v1220_v27 = vsel %vm1204_vm3, %v8973_v11, 16  ;;  %v9958_v9 = vcvt.s32.f32 %v1236_v60  ;;  %v9960_v10 = vcvt.s32.f32 %v1251_v40 }
 0x5a8   :  { %v9963_v5 = vsel %vm15971_vm1, %v1220_v27, 2147483647 }
 0x5a9   :  { %1239 = vmin.xlane.f32.xlu1 %v9958_v9  ;;  %v9966_v18 = vpop.xlane.xlu1 %1167  ;;  %1254 = vmin.xlane.f32.xlu0 %v9960_v10  ;;  %v9969_v22 = vpop.xlane.xlu0 %1164  ;;  %v1266_v29 = vshra.s32 %v9963_v5, 16  ;;  %v1265_v30 = vand.u32 65535, %v9963_v5 }
 0x5aa   :  { %16217 = vst [vmem:[#allocation88_spill] sm:$0xff] %v9966_v18  ;;  %16218 = vst [vmem:[#allocation89_spill] sm:$0xff] %v9969_v22  ;;  %vm1206_vm4 = vcmp.eq.f32.partialorder %v9807_v56, %v9966_v18  ;;  %vm1205_vm5 = vcmp.eq.f32.partialorder %v9810_v28, %v9969_v22 }
 0x5ab   :  { %v1222_v40 = vsel %vm1206_vm4, %v8973_v11, 16  ;;  %v1221_v60 = vsel %vm1205_vm5, %v8973_v11, 16  ;;  %v9978_v27 = vcvt.s32.f32 %v1266_v29 }
 0x5ac   :  { %v9981_v3 = vsel %vm15971_vm1, %v1222_v40, 2147483647  ;;  %v9984_v44 = vsel %vm15971_vm1, %v1221_v60, 2147483647 }
 0x5ad   :  { %1269 = vmin.xlane.f32.xlu1 %v9978_v27  ;;  %v9987_v50 = vpop.xlane.xlu1 %1173  ;;  %v9989_v18 = vpop.xlane.xlu0 %1170  ;;  %v1296_v22 = vshra.s32 %v9981_v3, 16  ;;  %v1281_v28 = vshra.s32 %v9984_v44, 16 }
 0x5ae   :  { %16219 = vst [vmem:[#allocation90_spill] sm:$0xff] %v9987_v50  ;;  %16220 = vst [vmem:[#allocation91_spill] sm:$0xff] %v9989_v18  ;;  %vm1208_vm6 = vcmp.eq.f32.partialorder %v9819_v58, %v9987_v50  ;;  %vm1207_vm7 = vcmp.eq.f32.partialorder %v9828_v8, %v9989_v18 }
 0x5af   :  { %v1224_v29 = vsel %vm1208_vm6, %v8973_v11, 16  ;;  %v1223_v40 = vsel %vm1207_vm7, %v8973_v11, 16  ;;  %v9999_v60 = vcvt.s32.f32 %v1296_v22  ;;  %v10001_v56 = vcvt.s32.f32 %v1281_v28 }
 0x5b0   :  { %v10004_v7 = vsel %vm15971_vm1, %v1224_v29, 2147483647  ;;  %v10007_v38 = vsel %vm15971_vm1, %v1223_v40, 2147483647 }
 0x5b1   :  { %1299 = vmin.xlane.f32.xlu1 %v9999_v60  ;;  %1284 = vmin.xlane.f32.xlu0 %v10001_v56  ;;  %v10011_v50 = vpop.xlane.xlu0 %1176  ;;  %v1326_v18 = vshra.s32 %v10004_v7, 16  ;;  %v1311_v8 = vshra.s32 %v10007_v38, 16 }
 0x5b2   :  { %16221 = vst [vmem:[#allocation92_spill] sm:$0xff] %v10011_v50  ;;  %vm1209_vm8 = vcmp.eq.f32.partialorder %v9835_v57, %v10011_v50  ;;  %v1355_v50 = vand.u32 65535, %v9850_v43 }
 0x5b3   :  { %v1225_v28 = vsel %vm1209_vm8, %v8973_v11, 16  ;;  %v10018_v22 = vcvt.s32.f32 %v1326_v18  ;;  %v10020_v29 = vcvt.s32.f32 %v1311_v8  ;;  %v1370_v18 = vand.u32 65535, %v9853_v51 }
 0x5b4   :  { %v10023_v40 = vsel %vm15971_vm1, %v1225_v28, 2147483647  ;;  %v1357_v28 = vcvt.s32.f32 %v1355_v50  ;;  %v1387_v50 = vcvt.s32.f32 %v1385_v55  ;;  %v1417_v55 = vcvt.s32.f32 %v1415_v63 }
 0x5b5   :  { %1329 = vmin.xlane.f32.xlu1 %v10018_v22  ;;  %1314 = vmin.xlane.f32.xlu0 %v10020_v29  ;;  %v1341_v58 = vshra.s32 %v10023_v40, 16  ;;  %v1372_v54 = vcvt.s32.f32 %v1370_v18  ;;  %v1402_v18 = vcvt.s32.f32 %v1400_v4  ;;  %v1432_v4 = vcvt.s32.f32 %v1430_v39 }
 0x5b7   :  { %v10028_v24 = vcvt.s32.f32 %v1341_v58 }
 0x5b9   :  { %1344 = vmin.xlane.f32.xlu0 %v10028_v24 }
 0x626   :  { %v10033_v57 = vpop.xlane.xlu1 %1359  ;;  %v10035_v8 = vpop.xlane.xlu0 %1374 }
 0x627   :  { %vm1361_vm9 = vcmp.eq.f32.partialorder %v9867_v34, %v10033_v57  ;;  %vm1376_vm10 = vcmp.eq.f32.partialorder %v9869_v41, %v10035_v8 }
 0x628   :  { %v1362_v58 = vsel %vm1361_vm9, %v1357_v28, inf  ;;  %v1377_v43 = vsel %vm1376_vm10, %v1372_v54, inf  ;;  %vm15975_vm10 = vcmask 7168  }
 0x629   :  { %1363 = vmin.xlane.f32.xlu1 %v1362_v58  ;;  %1378 = vmin.xlane.f32.xlu0 %v1377_v43 }
 0x62a   :  { %v10043_v51 = vpop.xlane.xlu1 %1389  ;;  %v10045_v13 = vpop.xlane.xlu0 %1404 }
 0x62b   :  { %vm1391_vm11 = vcmp.eq.f32.partialorder %v9891_v52, %v10043_v51  ;;  %vm1406_vm12 = vcmp.eq.f32.partialorder %v9893_v37, %v10045_v13 }
 0x62c   :  { %v1392_v34 = vsel %vm1391_vm11, %v1387_v50, inf  ;;  %v1407_v54 = vsel %vm1406_vm12, %v1402_v18, inf  ;;  %v1447_v50 = vcvt.s32.f32 %v1445_v36  ;;  %v1462_v18 = vcvt.s32.f32 %v1460_v14 }
 0x62d   :  { %1393 = vmin.xlane.f32.xlu1 %v1392_v34  ;;  %1408 = vmin.xlane.f32.xlu0 %v1407_v54  ;;  %v1237_v34 = vcvt.s32.f32 %v1235_v59  ;;  %v1252_v54 = vcvt.s32.f32 %v1250_v20  ;;  %v1280_v36 = vand.u32 65535, %v9984_v44  ;;  %vm15974_vm11 = vcmask 15360  }
 0x62e   :  { %v10053_v41 = vpop.xlane.xlu1 %1419  ;;  %v10055_v28 = vpop.xlane.xlu0 %1434 }
 0x62f   :  { %vm1421_vm13 = vcmp.eq.f32.partialorder %v9915_v0, %v10053_v41  ;;  %vm1436_vm14 = vcmp.eq.f32.partialorder %v9917_v31, %v10055_v28 }
 0x630   :  { %v1422_v52 = vsel %vm1421_vm13, %v1417_v55, inf  ;;  %v1437_v37 = vsel %vm1436_vm14, %v1432_v4, inf  ;;  %v1267_v55 = vcvt.s32.f32 %v1265_v30  ;;  %v1295_v4 = vand.u32 65535, %v9981_v3 }
 0x631   :  { %1423 = vmin.xlane.f32.xlu1 %v1422_v52  ;;  %1438 = vmin.xlane.f32.xlu0 %v1437_v37  ;;  %v1282_v52 = vcvt.s32.f32 %v1280_v36  ;;  %v1325_v37 = vand.u32 65535, %v10004_v7  ;;  %v1340_v7 = vand.u32 65535, %v10023_v40  ;;  %v1366_v40 = vcvt.f32.s32 %v10033_v57 }
 0x632   :  { %v10063_v58 = vpop.xlane.xlu1 %1449  ;;  %v10065_v43 = vpop.xlane.xlu0 %1464 }
 0x633   :  { %vm1451_vm15 = vcmp.eq.f32.partialorder %v9939_v21, %v10063_v58  ;;  %vm1466_vm0 = vcmp.eq.f32.partialorder %v9941_v16, %v10065_v43  ;;  %v1327_v59 = vcvt.s32.f32 %v1325_v37 }
 0x634   :  { %v1452_v0 = vsel %vm1451_vm15, %v1447_v50, inf  ;;  %v1467_v31 = vsel %vm1466_vm0, %v1462_v18, inf  ;;  %v1310_v50 = vand.u32 65535, %v10007_v38 }
 0x635   :  { %1453 = vmin.xlane.f32.xlu1 %v1452_v0  ;;  %1468 = vmin.xlane.f32.xlu0 %v1467_v31  ;;  %v1342_v0 = vcvt.s32.f32 %v1340_v7  ;;  %v1471_v7 = vcvt.f32.s32 %v10065_v43 }
 0x636   :  { %v10073_v63 = vpop.xlane.xlu1 %1239  ;;  %v10075_v39 = vpop.xlane.xlu0 %1254  ;;  %v1312_v20 = vcvt.s32.f32 %v1310_v50 }
 0x637   :  { %vm1241_vm2 = vcmp.eq.f32.partialorder %v9958_v9, %v10073_v63  ;;  %vm1256_vm3 = vcmp.eq.f32.partialorder %v9960_v10, %v10075_v39  ;;  %v1297_v10 = vcvt.s32.f32 %v1295_v4  ;;  %v1887_v4 = vsel %vm15975_vm10, %v9267_v61, %v9693_v17 }
 0x638   :  { %v1242_v62 = vsel %vm1241_vm2, %v1237_v34, inf  ;;  %v1257_v16 = vsel %vm1256_vm3, %v1252_v54, inf  ;;  %v1381_v34 = vcvt.f32.s32 %v10035_v8  ;;  %v1396_v54 = vcvt.f32.s32 %v10043_v51  ;;  %v16223_v51 = vld [vmem:[#allocation35_spill] sm:$0xff] }
 0x639   :  { %1243 = vmin.xlane.f32.xlu1 %v1242_v62  ;;  %1258 = vmin.xlane.f32.xlu0 %v1257_v16  ;;  %v1367_v16 = vshll.u32 %v1366_v40, 16  ;;  %v10137_v36 = vsel %vm15975_vm10, %v16223_v51, %v9733_v25  ;;  %v1246_v43 = vcvt.f32.s32 %v10073_v63 }
 0x63a   :  { %v10082_v21 = vpop.xlane.xlu1 %1269  ;;  %v1382_v57 = vshll.u32 %v1381_v34, 16 }
 0x63b   :  { %vm1271_vm4 = vcmp.eq.f32.partialorder %v9978_v27, %v10082_v21 }
 0x63c   :  { %v1272_v5 = vsel %vm1271_vm4, %v1267_v55, inf }
 0x63d   :  { %1273 = vmin.xlane.f32.xlu1 %v1272_v5  ;;  %v16224_v5 = vld [vmem:[#allocation36_spill] sm:$0xff] }
 0x63e   :  { %v10088_v9 = vpop.xlane.xlu1 %1299  ;;  %v10090_v14 = vpop.xlane.xlu0 %1284 }
 0x63f   :  { %vm1301_vm5 = vcmp.eq.f32.partialorder %v9999_v60, %v10088_v9  ;;  %vm1286_vm6 = vcmp.eq.f32.partialorder %v10001_v56, %v10090_v14 }
 0x640   :  { %v1302_v44 = vsel %vm1301_vm5, %v1297_v10, inf  ;;  %v1287_v3 = vsel %vm1286_vm6, %v1282_v52, inf }
 0x641   :  { %1303 = vmin.xlane.f32.xlu1 %v1302_v44  ;;  %1288 = vmin.xlane.f32.xlu0 %v1287_v3  ;;  %v1456_v44 = vcvt.f32.s32 %v10063_v58 }
 0x642   :  { %v10098_v27 = vpop.xlane.xlu1 %1329  ;;  %v10100_v18 = vpop.xlane.xlu0 %1314 }
 0x643   :  { %vm1331_vm7 = vcmp.eq.f32.partialorder %v10018_v22, %v10098_v27  ;;  %vm1316_vm8 = vcmp.eq.f32.partialorder %v10020_v29, %v10100_v18  ;;  %v1885_v22 = vsel %vm15975_vm10, %v9251_v42, %v9683_v53  ;;  %v1886_v29 = vsel %vm15975_vm10, %v9253_v46, %v9685_v6  ;;  %v16222_v6 = vld [vmem:[#allocation34_spill] sm:$0xff] }
 0x644   :  { %v1332_v38 = vsel %vm1331_vm7, %v1327_v59, inf  ;;  %v1317_v56 = vsel %vm1316_vm8, %v1312_v20, inf  ;;  %v1888_v42 = vsel %vm15975_vm10, %v9269_v45, %v9695_v12  ;;  %v1889_v46 = vsel %vm15975_vm10, %v9287_v23, %v9713_v49 }
 0x645   :  { %1333 = vmin.xlane.f32.xlu1 %v1332_v38  ;;  %1318 = vmin.xlane.f32.xlu0 %v1317_v56  ;;  %v1426_v53 = vcvt.f32.s32 %v10053_v41  ;;  %v10142_v45 = vsel %vm15975_vm10, %v16224_v5, %v9735_v26  ;;  %v1397_v12 = vshll.u32 %v1396_v54, 16  ;;  %v1441_v49 = vcvt.f32.s32 %v10055_v28 }
 0x646   :  { %v10107_v60 = vpop.xlane.xlu0 %1344  ;;  %v1457_v34 = vshll.u32 %v1456_v44, 16 }
 0x647   :  { %vm1346_vm9 = vcmp.eq.f32.partialorder %v10028_v24, %v10107_v60  ;;  %v1411_v24 = vcvt.f32.s32 %v10045_v13  ;;  %v1890_v13 = vsel %vm15975_vm10, %v16222_v6, %v9715_v32  ;;  %v1427_v50 = vshll.u32 %v1426_v53, 16 }
 0x648   :  { %v1347_v31 = vsel %vm1346_vm9, %v1342_v0, inf  ;;  %v1442_v20 = vshll.u32 %v1441_v49, 16  ;;  %v1247_v53 = vshll.u32 %v1246_v43, 16 }
 0x649   :  { %1348 = vmin.xlane.f32.xlu0 %v1347_v31  ;;  %v1412_v23 = vshll.u32 %v1411_v24, 16 }
 0x6b6   :  { %v1364_v30 = vpop.xlane.xlu1 %1363  ;;  %v1379_v62 = vpop.xlane.xlu0 %1378 }
 0x6b7   :  { %v1365_v55 = vcvt.f32.s32 %v1364_v30  ;;  %v1380_v8 = vcvt.f32.s32 %v1379_v62  ;;  %v1472_v30 = vshll.u32 %v1471_v7, 16  ;;  %v1261_v62 = vcvt.f32.s32 %v10075_v39  ;;  %v16231_v39 = vld [vmem:[#allocation37_spill] sm:$0xff] }
 0x6b9   :  { %v1368_v61 = vadd.s32 %v1367_v16, %v1365_v55  ;;  %v1383_v17 = vadd.s32 %v1382_v57, %v1380_v8 }
 0x6ba   :  { %v1394_v41 = vpop.xlane.xlu1 %1393  ;;  %v1409_v10 = vpop.xlane.xlu0 %1408 }
 0x6bb   :  { %v10146_v32 = vsel %vm15974_vm11, %v1885_v22, %v1368_v61  ;;  %v10149_v52 = vsel %vm15974_vm11, %v1886_v29, %v1383_v17  ;;  %v1395_v25 = vcvt.f32.s32 %v1394_v41  ;;  %v1410_v37 = vcvt.f32.s32 %v1409_v10  ;;  %v16234_v41 = vld [vmem:[#allocation38_spill] sm:$0xff] }
 0x6bc   :  { %16225 = vst [vmem:[#allocation34_spill] sm:$0xff] %v10146_v32  ;;  %16226 = vst [vmem:[#allocation35_spill] sm:$0xff] %v10149_v52  ;;  %vm1482_vm12 = vcmp.eq.s32.totalorder %v8973_v11, %v1368_v61  ;;  %vm1483_vm13 = vcmp.eq.s32.totalorder %v8973_v11, %v1383_v17  ;;  %v1262_v61 = vshll.u32 %v1261_v62, 16  ;;  %v1276_v17 = vcvt.f32.s32 %v10082_v21 }
 0x6bd   :  { %v1398_v26 = vadd.s32 %v1397_v12, %v1395_v25  ;;  %v1413_v3 = vadd.s32 %v1412_v23, %v1410_v37  ;;  %v10155_v28 = vsel %vm1482_vm12, -1e+30, %v9698_v1  ;;  %v10158_v59 = vsel %vm1483_vm13, -1e+30, %v9701_v2 }
 0x6be   :  { %v1530_v38 = vsel %vm15971_vm1, %v10155_v28, -inf  ;;  %v1424_v56 = vpop.xlane.xlu1 %1423  ;;  %v1533_v58 = vsel %vm15971_vm1, %v10158_v59, -inf  ;;  %v1439_v0 = vpop.xlane.xlu0 %1438  ;;  %v1878_v10 = vsel %vm15975_vm10, %v16234_v41, %v9754_v35  ;;  %v1306_v25 = vcvt.f32.s32 %v10088_v9 }
 0x6bf   :  { %v10166_v31 = vsel %vm15974_vm11, %v1887_v4, %v1398_v26  ;;  %v10169_v1 = vsel %vm15974_vm11, %v1888_v42, %v1413_v3  ;;  %1531 = vmax.xlane.f32.xlu1 %v1530_v38  ;;  %v1425_v2 = vcvt.f32.s32 %v1424_v56  ;;  %1534 = vmax.xlane.f32.xlu0 %v1533_v58  ;;  %v1440_v40 = vcvt.f32.s32 %v1439_v0  ;;  %v16239_v0 = vld [vmem:[#allocation64_spill] sm:$0xff] }
 0x6c0   :  { %16227 = vst [vmem:[#allocation36_spill] sm:$0xff] %v10166_v31  ;;  %16228 = vst [vmem:[#allocation93_spill] sm:$0xff] %v10169_v1  ;;  %vm1484_vm14 = vcmp.eq.s32.totalorder %v8973_v11, %v1398_v26  ;;  %vm1485_vm15 = vcmp.eq.s32.totalorder %v8973_v11, %v1413_v3  ;;  %v1877_v42 = vsel %vm15975_vm10, %v16231_v39, %v9752_v33  ;;  %v1277_v3 = vshll.u32 %v1276_v17, 16 }
 0x6c1   :  { %v1428_v22 = vadd.s32 %v1427_v50, %v1425_v2  ;;  %v1443_v29 = vadd.s32 %v1442_v20, %v1440_v40  ;;  %v10175_v54 = vsel %vm1484_vm14, -1e+30, %v9718_v19  ;;  %v10178_v24 = vsel %vm1485_vm15, -1e+30, %v9721_v48  ;;  %v16235_v50 = vld [vmem:[#allocation61_spill] sm:$0xff]  ;;  %v16241_v40 = vld [vmem:[#allocation63_spill] sm:$0xff] }
 0x6c2   :  { %v1536_v16 = vsel %vm15971_vm1, %v10175_v54, -inf  ;;  %v1454_v57 = vpop.xlane.xlu1 %1453  ;;  %v1539_v63 = vsel %vm15971_vm1, %v10178_v24, -inf  ;;  %v1469_v55 = vpop.xlane.xlu0 %1468  ;;  %v1291_v20 = vcvt.f32.s32 %v10090_v14  ;;  %v16240_v14 = vld [vmem:[#allocation39_spill] sm:$0xff]  ;;  %v1307_v43 = vshll.u32 %v1306_v25, 16 }
 0x6c3   :  { %v10186_v8 = vsel %vm15974_vm11, %v1889_v46, %v1428_v22  ;;  %v10189_v19 = vsel %vm15974_vm11, %v1890_v13, %v1443_v29  ;;  %1537 = vmax.xlane.f32.xlu1 %v1536_v16  ;;  %v1455_v48 = vcvt.f32.s32 %v1454_v57  ;;  %1540 = vmax.xlane.f32.xlu0 %v1539_v63  ;;  %v1470_v4 = vcvt.f32.s32 %v1469_v55 }
 0x6c4   :  { %16229 = vst [vmem:[#allocation94_spill] sm:$0xff] %v10186_v8  ;;  %16230 = vst [vmem:[#allocation95_spill] sm:$0xff] %v10189_v19  ;;  %vm1486_vm0 = vcmp.eq.s32.totalorder %v8973_v11, %v1428_v22  ;;  %vm1487_vm2 = vcmp.eq.s32.totalorder %v8973_v11, %v1443_v29  ;;  %v1879_v2 = vsel %vm15975_vm10, %v16240_v14, %v16239_v0  ;;  %v1292_v16 = vshll.u32 %v1291_v20, 16  ;;  %v16251_v20 = vld [vmem:[#allocation69_spill] sm:$0xff]  ;;  %v16254_v14 = vld [vmem:[#allocation72_spill] sm:$0xff] }
 0x6c5   :  { %v1458_v6 = vadd.s32 %v1457_v34, %v1455_v48  ;;  %v1473_v51 = vadd.s32 %v1472_v30, %v1470_v4  ;;  %v10197_v46 = vsel %vm1486_vm0, -1e+30, %v9738_v47  ;;  %v10200_v13 = vsel %vm1487_vm2, -1e+30, %v9741_v15  ;;  %v16242_v30 = vld [vmem:[#allocation65_spill] sm:$0xff]  ;;  %v16317_v8 = vld [vmem:[#allocation91_spill] sm:$0xff] }
 0x6c6   :  { %v1542_v5 = vsel %vm15971_vm1, %v10197_v46, -inf  ;;  %v1244_v33 = vpop.xlane.xlu1 %1243  ;;  %v1545_v12 = vsel %vm15971_vm1, %v10200_v13, -inf  ;;  %v1259_v23 = vpop.xlane.xlu0 %1258  ;;  %v1336_v57 = vcvt.f32.s32 %v10098_v27  ;;  %v1321_v63 = vcvt.f32.s32 %v10100_v18  ;;  %v16245_v27 = vld [vmem:[#allocation67_spill] sm:$0xff] }
 0x6c7   :  { %v10209_v49 = vsel %vm15974_vm11, %v10137_v36, %v1458_v6  ;;  %v10213_v47 = vsel %vm15974_vm11, %v10142_v45, %v1473_v51  ;;  %1543 = vmax.xlane.f32.xlu1 %v1542_v5  ;;  %v1245_v15 = vcvt.f32.s32 %v1244_v33  ;;  %1546 = vmax.xlane.f32.xlu0 %v1545_v12  ;;  %v1260_v21 = vcvt.f32.s32 %v1259_v23  ;;  %v16236_v45 = vld [vmem:[#allocation62_spill] sm:$0xff]  ;;  %v16247_v12 = vld [vmem:[#allocation68_spill] sm:$0xff]  ;;  %v16248_v23 = vld [vmem:[#allocation41_spill] sm:$0xff] }
 0x6c8   :  { %16232 = vst [vmem:[#allocation37_spill] sm:$0xff] %v10209_v49  ;;  %16233 = vst [vmem:[#allocation96_spill] sm:$0xff] %v10213_v47  ;;  %vm1488_vm3 = vcmp.eq.s32.totalorder %v8973_v11, %v1458_v6  ;;  %vm1489_vm4 = vcmp.eq.s32.totalorder %v8973_v11, %v1473_v51  ;;  %v16244_v6 = vld [vmem:[#allocation66_spill] sm:$0xff]  ;;  %v1322_v41 = vshll.u32 %v1321_v63, 16  ;;  %vm15972_vm15 = vcmask 23552   ;;  %v16316_v49 = vld [vmem:[#allocation32_spill] sm:$0xff] }
 0x6c9   :  { %v1248_v36 = vadd.s32 %v1247_v53, %v1245_v15  ;;  %v1263_v37 = vadd.s32 %v1262_v61, %v1260_v21  ;;  %v10222_v44 = vsel %vm1488_vm3, -1e+30, %v16235_v50  ;;  %v10225_v26 = vsel %vm1489_vm4, -1e+30, %v16236_v45  ;;  %v16246_v61 = vld [vmem:[#allocation40_spill] sm:$0xff] }
 0x6ca   :  { %v1548_v35 = vsel %vm15971_vm1, %v10222_v44, -inf  ;;  %v1274_v7 = vpop.xlane.xlu1 %1273  ;;  %v1551_v9 = vsel %vm15971_vm1, %v10225_v26, -inf  ;;  %v1881_v18 = vsel %vm15975_vm10, %v16246_v61, %v16245_v27  ;;  %v1880_v15 = vsel %vm15975_vm10, %v16248_v23, %v16247_v12  ;;  %v16261_v27 = vld [vmem:[#allocation75_spill] sm:$0xff]  ;;  %v16266_v23 = vld [vmem:[#allocation76_spill] sm:$0xff] }
 0x6cb   :  { %v10233_v38 = vsel %vm15974_vm11, %v1877_v42, %v1248_v36  ;;  %v10236_v56 = vsel %vm15974_vm11, %v1878_v10, %v1263_v37  ;;  %1549 = vmax.xlane.f32.xlu1 %v1548_v35  ;;  %v1275_v58 = vcvt.f32.s32 %v1274_v7  ;;  %1552 = vmax.xlane.f32.xlu0 %v1551_v9  ;;  %vm1474_vm5 = vcmp.eq.s32.totalorder %v8973_v11, %v1248_v36  ;;  %v16252_v35 = vld [vmem:[#allocation42_spill] sm:$0xff] }
 0x6cc   :  { %16237 = vst [vmem:[#allocation38_spill] sm:$0xff] %v10233_v38  ;;  %16238 = vst [vmem:[#allocation61_spill] sm:$0xff] %v10236_v56  ;;  %v10243_v34 = vsel %vm1474_vm5, -1e+30, %v16241_v40  ;;  %vm1475_vm6 = vcmp.eq.s32.totalorder %v8973_v11, %v1263_v37  ;;  %v1337_v21 = vshll.u32 %v1336_v57, 16  ;;  %v1351_v10 = vcvt.f32.s32 %v10107_v60  ;;  %v16255_v40 = vld [vmem:[#allocation70_spill] sm:$0xff] }
 0x6cd   :  { %v1278_v22 = vadd.s32 %v1277_v3, %v1275_v58  ;;  %v1506_v29 = vsel %vm15971_vm1, %v10243_v34, -inf  ;;  %v10249_v62 = vsel %vm1475_vm6, -1e+30, %v16242_v30  ;;  %v1883_v7 = vsel %vm15975_vm10, %v16252_v35, %v16251_v20  ;;  %v16253_v58 = vld [vmem:[#allocation71_spill] sm:$0xff]  ;;  %v16272_v20 = vld [vmem:[#allocation77_spill] sm:$0xff]  ;;  %v16312_v38 = vld [vmem:[#allocation88_spill] sm:$0xff] }
 0x6ce   :  { %v1304_v55 = vpop.xlane.xlu1 %1303  ;;  %v1509_v48 = vsel %vm15971_vm1, %v10249_v62, -inf  ;;  %v1289_v4 = vpop.xlane.xlu0 %1288 }
 0x6cf   :  { %v10256_v39 = vsel %vm15974_vm11, %v1879_v2, %v1278_v22  ;;  %1507 = vmax.xlane.f32.xlu1 %v1506_v29  ;;  %v1305_v42 = vcvt.f32.s32 %v1304_v55  ;;  %1510 = vmax.xlane.f32.xlu0 %v1509_v48  ;;  %v1290_v53 = vcvt.f32.s32 %v1289_v4  ;;  %vm1476_vm7 = vcmp.eq.s32.totalorder %v8973_v11, %v1278_v22  ;;  %v16259_v4 = vld [vmem:[#allocation73_spill] sm:$0xff] }
 0x6d0   :  { %16243 = vst [vmem:[#allocation62_spill] sm:$0xff] %v10256_v39  ;;  %v10260_v51 = vsel %vm1476_vm7, -1e+30, %v16244_v6  ;;  %v1352_v29 = vshll.u32 %v1351_v10, 16  ;;  %v16308_v39 = vld [vmem:[#allocation89_spill] sm:$0xff] }
 0x6d1   :  { %v1308_v17 = vadd.s32 %v1307_v43, %v1305_v42  ;;  %v1293_v5 = vadd.s32 %v1292_v16, %v1290_v53  ;;  %v1512_v33 = vsel %vm15971_vm1, %v10260_v51, -inf  ;;  %v16256_v43 = vld [vmem:[#allocation43_spill] sm:$0xff] }
 0x6d2   :  { %v1334_v25 = vpop.xlane.xlu1 %1333  ;;  %v1319_v36 = vpop.xlane.xlu0 %1318  ;;  %v1882_v22 = vsel %vm15975_vm10, %v16256_v43, %v16255_v40 }
 0x6d3   :  { %v10272_v37 = vsel %vm15974_vm11, %v1881_v18, %v1308_v17  ;;  %v10275_v50 = vsel %vm15974_vm11, %v1880_v15, %v1293_v5  ;;  %1513 = vmax.xlane.f32.xlu1 %v1512_v33  ;;  %v1335_v45 = vcvt.f32.s32 %v1334_v25  ;;  %v1320_v3 = vcvt.f32.s32 %v1319_v36  ;;  %v16263_v18 = vld [vmem:[#allocation74_spill] sm:$0xff]  ;;  %v16269_v25 = vld [vmem:[#allocation45_spill] sm:$0xff] }
 0x6d4   :  { %16249 = vst [vmem:[#allocation64_spill] sm:$0xff] %v10272_v37  ;;  %16250 = vst [vmem:[#allocation39_spill] sm:$0xff] %v10275_v50  ;;  %vm1478_vm8 = vcmp.eq.s32.totalorder %v8973_v11, %v1308_v17  ;;  %vm1477_vm9 = vcmp.eq.s32.totalorder %v8973_v11, %v1293_v5  ;;  %v16264_v17 = vld [vmem:[#allocation44_spill] sm:$0xff]  ;;  %v16270_v36 = vld [vmem:[#allocation18_spill] sm:$0xff] }
 0x6d5   :  { %v1338_v60 = vadd.s32 %v1337_v21, %v1335_v45  ;;  %v1323_v9 = vadd.s32 %v1322_v41, %v1320_v3  ;;  %v10283_v0 = vsel %vm1478_vm8, -1e+30, %v16253_v58  ;;  %v10286_v2 = vsel %vm1477_vm9, -1e+30, %v16254_v14  ;;  %v16268_v41 = vld [vmem:[#allocation14_spill] sm:$0xff]  ;;  %v16305_v37 = vld [vmem:[#allocation87_spill] sm:$0xff] }
 0x6d6   :  { %v1518_v30 = vsel %vm15971_vm1, %v10283_v0, -inf  ;;  %v1515_v16 = vsel %vm15971_vm1, %v10286_v2, -inf  ;;  %v1349_v57 = vpop.xlane.xlu0 %1348  ;;  %v1884_v5 = vsel %vm15975_vm10, %v16264_v17, %v16263_v18  ;;  %v10326_v10 = vsub.s32 0, %v16268_v41  ;;  %v16278_v17 = vld [vmem:[#allocation47_spill] sm:$0xff] }
 0x6d7   :  { %v10296_v63 = vsel %vm15974_vm11, %v1883_v7, %v1338_v60  ;;  %v10299_v55 = vsel %vm15974_vm11, %v1882_v22, %v1323_v9  ;;  %1519 = vmax.xlane.f32.xlu1 %v1518_v30  ;;  %1516 = vmax.xlane.f32.xlu0 %v1515_v16  ;;  %v1350_v48 = vcvt.f32.s32 %v1349_v57  ;;  %vm1480_vm12 = vcmp.eq.s32.totalorder %v8973_v11, %v1338_v60  ;;  %v16275_v22 = vld [vmem:[#allocation46_spill] sm:$0xff] }
 0x6d8   :  { %16257 = vst [vmem:[#allocation63_spill] sm:$0xff] %v10296_v63  ;;  %16258 = vst [vmem:[#allocation65_spill] sm:$0xff] %v10299_v55  ;;  %v10303_v42 = vsel %vm1480_vm12, -1e+30, %v16259_v4  ;;  %vm1479_vm13 = vcmp.eq.s32.totalorder %v8973_v11, %v1323_v9  ;;  %v1835_v45 = vsel %vm15975_vm10, %v16270_v36, %v16269_v25  ;;  %v10332_v3 = vsub.s32 1, %v16268_v41  ;;  %v16277_v16 = vld [vmem:[#allocation78_spill] sm:$0xff] }
 0x6d9   :  { %16260 = vst [vmem:[#allocation66_spill] sm:$0xff] %v10303_v42  ;;  %v1353_v53 = vadd.s32 %v1352_v29, %v1350_v48  ;;  %v1524_v6 = vsel %vm15971_vm1, %v10303_v42, -inf  ;;  %v10309_v61 = vsel %vm1479_vm13, -1e+30, %v16261_v27  ;;  %v1852_v35 = vsel %vm15974_vm11, %v1835_v45, %v16272_v20  ;;  %v16276_v29 = vld [vmem:[#allocation19_spill] sm:$0xff] }
 0x6da   :  { %16262 = vst [vmem:[#allocation67_spill] sm:$0xff] %v10309_v61  ;;  %v1521_v33 = vsel %vm15971_vm1, %v10309_v61, -inf  ;;  %16271 = vst [vmem:[#allocation41_spill] sm:$0xff] %v10332_v3  ;;  %v10347_v14 = vsub.s32 3, %v16268_v41  ;;  %v10350_v40 = vsub.s32 2, %v16268_v41  ;;  %v1836_v30 = vsel %vm15975_vm10, %v16276_v29, %v16275_v22  ;;  %v16282_v22 = vld [vmem:[#allocation21_spill] sm:$0xff] }
 0x6db   :  { %v10317_v12 = vsel %vm15974_vm11, %v1884_v5, %v1353_v53  ;;  %1525 = vmax.xlane.f32.xlu1 %v1524_v6  ;;  %1522 = vmax.xlane.f32.xlu0 %v1521_v33  ;;  %vm1481_vm14 = vcmp.eq.s32.totalorder %v8973_v11, %v1353_v53  ;;  %v1853_v57 = vsel %vm15974_vm11, %v1836_v30, %v16277_v16  ;;  %v16279_v5 = vld [vmem:[#allocation20_spill] sm:$0xff] }
 0x6dc   :  { %16265 = vst [vmem:[#allocation40_spill] sm:$0xff] %v10317_v12  ;;  %v10321_v15 = vsel %vm1481_vm14, -1e+30, %v16266_v23  ;;  %16273 = vst [vmem:[#allocation69_spill] sm:$0xff] %v10347_v14  ;;  %v1837_v33 = vsel %vm15975_vm10, %v16279_v5, %v16278_v17  ;;  %v16280_v23 = vld [vmem:[#allocation79_spill] sm:$0xff]  ;;  %v16283_v30 = vld [vmem:[#allocation80_spill] sm:$0xff] }
 0x6dd   :  { %16267 = vst [vmem:[#allocation68_spill] sm:$0xff] %v10321_v15  ;;  %v1527_v21 = vsel %vm15971_vm1, %v10321_v15, -inf  ;;  %16274 = vst [vmem:[#allocation42_spill] sm:$0xff] %v10350_v40  ;;  %v16284_v5 = vld [vmem:[#allocation49_spill] sm:$0xff] }
 0x6df   :  { %1528 = vmax.xlane.f32.xlu0 %v1527_v21  ;;  %v1854_v21 = vsel %vm15974_vm11, %v1837_v33, %v16280_v23  ;;  %v16285_v33 = vld [vmem:[#allocation22_spill] sm:$0xff] }
 0x6e0   :  { %v1839_v23 = vsel %vm15975_vm10, %v16285_v33, %v16284_v5 }
 0x74c   :  { %v10336_v7 = vpop.xlane.xlu1 %1531  ;;  %v10352_v43 = vpop.xlane.xlu0 %1534 }
 0x74d   :  { %v10340_v60 = vsel %vm15972_vm15, %v1852_v35, %v10336_v7  ;;  %v10365_v53 = vsel %vm15972_vm15, %v1853_v57, %v10352_v43  ;;  %vm1562_vm0 = vcmp.eq.f32.partialorder %v10155_v28, %v10336_v7  ;;  %vm1563_vm2 = vcmp.eq.f32.partialorder %v10158_v59, %v10352_v43 }
 0x74e   :  { %v2175_v9 = vrot.slane %v10340_v60, %v10332_v3  ;;  %v2168_v58 = vrot.slane %v10340_v60, %v10326_v10  ;;  %v2189_v48 = vrot.slane %v10340_v60, %v10347_v14  ;;  %v2182_v4 = vrot.slane %v10340_v60, %v10350_v40 }
 0x74f   :  { %v2203_v6 = vrot.slane %v10365_v53, %v10332_v3  ;;  %v2196_v27 = vrot.slane %v10365_v53, %v10326_v10  ;;  %v2217_v25 = vrot.slane %v10365_v53, %v10347_v14  ;;  %v2210_v36 = vrot.slane %v10365_v53, %v10350_v40 }
 0x750   :  { %2177 = vbcast.lane.b32.xlu1 %v2175_v9, 256  ;;  %2170 = vbcast.lane.b32.xlu0 %v2168_v58, 256  ;;  %v10371_v18 = vpop.xlane.xlu1 %1537  ;;  %v10390_v9 = vpop.xlane.xlu0 %1540  ;;  %v16281_v58 = vld [vmem:[#allocation48_spill] sm:$0xff] }
 0x751   :  { %v10384_v45 = vsel %vm15972_vm15, %v1854_v21, %v10371_v18  ;;  %v1838_v29 = vsel %vm15975_vm10, %v16282_v22, %v16281_v58  ;;  %v16286_v21 = vld [vmem:[#allocation81_spill] sm:$0xff]  ;;  %vm1564_vm3 = vcmp.eq.f32.partialorder %v10175_v54, %v10371_v18  ;;  %vm1565_vm4 = vcmp.eq.f32.partialorder %v10178_v24, %v10390_v9 }
 0x752   :  { %v2231_v20 = vrot.slane %v10384_v45, %v10332_v3  ;;  %v2224_v35 = vrot.slane %v10384_v45, %v10326_v10  ;;  %v1855_v16 = vsel %vm15974_vm11, %v1838_v29, %v16283_v30  ;;  %v2245_v57 = vrot.slane %v10384_v45, %v10347_v14  ;;  %v16287_v30 = vld [vmem:[#allocation50_spill] sm:$0xff] }
 0x753   :  { %v1580_v18 = vsel %vm1564_vm3, %v8973_v11, 16 }
 0x754   :  { %2191 = vbcast.lane.b32.xlu1 %v2189_v48, 256  ;;  %2184 = vbcast.lane.b32.xlu0 %v2182_v4, 256  ;;  %v2238_v48 = vrot.slane %v10384_v45, %v10350_v40  ;;  %v10403_v4 = vsel %vm15972_vm15, %v1855_v16, %v10390_v9  ;;  %v10409_v17 = vpop.xlane.xlu1 %1543  ;;  %v10428_v29 = vpop.xlane.xlu0 %1546  ;;  %v16288_v16 = vld [vmem:[#allocation23_spill] sm:$0xff] }
 0x755   :  { %vm1566_vm5 = vcmp.eq.f32.partialorder %v10197_v46, %v10409_v17  ;;  %vm1567_vm6 = vcmp.eq.f32.partialorder %v10200_v13, %v10428_v29 }
 0x758   :  { %2205 = vbcast.lane.b32.xlu1 %v2203_v6, 256  ;;  %2198 = vbcast.lane.b32.xlu0 %v2196_v27, 256  ;;  %v2259_v6 = vrot.slane %v10403_v4, %v10332_v3  ;;  %v2252_v27 = vrot.slane %v10403_v4, %v10326_v10 }
 0x75c   :  { %2219 = vbcast.lane.b32.xlu1 %v2217_v25, 256  ;;  %2212 = vbcast.lane.b32.xlu0 %v2210_v36, 256  ;;  %v1856_v25 = vsel %vm15974_vm11, %v1839_v23, %v16286_v21  ;;  %v2273_v36 = vrot.slane %v10403_v4, %v10347_v14 }
 0x760   :  { %2233 = vbcast.lane.b32.xlu1 %v2231_v20, 256  ;;  %2226 = vbcast.lane.b32.xlu0 %v2224_v35, 256  ;;  %v2266_v20 = vrot.slane %v10403_v4, %v10350_v40  ;;  %v10422_v35 = vsel %vm15972_vm15, %v1856_v25, %v10409_v17  ;;  %v10447_v25 = vpop.xlane.xlu1 %1549 }
 0x761   :  { %v2287_v58 = vrot.slane %v10422_v35, %v10332_v3  ;;  %v2280_v22 = vrot.slane %v10422_v35, %v10326_v10  ;;  %v2294_v5 = vrot.slane %v10422_v35, %v10350_v40  ;;  %vm1568_vm7 = vcmp.eq.f32.partialorder %v10222_v44, %v10447_v25 }
 0x764   :  { %2247 = vbcast.lane.b32.xlu1 %v2245_v57, 256  ;;  %2240 = vbcast.lane.b32.xlu0 %v2238_v48, 256  ;;  %v1840_v57 = vsel %vm15975_vm10, %v16288_v16, %v16287_v30  ;;  %v16289_v48 = vld [vmem:[#allocation82_spill] sm:$0xff] }
 0x768   :  { %2261 = vbcast.lane.b32.xlu1 %v2259_v6, 256  ;;  %2254 = vbcast.lane.b32.xlu0 %v2252_v27, 256  ;;  %v1857_v6 = vsel %vm15974_vm11, %v1840_v57, %v16289_v48  ;;  %v2301_v27 = vrot.slane %v10422_v35, %v10347_v14 }
 0x769   :  { %v10441_v33 = vsel %vm15972_vm15, %v1857_v6, %v10428_v29  ;;  %v1583_v29 = vsel %vm1567_vm6, %v8973_v11, 16 }
 0x76a   :  { %v2315_v23 = vrot.slane %v10441_v33, %v10332_v3  ;;  %v2308_v21 = vrot.slane %v10441_v33, %v10326_v10  ;;  %v2329_v16 = vrot.slane %v10441_v33, %v10347_v14  ;;  %v2322_v57 = vrot.slane %v10441_v33, %v10350_v40 }
 0x76c   :  { %2275 = vbcast.lane.b32.xlu1 %v2273_v36, 256  ;;  %2268 = vbcast.lane.b32.xlu0 %v2266_v20, 256  ;;  %v16290_v36 = vld [vmem:[#allocation51_spill] sm:$0xff]  ;;  %v16291_v20 = vld [vmem:[#allocation24_spill] sm:$0xff] }
 0x770   :  { %2289 = vbcast.lane.b32.xlu1 %v2287_v58, 256  ;;  %2282 = vbcast.lane.b32.xlu0 %v2280_v22, 256  ;;  %v1841_v58 = vsel %vm15975_vm10, %v16291_v20, %v16290_v36  ;;  %v16292_v22 = vld [vmem:[#allocation83_spill] sm:$0xff]  ;;  %v16295_v20 = vld [vmem:[#allocation84_spill] sm:$0xff] }
 0x771   :  { %v1858_v30 = vsel %vm15974_vm11, %v1841_v58, %v16292_v22 }
 0x772   :  { %v10460_v48 = vsel %vm15972_vm15, %v1858_v30, %v10447_v25  ;;  %v10829_v25 = vsel %vm15971_vm1, %v1583_v29, 2147483647  ;;  %v2630_v29 = vcombine.high %v10365_v53, %v10365_v53 }
 0x773   :  { %v2343_v6 = vrot.slane %v10460_v48, %v10332_v3  ;;  %v2357_v22 = vrot.slane %v10460_v48, %v10347_v14  ;;  %v2350_v30 = vrot.slane %v10460_v48, %v10350_v40  ;;  %16352 = vst [vmem:[#allocation83_spill] sm:$0xff] %v10829_v25 }
 0x774   :  { %2303 = vbcast.lane.b32.xlu1 %v2301_v27, 256  ;;  %2296 = vbcast.lane.b32.xlu0 %v2294_v5, 256  ;;  %v2336_v27 = vrot.slane %v10460_v48, %v10326_v10  ;;  %v10466_v5 = vpop.xlane.xlu0 %1552 }
 0x775   :  { %vm1569_vm8 = vcmp.eq.f32.partialorder %v10225_v26, %v10466_v5 }
 0x776   :  { %v1585_v26 = vsel %vm1569_vm8, %v8973_v11, 16 }
 0x778   :  { %2317 = vbcast.lane.b32.xlu1 %v2315_v23, 256  ;;  %2310 = vbcast.lane.b32.xlu0 %v2308_v21, 256  ;;  %v16293_v23 = vld [vmem:[#allocation52_spill] sm:$0xff]  ;;  %v16294_v21 = vld [vmem:[#allocation25_spill] sm:$0xff]  ;;  %v10500_v63 = vpop.xlane.xlu0 %1510 }
 0x779   :  { %v1842_v36 = vsel %vm15975_vm10, %v16294_v21, %v16293_v23  ;;  %v16296_v23 = vld [vmem:[#allocation53_spill] sm:$0xff]  ;;  %v16297_v21 = vld [vmem:[#allocation27_spill] sm:$0xff]  ;;  %vm1555_vm12 = vcmp.eq.f32.partialorder %v10249_v62, %v10500_v63 }
 0x77a   :  { %v1859_v58 = vsel %vm15974_vm11, %v1842_v36, %v16295_v20  ;;  %v1827_v36 = vsel %vm15975_vm10, %v16297_v21, %v16296_v23  ;;  %v16298_v20 = vld [vmem:[#allocation85_spill] sm:$0xff]  ;;  %v16301_v21 = vld [vmem:[#allocation86_spill] sm:$0xff] }
 0x77c   :  { %2331 = vbcast.lane.b32.xlu1 %v2329_v16, 256  ;;  %2324 = vbcast.lane.b32.xlu0 %v2322_v57, 256  ;;  %v10479_v16 = vsel %vm15972_vm15, %v1859_v58, %v10466_v5  ;;  %v1844_v58 = vsel %vm15974_vm11, %v1827_v36, %v16298_v20 }
 0x77d   :  { %v2371_v57 = vrot.slane %v10479_v16, %v10332_v3 }
 0x780   :  { %2345 = vbcast.lane.b32.xlu1 %v2343_v6, 256  ;;  %2338 = vbcast.lane.b32.xlu0 %v2336_v27, 256  ;;  %v2364_v6 = vrot.slane %v10479_v16, %v10326_v10  ;;  %v10485_v27 = vpop.xlane.xlu1 %1507 }
 0x781   :  { %v10498_v12 = vsel %vm15972_vm15, %v1844_v58, %v10485_v27  ;;  %vm1554_vm9 = vcmp.eq.f32.partialorder %v10243_v34, %v10485_v27  ;;  %v10862_v34 = vsel %vm15971_vm1, %v1585_v26, 2147483647  ;;  %v2730_v26 = vcombine.high %v10441_v33, %v10441_v33 }
 0x782   :  { %v1944_v20 = vrot.slane %v10498_v12, %v10326_v10  ;;  %v1951_v55 = vrot.slane %v10498_v12, %v10332_v3  ;;  %16356 = vst [vmem:[#allocation53_spill] sm:$0xff] %v10862_v34  ;;  %v1570_v27 = vsel %vm1554_vm9, %v8973_v11, 16  ;;  %v1571_v33 = vsel %vm1555_vm12, %v8973_v11, 16 }
 0x784   :  { %2359 = vbcast.lane.b32.xlu1 %v2357_v22, 256  ;;  %2352 = vbcast.lane.b32.xlu0 %v2350_v30, 256  ;;  %v2385_v22 = vrot.slane %v10479_v16, %v10347_v14  ;;  %v2378_v30 = vrot.slane %v10479_v16, %v10350_v40 }
 0x788   :  { %2373 = vbcast.lane.b32.xlu1 %v2371_v57, 256  ;;  %2366 = vbcast.lane.b32.xlu0 %v2364_v6, 256  ;;  %v16299_v57 = vld [vmem:[#allocation54_spill] sm:$0xff] }
 0x789   :  { %v16300_v6 = vld [vmem:[#allocation26_spill] sm:$0xff] }
 0x78a   :  { %v1828_v23 = vsel %vm15975_vm10, %v16300_v6, %v16299_v57  ;;  %v10519_v57 = vpop.xlane.xlu1 %1513  ;;  %v16303_v6 = vld [vmem:[#allocation55_spill] sm:$0xff] }
 0x78b   :  { %v1845_v36 = vsel %vm15974_vm11, %v1828_v23, %v16301_v21  ;;  %v16304_v23 = vld [vmem:[#allocation29_spill] sm:$0xff]  ;;  %vm1556_vm13 = vcmp.eq.f32.partialorder %v10260_v51, %v10519_v57 }
 0x78c   :  { %2387 = vbcast.lane.b32.xlu1 %v2385_v22, 256  ;;  %2380 = vbcast.lane.b32.xlu0 %v2378_v30, 256  ;;  %v10513_v58 = vsel %vm15972_vm15, %v1845_v36, %v10500_v63  ;;  %v1958_v22 = vrot.slane %v10498_v12, %v10350_v40  ;;  %v1829_v21 = vsel %vm15975_vm10, %v16304_v23, %v16303_v6  ;;  %v10538_v6 = vpop.xlane.xlu0 %1516  ;;  %v16307_v23 = vld [vmem:[#allocation31_spill] sm:$0xff] }
 0x78d   :  { %16302 = vst [vmem:[#allocation71_spill] sm:$0xff] %v10513_v58  ;;  %v1972_v30 = vrot.slane %v10513_v58, %v10326_v10  ;;  %v1846_v36 = vsel %vm15974_vm11, %v1829_v21, %v16305_v37  ;;  %v16306_v37 = vld [vmem:[#allocation57_spill] sm:$0xff] }
 0x78e   :  { %v10532_v50 = vsel %vm15972_vm15, %v1846_v36, %v10519_v57  ;;  %v1830_v21 = vsel %vm15975_vm10, %v16307_v23, %v16306_v37  ;;  %v10557_v37 = vpop.xlane.xlu1 %1519  ;;  %v16311_v23 = vld [vmem:[#allocation28_spill] sm:$0xff] }
 0x78f   :  { %v1847_v36 = vsel %vm15974_vm11, %v1830_v21, %v16308_v39  ;;  %v16310_v39 = vld [vmem:[#allocation56_spill] sm:$0xff]  ;;  %vm1558_vm14 = vcmp.eq.f32.partialorder %v10283_v0, %v10557_v37 }
 0x790   :  { %1946 = vbcast.lane.b32.xlu1 %v1944_v20, 256  ;;  %1953 = vbcast.lane.b32.xlu0 %v1951_v55, 256  ;;  %v1965_v55 = vrot.slane %v10498_v12, %v10347_v14  ;;  %v1986_v20 = vrot.slane %v10513_v58, %v10350_v40  ;;  %v10551_v56 = vsel %vm15972_vm15, %v1847_v36, %v10538_v6 }
 0x791   :  { %16309 = vst [vmem:[#allocation72_spill] sm:$0xff] %v10551_v56  ;;  %v1831_v21 = vsel %vm15975_vm10, %v16311_v23, %v16310_v39  ;;  %v2035_v39 = vrot.slane %v10551_v56, %v10332_v3  ;;  %v10576_v23 = vpop.xlane.xlu0 %1522 }
 0x792   :  { %v1848_v36 = vsel %vm15974_vm11, %v1831_v21, %v16312_v38  ;;  %16314 = vst [vmem:[#allocation43_spill] sm:$0xff] %v10576_v23  ;;  %v16315_v21 = vld [vmem:[#allocation59_spill] sm:$0xff] }
 0x793   :  { %v10570_v47 = vsel %vm15972_vm15, %v1848_v36, %v10557_v37  ;;  %v1832_v19 = vsel %vm15975_vm10, %v16316_v49, %v16315_v21  ;;  %v16321_v21 = vld [vmem:[#allocation30_spill] sm:$0xff] }
 0x794   :  { %1960 = vbcast.lane.b32.xlu1 %v1958_v22, 256  ;;  %1974 = vbcast.lane.b32.xlu0 %v1972_v30, 256  ;;  %v1979_v22 = vrot.slane %v10513_v58, %v10332_v3  ;;  %v2000_v30 = vrot.slane %v10532_v50, %v10326_v10  ;;  %16313 = vst [vmem:[#allocation70_spill] sm:$0xff] %v10570_v47 }
 0x795   :  { %v2056_v38 = vrot.slane %v10570_v47, %v10326_v10 }
 0x798   :  { %1967 = vbcast.lane.b32.xlu1 %v1965_v55, 256  ;;  %1988 = vbcast.lane.b32.xlu0 %v1986_v20, 256  ;;  %v1993_v55 = vrot.slane %v10513_v58, %v10347_v14  ;;  %v2014_v20 = vrot.slane %v10532_v50, %v10350_v40 }
 0x79c   :  { %1981 = vbcast.lane.b32.xlu1 %v1979_v22, 256  ;;  %2002 = vbcast.lane.b32.xlu0 %v2000_v30, 256  ;;  %v2007_v22 = vrot.slane %v10532_v50, %v10332_v3  ;;  %v2028_v30 = vrot.slane %v10551_v56, %v10326_v10 }
 0x7a0   :  { %1995 = vbcast.lane.b32.xlu1 %v1993_v55, 256  ;;  %2016 = vbcast.lane.b32.xlu0 %v2014_v20, 256  ;;  %v2021_v55 = vrot.slane %v10532_v50, %v10347_v14  ;;  %v2042_v20 = vrot.slane %v10551_v56, %v10350_v40 }
 0x7a4   :  { %2009 = vbcast.lane.b32.xlu1 %v2007_v22, 256  ;;  %2030 = vbcast.lane.b32.xlu0 %v2028_v30, 256  ;;  %v8795_v22 = vmov 1966171168  }
 0x7a5   :  { %v2407_v30 = vunpack.c.l.s4 %v8795_v22  ;;  %v2070_v22 = vrot.slane %v10570_v47, %v10350_v40 }
 0x7a7   :  { %v2408_v36 = vunpack.c.0.s8 %v2407_v30  ;;  %v10600_v30 = vpop.xlane.xlu1 %1525 }
 0x7a8   :  { %2023 = vbcast.lane.b32.xlu1 %v2021_v55, 256  ;;  %2044 = vbcast.lane.b32.xlu0 %v2042_v20, 256  ;;  %v1849_v55 = vsel %vm15974_vm11, %v1832_v19, %v16317_v8  ;;  %v2049_v20 = vrot.slane %v10551_v56, %v10347_v14  ;;  %v2063_v8 = vrot.slane %v10570_v47, %v10332_v3 }
 0x7a9   :  { %v10589_v1 = vsel %vm15972_vm15, %v1849_v55, %v10576_v23  ;;  %v10594_v49 = vsub.s32 %v2408_v36, %v16268_v41  ;;  %16319 = vst [vmem:[#allocation75_spill] sm:$0xff] %v10600_v30  ;;  %v2077_v36 = vrot.slane %v10570_v47, %v10347_v14 }
 0x7aa   :  { %16318 = vst [vmem:[#allocation73_spill] sm:$0xff] %v10589_v1  ;;  %v2084_v19 = vrot.slane %v10589_v1, %v10326_v10  ;;  %v2105_v32 = vrot.slane %v10589_v1, %v10347_v14 }
 0x7ab   :  { %v10900_v62 = vrot.slane %v2730_v26, %v10594_v49 }
 0x7ac   :  { %2037 = vbcast.lane.b32.xlu1 %v2035_v39, 256  ;;  %2058 = vbcast.lane.b32.xlu0 %v2056_v38, 256  ;;  %v2605_v39 = vcombine.high %v10340_v60, %v10340_v60  ;;  %v16320_v38 = vld [vmem:[#allocation58_spill] sm:$0xff] }
 0x7ad   :  { %v1833_v55 = vsel %vm15975_vm10, %v16321_v21, %v16320_v38  ;;  %v16322_v60 = vld [vmem:[#allocation90_spill] sm:$0xff]  ;;  %v10620_v38 = vpop.xlane.xlu0 %1528  ;;  %v16325_v21 = vld [vmem:[#allocation60_spill] sm:$0xff] }
 0x7ae   :  { %v1850_v41 = vsel %vm15974_vm11, %v1833_v55, %v16322_v60  ;;  %16324 = vst [vmem:[#allocation44_spill] sm:$0xff] %v10620_v38  ;;  %v16326_v55 = vld [vmem:[#allocation33_spill] sm:$0xff] }
 0x7af   :  { %v10614_v31 = vsel %vm15972_vm15, %v1850_v41, %v10600_v30  ;;  %v1834_v60 = vsel %vm15975_vm10, %v16326_v55, %v16325_v21 }
 0x7b0   :  { %2051 = vbcast.lane.b32.xlu1 %v2049_v20, 256  ;;  %2072 = vbcast.lane.b32.xlu0 %v2070_v22, 256  ;;  %v2612_v20 = vrot.slane %v2605_v39, %v10594_v49  ;;  %v2098_v22 = vrot.slane %v10589_v1, %v10350_v40  ;;  %16323 = vst [vmem:[#allocation74_spill] sm:$0xff] %v10614_v31 }
 0x7b1   :  { %v2112_v39 = vrot.slane %v10614_v31, %v10326_v10  ;;  %v2126_v56 = vrot.slane %v10614_v31, %v10350_v40  ;;  %v2133_v15 = vrot.slane %v10614_v31, %v10347_v14 }
 0x7b4   :  { %2065 = vbcast.lane.b32.xlu1 %v2063_v8, 256  ;;  %2086 = vbcast.lane.b32.xlu0 %v2084_v19, 256  ;;  %v2613_v8 = vcombine.high %v2612_v20, %v2612_v20  ;;  %v2091_v19 = vrot.slane %v10589_v1, %v10332_v3 }
 0x7b6   :  { %v2627_v41 = vrot.slane %v2613_v8, %v10594_v49 }
 0x7b8   :  { %2079 = vbcast.lane.b32.xlu1 %v2077_v36, 256  ;;  %2100 = vbcast.lane.b32.xlu0 %v2098_v22, 256  ;;  %v2620_v36 = vrot.slane %v2612_v20, %v10594_v49  ;;  %v16327_v22 = vld [vmem:[#allocation92_spill] sm:$0xff]  ;;  %v2629_v8 = vcombine.high %v2627_v41, %v2627_v41  ;;  %v2940_v1 = vrot.slane %v2627_v41, %v10326_v10 }
 0x7b9   :  { %v1851_v52 = vsel %vm15974_vm11, %v1834_v60, %v16327_v22  ;;  %v2119_v60 = vrot.slane %v10614_v31, %v10332_v3  ;;  %v16329_v31 = vld [vmem:[#allocation15_spill] sm:$0xff] }
 0x7ba   :  { %v2628_v20 = vcombine.high %v2620_v36, %v2620_v36 }
 0x7bc   :  { %2093 = vbcast.lane.b32.xlu1 %v2091_v19, 256  ;;  %2114 = vbcast.lane.b32.xlu0 %v2112_v39, 256  ;;  %v10635_v19 = vsel %vm15972_vm15, %v1851_v52, %v10620_v38  ;;  %v2655_v39 = vcombine.high %v10384_v45, %v10384_v45  ;;  %v2936_v45 = vrot.slane %v2620_v36, %v10326_v10 }
 0x7bd   :  { %16328 = vst [vmem:[#allocation76_spill] sm:$0xff] %v10635_v19  ;;  %v2140_v22 = vrot.slane %v10635_v19, %v10326_v10  ;;  %v2154_v38 = vrot.slane %v10635_v19, %v10350_v40  ;;  %v2147_v42 = vrot.slane %v10635_v19, %v10332_v3 }
 0x7be   :  { %v2662_v52 = vrot.slane %v2655_v39, %v10594_v49 }
 0x7c0   :  { %2107 = vbcast.lane.b32.xlu1 %v2105_v32, 256  ;;  %2128 = vbcast.lane.b32.xlu0 %v2126_v56, 256  ;;  %v2948_v32 = vrot.slane %v2629_v8, %v10326_v10  ;;  %v2944_v56 = vrot.slane %v2628_v20, %v10326_v10  ;;  %v2663_v23 = vcombine.high %v2662_v52, %v2662_v52 }
 0x7c2   :  { %v2178_v21 = vpop.permute.xlu1 %2177  ;;  %v2171_v55 = vpop.permute.xlu0 %2170 }
 0x7c4   :  { %2121 = vbcast.lane.b32.xlu1 %v2119_v60, 256  ;;  %2142 = vbcast.lane.b32.xlu0 %v2140_v22, 256  ;;  %v3158_v60 = vadd.f32 %v2940_v1, %v2178_v21  ;;  %v3157_v22 = vadd.f32 %v2936_v45, %v2171_v55  ;;  %v2161_v55 = vrot.slane %v10635_v19, %v10347_v14  ;;  %v16332_v45 = vld [vmem:[#allocation16_spill] sm:$0xff] }
 0x7c6   :  { %v2192_v58 = vpop.permute.xlu1 %2191  ;;  %v2185_v47 = vpop.permute.xlu0 %2184 }
 0x7c7   :  { %v3160_v61 = vadd.f32 %v2948_v32, %v2192_v58  ;;  %v3159_v39 = vadd.f32 %v2944_v56, %v2185_v47  ;;  %v2670_v58 = vrot.slane %v2662_v52, %v10594_v49 }
 0x7c8   :  { %2135 = vbcast.lane.b32.xlu1 %v2133_v15, 256  ;;  %2156 = vbcast.lane.b32.xlu0 %v2154_v38, 256  ;;  %v2677_v15 = vrot.slane %v2663_v23, %v10594_v49 }
 0x7c9   :  { %v3469_v41 = vcombine.low %v3158_v60, %v3160_v61  ;;  %v3461_v36 = vcombine.low %v3157_v22, %v3159_v39  ;;  %v2678_v56 = vcombine.high %v2670_v58, %v2670_v58 }
 0x7ca   :  { %v10652_v8 = vpop.permute.xlu1 %2205  ;;  %v10654_v20 = vpop.permute.xlu0 %2198  ;;  %v2679_v23 = vcombine.high %v2677_v15, %v2677_v15  ;;  %v2972_v39 = vrot.slane %v2677_v15, %v10326_v10 }
 0x7cb   :  { %v10659_v30 = vrot.slane %v3469_v41, %v16329_v31  ;;  %v10662_v1 = vrot.slane %v3461_v36, %v16329_v31  ;;  %v2968_v41 = vrot.slane %v2670_v58, %v10326_v10 }
 0x7cc   :  { %2149 = vbcast.lane.b32.xlu1 %v2147_v42, 256  ;;  %v2705_v42 = vcombine.high %v10422_v35, %v10422_v35  ;;  %v2980_v36 = vrot.slane %v2679_v23, %v10326_v10 }
 0x7cd   :  { %16330 = vst [vmem:[#allocation14_spill] sm:$0xff] %v10659_v30  ;;  %16331 = vst [vmem:[#allocation45_spill] sm:$0xff] %v10662_v1  ;;  %v3478_v61 = vcombine.high %v10662_v1, %v10659_v30 }
 0x7ce   :  { %v10670_v38 = vpop.permute.xlu1 %2219  ;;  %v10672_v21 = vpop.permute.xlu0 %2212  ;;  %v2712_v22 = vrot.slane %v2705_v42, %v10594_v49 }
 0x7cf   :  { %v10677_v32 = vrot.slane %v3478_v61, %v16332_v45  ;;  %v2976_v61 = vrot.slane %v2678_v56, %v10326_v10 }
 0x7d0   :  { %2163 = vbcast.lane.b32.xlu1 %v2161_v55, 256  ;;  %v2713_v1 = vcombine.high %v2712_v22, %v2712_v22 }
 0x7d1   :  { %16333 = vst [vmem:[#allocation18_spill] sm:$0xff] %v10677_v32  ;;  %3829 = vrot.lane.b32.xlu0 %v10677_v32, %s8784_s23 }
 0x7d2   :  { %v2234_v52 = vpop.permute.xlu1 %2233  ;;  %v2227_v60 = vpop.permute.xlu0 %2226 }
 0x7d3   :  { %v3166_v55 = vadd.f32 %v2972_v39, %v2234_v52  ;;  %v3165_v14 = vadd.f32 %v2968_v41, %v2227_v60 }
 0x7d6   :  { %v2248_v47 = vpop.permute.xlu1 %2247  ;;  %v2241_v35 = vpop.permute.xlu0 %2240 }
 0x7d7   :  { %v3168_v40 = vadd.f32 %v2980_v36, %v2248_v47  ;;  %v3167_v3 = vadd.f32 %v2976_v61, %v2241_v35 }
 0x7d9   :  { %v3537_v32 = vcombine.low %v3166_v55, %v3168_v40  ;;  %v3529_v30 = vcombine.low %v3165_v14, %v3167_v3  ;;  %v2727_v40 = vrot.slane %v2713_v1, %v10594_v49  ;;  %v2720_v3 = vrot.slane %v2712_v22, %v10594_v49 }
 0x7da   :  { %v10688_v19 = vpop.permute.xlu1 %2261  ;;  %v10690_v42 = vpop.permute.xlu0 %2254 }
 0x7db   :  { %v10693_v15 = vrot.slane %v3537_v32, %v16329_v31  ;;  %v10696_v58 = vrot.slane %v3529_v30, %v16329_v31  ;;  %v2755_v30 = vcombine.high %v10460_v48, %v10460_v48  ;;  %v2729_v52 = vcombine.high %v2727_v40, %v2727_v40 }
 0x7dc   :  { %v2728_v60 = vcombine.high %v2720_v3, %v2720_v3  ;;  %v3000_v1 = vrot.slane %v2720_v3, %v10326_v10  ;;  %v3004_v22 = vrot.slane %v2727_v40, %v10326_v10 }
 0x7dd   :  { %16334 = vst [vmem:[#allocation77_spill] sm:$0xff] %v10693_v15  ;;  %16335 = vst [vmem:[#allocation46_spill] sm:$0xff] %v10696_v58  ;;  %v3546_v47 = vcombine.high %v10696_v58, %v10693_v15  ;;  %v3012_v36 = vrot.slane %v2729_v52, %v10326_v10  ;;  %v2762_v48 = vrot.slane %v2755_v30, %v10594_v49  ;;  %v1578_v58 = vsel %vm1562_vm0, %v8973_v11, 16 }
 0x7de   :  { %v10704_v14 = vpop.permute.xlu1 %2275  ;;  %v10706_v56 = vpop.permute.xlu0 %2268  ;;  %v3008_v61 = vrot.slane %v2728_v60, %v10326_v10  ;;  %vm1557_vm0 = vcmp.eq.f32.partialorder %v10286_v2, %v10538_v6 }
 0x7df   :  { %v10709_v32 = vrot.slane %v3546_v47, %v16332_v45  ;;  %v2763_v40 = vcombine.high %v2762_v48, %v2762_v48 }
 0x7e1   :  { %16336 = vst [vmem:[#allocation19_spill] sm:$0xff] %v10709_v32  ;;  %3833 = vrot.lane.b32.xlu0 %v10709_v32, %s8784_s23 }
 0x7e2   :  { %v2290_v39 = vpop.permute.xlu1 %2289  ;;  %v2283_v41 = vpop.permute.xlu0 %2282 }
 0x7e3   :  { %v3174_v47 = vadd.f32 %v3004_v22, %v2290_v39  ;;  %v3173_v23 = vadd.f32 %v3000_v1, %v2283_v41  ;;  %v10736_v39 = vsel %vm15971_vm1, %v1578_v58, 2147483647  ;;  %v1579_v41 = vsel %vm1563_vm2, %v8973_v11, 16 }
 0x7e4   :  { %16339 = vst [vmem:[#allocation20_spill] sm:$0xff] %v10736_v39  ;;  %v1708_v58 = vshra.s32 %v10736_v39, 16  ;;  %v10756_v54 = vsel %vm15971_vm1, %v1579_v41, 2147483647 }
 0x7e5   :  { %16341 = vst [vmem:[#allocation48_spill] sm:$0xff] %v10756_v54 }
 0x7e6   :  { %v2304_v35 = vpop.permute.xlu1 %2303  ;;  %v2297_v55 = vpop.permute.xlu0 %2296 }
 0x7e7   :  { %v3176_v32 = vadd.f32 %v3012_v36, %v2304_v35  ;;  %v3175_v15 = vadd.f32 %v3008_v61, %v2297_v55  ;;  %v10763_v55 = vcvt.s32.f32 %v1708_v58 }
 0x7e9   :  { %v3605_v28 = vcombine.low %v3174_v47, %v3176_v32  ;;  %v3597_v7 = vcombine.low %v3173_v23, %v3175_v15  ;;  %v2777_v15 = vrot.slane %v2763_v40, %v10594_v49  ;;  %v2770_v23 = vrot.slane %v2762_v48, %v10594_v49  ;;  %16342 = vst [vmem:[#allocation21_spill] sm:$0xff] %v10763_v55 }
 0x7ea   :  { %v10725_v3 = vpop.permute.xlu1 %2317  ;;  %v10727_v52 = vpop.permute.xlu0 %2310  ;;  %v1723_v47 = vshra.s32 %v10756_v54, 16 }
 0x7eb   :  { %v10730_v30 = vrot.slane %v3605_v28, %v16329_v31  ;;  %v10733_v60 = vrot.slane %v3597_v7, %v16329_v31  ;;  %v2779_v36 = vcombine.high %v2777_v15, %v2777_v15  ;;  %v2778_v61 = vcombine.high %v2770_v23, %v2770_v23 }
 0x7ec   :  { %v1581_v28 = vsel %vm1565_vm4, %v8973_v11, 16  ;;  %v10768_v7 = vsel %vm15971_vm1, %v1580_v18, 2147483647  ;;  %v3032_v24 = vrot.slane %v2770_v23, %v10326_v10  ;;  %v3036_v9 = vrot.slane %v2777_v15, %v10326_v10 }
 0x7ed   :  { %16337 = vst [vmem:[#allocation78_spill] sm:$0xff] %v10730_v30  ;;  %16338 = vst [vmem:[#allocation47_spill] sm:$0xff] %v10733_v60  ;;  %v3614_v43 = vcombine.high %v10733_v60, %v10730_v30  ;;  %v3044_v40 = vrot.slane %v2779_v36, %v10326_v10  ;;  %v3040_v41 = vrot.slane %v2778_v61, %v10326_v10  ;;  %v10779_v18 = vcvt.s32.f32 %v1723_v47 }
 0x7ee   :  { %v10747_v32 = vpop.permute.xlu1 %2331  ;;  %v10749_v1 = vpop.permute.xlu0 %2324  ;;  %16343 = vst [vmem:[#allocation80_spill] sm:$0xff] %v10768_v7  ;;  %v1738_v54 = vshra.s32 %v10768_v7, 16  ;;  %v10783_v39 = vsel %vm15971_vm1, %v1581_v28, 2147483647  ;;  %v1582_v36 = vsel %vm1566_vm5, %v8973_v11, 16 }
 0x7ef   :  { %v10753_v22 = vrot.slane %v3614_v43, %v16332_v45  ;;  %v2405_v43 = vcombine.high %v10498_v12, %v10498_v12  ;;  %16344 = vst [vmem:[#allocation49_spill] sm:$0xff] %v10779_v18  ;;  %16345 = vst [vmem:[#allocation22_spill] sm:$0xff] %v10783_v39  ;;  %v10807_v13 = vsel %vm15971_vm1, %v1582_v36, 2147483647 }
 0x7f0   :  { %16349 = vst [vmem:[#allocation82_spill] sm:$0xff] %v10807_v13 }
 0x7f1   :  { %16340 = vst [vmem:[#allocation79_spill] sm:$0xff] %v10753_v22  ;;  %3837 = vrot.lane.b32.xlu0 %v10753_v22, %s8784_s23  ;;  %v2412_v47 = vrot.slane %v2405_v43, %v10594_v49  ;;  %v1768_v43 = vshra.s32 %v10807_v13, 16 }
 0x7f2   :  { %v2346_v48 = vpop.permute.xlu1 %2345  ;;  %v2339_v35 = vpop.permute.xlu0 %2338 }
 0x7f3   :  { %v3182_v23 = vadd.f32 %v3036_v9, %v2346_v48 }
 0x7f4   :  { %1711 = vmin.xlane.f32.xlu1 %v10763_v55  ;;  %v3181_v55 = vadd.f32 %v3032_v24, %v2339_v35  ;;  %v10797_v35 = vcvt.s32.f32 %v1738_v54  ;;  %v2413_v24 = vcombine.high %v2412_v47, %v2412_v47 }
 0x7f6   :  { %v2360_v58 = vpop.permute.xlu1 %2359  ;;  %v2353_v59 = vpop.permute.xlu0 %2352  ;;  %16346 = vst [vmem:[#allocation81_spill] sm:$0xff] %v10797_v35 }
 0x7f7   :  { %v3184_v22 = vadd.f32 %v3044_v40, %v2360_v58  ;;  %v3183_v15 = vadd.f32 %v3040_v41, %v2353_v59  ;;  %v1753_v59 = vshra.s32 %v10783_v39, 16  ;;  %v1584_v58 = vsel %vm1568_vm7, %v8973_v11, 16 }
 0x7f8   :  { %1726 = vmin.xlane.f32.xlu1 %v10779_v18 }
 0x7f9   :  { %v3673_v12 = vcombine.low %v3182_v23, %v3184_v22  ;;  %v3665_v61 = vcombine.low %v3181_v55, %v3183_v15  ;;  %v2420_v55 = vrot.slane %v2412_v47, %v10594_v49  ;;  %v10822_v41 = vcvt.s32.f32 %v1753_v59 }
 0x7fa   :  { %v10793_v28 = vpop.permute.xlu1 %2373  ;;  %v10795_v48 = vpop.permute.xlu0 %2366  ;;  %v2427_v23 = vrot.slane %v2413_v24, %v10594_v49  ;;  %v1783_v47 = vshra.s32 %v10829_v25, 16  ;;  %v10842_v59 = vsel %vm15971_vm1, %v1584_v58, 2147483647  ;;  %v2455_v24 = vcombine.high %v10532_v50, %v10532_v50 }
 0x7fb   :  { %v10801_v46 = vrot.slane %v3673_v12, %v16329_v31  ;;  %v10804_v17 = vrot.slane %v3665_v61, %v16329_v31  ;;  %16350 = vst [vmem:[#allocation51_spill] sm:$0xff] %v10822_v41  ;;  %v2428_v15 = vcombine.high %v2420_v55, %v2420_v55  ;;  %v10838_v61 = vcvt.s32.f32 %v1768_v43  ;;  %16354 = vst [vmem:[#allocation25_spill] sm:$0xff] %v10842_v59 }
 0x7fc   :  { %1741 = vmin.xlane.f32.xlu1 %v10797_v35  ;;  %v10855_v58 = vcvt.s32.f32 %v1783_v47  ;;  %v1798_v53 = vshra.s32 %v10842_v59, 16  ;;  %v2680_v25 = vcombine.high %v10403_v4, %v10403_v4  ;;  %v2637_v50 = vrot.slane %v2630_v29, %v10594_v49 }
 0x7fd   :  { %16347 = vst [vmem:[#allocation50_spill] sm:$0xff] %v10801_v46  ;;  %16348 = vst [vmem:[#allocation23_spill] sm:$0xff] %v10804_v17  ;;  %v3682_v54 = vcombine.high %v10804_v17, %v10801_v46  ;;  %v2816_v5 = vrot.slane %v2428_v15, %v10326_v10  ;;  %v2812_v4 = vrot.slane %v2427_v23, %v10326_v10 }
 0x7fe   :  { %v10818_v9 = vpop.permute.xlu1 %2387  ;;  %v10820_v40 = vpop.permute.xlu0 %2380  ;;  %16353 = vst [vmem:[#allocation52_spill] sm:$0xff] %v10838_v61  ;;  %16355 = vst [vmem:[#allocation84_spill] sm:$0xff] %v10855_v58  ;;  %v2462_v47 = vrot.slane %v2455_v24, %v10594_v49  ;;  %v10878_v59 = vcvt.s32.f32 %v1798_v53 }
 0x7ff   :  { %v10826_v44 = vrot.slane %v3682_v54, %v16332_v45  ;;  %v2429_v54 = vcombine.high %v2427_v23, %v2427_v23  ;;  %v16367_v23 = vld [vmem:[#allocation44_spill] sm:$0xff] }
 0x800   :  { %1756 = vmin.xlane.f32.xlu1 %v10822_v41  ;;  %16357 = vst [vmem:[#allocation27_spill] sm:$0xff] %v10878_v59  ;;  %v1813_v41 = vshra.s32 %v10862_v34, 16  ;;  %v2470_v24 = vrot.slane %v2462_v47, %v10594_v49  ;;  %v2463_v53 = vcombine.high %v2462_v47, %v2462_v47  ;;  %v16365_v47 = vld [vmem:[#allocation43_spill] sm:$0xff] }
 0x801   :  { %16351 = vst [vmem:[#allocation24_spill] sm:$0xff] %v10826_v44  ;;  %3841 = vrot.lane.b32.xlu0 %v10826_v44, %s8784_s23  ;;  %v16386_v44 = vld [vmem:[#allocation72_spill] sm:$0xff] }
 0x802   :  { %v1947_v36 = vpop.permute.xlu1 %1946  ;;  %v1954_v12 = vpop.permute.xlu0 %1953  ;;  %v10904_v51 = vcvt.s32.f32 %v1813_v41  ;;  %v16366_v41 = vld [vmem:[#allocation67_spill] sm:$0xff]  ;;  %v2840_v7 = vrot.slane %v2470_v24, %v10326_v10 }
 0x803   :  { %v3126_v29 = vadd.f32 %v2812_v4, %v1954_v12  ;;  %v16363_v4 = vld [vmem:[#allocation75_spill] sm:$0xff]  ;;  %vm1559_vm3 = vcmp.eq.f32.partialorder %v16366_v41, %v16365_v47  ;;  %v16372_v47 = vld [vmem:[#allocation70_spill] sm:$0xff] }
 0x804   :  { %1771 = vmin.xlane.f32.xlu1 %v10838_v61  ;;  %v2808_v61 = vrot.slane %v2420_v55, %v10326_v10  ;;  %v2820_v55 = vrot.slane %v2429_v54, %v10326_v10  ;;  %v2638_v54 = vcombine.high %v2637_v50, %v2637_v50  ;;  %16359 = vst [vmem:[#allocation54_spill] sm:$0xff] %v10904_v51 }
 0x805   :  { %v2505_v41 = vcombine.high %v16372_v47, %v16372_v47 }
 0x806   :  { %v1961_v43 = vpop.permute.xlu1 %1960  ;;  %v10853_v22 = vpop.permute.xlu0 %1974  ;;  %v3125_v15 = vadd.f32 %v2808_v61, %v1947_v36  ;;  %v10882_v36 = vsel %vm15971_vm1, %v1570_v27, 2147483647  ;;  %v1572_v61 = vsel %vm1556_vm13, %v8973_v11, 16  ;;  %v10923_v26 = vrot.slane %v2638_v54, %v10594_v49 }
 0x807   :  { %v3127_v13 = vadd.f32 %v2816_v5, %v1961_v43  ;;  %16358 = vst [vmem:[#allocation85_spill] sm:$0xff] %v10882_v36  ;;  %v1588_v57 = vshra.s32 %v10882_v36, 16  ;;  %v1574_v54 = vsel %vm1558_vm14, %v8973_v11, 16  ;;  %v16368_v36 = vld [vmem:[#allocation68_spill] sm:$0xff] }
 0x808   :  { %1786 = vmin.xlane.f32.xlu1 %v10855_v58  ;;  %vm1561_vm4 = vcmp.eq.f32.partialorder %v16368_v36, %v16367_v23  ;;  %v10959_v36 = vsel %vm15971_vm1, %v1572_v61, 2147483647  ;;  %v1575_v23 = vsel %vm1559_vm3, %v8973_v11, 16  ;;  %v2654_v2 = vcombine.high %v10923_v26, %v10923_v26 }
 0x809   :  { %v3189_v39 = vcombine.low %v3125_v15, %v3127_v13  ;;  %v2687_v13 = vrot.slane %v2680_v25, %v10594_v49  ;;  %v10916_v15 = vsel %vm15971_vm1, %v1571_v33, 2147483647  ;;  %v10942_v34 = vcvt.s32.f32 %v1588_v57  ;;  %16371 = vst [vmem:[#allocation57_spill] sm:$0xff] %v10959_v36 }
 0x80a   :  { %v1968_v5 = vpop.permute.xlu1 %1967  ;;  %v10876_v43 = vpop.permute.xlu0 %1988  ;;  %16362 = vst [vmem:[#allocation55_spill] sm:$0xff] %v10916_v15  ;;  %vm16085_vm3 = vcmask 31744  }
 0x80b   :  { %v3128_v58 = vadd.f32 %v2820_v55, %v1968_v5  ;;  %v10910_v25 = vrot.slane %v3189_v39, %v16329_v31  ;;  %v16364_v55 = vld [vmem:[#allocation66_spill] sm:$0xff]  ;;  %v10926_v5 = vrot.slane %v2637_v50, %v10594_v49  ;;  %16369 = vst [vmem:[#allocation29_spill] sm:$0xff] %v10942_v34  ;;  %v1603_v39 = vshra.s32 %v10916_v15, 16 }
 0x80c   :  { %1801 = vmin.xlane.f32.xlu1 %v10878_v59  ;;  %vm1560_vm2 = vcmp.eq.f32.partialorder %v16364_v55, %v16363_v4  ;;  %v2688_v57 = vcombine.high %v2687_v13, %v2687_v13  ;;  %v10971_v4 = vsel %vm1561_vm4, %v8973_v11, 16  ;;  %v10981_v15 = vrot.slane %v2687_v13, %v10594_v49 }
 0x80d   :  { %v3197_v12 = vcombine.low %v3126_v29, %v3128_v58  ;;  %16360 = vst [vmem:[#allocation26_spill] sm:$0xff] %v10910_v25  ;;  %v2478_v29 = vcombine.high %v2470_v24, %v2470_v24  ;;  %v10953_v0 = vsel %vm1560_vm2, %v8973_v11, 16  ;;  %v2653_v6 = vcombine.high %v10926_v5, %v10926_v5 }
 0x80e   :  { %v10902_v63 = vpop.permute.xlu1 %1981  ;;  %v2003_v27 = vpop.permute.xlu0 %2002  ;;  %vm16084_vm4 = vcmask 64512  }
 0x80f   :  { %v10913_v58 = vrot.slane %v3197_v12, %v16329_v31  ;;  %v2477_v12 = vrot.slane %v2463_v53, %v10594_v49  ;;  %v1573_v53 = vsel %vm1557_vm0, %v8973_v11, 16  ;;  %v2848_v61 = vrot.slane %v2478_v29, %v10326_v10 }
 0x810   :  { %1816 = vmin.xlane.f32.xlu1 %v10904_v51  ;;  %v10985_v11 = vcvt.s32.f32 %v1603_v39  ;;  %v1618_v29 = vshra.s32 %v10959_v36, 16  ;;  %v10992_v47 = vsel %vm15971_vm1, %v1573_v53, 2147483647  ;;  %v10998_v13 = vrot.slane %v2653_v6, %v10326_v10 }
 0x811   :  { %16361 = vst [vmem:[#allocation86_spill] sm:$0xff] %v10913_v58  ;;  %v3206_v33 = vcombine.high %v10910_v25, %v10913_v58  ;;  %v2479_v55 = vcombine.high %v2477_v12, %v2477_v12  ;;  %16375 = vst [vmem:[#allocation56_spill] sm:$0xff] %v10992_v47  ;;  %v11001_v39 = vrot.slane %v2688_v57, %v10594_v49 }
 0x812   :  { %v10940_v50 = vpop.permute.xlu1 %1995  ;;  %v2017_v51 = vpop.permute.xlu0 %2016  ;;  %16374 = vst [vmem:[#allocation89_spill] sm:$0xff] %v10985_v11  ;;  %v2738_v36 = vcombine.high %v10900_v62, %v10900_v62  ;;  %v3133_v35 = vadd.f32 %v2840_v7, %v2003_v27  ;;  %v2844_v24 = vrot.slane %v2477_v12, %v10326_v10  ;;  %v2512_v53 = vrot.slane %v2505_v41, %v10594_v49 }
 0x813   :  { %v10956_v37 = vrot.slane %v3206_v33, %v16332_v45  ;;  %v3135_v18 = vadd.f32 %v2848_v61, %v2017_v51  ;;  %v10995_v33 = vrot.slane %v2654_v2, %v10326_v10  ;;  %v2852_v51 = vrot.slane %v2479_v55, %v10326_v10 }
 0x814   :  { %1591 = vmin.xlane.f32.xlu1 %v10942_v34  ;;  %v2703_v2 = vcombine.high %v10981_v15, %v10981_v15  ;;  %v16376_v6 = vcombine.high %v10479_v16, %v10479_v16  ;;  %v11017_v58 = vcvt.s32.f32 %v1618_v29  ;;  %v1633_v7 = vshra.s32 %v10992_v47, 16  ;;  %v16380_v29 = vld [vmem:[#allocation71_spill] sm:$0xff] }
 0x815   :  { %16370 = vst [vmem:[#allocation87_spill] sm:$0xff] %v10956_v37  ;;  %3813 = vrot.lane.b32.xlu0 %v10956_v37, %s8784_s23  ;;  %v3257_v27 = vcombine.low %v3133_v35, %v3135_v18  ;;  %v11021_v41 = vsel %vm15971_vm1, %v1574_v54, 2147483647  ;;  %v11026_v25 = vrot.slane %v2738_v36, %v10594_v49  ;;  %v11030_v16 = vrot.slane %v10900_v62, %v10594_v49 }
 0x816   :  { %v2010_v59 = vpop.permute.xlu1 %2009  ;;  %v10983_v34 = vpop.permute.xlu0 %2030  ;;  %v2787_v57 = vrot.slane %v16376_v6, %v10594_v49  ;;  %16378 = vst [vmem:[#allocation88_spill] sm:$0xff] %v11017_v58  ;;  %16379 = vst [vmem:[#allocation59_spill] sm:$0xff] %v11021_v41  ;;  %v2430_v6 = vcombine.high %v16380_v29, %v16380_v29  ;;  %v2513_v54 = vcombine.high %v2512_v53, %v2512_v53  ;;  %v1648_v29 = vshra.s32 %v11021_v41, 16 }
 0x817   :  { %16373 = vst [vmem:[#allocation31_spill] sm:$0xff] %v10983_v34  ;;  %v3134_v12 = vadd.f32 %v2844_v24, %v2010_v59  ;;  %v2520_v59 = vrot.slane %v2512_v53, %v10594_v49  ;;  %v2704_v36 = vcombine.high %v11001_v39, %v11001_v39  ;;  %v11041_v24 = vrot.slane %v2703_v2, %v10326_v10 }
 0x818   :  { %1606 = vmin.xlane.f32.xlu1 %v10985_v11  ;;  %v2788_v11 = vcombine.high %v2787_v57, %v2787_v57  ;;  %v11049_v18 = vrot.slane %v3257_v27, %v16329_v31  ;;  %v11055_v53 = vsel %vm15971_vm1, %v1575_v23, 2147483647  ;;  %v2754_v2 = vcombine.high %v11026_v25, %v11026_v25 }
 0x819   :  { %16385 = vst [vmem:[#allocation90_spill] sm:$0xff] %v11055_v53  ;;  %v2437_v41 = vrot.slane %v2430_v6, %v10594_v49  ;;  %v2527_v47 = vrot.slane %v2513_v54, %v10594_v49  ;;  %v11078_v17 = vcvt.s32.f32 %v1648_v29 }
 0x81a   :  { %v2024_v61 = vpop.permute.xlu1 %2023  ;;  %v11015_v37 = vpop.permute.xlu0 %2044  ;;  %16383 = vst [vmem:[#allocation58_spill] sm:$0xff] %v11049_v18 }
 0x81b   :  { %16377 = vst [vmem:[#allocation28_spill] sm:$0xff] %v11015_v37  ;;  %v3136_v55 = vadd.f32 %v2852_v51, %v2024_v61  ;;  %v11045_v61 = vcvt.s32.f32 %v1633_v7  ;;  %v11062_v7 = vrot.slane %v2787_v57, %v10594_v49  ;;  %v2480_v57 = vcombine.high %v16386_v44, %v16386_v44  ;;  %16387 = vst [vmem:[#allocation60_spill] sm:$0xff] %v11078_v17 }
 0x81c   :  { %1621 = vmin.xlane.f32.xlu1 %v11017_v58  ;;  %v11072_v58 = vrot.slane %v2704_v36, %v10326_v10  ;;  %v11091_v36 = vsel %vm15971_vm1, %v10953_v0, 2147483647  ;;  %v2529_v44 = vcombine.high %v2527_v47, %v2527_v47 }
 0x81d   :  { %v3265_v35 = vcombine.low %v3134_v12, %v3136_v55  ;;  %16382 = vst [vmem:[#allocation91_spill] sm:$0xff] %v11045_v61  ;;  %v2753_v55 = vcombine.high %v11030_v16, %v11030_v16  ;;  %16389 = vst [vmem:[#allocation92_spill] sm:$0xff] %v11091_v36  ;;  %v2487_v30 = vrot.slane %v2480_v57, %v10594_v49 }
 0x81e   :  { %v11043_v62 = vpop.permute.xlu1 %2037  ;;  %v2059_v51 = vpop.permute.xlu0 %2058 }
 0x81f   :  { %16381 = vst [vmem:[#allocation32_spill] sm:$0xff] %v11043_v62  ;;  %v11052_v12 = vrot.slane %v3265_v35, %v16329_v31  ;;  %v2528_v35 = vcombine.high %v2520_v59, %v2520_v59  ;;  %v11096_v29 = vrot.slane %v2753_v55, %v10326_v10  ;;  %v11140_v57 = vrot.slane %v2487_v30, %v10594_v49 }
 0x820   :  { %1636 = vmin.xlane.f32.xlu1 %v11045_v61  ;;  %v1663_v61 = vshra.s32 %v11055_v53, 16  ;;  %v2803_v53 = vcombine.high %v11062_v7, %v11062_v7 }
 0x821   :  { %16384 = vst [vmem:[#allocation30_spill] sm:$0xff] %v11052_v12  ;;  %v3274_v23 = vcombine.high %v11049_v18, %v11052_v12  ;;  %v11084_v12 = vrot.slane %v2788_v11, %v10594_v49  ;;  %v16390_v11 = vld [vmem:[#allocation74_spill] sm:$0xff]  ;;  %v2438_v18 = vcombine.high %v2437_v41, %v2437_v41  ;;  %v2880_v0 = vrot.slane %v2528_v35, %v10326_v10 }
 0x822   :  { %v11076_v46 = vpop.permute.xlu1 %2051  ;;  %v2073_v6 = vpop.permute.xlu0 %2072  ;;  %v2555_v27 = vcombine.high %v16390_v11, %v16390_v11  ;;  %v11114_v34 = vcvt.s32.f32 %v1663_v61  ;;  %v2872_v35 = vrot.slane %v2520_v59, %v10326_v10  ;;  %v11127_v55 = vrot.slane %v2803_v53, %v10326_v10 }
 0x823   :  { %v11087_v54 = vrot.slane %v3274_v23, %v16332_v45  ;;  %v11104_v23 = vrot.slane %v2754_v2, %v10326_v10  ;;  %v1678_v2 = vshra.s32 %v11091_v36, 16  ;;  %v2804_v11 = vcombine.high %v11084_v12, %v11084_v12 }
 0x824   :  { %1651 = vmin.xlane.f32.xlu1 %v11078_v17  ;;  %16392 = vst [vmem:[#allocation66_spill] sm:$0xff] %v11114_v34  ;;  %v3143_v62 = vadd.f32 %v2880_v0, %v2073_v6  ;;  %v11130_v61 = vrot.slane %v2437_v41, %v10594_v49  ;;  %v2562_v36 = vrot.slane %v2555_v27, %v10594_v49 }
 0x825   :  { %16388 = vst [vmem:[#allocation33_spill] sm:$0xff] %v11087_v54  ;;  %3817 = vrot.lane.b32.xlu0 %v11087_v54, %s8784_s23  ;;  %v11122_v54 = vsel %vm15971_vm1, %v10971_v4, 2147483647  ;;  %v11135_v59 = vrot.slane %v2438_v18, %v10594_v49  ;;  %v3141_v6 = vadd.f32 %v2872_v35, %v2059_v51  ;;  %v2876_v4 = vrot.slane %v2527_v47, %v10326_v10 }
 0x826   :  { %v2066_v60 = vpop.permute.xlu1 %2065  ;;  %v11112_v17 = vpop.permute.xlu0 %2086  ;;  %16393 = vst [vmem:[#allocation43_spill] sm:$0xff] %v11122_v54  ;;  %v2884_v0 = vrot.slane %v2529_v44, %v10326_v10  ;;  %v2488_v53 = vcombine.high %v2487_v30, %v2487_v30  ;;  %v11144_v41 = vcvt.s32.f32 %v1678_v2  ;;  %v11148_v27 = vrot.slane %v2804_v11, %v10326_v10 }
 0x827   :  { %16391 = vst [vmem:[#allocation75_spill] sm:$0xff] %v11112_v17  ;;  %v3325_v18 = vcombine.low %v3141_v6, %v3143_v62  ;;  %v3142_v51 = vadd.f32 %v2876_v4, %v2066_v60  ;;  %v2453_v44 = vcombine.high %v11130_v61, %v11130_v61  ;;  %v2570_v30 = vrot.slane %v2562_v36, %v10594_v49  ;;  %v16394_v4 = vld [vmem:[#allocation73_spill] sm:$0xff] }
 0x828   :  { %1666 = vmin.xlane.f32.xlu1 %v11114_v34  ;;  %v1693_v34 = vshra.s32 %v11122_v54, 16  ;;  %v2563_v2 = vcombine.high %v2562_v36, %v2562_v36  ;;  %v3164_v54 = vadd.f32 %v10995_v33, %v10670_v38  ;;  %v3163_v11 = vadd.f32 %v10998_v13, %v10672_v21 }
 0x829   :  { %v2454_v60 = vcombine.high %v11135_v59, %v11135_v59  ;;  %v2503_v62 = vcombine.high %v11140_v57, %v11140_v57  ;;  %v11165_v6 = vrot.slane %v2488_v53, %v10594_v49  ;;  %v16396_v21 = vrot.slane %v10923_v26, %v10326_v10 }
 0x82a   :  { %v2080_v17 = vpop.permute.xlu1 %2079  ;;  %v11142_v37 = vpop.permute.xlu0 %2100  ;;  %v11171_v38 = vcvt.s32.f32 %v1693_v34  ;;  %v16397_v13 = vrot.slane %v10926_v5, %v10326_v10  ;;  %v11182_v53 = vrot.slane %v3325_v18, %v16329_v31  ;;  %v2577_v26 = vrot.slane %v2563_v2, %v10594_v49 }
 0x82b   :  { %v3144_v35 = vadd.f32 %v2884_v0, %v2080_v17  ;;  %v2530_v0 = vcombine.high %v16394_v4, %v16394_v4  ;;  %v3162_v33 = vadd.f32 %v16396_v21, %v10652_v8  ;;  %v11188_v4 = vrot.slane %v2453_v44, %v10326_v10 }
 0x82c   :  { %1681 = vmin.xlane.f32.xlu1 %v11144_v41  ;;  %16395 = vst [vmem:[#allocation67_spill] sm:$0xff] %v11171_v38  ;;  %v2578_v8 = vcombine.high %v2570_v30, %v2570_v30  ;;  %v3171_v44 = vadd.f32 %v11041_v24, %v10706_v56  ;;  %v11213_v2 = vrot.slane %v2503_v62, %v10326_v10 }
 0x82d   :  { %v3333_v17 = vcombine.low %v3142_v51, %v3144_v35  ;;  %v3161_v51 = vadd.f32 %v16397_v13, %v10654_v20  ;;  %v3503_v21 = vcombine.low %v3162_v33, %v3164_v54  ;;  %v3172_v20 = vadd.f32 %v11072_v58, %v10704_v14 }
 0x82e   :  { %v11169_v36 = vpop.permute.xlu1 %2093  ;;  %v2115_v47 = vpop.permute.xlu0 %2114  ;;  %v2504_v13 = vcombine.high %v11165_v6, %v11165_v6  ;;  %v2537_v34 = vrot.slane %v2530_v0, %v10594_v49  ;;  %v16398_v54 = vrot.slane %v11001_v39, %v10326_v10  ;;  %v16399_v24 = vrot.slane %v10981_v15, %v10326_v10  ;;  %v16400_v39 = vld [vmem:[#allocation76_spill] sm:$0xff] }
 0x82f   :  { %v11185_v35 = vrot.slane %v3333_v17, %v16329_v31  ;;  %v3495_v5 = vcombine.low %v3161_v51, %v3163_v11  ;;  %v2836_v17 = vrot.slane %v2454_v60, %v10326_v10  ;;  %v2860_v60 = vrot.slane %v11165_v6, %v10326_v10 }
 0x830   :  { %1696 = vmin.xlane.f32.xlu1 %v11171_v38  ;;  %v3170_v14 = vadd.f32 %v16398_v54, %v10688_v19  ;;  %v3169_v11 = vadd.f32 %v16399_v24, %v10690_v42  ;;  %v2580_v19 = vcombine.high %v16400_v39, %v16400_v39  ;;  %v2579_v33 = vcombine.high %v2577_v26, %v2577_v26 }
 0x831   :  { %v3342_v18 = vcombine.high %v11182_v53, %v11185_v35  ;;  %v11227_v51 = vrot.slane %v3503_v21, %v16329_v31  ;;  %v11230_v62 = vrot.slane %v3495_v5, %v16329_v31  ;;  %v2912_v54 = vrot.slane %v2578_v8, %v10326_v10 }
 0x832   :  { %v11204_v38 = vpop.permute.xlu1 %2107  ;;  %v2129_v0 = vpop.permute.xlu0 %2128  ;;  %v3563_v42 = vcombine.low %v3169_v11, %v3171_v44  ;;  %v3180_v15 = vadd.f32 %v11104_v23, %v10747_v32  ;;  %v2868_v24 = vrot.slane %v2504_v13, %v10326_v10  ;;  %v11239_v39 = vrot.slane %v2537_v34, %v10594_v49 }
 0x833   :  { %v11216_v56 = vrot.slane %v3342_v18, %v16332_v45  ;;  %v3571_v18 = vcombine.low %v3170_v14, %v3172_v20  ;;  %v3179_v5 = vadd.f32 %v11096_v29, %v10749_v1  ;;  %v2538_v58 = vcombine.high %v2537_v34, %v2537_v34 }
 0x834   :  { %v2904_v20 = vrot.slane %v2570_v30, %v10326_v10  ;;  %v3151_v8 = vadd.f32 %v2912_v54, %v2129_v0  ;;  %v16401_v44 = vrot.slane %v11026_v25, %v10326_v10  ;;  %v2908_v32 = vrot.slane %v2577_v26, %v10326_v10 }
 0x835   :  { %3821 = vrot.lane.b32.xlu0 %v11216_v56, %s8784_s23  ;;  %v2587_v23 = vrot.slane %v2580_v19, %v10594_v49  ;;  %v2916_v13 = vrot.slane %v2579_v33, %v10326_v10  ;;  %v11252_v11 = vrot.slane %v3571_v18, %v16329_v31  ;;  %v16402_v1 = vrot.slane %v11030_v16, %v10326_v10 }
 0x836   :  { %v2122_v21 = vpop.permute.xlu1 %2121  ;;  %v3178_v14 = vadd.f32 %v16401_v44, %v10725_v3  ;;  %v3149_v30 = vadd.f32 %v2904_v20, %v2115_v47  ;;  %v3512_v34 = vcombine.high %v11230_v62, %v11227_v51  ;;  %v11261_v3 = vrot.slane %v3563_v42, %v16329_v31 }
 0x837   :  { %v3177_v29 = vadd.f32 %v16402_v1, %v10727_v52  ;;  %v3188_v26 = vadd.f32 %v11148_v27, %v10818_v9  ;;  %v3187_v0 = vadd.f32 %v11127_v55, %v10820_v40  ;;  %v3150_v54 = vadd.f32 %v2908_v32, %v2122_v21 }
 0x838   :  { %v3639_v25 = vcombine.low %v3178_v14, %v3180_v15  ;;  %v3393_v18 = vcombine.low %v3149_v30, %v3151_v8  ;;  %v16403_v52 = vrot.slane %v11084_v12, %v10326_v10  ;;  %v16404_v42 = vrot.slane %v11062_v7, %v10326_v10 }
 0x839   :  { %v3631_v33 = vcombine.low %v3177_v29, %v3179_v5  ;;  %v2888_v9 = vrot.slane %v11239_v39, %v10326_v10  ;;  %v2553_v40 = vcombine.high %v11239_v39, %v11239_v39  ;;  %v2552_v55 = vrot.slane %v2538_v58, %v10594_v49 }
 0x83a   :  { %v2136_v19 = vpop.permute.xlu1 %2135  ;;  %v3186_v47 = vadd.f32 %v16403_v52, %v10793_v28  ;;  %v3185_v15 = vadd.f32 %v16404_v42, %v10795_v48  ;;  %v2588_v21 = vcombine.high %v2587_v23, %v2587_v23  ;;  %v11281_v5 = vrot.slane %v3512_v34, %v16332_v45 }
 0x83b   :  { %v3152_v16 = vadd.f32 %v2916_v13, %v2136_v19  ;;  %v3132_v20 = vadd.f32 %v2836_v17, %v10940_v50  ;;  %v3580_v48 = vcombine.high %v11261_v3, %v11252_v11  ;;  %v11287_v7 = vrot.slane %v3639_v25, %v16329_v31 }
 0x83c   :  { %v3707_v12 = vcombine.low %v3186_v47, %v3188_v26  ;;  %v3699_v28 = vcombine.low %v3185_v15, %v3187_v0  ;;  %v11290_v8 = vrot.slane %v3631_v33, %v16329_v31  ;;  %v11293_v58 = vrot.slane %v3393_v18, %v16329_v31  ;;  %v16410_v47 = vld [vmem:[#allocation28_spill] sm:$0xff] }
 0x83d   :  { %v3401_v27 = vcombine.low %v3150_v54, %v3152_v16  ;;  %v3131_v14 = vadd.f32 %v11188_v4, %v10876_v43  ;;  %v16405_v50 = vrot.slane %v11135_v59, %v10326_v10  ;;  %v2896_v32 = vrot.slane %v2553_v40, %v10326_v10  ;;  %v16406_v43 = vld [vmem:[#allocation45_spill] sm:$0xff]  ;;  %v16407_v4 = vld [vmem:[#allocation14_spill] sm:$0xff] }
 0x83e   :  { %v11306_v13 = vrot.slane %v2587_v23, %v10594_v49  ;;  %v2554_v1 = vcombine.high %v2552_v55, %v2552_v55  ;;  %v2602_v29 = vrot.slane %v2588_v21, %v10594_v49  ;;  %v16408_v34 = vcombine.low %v16406_v43, %v16407_v4  ;;  %v2150_v19 = vpop.permute.xlu1 %2149 }
 0x83f   :  { %v11296_v44 = vrot.slane %v3401_v27, %v16329_v31  ;;  %v3130_v17 = vadd.f32 %v16405_v50, %v10902_v63  ;;  %v11320_v63 = vrot.slane %v3707_v12, %v16329_v31  ;;  %v11323_v23 = vrot.slane %v3699_v28, %v16329_v31  ;;  %v16415_v28 = vld [vmem:[#allocation77_spill] sm:$0xff] }
 0x840   :  { %v11317_v59 = vrot.slane %v16408_v34, %v16332_v45  ;;  %v16409_v25 = vrot.slane %v11130_v61, %v10326_v10  ;;  %v3140_v33 = vadd.f32 %v2868_v24, %v11076_v46  ;;  %v11331_v18 = vrot.slane %v3580_v48, %v16332_v45  ;;  %v16411_v46 = vld [vmem:[#allocation32_spill] sm:$0xff] }
 0x841   :  { %3831 = vrot.lane.b32.xlu1 %v11281_v5, %s8784_s23  ;;  %v3410_v30 = vcombine.high %v11293_v58, %v11296_v44  ;;  %v3231_v0 = vcombine.low %v3130_v17, %v3132_v20  ;;  %v3648_v16 = vcombine.high %v11290_v8, %v11287_v7  ;;  %v3139_v42 = vadd.f32 %v11213_v2, %v16410_v47 }
 0x842   :  { %v3129_v26 = vadd.f32 %v16409_v25, %v10853_v22  ;;  %v2892_v61 = vrot.slane %v2552_v55, %v10326_v10  ;;  %v2143_v22 = vpop.permute.xlu0 %2142  ;;  %v2603_v15 = vcombine.high %v11306_v13, %v11306_v13  ;;  %v3138_v24 = vadd.f32 %v2860_v60, %v16411_v46  ;;  %v16412_v55 = vld [vmem:[#allocation31_spill] sm:$0xff]  ;;  %v16414_v60 = vld [vmem:[#allocation46_spill] sm:$0xff]  ;;  %v2164_v25 = vpop.permute.xlu1 %2163 }
 0x843   :  { %v11334_v54 = vrot.slane %v3410_v30, %v16332_v45  ;;  %v2900_v40 = vrot.slane %v2554_v1, %v10326_v10  ;;  %v2604_v27 = vcombine.high %v2602_v29, %v2602_v29  ;;  %v11353_v2 = vrot.slane %v3231_v0, %v16329_v31 }
 0x844   :  { %v3223_v52 = vcombine.low %v3129_v26, %v3131_v14  ;;  %v16413_v21 = vrot.slane %v11140_v57, %v10326_v10  ;;  %v3716_v6 = vcombine.high %v11323_v23, %v11320_v63  ;;  %v16416_v20 = vcombine.low %v16414_v60, %v16415_v28  ;;  %v16422_v60 = vld [vmem:[#allocation50_spill] sm:$0xff] }
 0x845   :  { %3835 = vrot.lane.b32.xlu1 %v11331_v18, %s8784_s23  ;;  %3825 = vrot.lane.b32.xlu0 %v11334_v54, %s8784_s23  ;;  %v3299_v14 = vcombine.low %v3138_v24, %v3140_v33  ;;  %v3148_v50 = vadd.f32 %v2900_v40, %v11204_v38  ;;  %v11369_v17 = vrot.slane %v3648_v16, %v16332_v45  ;;  %v8796_v1 = vmov 0.0  }
 0x846   :  { %v3137_v12 = vadd.f32 %v16413_v21, %v16412_v55  ;;  %v11365_v48 = vrot.slane %v16416_v20, %v16332_v45  ;;  %v3493_v57 = vcombine.high %v11317_v59, %v8796_v1  ;;  %v11374_v30 = vrot.slane %v3223_v52, %v16329_v31  ;;  %v2157_v33 = vpop.permute.xlu0 %2156 }
 0x847   :  { %v2928_v4 = vrot.slane %v2603_v15, %v10326_v10  ;;  %v2924_v34 = vrot.slane %v2602_v29, %v10326_v10  ;;  %v3147_v26 = vadd.f32 %v2896_v32, %v11142_v37  ;;  %v3146_v38 = vadd.f32 %v2892_v61, %v11169_v36  ;;  %v16417_v36 = vld [vmem:[#allocation47_spill] sm:$0xff]  ;;  %v16418_v32 = vld [vmem:[#allocation78_spill] sm:$0xff] }
 0x848   :  { %v3291_v43 = vcombine.low %v3137_v12, %v3139_v42  ;;  %v2932_v0 = vrot.slane %v2604_v27, %v10326_v10  ;;  %v11385_v16 = vrot.slane %v3716_v6, %v16332_v45  ;;  %v3561_v29 = vcombine.high %v11365_v48, %v8796_v1  ;;  %v16420_v61 = vld [vmem:[#allocation75_spill] sm:$0xff] }
 0x849   :  { %3839 = vrot.lane.b32.xlu1 %v11369_v17, %s8784_s23  ;;  %3765 = vrot.lane.b32.xlu0 %v3493_v57, %s8797_s16  ;;  %v3240_v37 = vcombine.high %v11374_v30, %v11353_v2  ;;  %v16419_v52 = vcombine.low %v16417_v36, %v16418_v32  ;;  %v11398_v42 = vrot.slane %v3299_v14, %v16329_v31 }
 0x84a   :  { %v3145_v15 = vadd.f32 %v2888_v9, %v16420_v61  ;;  %v3367_v46 = vcombine.low %v3146_v38, %v3148_v50  ;;  %v3156_v24 = vadd.f32 %v2932_v0, %v2164_v25  ;;  %v11405_v40 = vrot.slane %v3291_v43, %v16329_v31  ;;  %v16421_v9 = vld [vmem:[#allocation23_spill] sm:$0xff]  ;;  %v16424_v0 = vld [vmem:[#allocation18_spill] sm:$0xff] }
 0x84b   :  { %v11395_v47 = vrot.slane %v16419_v52, %v16332_v45  ;;  %v2920_v27 = vrot.slane %v11306_v13, %v10326_v10  ;;  %v3155_v21 = vadd.f32 %v2928_v4, %v2157_v33  ;;  %v3154_v12 = vadd.f32 %v2924_v34, %v2150_v19 }
 0x84c   :  { %v3359_v55 = vcombine.low %v3145_v15, %v3147_v26  ;;  %v11413_v6 = vrot.slane %v3240_v37, %v16332_v45  ;;  %v16423_v28 = vcombine.low %v16421_v9, %v16422_v60  ;;  %v11424_v13 = vrot.slane %v3367_v46, %v16329_v31  ;;  %v16426_v15 = vld [vmem:[#allocation79_spill] sm:$0xff] }
 0x84d   :  { %3843 = vrot.lane.b32.xlu1 %v11385_v16, %s8784_s23  ;;  %3769 = vrot.lane.b32.xlu0 %v3561_v29, %s8797_s16  ;;  %v3629_v39 = vcombine.high %v11395_v47, %v8796_v1  ;;  %v3153_v19 = vadd.f32 %v2920_v27, %v2143_v22  ;;  %v3435_v14 = vcombine.low %v3154_v12, %v3156_v24  ;;  %v16429_v12 = vld [vmem:[#allocation86_spill] sm:$0xff] }
 0x84e   :  { %v11421_v20 = vrot.slane %v16423_v28, %v16332_v45  ;;  %v3308_v50 = vcombine.high %v11405_v40, %v11398_v42  ;;  %v11429_v57 = vrot.slane %v3359_v55, %v16329_v31  ;;  %v3511_v38 = vcombine.low %v11230_v62, %v11227_v51  ;;  %v16425_v51 = vld [vmem:[#allocation19_spill] sm:$0xff]  ;;  %v16431_v28 = vld [vmem:[#allocation58_spill] sm:$0xff] }
 0x84f   :  { %v3427_v43 = vcombine.low %v3153_v19, %v3155_v21  ;;  %v11435_v4 = vrot.slane %v3435_v14, %v16329_v31  ;;  %v3494_v33 = vcombine.high %v16424_v0, %v8796_v1  ;;  %v3579_v36 = vcombine.low %v11261_v3, %v11252_v11  ;;  %v16428_v21 = vld [vmem:[#allocation26_spill] sm:$0xff] }
 0x850   :  { %v11438_v34 = vrot.slane %v3308_v50, %v16332_v45  ;;  %v3697_v22 = vcombine.high %v11421_v20, %v8796_v1  ;;  %v3376_v25 = vcombine.high %v11429_v57, %v11424_v13  ;;  %v3562_v62 = vcombine.high %v16425_v51, %v8796_v1  ;;  %v16432_v19 = vld [vmem:[#allocation30_spill] sm:$0xff] }
 0x851   :  { %3815 = vrot.lane.b32.xlu1 %v11413_v6, %s8784_s23  ;;  %3773 = vrot.lane.b32.xlu0 %v3629_v39, %s8797_s16  ;;  %v11445_v26 = vrot.slane %v3427_v43, %v16329_v31  ;;  %v11470_v52 = vrot.slane %v3511_v38, %v16332_v45  ;;  %v3647_v61 = vcombine.low %v11290_v8, %v11287_v7  ;;  %v16427_v7 = vld [vmem:[#allocation24_spill] sm:$0xff] }
 0x852   :  { %v11455_v29 = vrot.slane %v3376_v25, %v16332_v45  ;;  %v3630_v11 = vcombine.high %v16426_v15, %v8796_v1  ;;  %v11482_v46 = vrot.slane %v3579_v36, %v16332_v45  ;;  %v3715_v27 = vcombine.low %v11323_v23, %v11320_v63 }
 0x853   :  { %v3444_v37 = vcombine.high %v11445_v26, %v11435_v4  ;;  %v3527_v3 = vcombine.high %v11470_v52, %v8796_v1  ;;  %v11487_v24 = vrot.slane %v3647_v61, %v16332_v45  ;;  %v3698_v8 = vcombine.high %v16427_v7, %v8796_v1 }
 0x854   :  { %v3595_v55 = vcombine.high %v11482_v46, %v8796_v1  ;;  %v16430_v39 = vcombine.low %v16428_v21, %v16429_v12  ;;  %v3341_v63 = vcombine.low %v11182_v53, %v11185_v35  ;;  %v16433_v14 = vcombine.low %v16431_v28, %v16432_v19 }
 0x855   :  { %3819 = vrot.lane.b32.xlu1 %v11438_v34, %s8784_s23  ;;  %3777 = vrot.lane.b32.xlu0 %v3697_v22, %s8797_s16  ;;  %v11467_v32 = vrot.slane %v3444_v37, %v16332_v45  ;;  %v3663_v60 = vcombine.high %v11487_v24, %v8796_v1  ;;  %v11516_v43 = vrot.slane %v3715_v27, %v16332_v45  ;;  %v16434_v37 = vld [vmem:[#allocation87_spill] sm:$0xff] }
 0x856   :  { %v11499_v9 = vrot.slane %v16430_v39, %v16332_v45  ;;  %v11513_v50 = vrot.slane %v16433_v14, %v16332_v45  ;;  %v3409_v22 = vcombine.low %v11293_v58, %v11296_v44  ;;  %v11527_v25 = vrot.slane %v3341_v63, %v16332_v45  ;;  %v11619_v63 = vpop.permute.xlu0 %3829  ;;  %v16437_v14 = vld [vmem:[#allocation21_spill] sm:$0xff] }
 0x857   :  { %v3731_v35 = vcombine.high %v11516_v43, %v8796_v1  ;;  %v3528_v38 = vcombine.high %v11281_v5, %v8796_v1  ;;  %v3596_v44 = vcombine.high %v11331_v18, %v8796_v1  ;;  %v3239_v5 = vcombine.low %v11374_v30, %v11353_v2 }
 0x858   :  { %v3221_v23 = vcombine.high %v11499_v9, %v8796_v1  ;;  %v3289_v53 = vcombine.high %v11513_v50, %v8796_v1  ;;  %v3357_v0 = vcombine.high %v11527_v25, %v8796_v1  ;;  %v11536_v58 = vrot.slane %v3409_v22, %v16332_v45 }
 0x859   :  { %3823 = vrot.lane.b32.xlu1 %v11455_v29, %s8784_s23  ;;  %3893 = vrot.lane.b32.xlu0 %v3494_v33, %s8798_s17  ;;  %v3222_v36 = vcombine.high %v16434_v37, %v8796_v1  ;;  %v3664_v51 = vcombine.high %v11369_v17, %v8796_v1  ;;  %v3307_v18 = vcombine.low %v11405_v40, %v11398_v42 }
 0x85a   :  { %v3425_v33 = vcombine.high %v11536_v58, %v8796_v1  ;;  %v3732_v15 = vcombine.high %v11385_v16, %v8796_v1  ;;  %v11561_v2 = vrot.slane %v3239_v5, %v16332_v45  ;;  %v3375_v17 = vcombine.low %v11429_v57, %v11424_v13  ;;  %v11627_v19 = vpop.permute.xlu0 %3833 }
 0x85b   :  { %v3358_v30 = vcombine.high %v11216_v56, %v8796_v1  ;;  %v11572_v40 = vrot.slane %v3307_v18, %v16332_v45  ;;  %v3426_v13 = vcombine.high %v11334_v54, %v8796_v1  ;;  %v3324_v21 = vcombine.high %v11438_v34, %v8796_v1  ;;  %v16436_v34 = vld [vmem:[#allocation20_spill] sm:$0xff] }
 0x85c   :  { %v3255_v42 = vcombine.high %v11561_v2, %v8796_v1  ;;  %v11585_v57 = vrot.slane %v3375_v17, %v16332_v45  ;;  %v3392_v39 = vcombine.high %v11455_v29, %v8796_v1  ;;  %v1707_v28 = vand.u32 65535, %v16436_v34  ;;  %v16446_v34 = vld [vmem:[#allocation83_spill] sm:$0xff] }
 0x85d   :  { %3897 = vrot.lane.b32.xlu0 %v3562_v62, %s8798_s17  ;;  %3827 = vrot.lane.b32.xlu1 %v11467_v32, %s8784_s23  ;;  %v16435_v62 = vld [vmem:[#allocation33_spill] sm:$0xff]  ;;  %v3323_v56 = vcombine.high %v11572_v40, %v8796_v1 }
 0x85e   :  { %v3290_v61 = vcombine.high %v16435_v62, %v8796_v1  ;;  %v3391_v27 = vcombine.high %v11585_v57, %v8796_v1  ;;  %v1709_v22 = vcvt.s32.f32 %v1707_v28  ;;  %v1782_v28 = vand.u32 65535, %v16446_v34 }
 0x861   :  { %3901 = vrot.lane.b32.xlu0 %v3630_v11, %s8798_s17  ;;  %3767 = vrot.lane.b32.xlu1 %v3527_v3, %s8797_s16  ;;  %v3443_v11 = vcombine.low %v11445_v26, %v11435_v4 }
 0x863   :  { %v11594_v4 = vrot.slane %v3443_v11, %v16332_v45 }
 0x865   :  { %3905 = vrot.lane.b32.xlu0 %v3698_v8, %s8798_s17  ;;  %3771 = vrot.lane.b32.xlu1 %v3595_v55, %s8797_s16  ;;  %v3459_v54 = vcombine.high %v11594_v4, %v8796_v1  ;;  %v3256_v8 = vcombine.high %v11413_v6, %v8796_v1  ;;  %v3460_v6 = vcombine.high %v11467_v32, %v8796_v1  ;;  %v16439_v1 = vld [vmem:[#allocation49_spill] sm:$0xff] }
 0x869   :  { %3749 = vrot.lane.b32.xlu0 %v3221_v23, %s8797_s16  ;;  %3775 = vrot.lane.b32.xlu1 %v3663_v60, %s8797_s16 }
 0x86d   :  { %3753 = vrot.lane.b32.xlu0 %v3289_v53, %s8797_s16  ;;  %3779 = vrot.lane.b32.xlu1 %v3731_v35, %s8797_s16  ;;  %v16438_v53 = vld [vmem:[#allocation48_spill] sm:$0xff] }
 0x86e   :  { %v1722_v35 = vand.u32 65535, %v16438_v53  ;;  %v16447_v53 = vld [vmem:[#allocation84_spill] sm:$0xff] }
 0x871   :  { %3757 = vrot.lane.b32.xlu0 %v3357_v0, %s8797_s16  ;;  %3895 = vrot.lane.b32.xlu1 %v3528_v38, %s8798_s17  ;;  %v11634_v38 = vpop.permute.xlu0 %3837 }
 0x875   :  { %3761 = vrot.lane.b32.xlu0 %v3425_v33, %s8797_s16  ;;  %3899 = vrot.lane.b32.xlu1 %v3596_v44, %s8798_s17  ;;  %v1724_v44 = vcvt.s32.f32 %v1722_v35  ;;  %v16440_v33 = vld [vmem:[#allocation80_spill] sm:$0xff]  ;;  %v11641_v37 = vpop.permute.xlu0 %3841 }
 0x876   :  { %v1737_v5 = vand.u32 65535, %v16440_v33 }
 0x878   :  { %v1739_v62 = vcvt.s32.f32 %v1737_v5 }
 0x879   :  { %3877 = vrot.lane.b32.xlu0 %v3222_v36, %s8798_s17  ;;  %3903 = vrot.lane.b32.xlu1 %v3664_v51, %s8798_s17  ;;  %v16441_v51 = vld [vmem:[#allocation81_spill] sm:$0xff] }
 0x87d   :  { %3881 = vrot.lane.b32.xlu0 %v3290_v61, %s8798_s17  ;;  %3907 = vrot.lane.b32.xlu1 %v3732_v15, %s8798_s17  ;;  %v16442_v61 = vld [vmem:[#allocation22_spill] sm:$0xff] }
 0x87e   :  { %v1752_v15 = vand.u32 65535, %v16442_v61  ;;  %v16450_v61 = vld [vmem:[#allocation53_spill] sm:$0xff] }
 0x881   :  { %v11574_v16 = vpop.xlane.xlu1 %1711  ;;  %3885 = vrot.lane.b32.xlu0 %v3358_v30, %s8798_s17  ;;  %3751 = vrot.lane.b32.xlu1 %v3255_v42, %s8797_s16  ;;  %v16443_v42 = vld [vmem:[#allocation51_spill] sm:$0xff] }
 0x882   :  { %vm1713_vm5 = vcmp.eq.f32.partialorder %v16437_v14, %v11574_v16 }
 0x883   :  { %v1714_v0 = vsel %vm1713_vm5, %v1709_v22, inf }
 0x885   :  { %v11587_v3 = vpop.xlane.xlu1 %1726  ;;  %3889 = vrot.lane.b32.xlu0 %v3426_v13, %s8798_s17  ;;  %3755 = vrot.lane.b32.xlu1 %v3323_v56, %s8797_s16  ;;  %v1754_v13 = vcvt.s32.f32 %v1752_v15  ;;  %v16444_v56 = vld [vmem:[#allocation82_spill] sm:$0xff]  ;;  %v1812_v15 = vand.u32 65535, %v16450_v61 }
 0x886   :  { %vm1728_vm6 = vcmp.eq.f32.partialorder %v16439_v1, %v11587_v3  ;;  %v16448_v1 = vld [vmem:[#allocation25_spill] sm:$0xff] }
 0x887   :  { %v1729_v36 = vsel %vm1728_vm6, %v1724_v44, inf  ;;  %v11648_v17 = vpop.permute.xlu0 %3813  ;;  %v1797_v44 = vand.u32 65535, %v16448_v1  ;;  %vm16083_vm6 = vcmask 97280  }
 0x889   :  { %v11596_v26 = vpop.xlane.xlu1 %1741  ;;  %3759 = vrot.lane.b32.xlu1 %v3391_v27, %s8797_s16  ;;  %v1767_v27 = vand.u32 65535, %v16444_v56 }
 0x88a   :  { %vm1743_vm7 = vcmp.eq.f32.partialorder %v16441_v51, %v11596_v26 }
 0x88b   :  { %v1744_v30 = vsel %vm1743_vm7, %v1739_v62, inf  ;;  %v1799_v62 = vcvt.s32.f32 %v1797_v44  ;;  %vm5832_vm7 = vcmask 125952  }
 0x88d   :  { %v11601_v7 = vpop.xlane.xlu1 %1756  ;;  %3763 = vrot.lane.b32.xlu1 %v3459_v54, %s8797_s16 }
 0x88e   :  { %vm1758_vm8 = vcmp.eq.f32.partialorder %v16443_v42, %v11601_v7 }
 0x891   :  { %v11606_v55 = vpop.xlane.xlu1 %1771  ;;  %3879 = vrot.lane.b32.xlu1 %v3256_v8, %s8798_s17  ;;  %v1759_v8 = vsel %vm1758_vm8, %v1754_v13, inf  ;;  %v16451_v13 = vld [vmem:[#allocation54_spill] sm:$0xff] }
 0x895   :  { %v11611_v12 = vpop.xlane.xlu1 %1786  ;;  %3883 = vrot.lane.b32.xlu1 %v3324_v21, %s8798_s17  ;;  %v16445_v21 = vld [vmem:[#allocation52_spill] sm:$0xff] }
 0x896   :  { %vm1773_vm9 = vcmp.eq.f32.partialorder %v16445_v21, %v11606_v55  ;;  %vm1788_vm12 = vcmp.eq.f32.partialorder %v16447_v53, %v11611_v12 }
 0x897   :  { %v11655_v54 = vpop.permute.xlu0 %3817 }
 0x899   :  { %v11616_v60 = vpop.xlane.xlu1 %1801  ;;  %3887 = vrot.lane.b32.xlu1 %v3392_v39, %s8798_s17 }
 0x89d   :  { %v11623_v23 = vpop.xlane.xlu1 %1816  ;;  %3891 = vrot.lane.b32.xlu1 %v3460_v6, %s8798_s17  ;;  %v1769_v6 = vcvt.s32.f32 %v1767_v27  ;;  %v1814_v27 = vcvt.s32.f32 %v1812_v15  ;;  %v16456_v15 = vld [vmem:[#allocation57_spill] sm:$0xff] }
 0x89e   :  { %vm1818_vm14 = vcmp.eq.f32.partialorder %v16451_v13, %v11623_v23 }
 0x89f   :  { %v1774_v22 = vsel %vm1773_vm9, %v1769_v6, inf  ;;  %v1819_v34 = vsel %vm1818_vm14, %v1814_v27, inf }
 0x8a1   :  { %v11631_v29 = vpop.xlane.xlu1 %1591 }
 0x8a4   :  { %1715 = vmin.xlane.f32.xlu0 %v1714_v0  ;;  %v1784_v0 = vcvt.s32.f32 %v1782_v28  ;;  %v16453_v28 = vld [vmem:[#allocation29_spill] sm:$0xff] }
 0x8a5   :  { %v11638_v32 = vpop.xlane.xlu1 %1606  ;;  %vm1593_vm0 = vcmp.eq.f32.partialorder %v16453_v28, %v11631_v29 }
 0x8a6   :  { %v1789_v5 = vsel %vm1788_vm12, %v1784_v0, inf  ;;  %v16454_v0 = vld [vmem:[#allocation55_spill] sm:$0xff] }
 0x8a7   :  { %v11662_v14 = vpop.permute.xlu0 %3821  ;;  %v1602_v1 = vand.u32 65535, %v16454_v0 }
 0x8a8   :  { %1730 = vmin.xlane.f32.xlu0 %v1729_v36  ;;  %v16449_v36 = vld [vmem:[#allocation27_spill] sm:$0xff] }
 0x8a9   :  { %v11645_v18 = vpop.xlane.xlu1 %1621  ;;  %vm1803_vm13 = vcmp.eq.f32.partialorder %v16449_v36, %v11616_v60  ;;  %v16455_v36 = vld [vmem:[#allocation89_spill] sm:$0xff]  ;;  %v1604_v61 = vcvt.s32.f32 %v1602_v1 }
 0x8aa   :  { %v1804_v42 = vsel %vm1803_vm13, %v1799_v62, inf  ;;  %vm1608_vm2 = vcmp.eq.f32.partialorder %v16455_v36, %v11638_v32 }
 0x8ab   :  { %v1609_v27 = vsel %vm1608_vm2, %v1604_v61, inf  ;;  %v16460_v61 = vld [vmem:[#allocation91_spill] sm:$0xff] }
 0x8ac   :  { %1745 = vmin.xlane.f32.xlu0 %v1744_v30 }
 0x8ad   :  { %v11652_v11 = vpop.xlane.xlu1 %1636 }
 0x8ae   :  { %vm1638_vm8 = vcmp.eq.f32.partialorder %v16460_v61, %v11652_v11  ;;  %v16464_v61 = vld [vmem:[#allocation90_spill] sm:$0xff] }
 0x8b0   :  { %1760 = vmin.xlane.f32.xlu0 %v1759_v8  ;;  %v16452_v8 = vld [vmem:[#allocation85_spill] sm:$0xff] }
 0x8b1   :  { %v11659_v39 = vpop.xlane.xlu1 %1651  ;;  %v1587_v21 = vand.u32 65535, %v16452_v8 }
 0x8b3   :  { %v1589_v53 = vcvt.s32.f32 %v1587_v21  ;;  %v16457_v21 = vld [vmem:[#allocation88_spill] sm:$0xff] }
 0x8b4   :  { %1775 = vmin.xlane.f32.xlu0 %v1774_v22  ;;  %vm1623_vm5 = vcmp.eq.f32.partialorder %v16457_v21, %v11645_v18  ;;  %v16461_v21 = vld [vmem:[#allocation59_spill] sm:$0xff] }
 0x8b5   :  { %v11666_v35 = vpop.xlane.xlu1 %1666 }
 0x8b7   :  { %v11669_v33 = vpop.permute.xlu0 %3825 }
 0x8b8   :  { %1790 = vmin.xlane.f32.xlu0 %v1789_v5  ;;  %v1594_v5 = vsel %vm1593_vm0, %v1589_v53, inf  ;;  %v16458_v53 = vld [vmem:[#allocation56_spill] sm:$0xff] }
 0x8b9   :  { %v11673_v51 = vpop.xlane.xlu1 %1681  ;;  %v1632_v0 = vand.u32 65535, %v16458_v53 }
 0x8ba   :  { %vm1683_vm13 = vcmp.eq.f32.partialorder %v11144_v41, %v11673_v51 }
 0x8bb   :  { %v3766_v30 = vpop.permute.xlu0 %3765 }
 0x8bc   :  { %1805 = vmin.xlane.f32.xlu0 %v1804_v42  ;;  %v1617_v42 = vand.u32 65535, %v16456_v15  ;;  %v3934_v8 = vsel %vm16085_vm3, %v11317_v59, %v3766_v30 }
 0x8bd   :  { %v11678_v56 = vpop.xlane.xlu1 %1696  ;;  %v3951_v1 = vsel %vm16084_vm4, %v3934_v8, %v11619_v63  ;;  %v1647_v63 = vand.u32 65535, %v16461_v21  ;;  %v16466_v21 = vld [vmem:[#allocation66_spill] sm:$0xff] }
 0x8be   :  { %v1619_v28 = vcvt.s32.f32 %v1617_v42  ;;  %vm1668_vm12 = vcmp.eq.f32.partialorder %v16466_v21, %v11666_v35 }
 0x8bf   :  { %v3770_v6 = vpop.permute.xlu0 %3769 }
 0x8c0   :  { %1820 = vmin.xlane.f32.xlu0 %v1819_v34  ;;  %v1624_v36 = vsel %vm1623_vm5, %v1619_v28, inf  ;;  %v3936_v59 = vsel %vm16085_vm3, %v11365_v48, %v3770_v6 }
 0x8c1   :  { %v11683_v22 = vpop.permute.xlu1 %3831  ;;  %v3953_v8 = vsel %vm16084_vm4, %v3936_v59, %v11627_v19  ;;  %v1662_v19 = vand.u32 65535, %v16464_v61 }
 0x8c3   :  { %v3774_v44 = vpop.permute.xlu0 %3773 }
 0x8c4   :  { %1595 = vmin.xlane.f32.xlu0 %v1594_v5  ;;  %v3938_v28 = vsel %vm16085_vm3, %v11395_v47, %v3774_v44 }
 0x8c5   :  { %v11688_v62 = vpop.permute.xlu1 %3835  ;;  %v3955_v59 = vsel %vm16084_vm4, %v3938_v28, %v11634_v38 }
 0x8c7   :  { %v3778_v13 = vpop.permute.xlu0 %3777 }
 0x8c8   :  { %1610 = vmin.xlane.f32.xlu0 %v1609_v27  ;;  %v1634_v27 = vcvt.s32.f32 %v1632_v0 }
 0x8c9   :  { %v11695_v34 = vpop.permute.xlu1 %3839 }
 0x8ca   :  { %v1639_v6 = vsel %vm1638_vm8, %v1634_v27, inf }
 0x8cb   :  { %v3894_v5 = vpop.permute.xlu0 %3893 }
 0x8cc   :  { %v11703_v30 = vsel %vm16083_vm6, %v3951_v1, %v3894_v5  ;;  %1625 = vmin.xlane.f32.xlu0 %v1624_v36  ;;  %v16463_v1 = vld [vmem:[#allocation60_spill] sm:$0xff]  ;;  %v1649_v36 = vcvt.s32.f32 %v1647_v63 }
 0x8cd   :  { %16459 = vst [vmem:[#allocation44_spill] sm:$0xff] %v11703_v30  ;;  %v11707_v15 = vpop.permute.xlu1 %3843  ;;  %v5857_v42 = vsel %vm5832_vm7, %v11703_v30, -inf  ;;  %vm1653_vm9 = vcmp.eq.f32.partialorder %v16463_v1, %v11659_v39 }
 0x8ce   :  { %5858 = vmax.xlane.f32.xlu1 %v5857_v42  ;;  %v1654_v44 = vsel %vm1653_vm9, %v1649_v36, inf  ;;  %v3940_v42 = vsel %vm16085_vm3, %v11421_v20, %v3778_v13 }
 0x8cf   :  { %v3898_v48 = vpop.permute.xlu0 %3897  ;;  %v3957_v28 = vsel %vm16084_vm4, %v3940_v42, %v11641_v37  ;;  %v16470_v37 = vld [vmem:[#allocation67_spill] sm:$0xff] }
 0x8d0   :  { %v11717_v53 = vsel %vm16083_vm6, %v3953_v8, %v3898_v48  ;;  %1640 = vmin.xlane.f32.xlu0 %v1639_v6  ;;  %v1664_v48 = vcvt.s32.f32 %v1662_v19  ;;  %v16467_v6 = vld [vmem:[#allocation92_spill] sm:$0xff]  ;;  %v16469_v19 = vld [vmem:[#allocation43_spill] sm:$0xff]  ;;  %vm1698_vm14 = vcmp.eq.f32.partialorder %v16470_v37, %v11678_v56 }
 0x8d1   :  { %16462 = vst [vmem:[#allocation68_spill] sm:$0xff] %v11717_v53  ;;  %v11721_v5 = vpop.permute.xlu1 %3815  ;;  %v5863_v0 = vsel %vm5832_vm7, %v11717_v53, -inf  ;;  %v1677_v38 = vand.u32 65535, %v16467_v6 }
 0x8d2   :  { %5864 = vmax.xlane.f32.xlu1 %v5863_v0  ;;  %v1669_v13 = vsel %vm1668_vm12, %v1664_v48, inf }
 0x8d3   :  { %v3902_v47 = vpop.permute.xlu0 %3901  ;;  %v1679_v61 = vcvt.s32.f32 %v1677_v38 }
 0x8d4   :  { %v11731_v27 = vsel %vm16083_vm6, %v3955_v59, %v3902_v47  ;;  %1655 = vmin.xlane.f32.xlu0 %v1654_v44  ;;  %v1692_v59 = vand.u32 65535, %v16469_v19 }
 0x8d5   :  { %16465 = vst [vmem:[#allocation70_spill] sm:$0xff] %v11731_v27  ;;  %v11735_v8 = vpop.permute.xlu1 %3819  ;;  %v5869_v63 = vsel %vm5832_vm7, %v11731_v27, -inf  ;;  %v1684_v47 = vsel %vm1683_vm13, %v1679_v61, inf }
 0x8d6   :  { %5870 = vmax.xlane.f32.xlu1 %v5869_v63  ;;  %v1694_v42 = vcvt.s32.f32 %v1692_v59 }
 0x8d7   :  { %v3906_v20 = vpop.permute.xlu0 %3905 }
 0x8d8   :  { %v11743_v1 = vsel %vm16083_vm6, %v3957_v28, %v3906_v20  ;;  %1670 = vmin.xlane.f32.xlu0 %v1669_v13  ;;  %v1699_v21 = vsel %vm1698_vm14, %v1694_v42, inf }
 0x8d9   :  { %16468 = vst [vmem:[#allocation71_spill] sm:$0xff] %v11743_v1  ;;  %v11747_v0 = vpop.permute.xlu1 %3823  ;;  %v5875_v36 = vsel %vm5832_vm7, %v11743_v1, -inf }
 0x8da   :  { %5876 = vmax.xlane.f32.xlu1 %v5875_v36 }
 0x8db   :  { %v3750_v63 = vpop.permute.xlu0 %3749 }
 0x8dc   :  { %1685 = vmin.xlane.f32.xlu0 %v1684_v47 }
 0x8dd   :  { %v11754_v44 = vpop.permute.xlu1 %3827 }
 0x8df   :  { %v3754_v6 = vpop.permute.xlu0 %3753 }
 0x8e0   :  { %1700 = vmin.xlane.f32.xlu0 %v1699_v21 }
 0x8e1   :  { %v3768_v41 = vpop.permute.xlu1 %3767 }
 0x8e2   :  { %v3935_v38 = vsel %vm16085_vm3, %v11470_v52, %v3768_v41 }
 0x8e3   :  { %v3758_v13 = vpop.permute.xlu0 %3757  ;;  %v3952_v36 = vsel %vm16084_vm4, %v3935_v38, %v11683_v22 }
 0x8e5   :  { %v3772_v48 = vpop.permute.xlu1 %3771 }
 0x8e6   :  { %v3937_v19 = vsel %vm16085_vm3, %v11482_v46, %v3772_v48 }
 0x8e7   :  { %v3762_v37 = vpop.permute.xlu0 %3761  ;;  %v3954_v42 = vsel %vm16084_vm4, %v3937_v19, %v11688_v62 }
 0x8e9   :  { %v3776_v28 = vpop.permute.xlu1 %3775 }
 0x8ea   :  { %v3939_v21 = vsel %vm16085_vm3, %v11487_v24, %v3776_v28  ;;  %v3926_v28 = vsel %vm16085_vm3, %v11499_v9, %v3750_v63 }
 0x8eb   :  { %v3956_v41 = vsel %vm16084_vm4, %v3939_v21, %v11695_v34 }
 0x8ed   :  { %v3780_v20 = vpop.permute.xlu1 %3779 }
 0x8ee   :  { %v3941_v38 = vsel %vm16085_vm3, %v11516_v43, %v3780_v20  ;;  %v3943_v43 = vsel %vm16084_vm4, %v3926_v28, %v11648_v17 }
 0x8f1   :  { %v3896_v61 = vpop.permute.xlu1 %3895 }
 0x8f2   :  { %v11763_v59 = vsel %vm16083_vm6, %v3952_v36, %v3896_v61  ;;  %v3878_v36 = vpop.permute.xlu0 %3877  ;;  %v3958_v61 = vsel %vm16084_vm4, %v3941_v38, %v11707_v15 }
 0x8f3   :  { %16471 = vst [vmem:[#allocation72_spill] sm:$0xff] %v11763_v59  ;;  %v5860_v47 = vsel %vm5832_vm7, %v11763_v59, -inf }
 0x8f4   :  { %5861 = vmax.xlane.f32.xlu0 %v5860_v47  ;;  %v3928_v47 = vsel %vm16085_vm3, %v11513_v50, %v3754_v6 }
 0x8f5   :  { %v3900_v52 = vpop.permute.xlu1 %3899  ;;  %v3945_v15 = vsel %vm16084_vm4, %v3928_v47, %v11655_v54  ;;  %v3930_v54 = vsel %vm16085_vm3, %v11527_v25, %v3758_v13 }
 0x8f6   :  { %v11772_v22 = vsel %vm16083_vm6, %v3954_v42, %v3900_v52  ;;  %v11799_v42 = vsel %vm16083_vm6, %v3943_v43, %v3878_v36  ;;  %v3882_v9 = vpop.permute.xlu0 %3881 }
 0x8f7   :  { %16472 = vst [vmem:[#allocation74_spill] sm:$0xff] %v11772_v22  ;;  %v5866_v46 = vsel %vm5832_vm7, %v11772_v22, -inf  ;;  %16475 = vst [vmem:[#allocation45_spill] sm:$0xff] %v11799_v42  ;;  %v5833_v52 = vsel %vm5832_vm7, %v11799_v42, -inf  ;;  %v11806_v17 = vsel %vm16083_vm6, %v3945_v15, %v3882_v9 }
 0x8f8   :  { %5867 = vmax.xlane.f32.xlu0 %v5866_v46  ;;  %16476 = vst [vmem:[#allocation14_spill] sm:$0xff] %v11806_v17  ;;  %v5839_v50 = vsel %vm5832_vm7, %v11806_v17, -inf }
 0x8f9   :  { %v3904_v48 = vpop.permute.xlu1 %3903 }
 0x8fa   :  { %v11781_v62 = vsel %vm16083_vm6, %v3956_v41, %v3904_v48  ;;  %v3886_v48 = vpop.permute.xlu0 %3885 }
 0x8fb   :  { %16473 = vst [vmem:[#allocation73_spill] sm:$0xff] %v11781_v62  ;;  %v5872_v24 = vsel %vm5832_vm7, %v11781_v62, -inf }
 0x8fc   :  { %5873 = vmax.xlane.f32.xlu0 %v5872_v24 }
 0x8fd   :  { %v3908_v19 = vpop.permute.xlu1 %3907 }
 0x8fe   :  { %v11790_v34 = vsel %vm16083_vm6, %v3958_v61, %v3908_v19  ;;  %v3947_v61 = vsel %vm16084_vm4, %v3930_v54, %v11662_v14  ;;  %v3932_v19 = vsel %vm16085_vm3, %v11536_v58, %v3762_v37 }
 0x8ff   :  { %16474 = vst [vmem:[#allocation76_spill] sm:$0xff] %v11790_v34  ;;  %v5878_v20 = vsel %vm5832_vm7, %v11790_v34, -inf  ;;  %v11828_v25 = vsel %vm16083_vm6, %v3947_v61, %v3886_v48 }
 0x900   :  { %5879 = vmax.xlane.f32.xlu0 %v5878_v20  ;;  %16478 = vst [vmem:[#allocation32_spill] sm:$0xff] %v11828_v25  ;;  %v3949_v20 = vsel %vm16084_vm4, %v3932_v19, %v11669_v33  ;;  %v5845_v37 = vsel %vm5832_vm7, %v11828_v25, -inf  ;;  %v16484_v19 = vld [vmem:[#allocation41_spill] sm:$0xff] }
 0x901   :  { %v3752_v63 = vpop.permute.xlu1 %3751 }
 0x902   :  { %v3927_v41 = vsel %vm16085_vm3, %v11561_v2, %v3752_v63 }
 0x903   :  { %v3944_v38 = vsel %vm16084_vm4, %v3927_v41, %v11721_v5  ;;  %v3890_v5 = vpop.permute.xlu0 %3889  ;;  %v1733_v41 = vcvt.f32.s32 %v11587_v3 }
 0x904   :  { %5834 = vmax.xlane.f32.xlu0 %v5833_v52  ;;  %v11844_v47 = vsel %vm16083_vm6, %v3949_v20, %v3890_v5 }
 0x905   :  { %v3756_v21 = vpop.permute.xlu1 %3755  ;;  %16480 = vst [vmem:[#allocation46_spill] sm:$0xff] %v11844_v47  ;;  %v5851_v15 = vsel %vm5832_vm7, %v11844_v47, -inf }
 0x906   :  { %v3929_v24 = vsel %vm16085_vm3, %v11572_v40, %v3756_v21 }
 0x907   :  { %v3946_v40 = vsel %vm16084_vm4, %v3929_v24, %v11735_v8  ;;  %v16483_v24 = vld [vmem:[#allocation34_spill] sm:$0xff] }
 0x908   :  { %5840 = vmax.xlane.f32.xlu0 %v5839_v50  ;;  %v1718_v50 = vcvt.f32.s32 %v11574_v16 }
 0x909   :  { %v3760_v6 = vpop.permute.xlu1 %3759 }
 0x90a   :  { %v3931_v43 = vsel %vm16085_vm3, %v11585_v57, %v3760_v6 }
 0x90b   :  { %v3948_v57 = vsel %vm16084_vm4, %v3931_v43, %v11747_v0  ;;  %v16485_v43 = vld [vmem:[#allocation35_spill] sm:$0xff] }
 0x90d   :  { %v3764_v46 = vpop.permute.xlu1 %3763 }
 0x90e   :  { %v3933_v9 = vsel %vm16085_vm3, %v11594_v4, %v3764_v46  ;;  %v1719_v46 = vshll.u32 %v1718_v50, 16 }
 0x90f   :  { %v3950_v52 = vsel %vm16084_vm4, %v3933_v9, %v11754_v44  ;;  %v1748_v44 = vcvt.f32.s32 %v11596_v26 }
 0x911   :  { %v3880_v36 = vpop.permute.xlu1 %3879 }
 0x912   :  { %v11819_v28 = vsel %vm16083_vm6, %v3944_v38, %v3880_v36  ;;  %v1734_v36 = vshll.u32 %v1733_v41, 16 }
 0x913   :  { %16477 = vst [vmem:[#allocation28_spill] sm:$0xff] %v11819_v28  ;;  %v5836_v2 = vsel %vm5832_vm7, %v11819_v28, -inf }
 0x914   :  { %5837 = vmax.xlane.f32.xlu1 %v5836_v2 }
 0x915   :  { %v3884_v13 = vpop.permute.xlu1 %3883 }
 0x916   :  { %v11835_v14 = vsel %vm16083_vm6, %v3946_v40, %v3884_v13  ;;  %v1749_v13 = vshll.u32 %v1748_v44, 16 }
 0x917   :  { %16479 = vst [vmem:[#allocation31_spill] sm:$0xff] %v11835_v14  ;;  %v5842_v58 = vsel %vm5832_vm7, %v11835_v14, -inf }
 0x918   :  { %5843 = vmax.xlane.f32.xlu0 %v5842_v58  ;;  %5846 = vmax.xlane.f32.xlu1 %v5845_v37  ;;  %v16486_v58 = vld [vmem:[#allocation42_spill] sm:$0xff] }
 0x919   :  { %v3888_v8 = vpop.permute.xlu1 %3887 }
 0x91a   :  { %v11851_v33 = vsel %vm16083_vm6, %v3948_v57, %v3888_v8 }
 0x91b   :  { %16481 = vst [vmem:[#allocation77_spill] sm:$0xff] %v11851_v33  ;;  %v5848_v63 = vsel %vm5832_vm7, %v11851_v33, -inf }
 0x91c   :  { %5849 = vmax.xlane.f32.xlu0 %v5848_v63  ;;  %5852 = vmax.xlane.f32.xlu1 %v5851_v15  ;;  %v1763_v63 = vcvt.f32.s32 %v11601_v7  ;;  %v16487_v15 = vld [vmem:[#allocation69_spill] sm:$0xff] }
 0x91d   :  { %v3892_v21 = vpop.permute.xlu1 %3891 }
 0x91e   :  { %v11860_v0 = vsel %vm16083_vm6, %v3950_v52, %v3892_v21  ;;  %v1764_v41 = vshll.u32 %v1763_v63, 16 }
 0x91f   :  { %16482 = vst [vmem:[#allocation47_spill] sm:$0xff] %v11860_v0  ;;  %v5854_v4 = vsel %vm5832_vm7, %v11860_v0, -inf }
 0x920   :  { %5855 = vmax.xlane.f32.xlu0 %v5854_v4  ;;  %v16488_v4 = vld [vmem:[#allocation36_spill] sm:$0xff] }
 0x931   :  { %v1716_v6 = vpop.xlane.xlu0 %1715 }
 0x932   :  { %v1717_v48 = vcvt.f32.s32 %v1716_v6 }
 0x934   :  { %v1720_v54 = vadd.s32 %v1719_v46, %v1717_v48 }
 0x935   :  { %v1731_v38 = vpop.xlane.xlu0 %1730 }
 0x936   :  { %v11869_v61 = vsel %vm15972_vm15, %v16483_v24, %v1720_v54  ;;  %v1732_v2 = vcvt.f32.s32 %v1731_v38 }
 0x937   :  { %v4210_v5 = vrot.slane %v11869_v61, %v16484_v19  ;;  %v4203_v16 = vrot.slane %v11869_v61, %v10326_v10  ;;  %v4217_v37 = vrot.slane %v11869_v61, %v16486_v58  ;;  %v4224_v52 = vrot.slane %v11869_v61, %v16487_v15 }
 0x938   :  { %v1735_v40 = vadd.s32 %v1734_v36, %v1732_v2  ;;  %v1778_v36 = vcvt.f32.s32 %v11606_v55  ;;  %v16489_v2 = vld [vmem:[#allocation93_spill] sm:$0xff] }
 0x939   :  { %4212 = vbcast.lane.b32.xlu0 %v4210_v5, 256  ;;  %4205 = vbcast.lane.b32.xlu1 %v4203_v16, 256  ;;  %v1746_v3 = vpop.xlane.xlu0 %1745 }
 0x93a   :  { %v11877_v20 = vsel %vm15972_vm15, %v16485_v43, %v1735_v40  ;;  %v1747_v26 = vcvt.f32.s32 %v1746_v3  ;;  %v1779_v3 = vshll.u32 %v1778_v36, 16 }
 0x93b   :  { %v4231_v57 = vrot.slane %v11877_v20, %v10326_v10  ;;  %v4252_v21 = vrot.slane %v11877_v20, %v16487_v15  ;;  %v4238_v48 = vrot.slane %v11877_v20, %v16484_v19  ;;  %v4245_v44 = vrot.slane %v11877_v20, %v16486_v58 }
 0x93c   :  { %v1750_v8 = vadd.s32 %v1749_v13, %v1747_v26  ;;  %v1793_v26 = vcvt.f32.s32 %v11611_v12 }
 0x93d   :  { %4219 = vbcast.lane.b32.xlu1 %v4217_v37, 256  ;;  %4233 = vbcast.lane.b32.xlu0 %v4231_v57, 256  ;;  %v1761_v9 = vpop.xlane.xlu0 %1760 }
 0x93e   :  { %v11890_v50 = vsel %vm15972_vm15, %v16488_v4, %v1750_v8  ;;  %v1762_v6 = vcvt.f32.s32 %v1761_v9  ;;  %v16490_v9 = vld [vmem:[#allocation94_spill] sm:$0xff] }
 0x93f   :  { %v4266_v7 = vrot.slane %v11890_v50, %v16484_v19  ;;  %v4280_v24 = vrot.slane %v11890_v50, %v16487_v15  ;;  %v4259_v13 = vrot.slane %v11890_v50, %v10326_v10  ;;  %v4273_v57 = vrot.slane %v11890_v50, %v16486_v58 }
 0x940   :  { %v1765_v54 = vadd.s32 %v1764_v41, %v1762_v6  ;;  %v1808_v41 = vcvt.f32.s32 %v11616_v60 }
 0x941   :  { %4226 = vbcast.lane.b32.xlu1 %v4224_v52, 256  ;;  %4254 = vbcast.lane.b32.xlu0 %v4252_v21, 256  ;;  %v1776_v46 = vpop.xlane.xlu0 %1775  ;;  %v1794_v21 = vshll.u32 %v1793_v26, 16 }
 0x942   :  { %v11903_v5 = vsel %vm15972_vm15, %v16489_v2, %v1765_v54  ;;  %v1777_v16 = vcvt.f32.s32 %v1776_v46  ;;  %v16491_v54 = vld [vmem:[#allocation95_spill] sm:$0xff] }
 0x943   :  { %v4287_v55 = vrot.slane %v11903_v5, %v10326_v10  ;;  %v4308_v8 = vrot.slane %v11903_v5, %v16487_v15  ;;  %v4294_v4 = vrot.slane %v11903_v5, %v16484_v19 }
 0x944   :  { %v1780_v43 = vadd.s32 %v1779_v3, %v1777_v16  ;;  %v1823_v3 = vcvt.f32.s32 %v11623_v23 }
 0x945   :  { %4240 = vbcast.lane.b32.xlu1 %v4238_v48, 256  ;;  %4268 = vbcast.lane.b32.xlu0 %v4266_v7, 256  ;;  %v1791_v38 = vpop.xlane.xlu0 %1790  ;;  %v4301_v48 = vrot.slane %v11903_v5, %v16486_v58 }
 0x946   :  { %v11916_v63 = vsel %vm15972_vm15, %v16490_v9, %v1780_v43  ;;  %v1792_v52 = vcvt.f32.s32 %v1791_v38 }
 0x947   :  { %v4322_v12 = vrot.slane %v11916_v63, %v16484_v19  ;;  %v4336_v7 = vrot.slane %v11916_v63, %v16487_v15  ;;  %v4315_v2 = vrot.slane %v11916_v63, %v10326_v10 }
 0x948   :  { %v1795_v6 = vadd.s32 %v1794_v21, %v1792_v52  ;;  %v1598_v21 = vcvt.f32.s32 %v11631_v29 }
 0x949   :  { %4247 = vbcast.lane.b32.xlu1 %v4245_v44, 256  ;;  %4282 = vbcast.lane.b32.xlu0 %v4280_v24, 256  ;;  %v1806_v40 = vpop.xlane.xlu0 %1805  ;;  %v1809_v44 = vshll.u32 %v1808_v41, 16 }
 0x94a   :  { %v11929_v38 = vsel %vm15972_vm15, %v16491_v54, %v1795_v6  ;;  %v1807_v36 = vcvt.f32.s32 %v1806_v40  ;;  %v16493_v6 = vld [vmem:[#allocation96_spill] sm:$0xff]  ;;  %v1613_v54 = vcvt.f32.s32 %v11638_v32 }
 0x94b   :  { %v4350_v60 = vrot.slane %v11929_v38, %v16484_v19  ;;  %v4364_v40 = vrot.slane %v11929_v38, %v16487_v15  ;;  %v4343_v9 = vrot.slane %v11929_v38, %v10326_v10 }
 0x94c   :  { %v1810_v16 = vadd.s32 %v1809_v44, %v1807_v36 }
 0x94d   :  { %4261 = vbcast.lane.b32.xlu1 %v4259_v13, 256  ;;  %4289 = vbcast.lane.b32.xlu0 %v4287_v55, 256  ;;  %v1821_v37 = vpop.xlane.xlu0 %1820  ;;  %v4329_v13 = vrot.slane %v11916_v63, %v16486_v58  ;;  %v16492_v55 = vld [vmem:[#allocation37_spill] sm:$0xff] }
 0x94e   :  { %v11942_v43 = vsel %vm15972_vm15, %v16492_v55, %v1810_v16  ;;  %v1822_v26 = vcvt.f32.s32 %v1821_v37  ;;  %v1614_v16 = vshll.u32 %v1613_v54, 16  ;;  %v1628_v55 = vcvt.f32.s32 %v11645_v18 }
 0x94f   :  { %v4371_v23 = vrot.slane %v11942_v43, %v10326_v10  ;;  %v4392_v37 = vrot.slane %v11942_v43, %v16487_v15  ;;  %v4378_v29 = vrot.slane %v11942_v43, %v16484_v19 }
 0x951   :  { %4275 = vbcast.lane.b32.xlu1 %v4273_v57, 256  ;;  %4310 = vbcast.lane.b32.xlu0 %v4308_v8, 256  ;;  %v1596_v46 = vpop.xlane.xlu0 %1595  ;;  %v1824_v8 = vshll.u32 %v1823_v3, 16 }
 0x953   :  { %v1825_v52 = vadd.s32 %v1824_v8, %v1822_v26 }
 0x955   :  { %4296 = vbcast.lane.b32.xlu1 %v4294_v4, 256  ;;  %4324 = vbcast.lane.b32.xlu0 %v4322_v12, 256  ;;  %v1611_v24 = vpop.xlane.xlu0 %1610  ;;  %v4357_v12 = vrot.slane %v11929_v38, %v16486_v58  ;;  %v11955_v41 = vsel %vm15972_vm15, %v16493_v6, %v1825_v52 }
 0x956   :  { %v4406_v36 = vrot.slane %v11955_v41, %v16484_v19  ;;  %v4420_v3 = vrot.slane %v11955_v41, %v16487_v15  ;;  %v4399_v26 = vrot.slane %v11955_v41, %v10326_v10  ;;  %v4413_v18 = vrot.slane %v11955_v41, %v16486_v58 }
 0x959   :  { %4303 = vbcast.lane.b32.xlu1 %v4301_v48, 256  ;;  %4338 = vbcast.lane.b32.xlu0 %v4336_v7, 256  ;;  %v1626_v57 = vpop.xlane.xlu0 %1625  ;;  %v1597_v48 = vcvt.f32.s32 %v1596_v46  ;;  %v1599_v7 = vshll.u32 %v1598_v21, 16  ;;  %v4385_v46 = vrot.slane %v11942_v43, %v16486_v58  ;;  %v1629_v21 = vshll.u32 %v1628_v55, 16 }
 0x95a   :  { %v1627_v52 = vcvt.f32.s32 %v1626_v57 }
 0x95b   :  { %v1600_v44 = vadd.s32 %v1599_v7, %v1597_v48 }
 0x95c   :  { %v1630_v6 = vadd.s32 %v1629_v21, %v1627_v52  ;;  %v1673_v52 = vcvt.f32.s32 %v11666_v35 }
 0x95d   :  { %4317 = vbcast.lane.b32.xlu1 %v4315_v2, 256  ;;  %4352 = vbcast.lane.b32.xlu0 %v4350_v60, 256  ;;  %v1641_v4 = vpop.xlane.xlu0 %1640  ;;  %v1612_v2 = vcvt.f32.s32 %v1611_v24 }
 0x95e   :  { %v1642_v48 = vcvt.f32.s32 %v1641_v4 }
 0x961   :  { %4331 = vbcast.lane.b32.xlu1 %v4329_v13, 256  ;;  %4366 = vbcast.lane.b32.xlu0 %v4364_v40, 256  ;;  %v1656_v60 = vpop.xlane.xlu0 %1655  ;;  %v16494_v13 = vld [vmem:[#allocation38_spill] sm:$0xff]  ;;  %v1615_v40 = vadd.s32 %v1614_v16, %v1612_v2  ;;  %v1658_v2 = vcvt.f32.s32 %v11659_v39 }
 0x962   :  { %v11968_v32 = vsel %vm15972_vm15, %v16494_v13, %v1600_v44 }
 0x963   :  { %v3993_v8 = vrot.slane %v11968_v32, %v16486_v58  ;;  %v3979_v57 = vrot.slane %v11968_v32, %v10326_v10  ;;  %v3986_v16 = vrot.slane %v11968_v32, %v16484_v19  ;;  %v1659_v55 = vshll.u32 %v1658_v2, 16 }
 0x964   :  { %v4000_v39 = vrot.slane %v11968_v32, %v16487_v15 }
 0x965   :  { %4345 = vbcast.lane.b32.xlu1 %v4343_v9, 256  ;;  %4373 = vbcast.lane.b32.xlu0 %v4371_v23, 256  ;;  %v1671_v24 = vpop.xlane.xlu0 %1670  ;;  %v16495_v9 = vld [vmem:[#allocation61_spill] sm:$0xff] }
 0x966   :  { %v11977_v23 = vsel %vm15972_vm15, %v16495_v9, %v1615_v40  ;;  %v1657_v40 = vcvt.f32.s32 %v1656_v60 }
 0x967   :  { %v4007_v21 = vrot.slane %v11977_v23, %v10326_v10  ;;  %v4021_v35 = vrot.slane %v11977_v23, %v16486_v58 }
 0x968   :  { %v1660_v9 = vadd.s32 %v1659_v55, %v1657_v40 }
 0x969   :  { %4359 = vbcast.lane.b32.xlu1 %v4357_v12, 256  ;;  %4394 = vbcast.lane.b32.xlu0 %v4392_v37, 256  ;;  %v1643_v12 = vcvt.f32.s32 %v11652_v11  ;;  %v4014_v37 = vrot.slane %v11977_v23, %v16484_v19  ;;  %v1686_v7 = vpop.xlane.xlu0 %1685 }
 0x96b   :  { %v1644_v54 = vshll.u32 %v1643_v12, 16  ;;  %v16500_v12 = vld [vmem:[#allocation64_spill] sm:$0xff] }
 0x96d   :  { %4380 = vbcast.lane.b32.xlu1 %v4378_v29, 256  ;;  %4408 = vbcast.lane.b32.xlu0 %v4406_v36, 256  ;;  %v4028_v29 = vrot.slane %v11977_v23, %v16487_v15  ;;  %v16496_v36 = vld [vmem:[#allocation62_spill] sm:$0xff]  ;;  %v1645_v44 = vadd.s32 %v1644_v54, %v1642_v48  ;;  %v1701_v4 = vpop.xlane.xlu0 %1700  ;;  %v1674_v48 = vshll.u32 %v1673_v52, 16  ;;  %v1688_v54 = vcvt.f32.s32 %v11673_v51 }
 0x96e   :  { %v11990_v11 = vsel %vm15972_vm15, %v16496_v36, %v1630_v6 }
 0x971   :  { %4387 = vbcast.lane.b32.xlu1 %v4385_v46, 256  ;;  %4422 = vbcast.lane.b32.xlu0 %v4420_v3, 256  ;;  %v4042_v46 = vrot.slane %v11990_v11, %v16484_v19  ;;  %v16497_v3 = vld [vmem:[#allocation39_spill] sm:$0xff] }
 0x972   :  { %v11999_v13 = vsel %vm15972_vm15, %v16497_v3, %v1645_v44  ;;  %v1687_v44 = vcvt.f32.s32 %v1686_v7  ;;  %v1703_v7 = vcvt.f32.s32 %v11678_v56  ;;  %v4056_v56 = vrot.slane %v11990_v11, %v16487_v15 }
 0x973   :  { %16498 = vst [vmem:[#allocation78_spill] sm:$0xff] %v11999_v13  ;;  %v4084_v60 = vrot.slane %v11999_v13, %v16487_v15 }
 0x975   :  { %4401 = vbcast.lane.b32.xlu1 %v4399_v26, 256  ;;  %3995 = vbcast.lane.b32.xlu0 %v3993_v8, 256  ;;  %v4063_v8 = vrot.slane %v11999_v13, %v10326_v10 }
 0x979   :  { %4415 = vbcast.lane.b32.xlu1 %v4413_v18, 256  ;;  %4016 = vbcast.lane.b32.xlu0 %v4014_v37, 256  ;;  %v12014_v18 = vsel %vm15972_vm15, %v16500_v12, %v1660_v9  ;;  %v1672_v37 = vcvt.f32.s32 %v1671_v24  ;;  %v1689_v24 = vshll.u32 %v1688_v54, 16  ;;  %v16508_v9 = vld [vmem:[#allocation63_spill] sm:$0xff]  ;;  %v1704_v12 = vshll.u32 %v1703_v7, 16 }
 0x97a   :  { %16501 = vst [vmem:[#allocation23_spill] sm:$0xff] %v12014_v18  ;;  %v4112_v51 = vrot.slane %v12014_v18, %v16487_v15 }
 0x97b   :  { %v1675_v36 = vadd.s32 %v1674_v48, %v1672_v37  ;;  %v1690_v40 = vadd.s32 %v1689_v24, %v1687_v44 }
 0x97d   :  { %3981 = vbcast.lane.b32.xlu1 %v3979_v57, 256  ;;  %4030 = vbcast.lane.b32.xlu0 %v4028_v29, 256  ;;  %v12019_v57 = vpop.xlane.xlu1 %5858  ;;  %v4098_v29 = vrot.slane %v12014_v18, %v16484_v19  ;;  %v12044_v52 = vsel %vm15972_vm15, %v16508_v9, %v1690_v40 }
 0x97e   :  { %16503 = vst [vmem:[#allocation18_spill] sm:$0xff] %v12019_v57  ;;  %v4147_v48 = vrot.slane %v12044_v52, %v10326_v10 }
 0x981   :  { %3988 = vbcast.lane.b32.xlu1 %v3986_v16, 256  ;;  %4044 = vbcast.lane.b32.xlu0 %v4042_v46, 256  ;;  %v12001_v26 = vpop.xlane.xlu0 %5861  ;;  %v4035_v16 = vrot.slane %v11990_v11, %v10326_v10  ;;  %v16505_v46 = vld [vmem:[#allocation65_spill] sm:$0xff]  ;;  %v12035_v55 = vpop.xlane.xlu1 %5864 }
 0x982   :  { %16499 = vst [vmem:[#allocation75_spill] sm:$0xff] %v12001_v26  ;;  %v12033_v3 = vsel %vm15972_vm15, %v16505_v46, %v1675_v36  ;;  %16507 = vst [vmem:[#allocation24_spill] sm:$0xff] %v12035_v55  ;;  %v16512_v36 = vld [vmem:[#allocation40_spill] sm:$0xff]  ;;  %v1934_v46 = vmul.u32 16, %v11877_v20  ;;  %v4105_v20 = vrot.slane %v12014_v18, %v16486_v58  ;;  %vm5890_vm0 = vcmp.eq.f32.partialorder %v11763_v59, %v12001_v26 }
 0x983   :  { %16506 = vst [vmem:[#allocation79_spill] sm:$0xff] %v12033_v3 }
 0x984   :  { %v4649_v9 = vcombine.high %v1934_v46, %v1934_v46 }
 0x985   :  { %4002 = vbcast.lane.b32.xlu1 %v4000_v39, 256  ;;  %4065 = vbcast.lane.b32.xlu0 %v4063_v8, 256  ;;  %v12016_v6 = vpop.xlane.xlu0 %5867  ;;  %v4049_v39 = vrot.slane %v11990_v11, %v16486_v58  ;;  %v4126_v8 = vrot.slane %v12033_v3, %v16484_v19  ;;  %v12048_v37 = vpop.xlane.xlu1 %5870 }
 0x986   :  { %16502 = vst [vmem:[#allocation50_spill] sm:$0xff] %v12016_v6  ;;  %16510 = vst [vmem:[#allocation86_spill] sm:$0xff] %v12048_v37  ;;  %vm5892_vm2 = vcmp.eq.f32.partialorder %v11772_v22, %v12016_v6  ;;  %v1938_v6 = vmul.u32 16, %v11929_v38 }
 0x989   :  { %4009 = vbcast.lane.b32.xlu1 %v4007_v21, 256  ;;  %4086 = vbcast.lane.b32.xlu0 %v4084_v60, 256  ;;  %v12025_v2 = vpop.xlane.xlu0 %5873  ;;  %v1702_v21 = vcvt.f32.s32 %v1701_v4  ;;  %v4070_v4 = vrot.slane %v11999_v13, %v16484_v19  ;;  %v12064_v24 = vpop.xlane.xlu1 %5876 }
 0x98a   :  { %16504 = vst [vmem:[#allocation19_spill] sm:$0xff] %v12025_v2  ;;  %16513 = vst [vmem:[#allocation30_spill] sm:$0xff] %v12064_v24  ;;  %vm5894_vm5 = vcmp.eq.f32.partialorder %v11781_v62, %v12025_v2 }
 0x98b   :  { %v1705_v54 = vadd.s32 %v1704_v12, %v1702_v21 }
 0x98d   :  { %4023 = vbcast.lane.b32.xlu1 %v4021_v35, 256  ;;  %4100 = vbcast.lane.b32.xlu0 %v4098_v29, 256  ;;  %v12046_v60 = vpop.xlane.xlu0 %5879  ;;  %v4168_v29 = vrot.slane %v12044_v52, %v16487_v15  ;;  %v12062_v44 = vsel %vm15972_vm15, %v16512_v36, %v1705_v54 }
 0x98e   :  { %16509 = vst [vmem:[#allocation26_spill] sm:$0xff] %v12046_v60  ;;  %vm5896_vm8 = vcmp.eq.f32.partialorder %v11790_v34, %v12046_v60 }
 0x991   :  { %4037 = vbcast.lane.b32.xlu1 %v4035_v16, 256  ;;  %4114 = vbcast.lane.b32.xlu0 %v4112_v51, 256  ;;  %v12054_v35 = vpop.xlane.xlu0 %5834  ;;  %v4077_v16 = vrot.slane %v11999_v13, %v16486_v58  ;;  %v4182_v51 = vrot.slane %v12062_v44, %v16484_v19 }
 0x992   :  { %16511 = vst [vmem:[#allocation58_spill] sm:$0xff] %v12054_v35 }
 0x995   :  { %4051 = vbcast.lane.b32.xlu1 %v4049_v39, 256  ;;  %4128 = vbcast.lane.b32.xlu0 %v4126_v8, 256  ;;  %v12071_v40 = vpop.xlane.xlu0 %5840  ;;  %v4091_v39 = vrot.slane %v12014_v18, %v10326_v10  ;;  %v4196_v8 = vrot.slane %v12062_v44, %v16487_v15 }
 0x996   :  { %16514 = vst [vmem:[#allocation87_spill] sm:$0xff] %v12071_v40 }
 0x999   :  { %4058 = vbcast.lane.b32.xlu1 %v4056_v56, 256  ;;  %4149 = vbcast.lane.b32.xlu0 %v4147_v48, 256  ;;  %v4656_v56 = vrot.slane %v4649_v9, %v10594_v49 }
 0x99d   :  { %4072 = vbcast.lane.b32.xlu1 %v4070_v4, 256  ;;  %4170 = vbcast.lane.b32.xlu0 %v4168_v29, 256  ;;  %v4119_v4 = vrot.slane %v12033_v3, %v10326_v10  ;;  %v4657_v29 = vcombine.high %v4656_v56, %v4656_v56 }
 0x99f   :  { %v4671_v46 = vrot.slane %v4657_v29, %v10594_v49 }
 0x9a1   :  { %v12073_v7 = vpop.xlane.xlu1 %5837  ;;  %4079 = vbcast.lane.b32.xlu1 %v4077_v16, 256  ;;  %4184 = vbcast.lane.b32.xlu0 %v4182_v51, 256  ;;  %v4133_v51 = vrot.slane %v12033_v3, %v16486_v58 }
 0x9a2   :  { %16515 = vst [vmem:[#allocation33_spill] sm:$0xff] %v12073_v7  ;;  %vm5882_vm9 = vcmp.eq.f32.partialorder %v11819_v28, %v12073_v7  ;;  %v1939_v28 = vmul.u32 16, %v11942_v43 }
 0x9a5   :  { %v12079_v21 = vpop.xlane.xlu1 %5846  ;;  %4093 = vbcast.lane.b32.xlu1 %v4091_v39, 256  ;;  %4198 = vbcast.lane.b32.xlu0 %v4196_v8, 256  ;;  %v12081_v12 = vpop.xlane.xlu0 %5843  ;;  %v1936_v39 = vmul.u32 16, %v11903_v5  ;;  %v4154_v5 = vrot.slane %v12044_v52, %v16484_v19  ;;  %v4161_v19 = vrot.slane %v12044_v52, %v16486_v58 }
 0x9a6   :  { %16516 = vst [vmem:[#allocation20_spill] sm:$0xff] %v12079_v21  ;;  %16517 = vst [vmem:[#allocation21_spill] sm:$0xff] %v12081_v12  ;;  %vm5884_vm12 = vcmp.eq.f32.partialorder %v11835_v14, %v12081_v12 }
 0x9a7   :  { %v4699_v18 = vcombine.high %v1936_v39, %v1936_v39 }
 0x9a9   :  { %v12086_v48 = vpop.xlane.xlu1 %5852  ;;  %4107 = vbcast.lane.b32.xlu1 %v4105_v20, 256  ;;  %v12088_v54 = vpop.xlane.xlu0 %5849  ;;  %v4140_v20 = vrot.slane %v12033_v3, %v16487_v15  ;;  %v4975_v15 = vrot.slane %v4671_v46, %v10326_v10  ;;  %v4706_v39 = vrot.slane %v4699_v18, %v10594_v49 }
 0x9aa   :  { %16518 = vst [vmem:[#allocation48_spill] sm:$0xff] %v12086_v48  ;;  %16519 = vst [vmem:[#allocation49_spill] sm:$0xff] %v12088_v54  ;;  %vm5886_vm13 = vcmp.eq.f32.partialorder %v11851_v33, %v12088_v54 }
 0x9ab   :  { %v4707_v48 = vcombine.high %v4706_v39, %v4706_v39 }
 0x9ad   :  { %v12092_v36 = vpop.permute.xlu1 %4205  ;;  %4121 = vbcast.lane.b32.xlu1 %v4119_v4, 256  ;;  %v12094_v16 = vpop.xlane.xlu0 %5855  ;;  %v4673_v4 = vcombine.high %v4671_v46, %v4671_v46 }
 0x9ae   :  { %16520 = vst [vmem:[#allocation80_spill] sm:$0xff] %v12092_v36  ;;  %16521 = vst [vmem:[#allocation81_spill] sm:$0xff] %v12094_v16  ;;  %v4664_v36 = vrot.slane %v4656_v56, %v10594_v49  ;;  %vm5888_vm14 = vcmp.eq.f32.partialorder %v11860_v0, %v12094_v16 }
 0x9af   :  { %v4983_v56 = vrot.slane %v4673_v4, %v10326_v10 }
 0x9b0   :  { %v4971_v4 = vrot.slane %v4664_v36, %v10326_v10 }
 0x9b1   :  { %v12100_v8 = vpop.permute.xlu1 %4219  ;;  %4135 = vbcast.lane.b32.xlu1 %v4133_v51, 256  ;;  %v12102_v9 = vpop.permute.xlu0 %4212  ;;  %v4672_v51 = vcombine.high %v4664_v36, %v4664_v36 }
 0x9b2   :  { %16522 = vst [vmem:[#allocation22_spill] sm:$0xff] %v12100_v8  ;;  %16523 = vst [vmem:[#allocation51_spill] sm:$0xff] %v12102_v9  ;;  %v1937_v9 = vmul.u32 16, %v11916_v63  ;;  %v16525_v8 = vld [vmem:[#allocation17_spill] sm:$0xff] }
 0x9b3   :  { %v5906_v47 = vsel %vm5890_vm0, %v16525_v8, 16  ;;  %v5908_v46 = vsel %vm5892_vm2, %v16525_v8, 16  ;;  %v4979_v18 = vrot.slane %v4672_v51, %v10326_v10  ;;  %v5910_v2 = vsel %vm5894_vm5, %v16525_v8, 16 }
 0x9b4   :  { %v12123_v63 = vsel %vm5832_vm7, %v5906_v47, 2147483647  ;;  %v12136_v36 = vsel %vm5832_vm7, %v5908_v46, 2147483647  ;;  %v4714_v46 = vrot.slane %v4706_v39, %v10594_v49  ;;  %v5900_v12 = vsel %vm5884_vm12, %v16525_v8, 16 }
 0x9b5   :  { %v12109_v13 = vpop.permute.xlu1 %4226  ;;  %4142 = vbcast.lane.b32.xlu1 %v4140_v20, 256  ;;  %v4234_v29 = vpop.permute.xlu0 %4233  ;;  %16526 = vst [vmem:[#allocation52_spill] sm:$0xff] %v12123_v63  ;;  %v6050_v47 = vshra.s32 %v12123_v63, 16  ;;  %16527 = vst [vmem:[#allocation83_spill] sm:$0xff] %v12136_v36  ;;  %v5902_v54 = vsel %vm5886_vm13, %v16525_v8, 16  ;;  %vm5889_vm0 = vcmp.eq.f32.partialorder %v11703_v30, %v12019_v57  ;;  %vm5891_vm2 = vcmp.eq.f32.partialorder %v11717_v53, %v12035_v55 }
 0x9b6   :  { %16524 = vst [vmem:[#allocation82_spill] sm:$0xff] %v12109_v13  ;;  %v4724_v13 = vcombine.high %v1937_v9, %v1937_v9  ;;  %v4175_v9 = vrot.slane %v12062_v44, %v10326_v10  ;;  %v4722_v7 = vcombine.high %v4714_v46, %v4714_v46  ;;  %v5003_v14 = vrot.slane %v4714_v46, %v10326_v10 }
 0x9b7   :  { %vm5893_vm5 = vcmp.eq.f32.partialorder %v11731_v27, %v12048_v37  ;;  %vm5883_vm12 = vcmp.eq.f32.partialorder %v11806_v17, %v12071_v40  ;;  %vm5885_vm13 = vcmp.eq.f32.partialorder %v11828_v25, %v12079_v21  ;;  %v16551_v25 = vld [vmem:[#allocation48_spill] sm:$0xff]  ;;  %v16552_v17 = vld [vmem:[#allocation46_spill] sm:$0xff] }
 0x9b8   :  { %v4731_v51 = vrot.slane %v4724_v13, %v10594_v49  ;;  %v12155_v13 = vcvt.s32.f32 %v6050_v47 }
 0x9b9   :  { %v4241_v26 = vpop.permute.xlu1 %4240  ;;  %4156 = vbcast.lane.b32.xlu1 %v4154_v5, 256  ;;  %v4255_v20 = vpop.permute.xlu0 %4254 }
 0x9ba   :  { %v5117_v59 = vadd.s32 %v4975_v15, %v4241_v26  ;;  %v5119_v3 = vadd.s32 %v4983_v56, %v4255_v20  ;;  %v5116_v15 = vadd.s32 %v4971_v4, %v4234_v29  ;;  %16528 = vst [vmem:[#allocation84_spill] sm:$0xff] %v12155_v13  ;;  %v4732_v47 = vcombine.high %v4731_v51, %v4731_v51 }
 0x9bc   :  { %v5458_v56 = vcombine.low %v5117_v59, %v5119_v3  ;;  %v4721_v59 = vrot.slane %v4707_v48, %v10594_v49  ;;  %v4189_v48 = vrot.slane %v12062_v44, %v16486_v58  ;;  %v4746_v34 = vrot.slane %v4732_v47, %v10594_v49 }
 0x9bd   :  { %v4248_v5 = vpop.permute.xlu1 %4247  ;;  %4163 = vbcast.lane.b32.xlu1 %v4161_v19, 256  ;;  %v12130_v26 = vpop.permute.xlu0 %4268  ;;  %v5011_v47 = vrot.slane %v4722_v7, %v10326_v10  ;;  %v1940_v7 = vmul.u32 16, %v11955_v41 }
 0x9be   :  { %v5118_v20 = vadd.s32 %v4979_v18, %v4248_v5  ;;  %v12150_v4 = vrot.slane %v5458_v56, %v16329_v31  ;;  %v6080_v18 = vshra.s32 %v12136_v36, 16  ;;  %v5912_v5 = vsel %vm5896_vm8, %v16525_v8, 16 }
 0x9bf   :  { %v4723_v56 = vcombine.high %v4721_v59, %v4721_v59  ;;  %vm5895_vm8 = vcmp.eq.f32.partialorder %v11743_v1, %v12064_v24 }
 0x9c0   :  { %v5450_v29 = vcombine.low %v5116_v15, %v5118_v20  ;;  %v12162_v15 = vsel %vm5832_vm7, %v5910_v2, 2147483647  ;;  %v4749_v20 = vcombine.high %v1938_v6, %v1938_v6  ;;  %v12171_v60 = vcvt.s32.f32 %v6080_v18 }
 0x9c1   :  { %v12144_v3 = vpop.permute.xlu1 %4261  ;;  %4177 = vbcast.lane.b32.xlu1 %v4175_v9, 256  ;;  %v12146_v19 = vpop.permute.xlu0 %4282  ;;  %16529 = vst [vmem:[#allocation25_spill] sm:$0xff] %v12162_v15  ;;  %v6110_v58 = vshra.s32 %v12162_v15, 16  ;;  %v12175_v6 = vsel %vm5832_vm7, %v5912_v5, 2147483647  ;;  %v5898_v2 = vsel %vm5882_vm9, %v16525_v8, 16  ;;  %v5007_v18 = vrot.slane %v4721_v59, %v10326_v10 }
 0x9c2   :  { %v12153_v38 = vrot.slane %v5450_v29, %v16329_v31  ;;  %16530 = vst [vmem:[#allocation27_spill] sm:$0xff] %v12171_v60  ;;  %16531 = vst [vmem:[#allocation53_spill] sm:$0xff] %v12175_v6  ;;  %v4756_v39 = vrot.slane %v4749_v20, %v10594_v49  ;;  %v6140_v22 = vshra.s32 %v12175_v6, 16  ;;  %v12190_v43 = vsel %vm5832_vm7, %v5898_v2, 2147483647 }
 0x9c3   :  { %v12187_v20 = vcvt.s32.f32 %v6110_v58  ;;  %16533 = vst [vmem:[#allocation85_spill] sm:$0xff] %v12190_v43  ;;  %v4739_v59 = vrot.slane %v4731_v51, %v10594_v49  ;;  %v4774_v58 = vcombine.high %v1939_v28, %v1939_v28  ;;  %v12203_v51 = vsel %vm5832_vm7, %v5900_v12, 2147483647 }
 0x9c4   :  { %6053 = vmin.xlane.f32.xlu0 %v12155_v13  ;;  %v12199_v2 = vcvt.s32.f32 %v6140_v22  ;;  %16535 = vst [vmem:[#allocation55_spill] sm:$0xff] %v12203_v51  ;;  %v5023_v12 = vrot.slane %v4746_v34, %v10326_v10  ;;  %v5960_v41 = vshra.s32 %v12203_v51, 16  ;;  %vm5881_vm9 = vcmp.eq.f32.partialorder %v11799_v42, %v12054_v35 }
 0x9c5   :  { %v12169_v9 = vpop.permute.xlu1 %4275  ;;  %4191 = vbcast.lane.b32.xlu1 %v4189_v48, 256  ;;  %v4290_v29 = vpop.permute.xlu0 %4289  ;;  %v5015_v48 = vrot.slane %v4723_v56, %v10326_v10  ;;  %16532 = vst [vmem:[#allocation54_spill] sm:$0xff] %v12187_v20  ;;  %v4757_v56 = vcombine.high %v4756_v39, %v4756_v39  ;;  %v4747_v33 = vcombine.high %v4739_v59, %v4739_v59 }
 0x9c6   :  { %16534 = vst [vmem:[#allocation29_spill] sm:$0xff] %v12199_v2  ;;  %v5124_v6 = vadd.s32 %v5003_v14, %v4290_v29  ;;  %v5019_v22 = vrot.slane %v4739_v59, %v10326_v10  ;;  %v4781_v14 = vrot.slane %v4774_v58, %v10594_v49  ;;  %v4799_v58 = vcombine.high %v1940_v7, %v1940_v7 }
 0x9c7   :  { %v12234_v51 = vcvt.s32.f32 %v5960_v41 }
 0x9c8   :  { %6083 = vmin.xlane.f32.xlu0 %v12171_v60 }
 0x9c9   :  { %v4297_v5 = vpop.permute.xlu1 %4296  ;;  %v4311_v62 = vpop.permute.xlu0 %4310  ;;  %16538 = vst [vmem:[#allocation88_spill] sm:$0xff] %v12234_v51 }
 0x9ca   :  { %v5125_v15 = vadd.s32 %v5007_v18, %v4297_v5  ;;  %v5127_v36 = vadd.s32 %v5015_v48, %v4311_v62  ;;  %v4748_v62 = vcombine.high %v4746_v34, %v4746_v34  ;;  %v5930_v5 = vshra.s32 %v12190_v43, 16 }
 0x9cb   :  { %v4764_v34 = vrot.slane %v4756_v39, %v10594_v49 }
 0x9cc   :  { %6113 = vmin.xlane.f32.xlu0 %v12187_v20  ;;  %v5526_v46 = vcombine.low %v5125_v15, %v5127_v36  ;;  %v4771_v20 = vrot.slane %v4757_v56, %v10594_v49  ;;  %v5031_v43 = vrot.slane %v4748_v62, %v10326_v10  ;;  %v12215_v29 = vcvt.s32.f32 %v5930_v5 }
 0x9cd   :  { %v4304_v18 = vpop.permute.xlu1 %4303  ;;  %v4325_v48 = vpop.permute.xlu0 %4324  ;;  %v12225_v56 = vsel %vm5832_vm7, %v5902_v54, 2147483647  ;;  %v4772_v5 = vcombine.high %v4764_v34, %v4764_v34 }
 0x9ce   :  { %v5126_v60 = vadd.s32 %v5011_v47, %v4304_v18  ;;  %16536 = vst [vmem:[#allocation89_spill] sm:$0xff] %v12215_v29  ;;  %16537 = vst [vmem:[#allocation57_spill] sm:$0xff] %v12225_v56  ;;  %v5027_v47 = vrot.slane %v4747_v33, %v10326_v10  ;;  %v4773_v62 = vcombine.high %v4771_v20, %v4771_v20  ;;  %v5904_v18 = vsel %vm5888_vm14, %v16525_v8, 16 }
 0x9cf   :  { %v5990_v54 = vshra.s32 %v12225_v56, 16  ;;  %v12239_v39 = vsel %vm5832_vm7, %v5904_v18, 2147483647  ;;  %vm5887_vm14 = vcmp.eq.f32.partialorder %v16552_v17, %v16551_v25 }
 0x9d0   :  { %v5518_v28 = vcombine.low %v5124_v6, %v5126_v60  ;;  %6143 = vmin.xlane.f32.xlu0 %v12199_v2  ;;  %v12219_v60 = vrot.slane %v5526_v46, %v16329_v31  ;;  %v5129_v46 = vadd.s32 %v5023_v12, %v4325_v48  ;;  %16539 = vst [vmem:[#allocation56_spill] sm:$0xff] %v12239_v39 }
 0x9d1   :  { %v4318_v36 = vpop.permute.xlu1 %4317  ;;  %v4339_v15 = vpop.permute.xlu0 %4338  ;;  %v4806_v48 = vrot.slane %v4799_v58, %v10594_v49  ;;  %v5047_v12 = vrot.slane %v4773_v62, %v10326_v10  ;;  %v5905_v62 = vsel %vm5889_vm0, %v16525_v8, 16 }
 0x9d2   :  { %v12222_v6 = vrot.slane %v5518_v28, %v16329_v31  ;;  %v5131_v59 = vadd.s32 %v5031_v43, %v4339_v15  ;;  %v4782_v28 = vcombine.high %v4781_v14, %v4781_v14  ;;  %v5128_v15 = vadd.s32 %v5019_v22, %v4318_v36 }
 0x9d4   :  { %5933 = vmin.xlane.f32.xlu0 %v12215_v29  ;;  %v5560_v0 = vcombine.low %v5129_v46, %v5131_v59  ;;  %v4796_v22 = vrot.slane %v4782_v28, %v10594_v49  ;;  %v12246_v59 = vcvt.s32.f32 %v5990_v54  ;;  %v6020_v46 = vshra.s32 %v12239_v39, 16 }
 0x9d5   :  { %v4332_v16 = vpop.permute.xlu1 %4331  ;;  %v4353_v43 = vpop.permute.xlu0 %4352  ;;  %v4789_v28 = vrot.slane %v4781_v14, %v10594_v49  ;;  %v4807_v54 = vcombine.high %v4806_v48, %v4806_v48 }
 0x9d6   :  { %v5130_v33 = vadd.s32 %v5027_v47, %v4332_v16  ;;  %v5039_v16 = vrot.slane %v4771_v20, %v10326_v10  ;;  %16540 = vst [vmem:[#allocation91_spill] sm:$0xff] %v12246_v59  ;;  %v12249_v47 = vrot.slane %v5560_v0, %v16329_v31  ;;  %v5035_v20 = vrot.slane %v4764_v34, %v10326_v10 }
 0x9d7   :  { %v5043_v0 = vrot.slane %v4772_v5, %v10326_v10  ;;  %v12267_v39 = vcvt.s32.f32 %v6020_v46  ;;  %v4797_v14 = vcombine.high %v4789_v28, %v4789_v28  ;;  %v1925_v5 = vmul.u32 16, %v11968_v32 }
 0x9d8   :  { %v5552_v7 = vcombine.low %v5128_v15, %v5130_v33  ;;  %5963 = vmin.xlane.f32.xlu0 %v12234_v51  ;;  %v5133_v15 = vadd.s32 %v5039_v16, %v4353_v43  ;;  %v4798_v33 = vcombine.high %v4796_v22, %v4796_v22  ;;  %v12270_v43 = vsel %vm5832_vm7, %v5905_v62, 2147483647 }
 0x9d9   :  { %v4346_v36 = vpop.permute.xlu1 %4345  ;;  %v4367_v41 = vpop.permute.xlu0 %4366  ;;  %16541 = vst [vmem:[#allocation59_spill] sm:$0xff] %v12267_v39  ;;  %v4821_v53 = vrot.slane %v4807_v54, %v10594_v49  ;;  %v6035_v54 = vshra.s32 %v12270_v43, 16 }
 0x9da   :  { %v12252_v18 = vrot.slane %v5552_v7, %v16329_v31  ;;  %v5135_v58 = vadd.s32 %v5047_v12, %v4367_v41  ;;  %v5132_v57 = vadd.s32 %v5035_v20, %v4346_v36  ;;  %v5055_v7 = vrot.slane %v4796_v22, %v10326_v10 }
 0x9db   :  { %v5063_v55 = vrot.slane %v4798_v33, %v10326_v10  ;;  %v5907_v36 = vsel %vm5891_vm2, %v16525_v8, 16  ;;  %v5051_v22 = vrot.slane %v4789_v28, %v10326_v10  ;;  %v5059_v33 = vrot.slane %v4797_v14, %v10326_v10 }
 0x9dc   :  { %5993 = vmin.xlane.f32.xlu0 %v12246_v59  ;;  %v5594_v30 = vcombine.low %v5133_v15, %v5135_v58  ;;  %v4814_v15 = vrot.slane %v4806_v48, %v10594_v49  ;;  %v12299_v14 = vcvt.s32.f32 %v6035_v54 }
 0x9dd   :  { %v4360_v12 = vpop.permute.xlu1 %4359  ;;  %v4374_v41 = vpop.permute.xlu0 %4373 }
 0x9de   :  { %v5134_v34 = vadd.s32 %v5043_v0, %v4360_v12  ;;  %v12281_v62 = vrot.slane %v5594_v30, %v16329_v31  ;;  %v4424_v0 = vcombine.high %v1925_v5, %v1925_v5  ;;  %v4823_v12 = vcombine.high %v4821_v53, %v4821_v53 }
 0x9df   :  { %v5136_v48 = vadd.s32 %v5051_v22, %v4374_v41  ;;  %v4822_v27 = vcombine.high %v4814_v15, %v4814_v15  ;;  %v5071_v41 = vrot.slane %v4821_v53, %v10326_v10 }
 0x9e0   :  { %v5586_v16 = vcombine.low %v5132_v57, %v5134_v34  ;;  %6023 = vmin.xlane.f32.xlu0 %v12267_v39  ;;  %v12291_v34 = vsel %vm5832_vm7, %v5907_v36, 2147483647  ;;  %v5079_v30 = vrot.slane %v4823_v12, %v10326_v10  ;;  %v5911_v39 = vsel %vm5895_vm8, %v16525_v8, 16 }
 0x9e1   :  { %v4381_v58 = vpop.permute.xlu1 %4380  ;;  %v4395_v46 = vpop.permute.xlu0 %4394  ;;  %16542 = vst [vmem:[#allocation60_spill] sm:$0xff] %v12291_v34  ;;  %v6065_v36 = vshra.s32 %v12291_v34, 16 }
 0x9e2   :  { %v12284_v32 = vrot.slane %v5586_v16, %v16329_v31  ;;  %v5137_v57 = vadd.s32 %v5055_v7, %v4381_v58  ;;  %v5139_v20 = vadd.s32 %v5063_v55, %v4395_v46  ;;  %v5909_v16 = vsel %vm5893_vm5, %v16525_v8, 16 }
 0x9e3   :  { %v1933_v55 = vmul.u32 16, %v11869_v61  ;;  %v4431_v46 = vrot.slane %v4424_v0, %v10594_v49  ;;  %v12305_v61 = vsel %vm5832_vm7, %v5909_v16, 2147483647  ;;  %v12319_v12 = vcvt.s32.f32 %v6065_v36 }
 0x9e4   :  { %v5628_v5 = vcombine.low %v5137_v57, %v5139_v20  ;;  %16543 = vst [vmem:[#allocation90_spill] sm:$0xff] %v12305_v61  ;;  %v6095_v53 = vshra.s32 %v12305_v61, 16  ;;  %v16565_v61 = vld [vmem:[#allocation80_spill] sm:$0xff] }
 0x9e5   :  { %v4388_v7 = vpop.permute.xlu1 %4387  ;;  %v4409_v28 = vpop.permute.xlu0 %4408  ;;  %v4624_v59 = vcombine.high %v1933_v55, %v1933_v55  ;;  %16544 = vst [vmem:[#allocation66_spill] sm:$0xff] %v12319_v12  ;;  %v4432_v16 = vcombine.high %v4431_v46, %v4431_v46  ;;  %v4439_v36 = vrot.slane %v4431_v46, %v10594_v49  ;;  %v5899_v46 = vsel %vm5883_vm12, %v16525_v8, 16 }
 0x9e6   :  { %v5138_v58 = vadd.s32 %v5059_v33, %v4388_v7  ;;  %v12313_v22 = vrot.slane %v5628_v5, %v16329_v31  ;;  %v5067_v33 = vrot.slane %v4814_v15, %v10326_v10  ;;  %v5141_v55 = vadd.s32 %v5071_v41, %v4409_v28 }
 0x9e7   :  { %v5075_v7 = vrot.slane %v4822_v27, %v10326_v10  ;;  %v1935_v15 = vmul.u32 16, %v11890_v50  ;;  %v4446_v5 = vrot.slane %v4432_v16, %v10594_v49  ;;  %v5467_v50 = vcombine.high %v12153_v38, %v12150_v4 }
 0x9e8   :  { %v5620_v37 = vcombine.low %v5136_v48, %v5138_v58  ;;  %v12324_v48 = vsel %vm5832_vm7, %v5911_v39, 2147483647 }
 0x9e9   :  { %v4402_v57 = vpop.permute.xlu1 %4401  ;;  %6038 = vmin.xlane.f32.xlu1 %v12299_v14  ;;  %v4423_v20 = vpop.permute.xlu0 %4422  ;;  %16545 = vst [vmem:[#allocation92_spill] sm:$0xff] %v12324_v48  ;;  %v4674_v40 = vcombine.high %v1935_v15, %v1935_v15  ;;  %v4448_v15 = vcombine.high %v4446_v5, %v4446_v5 }
 0x9ea   :  { %v12316_v54 = vrot.slane %v5620_v37, %v16329_v31  ;;  %v5143_v0 = vadd.s32 %v5079_v30, %v4423_v20  ;;  %v5897_v37 = vsel %vm5881_vm9, %v16525_v8, 16  ;;  %v4631_v30 = vrot.slane %v4624_v59, %v10594_v49 }
 0x9eb   :  { %v5140_v27 = vadd.s32 %v5067_v33, %v4402_v57  ;;  %v12335_v20 = vcvt.s32.f32 %v6095_v53  ;;  %v6125_v59 = vshra.s32 %v12324_v48, 16  ;;  %v12342_v24 = vsel %vm5832_vm7, %v5897_v37, 2147483647  ;;  %v16564_v48 = vld [vmem:[#allocation51_spill] sm:$0xff] }
 0x9ec   :  { %v5662_v39 = vcombine.low %v5141_v55, %v5143_v0  ;;  %16547 = vst [vmem:[#allocation67_spill] sm:$0xff] %v12342_v24  ;;  %v4632_v42 = vcombine.high %v4631_v30, %v4631_v30  ;;  %v1926_v0 = vmul.u32 16, %v11977_v23  ;;  %v4447_v55 = vcombine.high %v4439_v36, %v4439_v36 }
 0x9ed   :  { %v4416_v58 = vpop.permute.xlu1 %4415  ;;  %6068 = vmin.xlane.f32.xlu1 %v12319_v12  ;;  %v3996_v28 = vpop.permute.xlu0 %3995  ;;  %16546 = vst [vmem:[#allocation43_spill] sm:$0xff] %v12335_v20  ;;  %v12358_v37 = vcvt.s32.f32 %v6125_v59  ;;  %v12362_v23 = vrot.slane %v5467_v50, %v16332_v45  ;;  %v4681_v59 = vrot.slane %v4674_v40, %v10594_v49  ;;  %v1927_v50 = vmul.u32 16, %v11990_v11 }
 0x9ee   :  { %v5142_v41 = vadd.s32 %v5075_v7, %v4416_v58  ;;  %v12352_v53 = vrot.slane %v5662_v39, %v16329_v31  ;;  %v4827_v7 = vrot.slane %v4439_v36, %v10326_v10  ;;  %v5915_v58 = vshra.s32 %v12342_v24, 16 }
 0x9ef   :  { %16548 = vst [vmem:[#allocation34_spill] sm:$0xff] %v12358_v37  ;;  %16549 = vst [vmem:[#allocation41_spill] sm:$0xff] %v12362_v23  ;;  %v12367_v39 = vsel %vm5832_vm7, %v5899_v46, 2147483647  ;;  %v12373_v36 = vrot.slane %v4631_v30, %v10594_v49  ;;  %v4835_v46 = vrot.slane %v4447_v55, %v10326_v10  ;;  %v4449_v56 = vcombine.high %v1926_v0, %v1926_v0 }
 0x9f0   :  { %v5654_v35 = vcombine.low %v5140_v27, %v5142_v41  ;;  %v5535_v27 = vcombine.high %v12222_v6, %v12219_v60  ;;  %16550 = vst [vmem:[#allocation35_spill] sm:$0xff] %v12367_v39  ;;  %v5901_v41 = vsel %vm5885_vm13, %v16525_v8, 16  ;;  %v12384_v30 = vrot.slane %v4632_v42, %v10594_v49 }
 0x9f1   :  { %v3982_v57 = vpop.permute.xlu1 %3981  ;;  %6098 = vmin.xlane.f32.xlu1 %v12335_v20  ;;  %v12347_v33 = vpop.permute.xlu0 %4016  ;;  %v4831_v40 = vrot.slane %v4446_v5, %v10326_v10  ;;  %v12389_v51 = vcvt.s32.f32 %v5915_v58  ;;  %v5945_v11 = vshra.s32 %v12367_v39, 16  ;;  %v5082_v29 = vadd.s32 %v4835_v46, %v3996_v28  ;;  %v16556_v58 = vld [vmem:[#allocation78_spill] sm:$0xff] }
 0x9f2   :  { %v12355_v16 = vrot.slane %v5654_v35, %v16329_v31  ;;  %v5080_v1 = vadd.s32 %v4827_v7, %v3982_v57  ;;  %v4839_v25 = vrot.slane %v4448_v15, %v10326_v10  ;;  %v12394_v57 = vrot.slane %v5535_v27, %v16332_v45 }
 0x9f3   :  { %16553 = vst [vmem:[#allocation42_spill] sm:$0xff] %v12389_v51  ;;  %v12397_v0 = vsel %vm5832_vm7, %v5901_v41, 2147483647  ;;  %v5903_v42 = vsel %vm5887_vm14, %v16525_v8, 16  ;;  %v4682_v55 = vcombine.high %v4681_v59, %v4681_v59  ;;  %v4474_v5 = vcombine.high %v1927_v50, %v1927_v50 }
 0x9f4   :  { %16554 = vst [vmem:[#allocation69_spill] sm:$0xff] %v12394_v57  ;;  %16555 = vst [vmem:[#allocation36_spill] sm:$0xff] %v12397_v0  ;;  %v5144_v17 = vcombine.low %v5080_v1, %v5082_v29  ;;  %v4456_v28 = vrot.slane %v4449_v56, %v10594_v49  ;;  %v12405_v27 = vcvt.s32.f32 %v5945_v11  ;;  %v5975_v41 = vshra.s32 %v12397_v0, 16 }
 0x9f5   :  { %v3989_v21 = vpop.permute.xlu1 %3988  ;;  %6128 = vmin.xlane.f32.xlu1 %v12358_v37  ;;  %v12387_v35 = vpop.permute.xlu0 %4030  ;;  %v4647_v8 = vcombine.high %v12373_v36, %v12373_v36  ;;  %v12411_v50 = vsel %vm5832_vm7, %v5903_v42, 2147483647  ;;  %v4648_v1 = vcombine.high %v12384_v30, %v12384_v30 }
 0x9f6   :  { %5738 = vrot.lane.b32.xlu0 %v12362_v23, %s8784_s23  ;;  %v1928_v23 = vmul.u32 16, %v16556_v58  ;;  %v5081_v46 = vadd.s32 %v4831_v40, %v3989_v21  ;;  %16557 = vst [vmem:[#allocation93_spill] sm:$0xff] %v12405_v27  ;;  %16558 = vst [vmem:[#allocation94_spill] sm:$0xff] %v12411_v50  ;;  %v12416_v21 = vrot.slane %v4682_v55, %v10594_v49  ;;  %v12431_v55 = vcvt.s32.f32 %v5975_v41 }
 0x9f7   :  { %v12425_v11 = vrot.slane %v5144_v17, %v16329_v31  ;;  %v4457_v42 = vcombine.high %v4456_v28, %v4456_v28  ;;  %v4481_v58 = vrot.slane %v4474_v5, %v10594_v49  ;;  %v4967_v0 = vrot.slane %v4648_v1, %v10326_v10 }
 0x9f8   :  { %v4499_v40 = vcombine.high %v1928_v23, %v1928_v23  ;;  %16559 = vst [vmem:[#allocation95_spill] sm:$0xff] %v12431_v55  ;;  %v4959_v1 = vrot.slane %v12384_v30, %v10326_v10 }
 0x9f9   :  { %v4003_v7 = vpop.permute.xlu1 %4002  ;;  %5918 = vmin.xlane.f32.xlu1 %v12389_v51  ;;  %v12419_v29 = vpop.permute.xlu0 %4044  ;;  %v16561_v51 = vld [vmem:[#allocation82_spill] sm:$0xff] }
 0x9fa   :  { %v5083_v15 = vadd.s32 %v4839_v25, %v4003_v7  ;;  %5742 = vrot.lane.b32.xlu0 %v12394_v57, %s8784_s23  ;;  %v4689_v25 = vrot.slane %v4681_v59, %v10594_v49  ;;  %v6005_v59 = vshra.s32 %v12411_v50, 16  ;;  %v4963_v57 = vrot.slane %v4647_v8, %v10326_v10 }
 0x9fb   :  { %v4506_v41 = vrot.slane %v4499_v40, %v10594_v49  ;;  %v4482_v8 = vcombine.high %v4481_v58, %v4481_v58  ;;  %v4464_v50 = vrot.slane %v4456_v28, %v10594_v49  ;;  %v5115_v2 = vadd.s32 %v4967_v0, %v16561_v51 }
 0x9fc   :  { %v5152_v39 = vcombine.low %v5081_v46, %v5083_v15  ;;  %v16560_v46 = vld [vmem:[#allocation23_spill] sm:$0xff]  ;;  %v4697_v5 = vcombine.high %v4689_v25, %v4689_v25  ;;  %v12455_v37 = vcvt.s32.f32 %v6005_v59  ;;  %v4987_v28 = vrot.slane %v4689_v25, %v10326_v10 }
 0x9fd   :  { %v12421_v56 = vpop.permute.xlu1 %4009  ;;  %5948 = vmin.xlane.f32.xlu1 %v12405_v27  ;;  %v1929_v15 = vmul.u32 16, %v16560_v46  ;;  %v4471_v46 = vrot.slane %v4457_v42, %v10594_v49  ;;  %v12453_v24 = vpop.permute.xlu0 %4065  ;;  %v4991_v42 = vrot.slane %v12416_v21, %v10326_v10  ;;  %v5113_v51 = vadd.s32 %v4959_v1, %v16564_v48 }
 0x9fe   :  { %v12428_v7 = vrot.slane %v5152_v39, %v16329_v31  ;;  %v4698_v39 = vcombine.high %v12416_v21, %v12416_v21  ;;  %16562 = vst [vmem:[#allocation37_spill] sm:$0xff] %v12455_v37  ;;  %v4995_v0 = vrot.slane %v4697_v5, %v10326_v10  ;;  %v4507_v59 = vcombine.high %v4506_v41, %v4506_v41 }
 0x9ff   :  { %v4524_v40 = vcombine.high %v1929_v15, %v1929_v15  ;;  %v4473_v15 = vcombine.high %v4471_v46, %v4471_v46  ;;  %v4496_v21 = vrot.slane %v4482_v8, %v10594_v49  ;;  %v4472_v25 = vcombine.high %v4464_v50, %v4464_v50 }
 0xa00   :  { %v5161_v17 = vcombine.high %v12425_v11, %v12428_v7  ;;  %v5424_v13 = vcombine.low %v5113_v51, %v5115_v2  ;;  %v4843_v5 = vrot.slane %v4464_v50, %v10326_v10  ;;  %v4514_v1 = vrot.slane %v4506_v41, %v10594_v49 }
 0xa01   :  { %v4024_v27 = vpop.permute.xlu1 %4023  ;;  %5978 = vmin.xlane.f32.xlu1 %v12431_v55  ;;  %v4955_v55 = vrot.slane %v12373_v36, %v10326_v10  ;;  %v4999_v36 = vrot.slane %v4698_v39, %v10326_v10  ;;  %v4531_v48 = vrot.slane %v4524_v40, %v10594_v49  ;;  %v5120_v63 = vadd.s32 %v4987_v28, %v12144_v3  ;;  %v4087_v2 = vpop.permute.xlu0 %4086 }
 0xa02   :  { %v12448_v23 = vrot.slane %v5161_v17, %v16332_v45  ;;  %v16563_v17 = vld [vmem:[#allocation22_spill] sm:$0xff]  ;;  %v4855_v40 = vrot.slane %v4473_v15, %v10326_v10  ;;  %v4851_v50 = vrot.slane %v4472_v25, %v10326_v10  ;;  %v4498_v41 = vcombine.high %v4496_v21, %v4496_v21 }
 0xa03   :  { %v5114_v30 = vadd.s32 %v4963_v57, %v16563_v17  ;;  %v5112_v12 = vadd.s32 %v4955_v55, %v16565_v61  ;;  %v5122_v57 = vadd.s32 %v4995_v0, %v12169_v9  ;;  %v4489_v17 = vrot.slane %v4481_v58, %v10594_v49 }
 0xa04   :  { %5720 = vrot.lane.b32.xlu0 %v12448_v23, %s8784_s23  ;;  %v5123_v8 = vadd.s32 %v4999_v36, %v12146_v19  ;;  %v4521_v61 = vrot.slane %v4507_v59, %v10594_v49  ;;  %v4847_v9 = vrot.slane %v4471_v46, %v10326_v10  ;;  %v12486_v58 = vrot.slane %v5424_v13, %v16329_v31 }
 0xa05   :  { %v12467_v20 = vpop.permute.xlu1 %4037  ;;  %6008 = vmin.xlane.f32.xlu1 %v12455_v37  ;;  %v16566_v37 = vld [vmem:[#allocation79_spill] sm:$0xff]  ;;  %v5416_v39 = vcombine.low %v5112_v12, %v5114_v30  ;;  %v5121_v12 = vadd.s32 %v4991_v42, %v12130_v26  ;;  %v4532_v3 = vcombine.high %v4531_v48, %v4531_v48  ;;  %v4863_v19 = vrot.slane %v4496_v21, %v10326_v10 }
 0xa06   :  { %v1930_v34 = vmul.u32 16, %v16566_v37  ;;  %v5484_v37 = vcombine.low %v5120_v63, %v5122_v57  ;;  %v5086_v28 = vadd.s32 %v4851_v50, %v4024_v27  ;;  %v4859_v30 = vrot.slane %v4489_v17, %v10326_v10  ;;  %v4101_v57 = vpop.permute.xlu0 %4100 }
 0xa07   :  { %v4497_v51 = vcombine.high %v4489_v17, %v4489_v17  ;;  %v12492_v46 = vrot.slane %v5416_v39, %v16329_v31  ;;  %v5492_v0 = vcombine.low %v5121_v12, %v5123_v8  ;;  %v5087_v59 = vadd.s32 %v4855_v40, %v12387_v35 }
 0xa08   :  { %v4523_v36 = vcombine.high %v4521_v61, %v4521_v61  ;;  %v5084_v13 = vadd.s32 %v4843_v5, %v12421_v56  ;;  %v4875_v26 = vrot.slane %v4514_v1, %v10326_v10  ;;  %v4871_v63 = vrot.slane %v4498_v41, %v10326_v10 }
 0xa09   :  { %v4052_v55 = vpop.permute.xlu1 %4051  ;;  %v4522_v42 = vcombine.high %v4514_v1, %v4514_v1  ;;  %v12499_v27 = vrot.slane %v5484_v37, %v16329_v31  ;;  %v5085_v21 = vadd.s32 %v4847_v9, %v12347_v33  ;;  %v4546_v25 = vrot.slane %v4532_v3, %v10594_v49 }
 0xa0a   :  { %v5433_v35 = vcombine.high %v12492_v46, %v12486_v58  ;;  %v5178_v17 = vcombine.low %v5084_v13, %v5086_v28  ;;  %v4867_v39 = vrot.slane %v4497_v51, %v10326_v10  ;;  %v4879_v5 = vrot.slane %v4521_v61, %v10326_v10 }
 0xa0b   :  { %v12508_v8 = vrot.slane %v5492_v0, %v16329_v31  ;;  %v5186_v1 = vcombine.low %v5085_v21, %v5087_v59  ;;  %v4887_v40 = vrot.slane %v4523_v36, %v10326_v10  ;;  %v4549_v50 = vcombine.high %v1930_v34, %v1930_v34 }
 0xa0c   :  { %v5089_v9 = vadd.s32 %v4863_v19, %v12419_v29  ;;  %v5090_v41 = vadd.s32 %v4867_v39, %v4052_v55  ;;  %v4883_v37 = vrot.slane %v4522_v42, %v10326_v10  ;;  %v4548_v3 = vcombine.high %v4546_v25, %v4546_v25  ;;  %v4115_v19 = vpop.permute.xlu0 %4114 }
 0xa0d   :  { %v4059_v15 = vpop.permute.xlu1 %4058  ;;  %v12514_v28 = vrot.slane %v5433_v35, %v16332_v45  ;;  %v4539_v61 = vrot.slane %v4531_v48, %v10594_v49  ;;  %v5501_v51 = vcombine.high %v12499_v27, %v12508_v8  ;;  %v12520_v0 = vrot.slane %v5178_v17, %v16329_v31 }
 0xa0e   :  { %v5091_v56 = vadd.s32 %v4871_v63, %v4059_v15  ;;  %v5095_v34 = vadd.s32 %v4887_v40, %v4087_v2  ;;  %v5088_v59 = vadd.s32 %v4859_v30, %v12467_v20  ;;  %v12524_v55 = vrot.slane %v5186_v1, %v16329_v31 }
 0xa0f   :  { %v1931_v36 = vmul.u32 16, %v12044_v52  ;;  %v5092_v13 = vadd.s32 %v4875_v26, %v12453_v24  ;;  %v4903_v2 = vrot.slane %v4548_v3, %v10326_v10  ;;  %v4556_v20 = vrot.slane %v4549_v50, %v10594_v49 }
 0xa10   :  { %v5220_v29 = vcombine.low %v5089_v9, %v5091_v56  ;;  %v5212_v48 = vcombine.low %v5088_v59, %v5090_v41  ;;  %v4547_v30 = vcombine.high %v4539_v61, %v4539_v61  ;;  %v12536_v52 = vrot.slane %v5501_v51, %v16332_v45  ;;  %v4129_v9 = vpop.permute.xlu0 %4128 }
 0xa11   :  { %v4073_v33 = vpop.permute.xlu1 %4072  ;;  %v5195_v24 = vcombine.high %v12520_v0, %v12524_v55  ;;  %v4895_v26 = vrot.slane %v4546_v25, %v10326_v10  ;;  %v4574_v17 = vcombine.high %v1931_v36, %v1931_v36  ;;  %v1932_v56 = vmul.u32 16, %v12062_v44 }
 0xa12   :  { %v5093_v12 = vadd.s32 %v4879_v5, %v4073_v33  ;;  %v12533_v21 = vrot.slane %v5220_v29, %v16329_v31  ;;  %v12543_v5 = vrot.slane %v5212_v48, %v16329_v31  ;;  %v5099_v1 = vadd.s32 %v4903_v2, %v4115_v19 }
 0xa13   :  { %v4557_v33 = vcombine.high %v4556_v20, %v4556_v20  ;;  %v4891_v25 = vrot.slane %v4539_v61, %v10326_v10  ;;  %v4899_v41 = vrot.slane %v4547_v30, %v10326_v10  ;;  %v4564_v44 = vrot.slane %v4556_v20, %v10594_v49 }
 0xa14   :  { %v5254_v63 = vcombine.low %v5093_v12, %v5095_v34  ;;  %v5097_v12 = vadd.s32 %v4895_v26, %v4101_v57  ;;  %v5229_v51 = vcombine.high %v12543_v5, %v12533_v21  ;;  %v4581_v34 = vrot.slane %v4574_v17, %v10594_v49 }
 0xa15   :  { %v4080_v15 = vpop.permute.xlu1 %4079  ;;  %v4571_v36 = vrot.slane %v4557_v33, %v10594_v49  ;;  %v4907_v33 = vrot.slane %v4564_v44, %v10326_v10 }
 0xa16   :  { %v5094_v42 = vadd.s32 %v4883_v37, %v4080_v15  ;;  %5736 = vrot.lane.b32.xlu1 %v12514_v28, %s8784_s23  ;;  %v12546_v40 = vrot.slane %v5254_v63, %v16329_v31  ;;  %v12557_v37 = vrot.slane %v5195_v24, %v16332_v45  ;;  %v5288_v29 = vcombine.low %v5097_v12, %v5099_v1 }
 0xa17   :  { %v4599_v15 = vcombine.high %v1932_v56, %v1932_v56  ;;  %v12573_v48 = vrot.slane %v5229_v51, %v16332_v45  ;;  %v4572_v63 = vcombine.high %v4564_v44, %v4564_v44  ;;  %v4582_v30 = vcombine.high %v4581_v34, %v4581_v34 }
 0xa18   :  { %v5246_v35 = vcombine.low %v5092_v13, %v5094_v42  ;;  %v4150_v42 = vpop.permute.xlu0 %4149  ;;  %v12576_v20 = vrot.slane %v5288_v29, %v16329_v31  ;;  %v4589_v12 = vrot.slane %v4581_v34, %v10594_v49  ;;  %v4911_v51 = vrot.slane %v4571_v36, %v10326_v10 }
 0xa19   :  { %v4094_v39 = vpop.permute.xlu1 %4093  ;;  %v4606_v24 = vrot.slane %v4599_v15, %v10594_v49  ;;  %v4915_v26 = vrot.slane %v4572_v63, %v10326_v10  ;;  %v4596_v1 = vrot.slane %v4582_v30, %v10594_v49 }
 0xa1a   :  { %v12549_v50 = vrot.slane %v5246_v35, %v16329_v31  ;;  %5740 = vrot.lane.b32.xlu1 %v12536_v52, %s8784_s23  ;;  %v5096_v19 = vadd.s32 %v4891_v25, %v4094_v39  ;;  %v4573_v39 = vcombine.high %v4571_v36, %v4571_v36  ;;  %v5101_v15 = vadd.s32 %v4911_v51, %v4129_v9 }
 0xa1b   :  { %v4927_v34 = vrot.slane %v4596_v1, %v10326_v10  ;;  %v4614_v51 = vrot.slane %v4606_v24, %v10594_v49 }
 0xa1c   :  { %v5263_v3 = vcombine.high %v12549_v50, %v12546_v40 }
 0xa1d   :  { %v4108_v59 = vpop.permute.xlu1 %4107 }
 0xa1e   :  { %v5098_v61 = vadd.s32 %v4899_v41, %v4108_v59  ;;  %5722 = vrot.lane.b32.xlu1 %v12557_v37, %s8784_s23  ;;  %v12567_v57 = vrot.slane %v5263_v3, %v16332_v45  ;;  %v4171_v3 = vpop.permute.xlu0 %4170  ;;  %v4607_v59 = vcombine.high %v4606_v24, %v4606_v24  ;;  %v5432_v24 = vcombine.low %v12492_v46, %v12486_v58 }
 0xa1f   :  { %v5500_v58 = vcombine.low %v12499_v27, %v12508_v8  ;;  %v5568_v27 = vcombine.low %v12252_v18, %v12249_v47 }
 0xa20   :  { %v5280_v13 = vcombine.low %v5096_v19, %v5098_v61  ;;  %5726 = vrot.lane.b32.xlu0 %v12567_v57, %s8784_s23  ;;  %v4919_v19 = vrot.slane %v4573_v39, %v10326_v10  ;;  %v4621_v30 = vrot.slane %v4607_v59, %v10594_v49  ;;  %v4622_v49 = vcombine.high %v4614_v51, %v4614_v51 }
 0xa21   :  { %v4122_v2 = vpop.permute.xlu1 %4121 }
 0xa22   :  { %v12579_v35 = vrot.slane %v5280_v13, %v16329_v31  ;;  %5724 = vrot.lane.b32.xlu1 %v12573_v48, %s8784_s23  ;;  %v5100_v29 = vadd.s32 %v4907_v33, %v4122_v2  ;;  %v4598_v13 = vcombine.high %v4596_v1, %v4596_v1 }
 0xa24   :  { %v5297_v17 = vcombine.high %v12579_v35, %v12576_v20  ;;  %v4935_v2 = vrot.slane %v4598_v13, %v10326_v10 }
 0xa25   :  { %v4136_v56 = vpop.permute.xlu1 %4135 }
 0xa26   :  { %v5102_v25 = vadd.s32 %v4915_v26, %v4136_v56  ;;  %v12590_v41 = vrot.slane %v5297_v17, %v16332_v45  ;;  %v4597_v17 = vcombine.high %v4589_v12, %v4589_v12  ;;  %v4185_v56 = vpop.permute.xlu0 %4184  ;;  %v5107_v59 = vadd.s32 %v4935_v2, %v4171_v3 }
 0xa28   :  { %5728 = vrot.lane.b32.xlu1 %v12590_v41, %s8784_s23  ;;  %v5314_v44 = vcombine.low %v5100_v29, %v5102_v25  ;;  %v4923_v25 = vrot.slane %v4589_v12, %v10326_v10  ;;  %v4623_v29 = vcombine.high %v4621_v30, %v4621_v30  ;;  %v4931_v1 = vrot.slane %v4597_v17, %v10326_v10 }
 0xa29   :  { %v4143_v61 = vpop.permute.xlu1 %4142  ;;  %v4943_v17 = vrot.slane %v4621_v30, %v10326_v10  ;;  %v12633_v30 = vrot.slane %v5432_v24, %v16332_v45 }
 0xa2a   :  { %v5103_v63 = vadd.s32 %v4919_v19, %v4143_v61  ;;  %v12601_v33 = vrot.slane %v5314_v44, %v16329_v31 }
 0xa2b   :  { %16567 = vst [vmem:[#allocation96_spill] sm:$0xff] %v12633_v30 }
 0xa2c   :  { %v5322_v26 = vcombine.low %v5101_v15, %v5103_v63  ;;  %v5104_v15 = vadd.s32 %v4923_v25, %v4150_v42  ;;  %v4939_v25 = vrot.slane %v4614_v51, %v10326_v10 }
 0xa2d   :  { %v4157_v36 = vpop.permute.xlu1 %4156 }
 0xa2e   :  { %v12604_v39 = vrot.slane %v5322_v26, %v16329_v31  ;;  %v5105_v9 = vadd.s32 %v4927_v34, %v4157_v36  ;;  %v4199_v26 = vpop.permute.xlu0 %4198  ;;  %v4951_v34 = vrot.slane %v4623_v29, %v10326_v10 }
 0xa30   :  { %v5331_v19 = vcombine.high %v12601_v33, %v12604_v39  ;;  %v5356_v13 = vcombine.low %v5105_v9, %v5107_v59  ;;  %v5111_v42 = vadd.s32 %v4951_v34, %v4199_v26  ;;  %v5109_v9 = vadd.s32 %v4943_v17, %v4185_v56 }
 0xa31   :  { %v4164_v61 = vpop.permute.xlu1 %4163  ;;  %v4947_v59 = vrot.slane %v4622_v49, %v10326_v10  ;;  %v15952_v10 = vmov 0   ;;  %v16569_v34 = vcombine.low %v12153_v38, %v12150_v4  ;;  %v5636_v49 = vcombine.low %v12316_v54, %v12313_v22 }
 0xa32   :  { %v5106_v44 = vadd.s32 %v4931_v1, %v4164_v61  ;;  %v12612_v63 = vrot.slane %v5331_v19, %v16332_v45  ;;  %v12621_v36 = vrot.slane %v5356_v13, %v16329_v31  ;;  %v5390_v1 = vcombine.low %v5109_v9, %v5111_v42 }
 0xa33   :  { %v5448_v51 = vcombine.high %v12633_v30, %v15952_v10  ;;  %v12664_v17 = vrot.slane %v5568_v27, %v16332_v45  ;;  %v16572_v4 = vcombine.low %v12222_v6, %v12219_v60  ;;  %v5602_v42 = vcombine.low %v12284_v32, %v12281_v62 }
 0xa34   :  { %v5348_v12 = vcombine.low %v5104_v15, %v5106_v44  ;;  %5730 = vrot.lane.b32.xlu0 %v12612_v63, %s8784_s23  ;;  %v5397_v8 = vrot.slane %v5390_v1, %v16329_v31  ;;  %v12647_v44 = vrot.slane %v5500_v58, %v16332_v45  ;;  %v5670_v60 = vcombine.low %v12355_v16, %v12352_v53 }
 0xa35   :  { %v4178_v3 = vpop.permute.xlu1 %4177  ;;  %16571 = vst [vmem:[#allocation62_spill] sm:$0xff] %v12664_v17  ;;  %v12673_v38 = vrot.slane %v16572_v4, %v16332_v45  ;;  %v5584_v9 = vcombine.high %v12664_v17, %v15952_v10 }
 0xa36   :  { %v12624_v2 = vrot.slane %v5348_v12, %v16329_v31  ;;  %v5108_v19 = vadd.s32 %v4939_v25, %v4178_v3  ;;  %16568 = vst [vmem:[#allocation38_spill] sm:$0xff] %v12647_v44  ;;  %v12654_v12 = vrot.slane %v16569_v34, %v16332_v45  ;;  %v5516_v24 = vcombine.high %v12647_v44, %v15952_v10 }
 0xa37   :  { %16573 = vst [vmem:[#allocation39_spill] sm:$0xff] %v12673_v38  ;;  %v5550_v6 = vcombine.high %v12673_v38, %v15952_v10  ;;  %v5296_v34 = vcombine.low %v12579_v35, %v12576_v20 }
 0xa38   :  { %v5365_v29 = vcombine.high %v12624_v2, %v12621_v36  ;;  %16570 = vst [vmem:[#allocation61_spill] sm:$0xff] %v12654_v12  ;;  %v5482_v25 = vcombine.high %v12654_v12, %v15952_v10 }
 0xa39   :  { %v4192_v46 = vpop.permute.xlu1 %4191  ;;  %v12756_v35 = vrot.slane %v5296_v34, %v16332_v45 }
 0xa3a   :  { %v5110_v61 = vadd.s32 %v4947_v59, %v4192_v46  ;;  %v12636_v15 = vrot.slane %v5365_v29, %v16332_v45  ;;  %v12682_v59 = vrot.slane %v5636_v49, %v16332_v45  ;;  %v5228_v29 = vcombine.low %v12543_v5, %v12533_v21 }
 0xa3b   :  { %v16575_v46 = vcombine.low %v12425_v11, %v12428_v7  ;;  %v12708_v21 = vrot.slane %v5670_v60, %v16332_v45  ;;  %v5330_v5 = vcombine.low %v12601_v33, %v12604_v39  ;;  %v5262_v33 = vcombine.low %v12549_v50, %v12546_v40  ;;  %16584 = vst [vmem:[#allocation80_spill] sm:$0xff] %v12756_v35 }
 0xa3c   :  { %v5382_v56 = vcombine.low %v5108_v19, %v5110_v61  ;;  %5732 = vrot.lane.b32.xlu1 %v12636_v15, %s8784_s23  ;;  %16574 = vst [vmem:[#allocation64_spill] sm:$0xff] %v12682_v59  ;;  %v5652_v58 = vcombine.high %v12682_v59, %v15952_v10  ;;  %v12701_v19 = vrot.slane %v5602_v42, %v16332_v45 }
 0xa3d   :  { %v12698_v1 = vrot.slane %v16575_v46, %v16332_v45  ;;  %v5194_v61 = vcombine.low %v12520_v0, %v12524_v55  ;;  %16578 = vst [vmem:[#allocation40_spill] sm:$0xff] %v12708_v21  ;;  %v5686_v0 = vcombine.high %v12708_v21, %v15952_v10  ;;  %v5364_v39 = vcombine.low %v12624_v2, %v12621_v36 }
 0xa3e   :  { %v5389_v13 = vrot.slane %v5382_v56, %v16329_v31  ;;  %16577 = vst [vmem:[#allocation63_spill] sm:$0xff] %v12701_v19  ;;  %v5618_v7 = vcombine.high %v12701_v19, %v15952_v10  ;;  %v12717_v56 = vrot.slane %v5228_v29, %v16332_v45  ;;  %v12733_v27 = vrot.slane %v5330_v5, %v16332_v45 }
 0xa3f   :  { %16576 = vst [vmem:[#allocation65_spill] sm:$0xff] %v12698_v1  ;;  %v5176_v11 = vcombine.high %v12698_v1, %v15952_v10  ;;  %v12724_v55 = vrot.slane %v5194_v61, %v16332_v45  ;;  %v12744_v50 = vrot.slane %v5364_v39, %v16332_v45  ;;  %v12747_v36 = vrot.slane %v5262_v33, %v16332_v45  ;;  %v16588_v33 = vld [vmem:[#allocation84_spill] sm:$0xff] }
 0xa40   :  { %5704 = vrot.lane.b32.xlu1 %v5448_v51, %s8797_s16  ;;  %v5399_v26 = vcombine.high %v5389_v13, %v5397_v8  ;;  %16579 = vst [vmem:[#allocation78_spill] sm:$0xff] %v12717_v56  ;;  %v5244_v51 = vcombine.high %v12717_v56, %v15952_v10  ;;  %16581 = vst [vmem:[#allocation82_spill] sm:$0xff] %v12733_v27  ;;  %v5346_v40 = vcombine.high %v12733_v27, %v15952_v10 }
 0xa41   :  { %16580 = vst [vmem:[#allocation23_spill] sm:$0xff] %v12724_v55  ;;  %16582 = vst [vmem:[#allocation22_spill] sm:$0xff] %v12744_v50  ;;  %v5398_v2 = vcombine.low %v5389_v13, %v5397_v8  ;;  %v5380_v49 = vcombine.high %v12744_v50, %v15952_v10  ;;  %v5278_v20 = vcombine.high %v12747_v36, %v15952_v10 }
 0xa42   :  { %v12661_v3 = vrot.slane %v5399_v26, %v16332_v45  ;;  %v5210_v26 = vcombine.high %v12724_v55, %v15952_v10  ;;  %16583 = vst [vmem:[#allocation51_spill] sm:$0xff] %v12747_v36  ;;  %v5312_v4 = vcombine.high %v12756_v35, %v15952_v10  ;;  %v5245_v13 = vcombine.high %v12573_v48, %v15952_v10  ;;  %v16654_v35 = vld [vmem:[#allocation17_spill] sm:$0xff] }
 0xa43   :  { %v12765_v8 = vrot.slane %v5398_v2, %v16332_v45  ;;  %v5279_v48 = vcombine.high %v12567_v57, %v15952_v10 }
 0xa44   :  { %5708 = vrot.lane.b32.xlu1 %v5516_v24, %s8797_s16  ;;  %5734 = vrot.lane.b32.xlu0 %v12661_v3, %s8784_s23  ;;  %v5177_v24 = vcombine.high %v12448_v23, %v15952_v10  ;;  %v5211_v23 = vcombine.high %v12557_v37, %v15952_v10  ;;  %v5347_v37 = vcombine.high %v12612_v63, %v15952_v10 }
 0xa45   :  { %16585 = vst [vmem:[#allocation79_spill] sm:$0xff] %v12765_v8  ;;  %v5414_v42 = vcombine.high %v12765_v8, %v15952_v10 }
 0xa48   :  { %5712 = vrot.lane.b32.xlu1 %v5584_v9, %s8797_s16  ;;  %5706 = vrot.lane.b32.xlu0 %v5482_v25, %s8797_s16  ;;  %v5313_v9 = vcombine.high %v12590_v41, %v15952_v10  ;;  %v5381_v25 = vcombine.high %v12636_v15, %v15952_v10  ;;  %v5415_v41 = vcombine.high %v12661_v3, %v15952_v10  ;;  %v16586_v3 = vld [vmem:[#allocation52_spill] sm:$0xff] }
 0xa49   :  { %v6049_v46 = vand.u32 65535, %v16586_v3  ;;  %v16596_v3 = vld [vmem:[#allocation54_spill] sm:$0xff] }
 0xa4b   :  { %v6051_v39 = vcvt.s32.f32 %v6049_v46 }
 0xa4c   :  { %5716 = vrot.lane.b32.xlu1 %v5652_v58, %s8797_s16  ;;  %5710 = vrot.lane.b32.xlu0 %v5550_v6, %s8797_s16  ;;  %v6034_v58 = vand.u32 65535, %v12270_v43  ;;  %v16589_v43 = vld [vmem:[#allocation66_spill] sm:$0xff] }
 0xa4e   :  { %v6036_v5 = vcvt.s32.f32 %v6034_v58 }
 0xa50   :  { %5688 = vrot.lane.b32.xlu1 %v5176_v11, %s8797_s16  ;;  %5714 = vrot.lane.b32.xlu0 %v5618_v7, %s8797_s16  ;;  %v16587_v11 = vld [vmem:[#allocation60_spill] sm:$0xff] }
 0xa51   :  { %v12795_v57 = vpop.xlane.xlu0 %6053  ;;  %v6064_v7 = vand.u32 65535, %v16587_v11  ;;  %v16597_v11 = vld [vmem:[#allocation34_spill] sm:$0xff] }
 0xa52   :  { %vm6055_vm2 = vcmp.eq.f32.partialorder %v16588_v33, %v12795_v57 }
 0xa53   :  { %v6066_v34 = vcvt.s32.f32 %v6064_v7  ;;  %v16598_v7 = vld [vmem:[#allocation53_spill] sm:$0xff] }
 0xa54   :  { %5692 = vrot.lane.b32.xlu1 %v5244_v51, %s8797_s16  ;;  %5718 = vrot.lane.b32.xlu0 %v5686_v0, %s8797_s16  ;;  %v16590_v51 = vld [vmem:[#allocation83_spill] sm:$0xff] }
 0xa55   :  { %v12799_v15 = vpop.xlane.xlu0 %6083 }
 0xa58   :  { %5698 = vrot.lane.b32.xlu1 %v5346_v40, %s8797_s16  ;;  %5690 = vrot.lane.b32.xlu0 %v5210_v26, %s8797_s16  ;;  %v6079_v26 = vand.u32 65535, %v16590_v51 }
 0xa59   :  { %v12804_v63 = vpop.xlane.xlu0 %6113 }
 0xa5a   :  { %vm6115_vm12 = vcmp.eq.f32.partialorder %v16596_v3, %v12804_v63  ;;  %v16605_v3 = vld [vmem:[#allocation93_spill] sm:$0xff] }
 0xa5c   :  { %5700 = vrot.lane.b32.xlu1 %v5380_v49, %s8797_s16  ;;  %5694 = vrot.lane.b32.xlu0 %v5278_v20, %s8797_s16  ;;  %v6056_v49 = vsel %vm6055_vm2, %v6051_v39, inf }
 0xa5d   :  { %v12818_v2 = vpop.xlane.xlu0 %6143 }
 0xa60   :  { %5752 = vrot.lane.b32.xlu1 %v5177_v24, %s8798_s17  ;;  %5696 = vrot.lane.b32.xlu0 %v5312_v4, %s8797_s16  ;;  %v16592_v4 = vld [vmem:[#allocation27_spill] sm:$0xff] }
 0xa61   :  { %vm6085_vm8 = vcmp.eq.f32.partialorder %v16592_v4, %v12799_v15  ;;  %v12830_v46 = vpop.xlane.xlu0 %5933 }
 0xa64   :  { %5756 = vrot.lane.b32.xlu1 %v5245_v13, %s8798_s17  ;;  %5702 = vrot.lane.b32.xlu0 %v5414_v42, %s8797_s16  ;;  %v6081_v13 = vcvt.s32.f32 %v6079_v26  ;;  %v16593_v42 = vld [vmem:[#allocation43_spill] sm:$0xff] }
 0xa68   :  { %5760 = vrot.lane.b32.xlu1 %v5313_v9, %s8798_s17  ;;  %5754 = vrot.lane.b32.xlu0 %v5211_v23, %s8798_s17  ;;  %v16594_v23 = vld [vmem:[#allocation25_spill] sm:$0xff] }
 0xa69   :  { %v6109_v9 = vand.u32 65535, %v16594_v23 }
 0xa6c   :  { %5764 = vrot.lane.b32.xlu1 %v5381_v25, %s8798_s17  ;;  %5758 = vrot.lane.b32.xlu0 %v5279_v48, %s8798_s17  ;;  %v16595_v25 = vld [vmem:[#allocation92_spill] sm:$0xff] }
 0xa70   :  { %5762 = vrot.lane.b32.xlu0 %v5347_v37, %s8798_s17  ;;  %v6124_v37 = vand.u32 65535, %v16595_v25 }
 0xa72   :  { %v6126_v39 = vcvt.s32.f32 %v6124_v37 }
 0xa74   :  { %5766 = vrot.lane.b32.xlu0 %v5415_v41, %s8798_s17  ;;  %v6086_v41 = vsel %vm6085_vm8, %v6081_v13, inf }
 0xa76   :  { %v12793_v60 = vpop.xlane.xlu1 %6038 }
 0xa77   :  { %vm6040_vm0 = vcmp.eq.f32.partialorder %v12299_v14, %v12793_v60  ;;  %v16591_v14 = vld [vmem:[#allocation90_spill] sm:$0xff]  ;;  %v6045_v17 = vcvt.f32.s32 %v12793_v60 }
 0xa78   :  { %v6041_v0 = vsel %vm6040_vm0, %v6036_v5, inf  ;;  %v6094_v40 = vand.u32 65535, %v16591_v14  ;;  %v6111_v5 = vcvt.s32.f32 %v6109_v9  ;;  %v16600_v14 = vld [vmem:[#allocation29_spill] sm:$0xff]  ;;  %v12844_v9 = vpop.xlane.xlu0 %5963 }
 0xa79   :  { %vm6145_vm14 = vcmp.eq.f32.partialorder %v16600_v14, %v12818_v2 }
 0xa7a   :  { %v12797_v6 = vpop.xlane.xlu1 %6068  ;;  %v6096_v48 = vcvt.s32.f32 %v6094_v40  ;;  %v6116_v26 = vsel %vm6115_vm12, %v6111_v5, inf  ;;  %v16606_v5 = vld [vmem:[#allocation55_spill] sm:$0xff] }
 0xa7b   :  { %vm6070_vm5 = vcmp.eq.f32.partialorder %v16589_v43, %v12797_v6  ;;  %v16599_v43 = vld [vmem:[#allocation67_spill] sm:$0xff] }
 0xa7c   :  { %v6071_v24 = vsel %vm6070_vm5, %v6066_v34, inf  ;;  %v5914_v51 = vand.u32 65535, %v16599_v43 }
 0xa7e   :  { %v12801_v29 = vpop.xlane.xlu1 %6098  ;;  %v5916_v13 = vcvt.s32.f32 %v5914_v51 }
 0xa7f   :  { %vm6100_vm9 = vcmp.eq.f32.partialorder %v16593_v42, %v12801_v29  ;;  %v16603_v42 = vld [vmem:[#allocation35_spill] sm:$0xff] }
 0xa80   :  { %v6101_v58 = vsel %vm6100_vm9, %v6096_v48, inf  ;;  %v5944_v23 = vand.u32 65535, %v16603_v42  ;;  %v16611_v42 = vld [vmem:[#allocation94_spill] sm:$0xff] }
 0xa82   :  { %v12809_v61 = vpop.xlane.xlu1 %6128 }
 0xa83   :  { %vm6130_vm13 = vcmp.eq.f32.partialorder %v16597_v11, %v12809_v61  ;;  %v5959_v11 = vand.u32 65535, %v16606_v5 }
 0xa84   :  { %v6131_v34 = vsel %vm6130_vm13, %v6126_v39, inf }
 0xa85   :  { %v5961_v14 = vcvt.s32.f32 %v5959_v11 }
 0xa86   :  { %v12820_v20 = vpop.xlane.xlu1 %5918 }
 0xa8a   :  { %v12835_v33 = vpop.xlane.xlu1 %5948 }
 0xa8b   :  { %vm5950_vm5 = vcmp.eq.f32.partialorder %v16605_v3, %v12835_v33  ;;  %v16613_v3 = vld [vmem:[#allocation37_spill] sm:$0xff] }
 0xa8e   :  { %v12846_v25 = vpop.xlane.xlu1 %5978 }
 0xa90   :  { %6042 = vmin.xlane.f32.xlu1 %v6041_v0  ;;  %v6139_v0 = vand.u32 65535, %v16598_v7  ;;  %v5946_v7 = vcvt.s32.f32 %v5944_v23  ;;  %v6004_v23 = vand.u32 65535, %v16611_v42 }
 0xa92   :  { %v6141_v40 = vcvt.s32.f32 %v6139_v0  ;;  %v16607_v0 = vld [vmem:[#allocation36_spill] sm:$0xff]  ;;  %v5951_v51 = vsel %vm5950_vm5, %v5946_v7, inf  ;;  %v6006_v5 = vcvt.s32.f32 %v6004_v23 }
 0xa93   :  { %6057 = vmin.xlane.f32.xlu0 %v6056_v49  ;;  %v16601_v49 = vld [vmem:[#allocation42_spill] sm:$0xff]  ;;  %v5974_v39 = vand.u32 65535, %v16607_v0 }
 0xa94   :  { %6072 = vmin.xlane.f32.xlu1 %v6071_v24  ;;  %vm5920_vm0 = vcmp.eq.f32.partialorder %v16601_v49, %v12820_v20  ;;  %v16602_v24 = vld [vmem:[#allocation85_spill] sm:$0xff]  ;;  %v6146_v48 = vsel %vm6145_vm14, %v6141_v40, inf  ;;  %v16609_v40 = vld [vmem:[#allocation95_spill] sm:$0xff] }
 0xa95   :  { %v5929_v4 = vand.u32 65535, %v16602_v24  ;;  %v5921_v37 = vsel %vm5920_vm0, %v5916_v13, inf  ;;  %vm5980_vm9 = vcmp.eq.f32.partialorder %v16609_v40, %v12846_v25  ;;  %v16610_v49 = vld [vmem:[#allocation57_spill] sm:$0xff]  ;;  %v5976_v13 = vcvt.s32.f32 %v5974_v39 }
 0xa96   :  { %v5989_v24 = vand.u32 65535, %v16610_v49  ;;  %v16618_v40 = vcombine.high %v12284_v32, %v12281_v62 }
 0xa97   :  { %6087 = vmin.xlane.f32.xlu0 %v6086_v41  ;;  %v16604_v41 = vld [vmem:[#allocation89_spill] sm:$0xff] }
 0xa98   :  { %6102 = vmin.xlane.f32.xlu1 %v6101_v58  ;;  %vm5935_vm2 = vcmp.eq.f32.partialorder %v16604_v41, %v12830_v46  ;;  %v5931_v58 = vcvt.s32.f32 %v5929_v4  ;;  %v12861_v4 = vpop.xlane.xlu1 %6008  ;;  %v16612_v41 = vld [vmem:[#allocation91_spill] sm:$0xff]  ;;  %v12888_v49 = vrot.slane %v16618_v40, %v16332_v45 }
 0xa99   :  { %vm6010_vm13 = vcmp.eq.f32.partialorder %v16613_v3, %v12861_v4 }
 0xa9a   :  { %v5936_v43 = vsel %vm5935_vm2, %v5931_v58, inf  ;;  %v5991_v58 = vcvt.s32.f32 %v5989_v24  ;;  %v6011_v7 = vsel %vm6010_vm13, %v6006_v5, inf  ;;  %v16631_v5 = vld [vmem:[#allocation59_spill] sm:$0xff] }
 0xa9b   :  { %6117 = vmin.xlane.f32.xlu0 %v6116_v26  ;;  %v16608_v26 = vld [vmem:[#allocation88_spill] sm:$0xff] }
 0xa9c   :  { %6132 = vmin.xlane.f32.xlu1 %v6131_v34  ;;  %vm5965_vm8 = vcmp.eq.f32.partialorder %v16608_v26, %v12844_v9  ;;  %v12856_v34 = vpop.xlane.xlu0 %5993  ;;  %v12868_v0 = vpop.permute.xlu1 %5736 }
 0xa9d   :  { %vm5995_vm12 = vcmp.eq.f32.partialorder %v16612_v41, %v12856_v34  ;;  %16614 = vst [vmem:[#allocation52_spill] sm:$0xff] %v12868_v0  ;;  %v16629_v41 = vld [vmem:[#allocation56_spill] sm:$0xff]  ;;  %v6075_v0 = vcvt.f32.s32 %v12797_v6 }
 0xa9e   :  { %v5996_v11 = vsel %vm5995_vm12, %v5991_v58, inf  ;;  %v6019_v58 = vand.u32 65535, %v16629_v41 }
 0xa9f   :  { %6147 = vmin.xlane.f32.xlu0 %v6146_v48  ;;  %v5966_v48 = vsel %vm5965_vm8, %v5961_v14, inf  ;;  %v6076_v60 = vshll.u32 %v6075_v0, 16  ;;  %v6120_v0 = vcvt.f32.s32 %v12804_v63 }
 0xaa0   :  { %5922 = vmin.xlane.f32.xlu1 %v5921_v37  ;;  %v5981_v37 = vsel %vm5980_vm9, %v5976_v13, inf  ;;  %v12870_v39 = vpop.xlane.xlu0 %6023 }
 0xaa1   :  { %vm6025_vm14 = vcmp.eq.f32.partialorder %v16631_v5, %v12870_v39 }
 0xaa3   :  { %5937 = vmin.xlane.f32.xlu0 %v5936_v43  ;;  %v12872_v43 = vpop.permute.xlu1 %5740 }
 0xaa4   :  { %5952 = vmin.xlane.f32.xlu1 %v5951_v51  ;;  %16615 = vst [vmem:[#allocation60_spill] sm:$0xff] %v12872_v43  ;;  %v16616_v51 = vcombine.high %v12252_v18, %v12249_v47  ;;  %v12880_v14 = vpop.permute.xlu0 %5738  ;;  %v6060_v43 = vcvt.f32.s32 %v12795_v57 }
 0xaa5   :  { %16617 = vst [vmem:[#allocation84_spill] sm:$0xff] %v12880_v14 }
 0xaa6   :  { %v12878_v26 = vrot.slane %v16616_v51, %v16332_v45  ;;  %v6061_v50 = vshll.u32 %v6060_v43, 16 }
 0xaa7   :  { %5967 = vmin.xlane.f32.xlu0 %v5966_v48  ;;  %v12890_v24 = vpop.permute.xlu1 %5722 }
 0xaa8   :  { %5982 = vmin.xlane.f32.xlu1 %v5981_v37  ;;  %16619 = vst [vmem:[#allocation66_spill] sm:$0xff] %v12890_v24  ;;  %v12894_v13 = vpop.permute.xlu0 %5742 }
 0xaa9   :  { %16620 = vst [vmem:[#allocation83_spill] sm:$0xff] %v12894_v13 }
 0xaab   :  { %5997 = vmin.xlane.f32.xlu0 %v5996_v11  ;;  %v12896_v47 = vpop.permute.xlu1 %5724 }
 0xaac   :  { %6012 = vmin.xlane.f32.xlu1 %v6011_v7  ;;  %16621 = vst [vmem:[#allocation90_spill] sm:$0xff] %v12896_v47  ;;  %v12898_v18 = vpop.permute.xlu0 %5720  ;;  %v6021_v7 = vcvt.s32.f32 %v6019_v58 }
 0xaad   :  { %16622 = vst [vmem:[#allocation27_spill] sm:$0xff] %v12898_v18 }
 0xaae   :  { %v6026_v51 = vsel %vm6025_vm14, %v6021_v7, inf }
 0xaaf   :  { %v12902_v23 = vpop.permute.xlu1 %5728 }
 0xab0   :  { %v12900_v42 = vpop.permute.xlu0 %5726  ;;  %16624 = vst [vmem:[#allocation25_spill] sm:$0xff] %v12902_v23 }
 0xab1   :  { %16623 = vst [vmem:[#allocation43_spill] sm:$0xff] %v12900_v42 }
 0xab3   :  { %v12906_v62 = vpop.permute.xlu1 %5732 }
 0xab4   :  { %v12904_v48 = vpop.permute.xlu0 %5730  ;;  %16626 = vst [vmem:[#allocation54_spill] sm:$0xff] %v12906_v62 }
 0xab5   :  { %16625 = vst [vmem:[#allocation92_spill] sm:$0xff] %v12904_v48 }
 0xab7   :  { %v12910_v37 = vpop.permute.xlu1 %5704 }
 0xab8   :  { %v12908_v32 = vpop.permute.xlu0 %5734  ;;  %16628 = vst [vmem:[#allocation53_spill] sm:$0xff] %v12910_v37  ;;  %v6090_v37 = vcvt.f32.s32 %v12799_v15 }
 0xab9   :  { %16627 = vst [vmem:[#allocation34_spill] sm:$0xff] %v12908_v32 }
 0xabb   :  { %v12917_v11 = vpop.permute.xlu1 %5708 }
 0xabc   :  { %v12913_v3 = vpop.permute.xlu0 %5706  ;;  %16632 = vst [vmem:[#allocation29_spill] sm:$0xff] %v12917_v11  ;;  %v6046_v11 = vshll.u32 %v6045_v17, 16  ;;  %v16656_v17 = vld [vmem:[#allocation44_spill] sm:$0xff] }
 0xabd   :  { %5744 = vrot.lane.b32.xlu1 %v12878_v26, %s8784_s23  ;;  %16630 = vst [vmem:[#allocation67_spill] sm:$0xff] %v12913_v3 }
 0xabf   :  { %v12921_v10 = vpop.permute.xlu1 %5712 }
 0xac0   :  { %v12919_v40 = vpop.permute.xlu0 %5710  ;;  %16634 = vst [vmem:[#allocation85_spill] sm:$0xff] %v12921_v10 }
 0xac1   :  { %5746 = vrot.lane.b32.xlu0 %v12888_v49, %s8784_s23  ;;  %16633 = vst [vmem:[#allocation42_spill] sm:$0xff] %v12919_v40 }
 0xac3   :  { %v12925_v21 = vpop.permute.xlu1 %5716 }
 0xac4   :  { %v12923_v31 = vpop.permute.xlu0 %5714  ;;  %16636 = vst [vmem:[#allocation89_spill] sm:$0xff] %v12925_v21 }
 0xac5   :  { %16635 = vst [vmem:[#allocation35_spill] sm:$0xff] %v12923_v31 }
 0xac7   :  { %v12929_v41 = vpop.permute.xlu1 %5688 }
 0xac8   :  { %v12927_v19 = vpop.permute.xlu0 %5718 }
 0xac9   :  { %16637 = vst [vmem:[#allocation93_spill] sm:$0xff] %v12927_v19 }
 0xacb   :  { %v12933_v5 = vpop.permute.xlu1 %5692 }
 0xacc   :  { %v12931_v13 = vpop.permute.xlu0 %5690  ;;  %16639 = vst [vmem:[#allocation36_spill] sm:$0xff] %v12933_v5 }
 0xacd   :  { %16638 = vst [vmem:[#allocation55_spill] sm:$0xff] %v12931_v13 }
 0xacf   :  { %v12937_v58 = vpop.permute.xlu1 %5698 }
 0xad0   :  { %v12935_v38 = vpop.permute.xlu0 %5694  ;;  %16641 = vst [vmem:[#allocation95_spill] sm:$0xff] %v12937_v58 }
 0xad1   :  { %16640 = vst [vmem:[#allocation88_spill] sm:$0xff] %v12935_v38 }
 0xad4   :  { %v12939_v7 = vpop.permute.xlu0 %5696 }
 0xad5   :  { %16642 = vst [vmem:[#allocation57_spill] sm:$0xff] %v12939_v7  ;;  %v16678_v7 = vld [vmem:[#allocation31_spill] sm:$0xff] }
 0xad8   :  { %v12943_v40 = vpop.permute.xlu0 %5702 }
 0xad9   :  { %16644 = vst [vmem:[#allocation91_spill] sm:$0xff] %v12943_v40 }
 0xadc   :  { %v12947_v14 = vpop.permute.xlu0 %5754 }
 0xadd   :  { %16646 = vst [vmem:[#allocation56_spill] sm:$0xff] %v12947_v14 }
 0xae0   :  { %6027 = vmin.xlane.f32.xlu0 %v6026_v51  ;;  %v12941_v51 = vpop.permute.xlu1 %5700  ;;  %v12951_v12 = vpop.permute.xlu0 %5758 }
 0xae1   :  { %16643 = vst [vmem:[#allocation94_spill] sm:$0xff] %v12941_v51  ;;  %16648 = vst [vmem:[#allocation97_spill] sm:$0xff] %v12951_v12  ;;  %v6105_v51 = vcvt.f32.s32 %v12801_v29 }
 0xae3   :  { %v6106_v43 = vshll.u32 %v6105_v51, 16  ;;  %v16660_v51 = vld [vmem:[#allocation68_spill] sm:$0xff] }
 0xae4   :  { %v12945_v31 = vpop.permute.xlu1 %5752  ;;  %v12955_v59 = vpop.permute.xlu0 %5762 }
 0xae5   :  { %16645 = vst [vmem:[#allocation37_spill] sm:$0xff] %v12945_v31  ;;  %16650 = vst [vmem:[#allocation99_spill] sm:$0xff] %v12955_v59 }
 0xae8   :  { %v12949_v19 = vpop.permute.xlu1 %5756  ;;  %v12960_v10 = vpop.permute.xlu0 %5766 }
 0xae9   :  { %16647 = vst [vmem:[#allocation59_spill] sm:$0xff] %v12949_v19  ;;  %16652 = vst [vmem:[#allocation101_spill] sm:$0xff] %v12960_v10 }
 0xaec   :  { %v12953_v3 = vpop.permute.xlu1 %5760 }
 0xaed   :  { %16649 = vst [vmem:[#allocation98_spill] sm:$0xff] %v12953_v3 }
 0xaf0   :  { %v12957_v21 = vpop.permute.xlu1 %5764 }
 0xaf1   :  { %16651 = vst [vmem:[#allocation100_spill] sm:$0xff] %v12957_v21 }
 0xb1d   :  { %v6043_v44 = vpop.xlane.xlu1 %6042 }
 0xb1e   :  { %v6044_v30 = vcvt.f32.s32 %v6043_v44 }
 0xb20   :  { %v12965_v62 = vadd.s32 %v6046_v11, %v6044_v30  ;;  %v6058_v3 = vpop.xlane.xlu0 %6057  ;;  %v6091_v30 = vshll.u32 %v6090_v37, 16  ;;  %v16658_v11 = vld [vmem:[#allocation72_spill] sm:$0xff] }
 0xb21   :  { %v6059_v21 = vcvt.f32.s32 %v6058_v3  ;;  %v6073_v23 = vpop.xlane.xlu1 %6072 }
 0xb22   :  { %16653 = vst [vmem:[#allocation102_spill] sm:$0xff] %v12965_v62  ;;  %v6074_v19 = vcvt.f32.s32 %v6073_v23  ;;  %vm16024_vm0 = vcmp.eq.s32.totalorder %v16654_v35, %v12965_v62 }
 0xb23   :  { %v12970_v57 = vadd.s32 %v6061_v50, %v6059_v21  ;;  %v12976_v44 = vsel %vm16024_vm0, -1e+30, %v16656_v17  ;;  %v6135_v50 = vcvt.f32.s32 %v12809_v61 }
 0xb24   :  { %v12978_v6 = vadd.s32 %v6076_v60, %v6074_v19  ;;  %v6088_v15 = vpop.xlane.xlu0 %6087  ;;  %v6433_v29 = vsel %vm5832_vm7, %v12976_v44, -inf  ;;  %v6150_v60 = vcvt.f32.s32 %v12818_v2 }
 0xb25   :  { %16655 = vst [vmem:[#allocation17_spill] sm:$0xff] %v12970_v57  ;;  %v6089_v23 = vcvt.f32.s32 %v6088_v15  ;;  %6434 = vmax.xlane.f32.xlu1 %v6433_v29  ;;  %v6103_v21 = vpop.xlane.xlu1 %6102  ;;  %vm15980_vm2 = vcmp.eq.s32.totalorder %v16654_v35, %v12970_v57 }
 0xb26   :  { %16657 = vst [vmem:[#allocation44_spill] sm:$0xff] %v12978_v6  ;;  %v6104_v3 = vcvt.f32.s32 %v6103_v21  ;;  %v12990_v19 = vsel %vm15980_vm2, -1e+30, %v16658_v11  ;;  %vm15983_vm5 = vcmp.eq.s32.totalorder %v16654_v35, %v12978_v6  ;;  %v16662_v6 = vld [vmem:[#allocation74_spill] sm:$0xff] }
 0xb27   :  { %v12994_v63 = vadd.s32 %v6091_v30, %v6089_v23  ;;  %v6436_v37 = vsel %vm5832_vm7, %v12990_v19, -inf  ;;  %v13002_v61 = vsel %vm15983_vm5, -1e+30, %v16660_v51  ;;  %v6121_v30 = vshll.u32 %v6120_v0, 16 }
 0xb28   :  { %v13005_v17 = vadd.s32 %v6106_v43, %v6104_v3  ;;  %6437 = vmax.xlane.f32.xlu0 %v6436_v37  ;;  %v6118_v15 = vpop.xlane.xlu0 %6117  ;;  %v6439_v29 = vsel %vm5832_vm7, %v13002_v61, -inf  ;;  %v5925_v23 = vcvt.f32.s32 %v12820_v20  ;;  %v6136_v51 = vshll.u32 %v6135_v50, 16  ;;  %v16664_v43 = vld [vmem:[#allocation70_spill] sm:$0xff] }
 0xb29   :  { %16659 = vst [vmem:[#allocation72_spill] sm:$0xff] %v12994_v63  ;;  %v6119_v21 = vcvt.f32.s32 %v6118_v15  ;;  %6440 = vmax.xlane.f32.xlu1 %v6439_v29  ;;  %v6133_v11 = vpop.xlane.xlu1 %6132  ;;  %vm15979_vm8 = vcmp.eq.s32.totalorder %v16654_v35, %v12994_v63  ;;  %v6151_v3 = vshll.u32 %v6150_v60, 16  ;;  %v5940_v29 = vcvt.f32.s32 %v12830_v46  ;;  %v16666_v60 = vld [vmem:[#allocation73_spill] sm:$0xff] }
 0xb2a   :  { %16661 = vst [vmem:[#allocation68_spill] sm:$0xff] %v13005_v17  ;;  %v6134_v57 = vcvt.f32.s32 %v6133_v11  ;;  %v13016_v2 = vsel %vm15979_vm8, -1e+30, %v16662_v6  ;;  %vm15982_vm9 = vcmp.eq.s32.totalorder %v16654_v35, %v13005_v17  ;;  %v16670_v17 = vld [vmem:[#allocation76_spill] sm:$0xff] }
 0xb2b   :  { %v13020_v0 = vadd.s32 %v6121_v30, %v6119_v21  ;;  %v6442_v20 = vsel %vm5832_vm7, %v13016_v2, -inf  ;;  %v13028_v50 = vsel %vm15982_vm9, -1e+30, %v16664_v43  ;;  %v5926_v30 = vshll.u32 %v5925_v23, 16 }
 0xb2c   :  { %v13030_v37 = vadd.s32 %v6136_v51, %v6134_v57  ;;  %6443 = vmax.xlane.f32.xlu0 %v6442_v20  ;;  %v6148_v6 = vpop.xlane.xlu0 %6147  ;;  %v6445_v15 = vsel %vm5832_vm7, %v13028_v50, -inf  ;;  %v5955_v43 = vcvt.f32.s32 %v12835_v33  ;;  %v16668_v51 = vld [vmem:[#allocation71_spill] sm:$0xff]  ;;  %v5970_v20 = vcvt.f32.s32 %v12844_v9 }
 0xb2d   :  { %16663 = vst [vmem:[#allocation74_spill] sm:$0xff] %v13020_v0  ;;  %v6149_v21 = vcvt.f32.s32 %v6148_v6  ;;  %6446 = vmax.xlane.f32.xlu1 %v6445_v15  ;;  %v5923_v11 = vpop.xlane.xlu1 %5922  ;;  %vm15978_vm12 = vcmp.eq.s32.totalorder %v16654_v35, %v13020_v0 }
 0xb2e   :  { %16665 = vst [vmem:[#allocation70_spill] sm:$0xff] %v13030_v37  ;;  %v5924_v63 = vcvt.f32.s32 %v5923_v11  ;;  %v13042_v57 = vsel %vm15978_vm12, -1e+30, %v16666_v60  ;;  %vm15981_vm13 = vcmp.eq.s32.totalorder %v16654_v35, %v13030_v37 }
 0xb2f   :  { %v13046_v46 = vadd.s32 %v6151_v3, %v6149_v21  ;;  %v6448_v23 = vsel %vm5832_vm7, %v13042_v57, -inf  ;;  %v13054_v33 = vsel %vm15981_vm13, -1e+30, %v16668_v51  ;;  %v5941_v3 = vshll.u32 %v5940_v29, 16  ;;  %v16672_v29 = vld [vmem:[#allocation45_spill] sm:$0xff] }
 0xb30   :  { %v13057_v6 = vadd.s32 %v5926_v30, %v5924_v63  ;;  %6449 = vmax.xlane.f32.xlu0 %v6448_v23  ;;  %v5938_v15 = vpop.xlane.xlu0 %5937  ;;  %v6451_v11 = vsel %vm5832_vm7, %v13054_v33, -inf  ;;  %v5985_v21 = vcvt.f32.s32 %v12846_v25  ;;  %v5956_v51 = vshll.u32 %v5955_v43, 16 }
 0xb31   :  { %16667 = vst [vmem:[#allocation73_spill] sm:$0xff] %v13046_v46  ;;  %v5939_v60 = vcvt.f32.s32 %v5938_v15  ;;  %6452 = vmax.xlane.f32.xlu1 %v6451_v11  ;;  %v5953_v0 = vpop.xlane.xlu1 %5952  ;;  %vm15977_vm14 = vcmp.eq.s32.totalorder %v16654_v35, %v13046_v46  ;;  %v6000_v15 = vcvt.f32.s32 %v12856_v34 }
 0xb32   :  { %16669 = vst [vmem:[#allocation71_spill] sm:$0xff] %v13057_v6  ;;  %v5954_v37 = vcvt.f32.s32 %v5953_v0  ;;  %v13068_v9 = vsel %vm15977_vm14, -1e+30, %v16670_v17  ;;  %vm6153_vm1 = vcmp.eq.s32.totalorder %v16654_v35, %v13057_v6  ;;  %v5971_v0 = vshll.u32 %v5970_v20, 16  ;;  %v16674_v20 = vld [vmem:[#allocation28_spill] sm:$0xff] }
 0xb33   :  { %v13072_v63 = vadd.s32 %v5941_v3, %v5939_v60  ;;  %v6454_v25 = vsel %vm5832_vm7, %v13068_v9, -inf  ;;  %v13080_v30 = vsel %vm6153_vm1, -1e+30, %v16672_v29  ;;  %v5986_v11 = vshll.u32 %v5985_v21, 16 }
 0xb34   :  { %v13082_v43 = vadd.s32 %v5956_v51, %v5954_v37  ;;  %6455 = vmax.xlane.f32.xlu0 %v6454_v25  ;;  %v5968_v17 = vpop.xlane.xlu0 %5967  ;;  %v6409_v23 = vsel %vm5832_vm7, %v13080_v30, -inf  ;;  %v6015_v29 = vcvt.f32.s32 %v12861_v4  ;;  %v16676_v51 = vld [vmem:[#allocation14_spill] sm:$0xff] }
 0xb35   :  { %16671 = vst [vmem:[#allocation76_spill] sm:$0xff] %v13072_v63  ;;  %v5969_v3 = vcvt.f32.s32 %v5968_v17  ;;  %6410 = vmax.xlane.f32.xlu1 %v6409_v23  ;;  %v5983_v60 = vpop.xlane.xlu1 %5982  ;;  %vm6154_vm15 = vcmp.eq.s32.totalorder %v16654_v35, %v13072_v63 }
 0xb36   :  { %16673 = vst [vmem:[#allocation45_spill] sm:$0xff] %v13082_v43  ;;  %v5984_v46 = vcvt.f32.s32 %v5983_v60  ;;  %v13094_v37 = vsel %vm6154_vm15, -1e+30, %v16674_v20  ;;  %vm16034_vm11 = vcmp.eq.s32.totalorder %v16654_v35, %v13082_v43  ;;  %v6001_v60 = vshll.u32 %v6000_v15, 16 }
 0xb37   :  { %v13098_v34 = vadd.s32 %v5971_v0, %v5969_v3  ;;  %v6412_v21 = vsel %vm5832_vm7, %v13094_v37, -inf  ;;  %v13106_v4 = vsel %vm16034_vm11, -1e+30, %v16676_v51  ;;  %v6016_v3 = vshll.u32 %v6015_v29, 16 }
 0xb38   :  { %v13108_v25 = vadd.s32 %v5986_v11, %v5984_v46  ;;  %6413 = vmax.xlane.f32.xlu0 %v6412_v21  ;;  %v5998_v17 = vpop.xlane.xlu0 %5997  ;;  %v6415_v23 = vsel %vm5832_vm7, %v13106_v4, -inf  ;;  %v16680_v21 = vld [vmem:[#allocation32_spill] sm:$0xff] }
 0xb39   :  { %16675 = vst [vmem:[#allocation28_spill] sm:$0xff] %v13098_v34  ;;  %v5999_v20 = vcvt.f32.s32 %v5998_v17  ;;  %6416 = vmax.xlane.f32.xlu1 %v6415_v23  ;;  %v6013_v0 = vpop.xlane.xlu1 %6012  ;;  %vm6156_vm10 = vcmp.eq.s32.totalorder %v16654_v35, %v13098_v34  ;;  %v16682_v17 = vld [vmem:[#allocation77_spill] sm:$0xff]  ;;  %v16704_v34 = vmov 0  }
 0xb3a   :  { %16677 = vst [vmem:[#allocation14_spill] sm:$0xff] %v13108_v25  ;;  %v6014_v62 = vcvt.f32.s32 %v6013_v0  ;;  %v13118_v46 = vsel %vm6156_vm10, -1e+30, %v16678_v7  ;;  %vm16030_vm14 = vcmp.eq.s32.totalorder %v16654_v35, %v13108_v25  ;;  %v5449_v12 = vcombine.high %v12514_v28, %v16704_v34 }
 0xb3b   :  { %v13122_v11 = vadd.s32 %v6001_v60, %v5999_v20  ;;  %v6418_v15 = vsel %vm5832_vm7, %v13118_v46, -inf  ;;  %v13130_v29 = vsel %vm16030_vm14, -1e+30, %v16680_v21  ;;  %v16683_v60 = vld [vmem:[#allocation46_spill] sm:$0xff]  ;;  %v16685_v21 = vcombine.high %v12355_v16, %v12352_v53 }
 0xb3c   :  { %v13132_v51 = vadd.s32 %v6016_v3, %v6014_v62  ;;  %6419 = vmax.xlane.f32.xlu0 %v6418_v15  ;;  %v6421_v7 = vsel %vm5832_vm7, %v13130_v29, -inf  ;;  %v16684_v3 = vcombine.high %v12316_v54, %v12313_v22 }
 0xb3d   :  { %16679 = vst [vmem:[#allocation31_spill] sm:$0xff] %v13122_v11  ;;  %6422 = vmax.xlane.f32.xlu1 %v6421_v7  ;;  %vm6158_vm12 = vcmp.eq.s32.totalorder %v16654_v35, %v13122_v11  ;;  %v13168_v7 = vrot.slane %v16685_v21, %v16332_v45  ;;  %v13187_v21 = vpop.permute.xlu1 %5744 }
 0xb3e   :  { %16681 = vst [vmem:[#allocation32_spill] sm:$0xff] %v13132_v51  ;;  %v13142_v23 = vsel %vm6158_vm12, -1e+30, %v16682_v17  ;;  %vm16029_vm8 = vcmp.eq.s32.totalorder %v16654_v35, %v13132_v51  ;;  %v13160_v15 = vrot.slane %v16684_v3, %v16332_v45  ;;  %v13172_v17 = vpop.permute.xlu0 %5746  ;;  %v16689_v3 = vld [vmem:[#allocation47_spill] sm:$0xff] }
 0xb3f   :  { %v6424_v62 = vsel %vm5832_vm7, %v13142_v23, -inf  ;;  %v13152_v20 = vsel %vm16029_vm8, -1e+30, %v16683_v60  ;;  %16686 = vst [vmem:[#allocation77_spill] sm:$0xff] %v13168_v7  ;;  %16687 = vst [vmem:[#allocation46_spill] sm:$0xff] %v13172_v17 }
 0xb40   :  { %6425 = vmax.xlane.f32.xlu0 %v6424_v62  ;;  %v6427_v0 = vsel %vm5832_vm7, %v13152_v20, -inf  ;;  %v6030_v62 = vcvt.f32.s32 %v12870_v39  ;;  %16690 = vst [vmem:[#allocation47_spill] sm:$0xff] %v13187_v21 }
 0xb41   :  { %6428 = vmax.xlane.f32.xlu1 %v6427_v0 }
 0xb42   :  { %v6031_v22 = vshll.u32 %v6030_v62, 16 }
 0xb52   :  { %5748 = vrot.lane.b32.xlu1 %v13160_v15, %s8784_s23 }
 0xb56   :  { %5750 = vrot.lane.b32.xlu0 %v13168_v7, %s8784_s23 }
 0xb6d   :  { %v6028_v60 = vpop.xlane.xlu0 %6027 }
 0xb6e   :  { %v6029_v54 = vcvt.f32.s32 %v6028_v60 }
 0xb70   :  { %v13175_v0 = vadd.s32 %v6031_v22, %v6029_v54 }
 0xb72   :  { %16688 = vst [vmem:[#allocation103_spill] sm:$0xff] %v13175_v0  ;;  %vm6160_vm2 = vcmp.eq.s32.totalorder %v16654_v35, %v13175_v0 }
 0xb73   :  { %v13183_v53 = vsel %vm6160_vm2, -1e+30, %v16689_v3 }
 0xb74   :  { %v6430_v16 = vsel %vm5832_vm7, %v13183_v53, -inf }
 0xb75   :  { %6431 = vmax.xlane.f32.xlu0 %v6430_v16 }
 0xbb2   :  { %v13189_v39 = vpop.xlane.xlu1 %6434 }
 0xbb3   :  { %16691 = vst [vmem:[#allocation104_spill] sm:$0xff] %v13189_v39  ;;  %vm6465_vm13 = vcmp.eq.f32.partialorder %v12976_v44, %v13189_v39 }
 0xbb4   :  { %v6481_v62 = vsel %vm6465_vm13, %v16654_v35, 16 }
 0xbb5   :  { %v13194_v60 = vpop.xlane.xlu0 %6437  ;;  %v13197_v22 = vsel %vm5832_vm7, %v6481_v62, 2147483647 }
 0xbb6   :  { %16692 = vst [vmem:[#allocation105_spill] sm:$0xff] %v13194_v60  ;;  %vm6466_vm9 = vcmp.eq.f32.partialorder %v12990_v19, %v13194_v60  ;;  %v13201_v54 = vpop.xlane.xlu1 %6440  ;;  %v6611_v3 = vshra.s32 %v13197_v22, 16 }
 0xbb7   :  { %16693 = vst [vmem:[#allocation106_spill] sm:$0xff] %v13201_v54  ;;  %v6482_v16 = vsel %vm6466_vm9, %v16654_v35, 16  ;;  %vm6467_vm5 = vcmp.eq.f32.partialorder %v13002_v61, %v13201_v54 }
 0xbb8   :  { %v6483_v45 = vsel %vm6467_vm5, %v16654_v35, 16  ;;  %v13208_v39 = vcvt.s32.f32 %v6611_v3  ;;  %v13211_v17 = vsel %vm5832_vm7, %v6482_v16, 2147483647 }
 0xbb9   :  { %v13213_v62 = vpop.xlane.xlu0 %6443  ;;  %v6626_v60 = vshra.s32 %v13211_v17, 16  ;;  %v13217_v21 = vsel %vm5832_vm7, %v6483_v45, 2147483647 }
 0xbba   :  { %16694 = vst [vmem:[#allocation107_spill] sm:$0xff] %v13213_v62  ;;  %vm6468_vm9 = vcmp.eq.f32.partialorder %v13016_v2, %v13213_v62  ;;  %v13221_v51 = vpop.xlane.xlu1 %6446  ;;  %6614 = vmin.xlane.f32.xlu0 %v13208_v39  ;;  %v6641_v54 = vshra.s32 %v13217_v21, 16 }
 0xbbb   :  { %16695 = vst [vmem:[#allocation108_spill] sm:$0xff] %v13221_v51  ;;  %v6484_v3 = vsel %vm6468_vm9, %v16654_v35, 16  ;;  %vm6469_vm5 = vcmp.eq.f32.partialorder %v13028_v50, %v13221_v51  ;;  %v13227_v16 = vcvt.s32.f32 %v6626_v60 }
 0xbbc   :  { %v13233_v45 = vsel %vm5832_vm7, %v6484_v3, 2147483647  ;;  %v6485_v62 = vsel %vm6469_vm5, %v16654_v35, 16  ;;  %v13244_v51 = vcvt.s32.f32 %v6641_v54 }
 0xbbd   :  { %v13230_v25 = vpop.xlane.xlu0 %6449  ;;  %v6656_v47 = vshra.s32 %v13233_v45, 16  ;;  %v13253_v56 = vsel %vm5832_vm7, %v6485_v62, 2147483647 }
 0xbbe   :  { %16696 = vst [vmem:[#allocation109_spill] sm:$0xff] %v13230_v25  ;;  %v13236_v43 = vpop.xlane.xlu1 %6452  ;;  %6629 = vmin.xlane.f32.xlu0 %v13227_v16  ;;  %vm6470_vm13 = vcmp.eq.f32.partialorder %v13042_v57, %v13230_v25 }
 0xbbf   :  { %16697 = vst [vmem:[#allocation110_spill] sm:$0xff] %v13236_v43  ;;  %vm6471_vm9 = vcmp.eq.f32.partialorder %v13054_v33, %v13236_v43  ;;  %v6486_v5 = vsel %vm6470_vm13, %v16654_v35, 16  ;;  %v13264_v7 = vcvt.s32.f32 %v6656_v47 }
 0xbc0   :  { %v6487_v60 = vsel %vm6471_vm9, %v16654_v35, 16  ;;  %v13268_v62 = vsel %vm5832_vm7, %v6486_v5, 2147483647 }
 0xbc1   :  { %v13247_v3 = vpop.xlane.xlu0 %6455  ;;  %v13250_v63 = vsel %vm5832_vm7, %v6487_v60, 2147483647  ;;  %v6671_v60 = vshra.s32 %v13253_v56, 16 }
 0xbc2   :  { %16698 = vst [vmem:[#allocation111_spill] sm:$0xff] %v13247_v3  ;;  %v13256_v25 = vpop.xlane.xlu1 %6410  ;;  %6644 = vmin.xlane.f32.xlu0 %v13244_v51  ;;  %v6701_v43 = vshra.s32 %v13250_v63, 16  ;;  %vm6472_vm5 = vcmp.eq.f32.partialorder %v13068_v9, %v13247_v3  ;;  %v6686_v3 = vshra.s32 %v13268_v62, 16 }
 0xbc3   :  { %16699 = vst [vmem:[#allocation112_spill] sm:$0xff] %v13256_v25  ;;  %v6488_v14 = vsel %vm6472_vm5, %v16654_v35, 16  ;;  %vm6457_vm13 = vcmp.eq.f32.partialorder %v13080_v30, %v13256_v25  ;;  %v13279_v47 = vcvt.s32.f32 %v6671_v60 }
 0xbc4   :  { %v13262_v54 = vcvt.s32.f32 %v6701_v43  ;;  %v13283_v5 = vsel %vm5832_vm7, %v6488_v14, 2147483647  ;;  %v6473_v0 = vsel %vm6457_vm13, %v16654_v35, 16  ;;  %v13294_v25 = vcvt.s32.f32 %v6686_v3 }
 0xbc5   :  { %v13277_v43 = vpop.xlane.xlu0 %6413  ;;  %v6716_v55 = vshra.s32 %v13283_v5, 16  ;;  %v13301_v13 = vsel %vm5832_vm7, %v6473_v0, 2147483647 }
 0xbc6   :  { %6704 = vmin.xlane.f32.xlu1 %v13262_v54  ;;  %v13272_v24 = vpop.xlane.xlu1 %6416  ;;  %6659 = vmin.xlane.f32.xlu0 %v13264_v7  ;;  %16701 = vst [vmem:[#allocation114_spill] sm:$0xff] %v13277_v43  ;;  %vm6458_vm9 = vcmp.eq.f32.partialorder %v13094_v37, %v13277_v43 }
 0xbc7   :  { %16700 = vst [vmem:[#allocation113_spill] sm:$0xff] %v13272_v24  ;;  %v6474_v32 = vsel %vm6458_vm9, %v16654_v35, 16  ;;  %vm6459_vm13 = vcmp.eq.f32.partialorder %v13106_v4, %v13272_v24  ;;  %v13312_v11 = vcvt.s32.f32 %v6716_v55 }
 0xbc8   :  { %v13316_v0 = vsel %vm5832_vm7, %v6474_v32, 2147483647  ;;  %v6475_v59 = vsel %vm6459_vm13, %v16654_v35, 16 }
 0xbc9   :  { %v13327_v55 = vsel %vm5832_vm7, %v6475_v59, 2147483647 }
 0xbca   :  { %v13286_v10 = vpop.xlane.xlu1 %6422  ;;  %6674 = vmin.xlane.f32.xlu0 %v13279_v47  ;;  %v6521_v40 = vshra.s32 %v13327_v55, 16 }
 0xbcb   :  { %16702 = vst [vmem:[#allocation115_spill] sm:$0xff] %v13286_v10  ;;  %vm6461_vm5 = vcmp.eq.f32.partialorder %v13130_v29, %v13286_v10  ;;  %v13308_v10 = vpop.xlane.xlu0 %6419 }
 0xbcc   :  { %v6477_v60 = vsel %vm6461_vm5, %v16654_v35, 16  ;;  %16703 = vst [vmem:[#allocation116_spill] sm:$0xff] %v13308_v10  ;;  %vm6460_vm9 = vcmp.eq.f32.partialorder %v13118_v46, %v13308_v10 }
 0xbcd   :  { %v13298_v14 = vsel %vm5832_vm7, %v6477_v60, 2147483647  ;;  %v6491_v60 = vshra.s32 %v13301_v13, 16  ;;  %v6476_v8 = vsel %vm6460_vm9, %v16654_v35, 16 }
 0xbce   :  { %6689 = vmin.xlane.f32.xlu0 %v13294_v25  ;;  %v6551_v43 = vshra.s32 %v13298_v14, 16  ;;  %v13335_v48 = vsel %vm5832_vm7, %v6476_v8, 2147483647  ;;  %v16705_v8 = vld [vmem:[#allocation41_spill] sm:$0xff]  ;;  %v13355_v27 = vpop.xlane.xlu1 %6428 }
 0xbcf   :  { %v13323_v24 = vcvt.s32.f32 %v6491_v60  ;;  %v13338_v60 = vcvt.s32.f32 %v6521_v40  ;;  %v6536_v10 = vshra.s32 %v13335_v48, 16  ;;  %v13351_v40 = vpop.xlane.xlu0 %6425  ;;  %16707 = vst [vmem:[#allocation117_spill] sm:$0xff] %v13355_v27  ;;  %vm6463_vm13 = vcmp.eq.f32.partialorder %v13152_v20, %v13355_v27 }
 0xbd0   :  { %v13310_v3 = vcvt.s32.f32 %v6551_v43  ;;  %v6506_v43 = vshra.s32 %v13316_v0, 16  ;;  %16706 = vst [vmem:[#allocation41_spill] sm:$0xff] %v13351_v40  ;;  %vm6462_vm5 = vcmp.eq.f32.partialorder %v13142_v23, %v13351_v40 }
 0xbd1   :  { %v13342_v59 = vcvt.s32.f32 %v6536_v10  ;;  %v6478_v28 = vsel %vm6462_vm5, %v16654_v35, 16 }
 0xbd2   :  { %6554 = vmin.xlane.f32.xlu1 %v13310_v3  ;;  %6719 = vmin.xlane.f32.xlu0 %v13312_v11  ;;  %v13331_v32 = vcvt.s32.f32 %v6506_v43  ;;  %v5483_v43 = vcombine.high %v16705_v8, %v16704_v34  ;;  %v13365_v8 = vsel %vm5832_vm7, %v6478_v28, 2147483647 }
 0xbd3   :  { %v13357_v10 = vpop.permute.xlu0 %5750  ;;  %v6566_v40 = vshra.s32 %v13365_v8, 16 }
 0xbd4   :  { %16708 = vst [vmem:[#allocation118_spill] sm:$0xff] %v13357_v10 }
 0xbd5   :  { %v13375_v42 = vcvt.s32.f32 %v6566_v40  ;;  %v6610_v40 = vand.u32 65535, %v13197_v22 }
 0xbd6   :  { %6494 = vmin.xlane.f32.xlu0 %v13323_v24 }
 0xbd7   :  { %v6612_v36 = vcvt.s32.f32 %v6610_v40 }
 0xbda   :  { %6509 = vmin.xlane.f32.xlu0 %v13331_v32 }
 0xbde   :  { %6524 = vmin.xlane.f32.xlu0 %v13338_v60 }
 0xbe2   :  { %6539 = vmin.xlane.f32.xlu0 %v13342_v59 }
 0xbe3   :  { %5768 = vrot.lane.b32.xlu1 %v5449_v12, %s8798_s17 }
 0xbf8   :  { %5770 = vrot.lane.b32.xlu0 %v5483_v43, %s8798_s17  ;;  %v6479_v43 = vsel %vm6463_vm13, %v16654_v35, 16 }
 0xbf9   :  { %v13372_v58 = vsel %vm5832_vm7, %v6479_v43, 2147483647 }
 0xbfa   :  { %v6581_v27 = vshra.s32 %v13372_v58, 16 }
 0xbfc   :  { %v13382_v28 = vcvt.s32.f32 %v6581_v27 }
 0xc02   :  { %v13362_v12 = vpop.xlane.xlu0 %6431 }
 0xc03   :  { %16709 = vst [vmem:[#allocation119_spill] sm:$0xff] %v13362_v12  ;;  %vm6464_vm9 = vcmp.eq.f32.partialorder %v13183_v53, %v13362_v12 }
 0xc04   :  { %v6480_v10 = vsel %vm6464_vm9, %v16654_v35, 16 }
 0xc05   :  { %v13379_v6 = vsel %vm5832_vm7, %v6480_v10, 2147483647  ;;  %v6625_v10 = vand.u32 65535, %v13211_v17  ;;  %v6655_v17 = vand.u32 65535, %v13233_v45 }
 0xc06   :  { %v6596_v12 = vshra.s32 %v13379_v6, 16 }
 0xc07   :  { %v6627_v18 = vcvt.s32.f32 %v6625_v10 }
 0xc08   :  { %v13386_v31 = vcvt.s32.f32 %v6596_v12  ;;  %v6640_v12 = vand.u32 65535, %v13217_v21  ;;  %v6657_v21 = vcvt.s32.f32 %v6655_v17 }
 0xc0a   :  { %v6642_v40 = vcvt.s32.f32 %v6640_v12  ;;  %v6685_v12 = vand.u32 65535, %v13268_v62 }
 0xc0c   :  { %v6687_v17 = vcvt.s32.f32 %v6685_v12 }
 0xc17   :  { %6569 = vmin.xlane.f32.xlu0 %v13375_v42 }
 0xc1b   :  { %6584 = vmin.xlane.f32.xlu0 %v13382_v28 }
 0xc1f   :  { %6599 = vmin.xlane.f32.xlu0 %v13386_v31 }
 0xc47   :  { %v13390_v43 = vpop.xlane.xlu0 %6614 }
 0xc48   :  { %vm6616_vm5 = vcmp.eq.f32.partialorder %v13208_v39, %v13390_v43  ;;  %v13405_v39 = vpop.permute.xlu1 %5748 }
 0xc49   :  { %v6617_v27 = vsel %vm6616_vm5, %v6612_v36, inf }
 0xc4a   :  { %6618 = vmin.xlane.f32.xlu1 %v6617_v27  ;;  %v6670_v27 = vand.u32 65535, %v13253_v56 }
 0xc4b   :  { %v13395_v38 = vpop.xlane.xlu0 %6629 }
 0xc4c   :  { %vm6631_vm13 = vcmp.eq.f32.partialorder %v13227_v16, %v13395_v38  ;;  %v6672_v45 = vcvt.s32.f32 %v6670_v27  ;;  %v6490_v27 = vand.u32 65535, %v13301_v13 }
 0xc4d   :  { %v6632_v1 = vsel %vm6631_vm13, %v6627_v18, inf }
 0xc4e   :  { %6633 = vmin.xlane.f32.xlu0 %v6632_v1 }
 0xc4f   :  { %v13400_v22 = vpop.xlane.xlu0 %6644 }
 0xc50   :  { %vm6646_vm9 = vcmp.eq.f32.partialorder %v13244_v51, %v13400_v22  ;;  %v6700_v51 = vand.u32 65535, %v13250_v63 }
 0xc51   :  { %v6647_v36 = vsel %vm6646_vm9, %v6642_v40, inf }
 0xc52   :  { %6648 = vmin.xlane.f32.xlu1 %v6647_v36  ;;  %v6715_v36 = vand.u32 65535, %v13283_v5  ;;  %v6492_v5 = vcvt.s32.f32 %v6490_v27 }
 0xc53   :  { %v13407_v10 = vpop.xlane.xlu0 %6659  ;;  %v13412_v18 = vpop.xlane.xlu1 %6704 }
 0xc54   :  { %vm6661_vm5 = vcmp.eq.f32.partialorder %v13264_v7, %v13407_v10  ;;  %vm6706_vm9 = vcmp.eq.f32.partialorder %v13262_v54, %v13412_v18  ;;  %v6702_v7 = vcvt.s32.f32 %v6700_v51 }
 0xc55   :  { %v6662_v1 = vsel %vm6661_vm5, %v6657_v21, inf }
 0xc56   :  { %6663 = vmin.xlane.f32.xlu0 %v6662_v1  ;;  %v6707_v63 = vsel %vm6706_vm9, %v6702_v7, inf }
 0xc57   :  { %v13414_v16 = vpop.xlane.xlu0 %6674 }
 0xc58   :  { %vm6676_vm13 = vcmp.eq.f32.partialorder %v13279_v47, %v13414_v16  ;;  %v6717_v47 = vcvt.s32.f32 %v6715_v36  ;;  %v6535_v36 = vand.u32 65535, %v13335_v48 }
 0xc59   :  { %v6677_v40 = vsel %vm6676_vm13, %v6672_v45, inf  ;;  %v6505_v45 = vand.u32 65535, %v13316_v0 }
 0xc5a   :  { %6678 = vmin.xlane.f32.xlu1 %v6677_v40  ;;  %v6550_v40 = vand.u32 65535, %v13298_v14 }
 0xc5b   :  { %v13422_v56 = vpop.xlane.xlu0 %6689  ;;  %v6507_v13 = vcvt.s32.f32 %v6505_v45 }
 0xc5c   :  { %vm6691_vm5 = vcmp.eq.f32.partialorder %v13294_v25, %v13422_v56  ;;  %v6552_v0 = vcvt.s32.f32 %v6550_v40 }
 0xc5d   :  { %v6692_v21 = vsel %vm6691_vm5, %v6687_v17, inf }
 0xc5e   :  { %6708 = vmin.xlane.f32.xlu1 %v6707_v63  ;;  %6693 = vmin.xlane.f32.xlu0 %v6692_v21 }
 0xc5f   :  { %v13427_v62 = vpop.xlane.xlu0 %6719  ;;  %v13437_v51 = vpop.xlane.xlu1 %6554 }
 0xc60   :  { %vm6721_vm13 = vcmp.eq.f32.partialorder %v13312_v11, %v13427_v62  ;;  %v6520_v11 = vand.u32 65535, %v13327_v55 }
 0xc61   :  { %v6722_v54 = vsel %vm6721_vm13, %v6717_v47, inf  ;;  %vm6556_vm13 = vcmp.eq.f32.partialorder %v13310_v3, %v13437_v51  ;;  %v6565_v47 = vand.u32 65535, %v13365_v8  ;;  %v5517_v8 = vcombine.high %v12536_v52, %v16704_v34 }
 0xc62   :  { %6723 = vmin.xlane.f32.xlu0 %v6722_v54  ;;  %v6522_v17 = vcvt.s32.f32 %v6520_v11  ;;  %v6557_v14 = vsel %vm6556_vm13, %v6552_v0, inf  ;;  %v6636_v0 = vcvt.f32.s32 %v13395_v38 }
 0xc63   :  { %v13432_v1 = vpop.xlane.xlu0 %6494  ;;  %v6567_v27 = vcvt.s32.f32 %v6565_v47 }
 0xc64   :  { %vm6496_vm9 = vcmp.eq.f32.partialorder %v13323_v24, %v13432_v1 }
 0xc65   :  { %v6497_v25 = vsel %vm6496_vm9, %v6492_v5, inf }
 0xc66   :  { %6498 = vmin.xlane.f32.xlu0 %v6497_v25  ;;  %v16711_v25 = vld [vmem:[#allocation69_spill] sm:$0xff] }
 0xc67   :  { %v13439_v12 = vpop.xlane.xlu0 %6509 }
 0xc68   :  { %vm6511_vm5 = vcmp.eq.f32.partialorder %v13331_v32, %v13439_v12  ;;  %v6537_v32 = vcvt.s32.f32 %v6535_v36 }
 0xc69   :  { %v6512_v7 = vsel %vm6511_vm5, %v6507_v13, inf  ;;  %v5551_v13 = vcombine.high %v16711_v25, %v16704_v34 }
 0xc6a   :  { %6513 = vmin.xlane.f32.xlu1 %v6512_v7 }
 0xc6b   :  { %v13447_v24 = vpop.xlane.xlu0 %6524 }
 0xc6c   :  { %vm6526_vm9 = vcmp.eq.f32.partialorder %v13338_v60, %v13447_v24  ;;  %v6580_v60 = vand.u32 65535, %v13372_v58  ;;  %v6621_v58 = vcvt.f32.s32 %v13390_v43  ;;  %v6651_v43 = vcvt.f32.s32 %v13400_v22 }
 0xc6d   :  { %v6527_v63 = vsel %vm6526_vm9, %v6522_v17, inf  ;;  %v6666_v22 = vcvt.f32.s32 %v13407_v10  ;;  %v6681_v10 = vcvt.f32.s32 %v13414_v16 }
 0xc6e   :  { %6558 = vmin.xlane.f32.xlu1 %v6557_v14  ;;  %6528 = vmin.xlane.f32.xlu0 %v6527_v63  ;;  %v6582_v45 = vcvt.s32.f32 %v6580_v60  ;;  %v6622_v7 = vshll.u32 %v6621_v58, 16 }
 0xc6f   :  { %v13452_v55 = vpop.xlane.xlu0 %6539  ;;  %v6682_v16 = vshll.u32 %v6681_v10, 16 }
 0xc70   :  { %vm6541_vm5 = vcmp.eq.f32.partialorder %v13342_v59, %v13452_v55 }
 0xc71   :  { %v6542_v3 = vsel %vm6541_vm5, %v6537_v32, inf  ;;  %v6637_v32 = vshll.u32 %v6636_v0, 16 }
 0xc72   :  { %6543 = vmin.xlane.f32.xlu0 %v6542_v3 }
 0xc73   :  { %v13456_v21 = vpop.permute.xlu0 %5770 }
 0xc74   :  { %16710 = vst [vmem:[#allocation120_spill] sm:$0xff] %v13456_v21 }
 0xca4   :  { %v13459_v48 = vpop.xlane.xlu0 %6569 }
 0xca5   :  { %vm6571_vm13 = vcmp.eq.f32.partialorder %v13375_v42, %v13459_v48  ;;  %v13474_v42 = vpop.permute.xlu1 %5768 }
 0xca6   :  { %v6572_v54 = vsel %vm6571_vm13, %v6567_v27, inf  ;;  %v6652_v27 = vshll.u32 %v6651_v43, 16 }
 0xca7   :  { %6573 = vmin.xlane.f32.xlu0 %v6572_v54 }
 0xca8   :  { %v13464_v5 = vpop.xlane.xlu0 %6584 }
 0xca9   :  { %vm6586_vm9 = vcmp.eq.f32.partialorder %v13382_v28, %v13464_v5  ;;  %v6595_v28 = vand.u32 65535, %v13379_v6 }
 0xcaa   :  { %v6587_v59 = vsel %vm6586_vm9, %v6582_v45, inf }
 0xcab   :  { %6588 = vmin.xlane.f32.xlu1 %v6587_v59  ;;  %v6597_v17 = vcvt.s32.f32 %v6595_v28  ;;  %v6711_v28 = vcvt.f32.s32 %v13412_v18 }
 0xcac   :  { %v13477_v40 = vpop.xlane.xlu0 %6599 }
 0xcad   :  { %vm6601_vm5 = vcmp.eq.f32.partialorder %v13386_v31, %v13477_v40 }
 0xcae   :  { %v6602_v63 = vsel %vm6601_vm5, %v6597_v17, inf  ;;  %v6712_v17 = vshll.u32 %v6711_v28, 16 }
 0xcbc   :  { %5772 = vrot.lane.b32.xlu1 %v5517_v8, %s8798_s17  ;;  %v6667_v8 = vshll.u32 %v6666_v22, 16 }
 0xcbd   :  { %5774 = vrot.lane.b32.xlu0 %v5551_v13, %s8798_s17 }
 0xcd7   :  { %v6619_v11 = vpop.xlane.xlu1 %6618 }
 0xcd8   :  { %v6620_v52 = vcvt.f32.s32 %v6619_v11 }
 0xcda   :  { %v13483_v36 = vadd.s32 %v6622_v7, %v6620_v52  ;;  %v6696_v7 = vcvt.f32.s32 %v13422_v56 }
 0xcdb   :  { %v6634_v14 = vpop.xlane.xlu0 %6633 }
 0xcdc   :  { %16712 = vst [vmem:[#allocation69_spill] sm:$0xff] %v13483_v36  ;;  %v6635_v3 = vcvt.f32.s32 %v6634_v14  ;;  %6603 = vmin.xlane.f32.xlu0 %v6602_v63  ;;  %vm16023_vm13 = vcmp.eq.s32.totalorder %v16654_v35, %v13483_v36  ;;  %v6726_v14 = vcvt.f32.s32 %v13427_v62 }
 0xcdd   :  { %v13492_v38 = vsel %vm16023_vm13, -1e+30, %v12976_v44 }
 0xcde   :  { %16713 = vst [vmem:[#allocation121_spill] sm:$0xff] %v13492_v38  ;;  %v13494_v31 = vadd.s32 %v6637_v32, %v6635_v3  ;;  %v7009_v6 = vsel %vm5832_vm7, %v13492_v38, -inf  ;;  %v6697_v32 = vshll.u32 %v6696_v7, 16  ;;  %v6561_v7 = vcvt.f32.s32 %v13437_v51 }
 0xcdf   :  { %v6649_v47 = vpop.xlane.xlu1 %6648 }
 0xce0   :  { %16714 = vst [vmem:[#allocation122_spill] sm:$0xff] %v13494_v31  ;;  %v6650_v60 = vcvt.f32.s32 %v6649_v47  ;;  %7010 = vmax.xlane.f32.xlu1 %v7009_v6  ;;  %vm16016_vm9 = vcmp.eq.s32.totalorder %v16654_v35, %v13494_v31 }
 0xce1   :  { %v13505_v44 = vsel %vm16016_vm9, -1e+30, %v12990_v19 }
 0xce2   :  { %16715 = vst [vmem:[#allocation123_spill] sm:$0xff] %v13505_v44  ;;  %v13507_v54 = vadd.s32 %v6652_v27, %v6650_v60  ;;  %v7012_v45 = vsel %vm5832_vm7, %v13505_v44, -inf  ;;  %v6727_v27 = vshll.u32 %v6726_v14, 16  ;;  %v6501_v60 = vcvt.f32.s32 %v13432_v1 }
 0xce3   :  { %7013 = vmax.xlane.f32.xlu0 %v7012_v45  ;;  %v6664_v59 = vpop.xlane.xlu0 %6663 }
 0xce4   :  { %16716 = vst [vmem:[#allocation124_spill] sm:$0xff] %v13507_v54  ;;  %v6665_v25 = vcvt.f32.s32 %v6664_v59  ;;  %vm16017_vm5 = vcmp.eq.s32.totalorder %v16654_v35, %v13507_v54 }
 0xce5   :  { %v13518_v19 = vsel %vm16017_vm5, -1e+30, %v13002_v61 }
 0xce6   :  { %16717 = vst [vmem:[#allocation125_spill] sm:$0xff] %v13518_v19  ;;  %v13520_v13 = vadd.s32 %v6667_v8, %v6665_v25  ;;  %v7015_v58 = vsel %vm5832_vm7, %v13518_v19, -inf }
 0xce7   :  { %v6679_v11 = vpop.xlane.xlu1 %6678  ;;  %7016 = vmax.xlane.f32.xlu1 %v7015_v58  ;;  %v6502_v58 = vshll.u32 %v6501_v60, 16 }
 0xce8   :  { %16718 = vst [vmem:[#allocation126_spill] sm:$0xff] %v13520_v13  ;;  %v6680_v0 = vcvt.f32.s32 %v6679_v11  ;;  %vm16018_vm9 = vcmp.eq.s32.totalorder %v16654_v35, %v13520_v13 }
 0xce9   :  { %v13532_v61 = vsel %vm16018_vm9, -1e+30, %v13016_v2 }
 0xcea   :  { %16719 = vst [vmem:[#allocation127_spill] sm:$0xff] %v13532_v61  ;;  %v13534_v52 = vadd.s32 %v6682_v16, %v6680_v0  ;;  %v7018_v18 = vsel %vm5832_vm7, %v13532_v61, -inf  ;;  %v6531_v0 = vcvt.f32.s32 %v13447_v24 }
 0xceb   :  { %v6709_v63 = vpop.xlane.xlu1 %6708  ;;  %7019 = vmax.xlane.f32.xlu0 %v7018_v18  ;;  %v6694_v56 = vpop.xlane.xlu0 %6693 }
 0xcec   :  { %16720 = vst [vmem:[#allocation128_spill] sm:$0xff] %v13534_v52  ;;  %v6710_v43 = vcvt.f32.s32 %v6709_v63  ;;  %v6695_v3 = vcvt.f32.s32 %v6694_v56  ;;  %vm16019_vm5 = vcmp.eq.s32.totalorder %v16654_v35, %v13534_v52  ;;  %v6562_v63 = vshll.u32 %v6561_v7, 16 }
 0xced   :  { %v13545_v2 = vsel %vm16019_vm5, -1e+30, %v13028_v50  ;;  %v6532_v24 = vshll.u32 %v6531_v0, 16  ;;  %v6591_v0 = vcvt.f32.s32 %v13464_v5 }
 0xcee   :  { %16721 = vst [vmem:[#allocation129_spill] sm:$0xff] %v13545_v2  ;;  %v13547_v6 = vadd.s32 %v6712_v17, %v6710_v43  ;;  %v13549_v47 = vadd.s32 %v6697_v32, %v6695_v3  ;;  %v7021_v62 = vsel %vm5832_vm7, %v13545_v2, -inf  ;;  %v6546_v43 = vcvt.f32.s32 %v13452_v55 }
 0xcef   :  { %7022 = vmax.xlane.f32.xlu1 %v7021_v62  ;;  %v6724_v22 = vpop.xlane.xlu0 %6723 }
 0xcf0   :  { %16722 = vst [vmem:[#allocation130_spill] sm:$0xff] %v13547_v6  ;;  %16723 = vst [vmem:[#allocation131_spill] sm:$0xff] %v13549_v47  ;;  %v6725_v45 = vcvt.f32.s32 %v6724_v22  ;;  %vm16020_vm9 = vcmp.eq.s32.totalorder %v16654_v35, %v13547_v6  ;;  %vm16021_vm5 = vcmp.eq.s32.totalorder %v16654_v35, %v13549_v47 }
 0xcf1   :  { %v13562_v50 = vsel %vm16020_vm9, -1e+30, %v13054_v33  ;;  %v13568_v59 = vsel %vm16021_vm5, -1e+30, %v13042_v57  ;;  %v6516_v33 = vcvt.f32.s32 %v13439_v12 }
 0xcf2   :  { %16724 = vst [vmem:[#allocation132_spill] sm:$0xff] %v13562_v50  ;;  %16725 = vst [vmem:[#allocation133_spill] sm:$0xff] %v13568_v59  ;;  %v13570_v1 = vadd.s32 %v6727_v27, %v6725_v45  ;;  %v7027_v8 = vsel %vm5832_vm7, %v13562_v50, -inf  ;;  %v7024_v10 = vsel %vm5832_vm7, %v13568_v59, -inf  ;;  %v6547_v45 = vshll.u32 %v6546_v43, 16 }
 0xcf3   :  { %7028 = vmax.xlane.f32.xlu1 %v7027_v8  ;;  %7025 = vmax.xlane.f32.xlu0 %v7024_v10  ;;  %v6499_v25 = vpop.xlane.xlu0 %6498  ;;  %v6517_v18 = vshll.u32 %v6516_v33, 16  ;;  %v6606_v43 = vcvt.f32.s32 %v13477_v40 }
 0xcf4   :  { %16726 = vst [vmem:[#allocation134_spill] sm:$0xff] %v13570_v1  ;;  %v6500_v28 = vcvt.f32.s32 %v6499_v25  ;;  %vm16022_vm9 = vcmp.eq.s32.totalorder %v16654_v35, %v13570_v1 }
 0xcf5   :  { %v13583_v57 = vsel %vm16022_vm9, -1e+30, %v13068_v9 }
 0xcf6   :  { %16727 = vst [vmem:[#allocation135_spill] sm:$0xff] %v13583_v57  ;;  %v13585_v11 = vadd.s32 %v6502_v58, %v6500_v28  ;;  %v7030_v16 = vsel %vm5832_vm7, %v13583_v57, -inf  ;;  %v6576_v28 = vcvt.f32.s32 %v13459_v48 }
 0xcf7   :  { %v6514_v12 = vpop.xlane.xlu1 %6513  ;;  %7031 = vmax.xlane.f32.xlu0 %v7030_v16 }
 0xcf8   :  { %v6515_v17 = vcvt.f32.s32 %v6514_v12  ;;  %vm16027_vm5 = vcmp.eq.s32.totalorder %v16654_v35, %v13585_v11  ;;  %v6577_v7 = vshll.u32 %v6576_v28, 16 }
 0xcf9   :  { %v13597_v9 = vsel %vm16027_vm5, -1e+30, %v13080_v30 }
 0xcfa   :  { %16728 = vst [vmem:[#allocation136_spill] sm:$0xff] %v13597_v9  ;;  %v13599_v14 = vadd.s32 %v6517_v18, %v6515_v17  ;;  %v6985_v51 = vsel %vm5832_vm7, %v13597_v9, -inf }
 0xcfb   :  { %v6559_v56 = vpop.xlane.xlu1 %6558  ;;  %6986 = vmax.xlane.f32.xlu0 %v6985_v51  ;;  %v6529_v32 = vpop.xlane.xlu0 %6528  ;;  %v6592_v51 = vshll.u32 %v6591_v0, 16 }
 0xcfc   :  { %v6560_v3 = vcvt.f32.s32 %v6559_v56  ;;  %v6530_v62 = vcvt.f32.s32 %v6529_v32  ;;  %vm6730_vm9 = vcmp.eq.s32.totalorder %v16654_v35, %v13599_v14 }
 0xcfd   :  { %v13610_v30 = vsel %vm6730_vm9, -1e+30, %v13094_v37 }
 0xcfe   :  { %16729 = vst [vmem:[#allocation137_spill] sm:$0xff] %v13610_v30  ;;  %v13612_v27 = vadd.s32 %v6562_v63, %v6560_v3  ;;  %v13614_v22 = vadd.s32 %v6532_v24, %v6530_v62  ;;  %v6988_v60 = vsel %vm5832_vm7, %v13610_v30, -inf }
 0xcff   :  { %6989 = vmax.xlane.f32.xlu1 %v6988_v60  ;;  %v6544_v55 = vpop.xlane.xlu0 %6543  ;;  %v6607_v60 = vshll.u32 %v6606_v43, 16 }
 0xd00   :  { %v6545_v8 = vcvt.f32.s32 %v6544_v55  ;;  %vm16025_vm13 = vcmp.eq.s32.totalorder %v16654_v35, %v13612_v27  ;;  %vm16026_vm0 = vcmp.eq.s32.totalorder %v16654_v35, %v13614_v22 }
 0xd01   :  { %v13626_v37 = vsel %vm16025_vm13, -1e+30, %v13130_v29  ;;  %v13632_v10 = vsel %vm16026_vm0, -1e+30, %v13106_v4 }
 0xd02   :  { %16730 = vst [vmem:[#allocation138_spill] sm:$0xff] %v13626_v37  ;;  %16731 = vst [vmem:[#allocation139_spill] sm:$0xff] %v13632_v10  ;;  %v13634_v25 = vadd.s32 %v6547_v45, %v6545_v8  ;;  %v6997_v58 = vsel %vm5832_vm7, %v13626_v37, -inf  ;;  %v6991_v33 = vsel %vm5832_vm7, %v13632_v10, -inf }
 0xd03   :  { %6998 = vmax.xlane.f32.xlu1 %v6997_v58  ;;  %6992 = vmax.xlane.f32.xlu0 %v6991_v33 }
 0xd04   :  { %vm6732_vm13 = vcmp.eq.s32.totalorder %v16654_v35, %v13634_v25  ;;  %v16783_v25 = vld [vmem:[#allocation77_spill] sm:$0xff] }
 0xd05   :  { %v13646_v29 = vsel %vm6732_vm13, -1e+30, %v13118_v46 }
 0xd06   :  { %16732 = vst [vmem:[#allocation140_spill] sm:$0xff] %v13646_v29  ;;  %v6994_v4 = vsel %vm5832_vm7, %v13646_v29, -inf }
 0xd07   :  { %6995 = vmax.xlane.f32.xlu0 %v6994_v4 }
 0xd34   :  { %v6574_v16 = vpop.xlane.xlu0 %6573 }
 0xd35   :  { %v6575_v12 = vcvt.f32.s32 %v6574_v16 }
 0xd37   :  { %v13652_v18 = vadd.s32 %v6577_v7, %v6575_v12 }
 0xd38   :  { %v6589_v17 = vpop.xlane.xlu1 %6588  ;;  %v13679_v32 = vpop.permute.xlu0 %5774 }
 0xd39   :  { %v6590_v63 = vcvt.f32.s32 %v6589_v17  ;;  %vm6734_vm0 = vcmp.eq.s32.totalorder %v16654_v35, %v13652_v18  ;;  %16735 = vst [vmem:[#allocation143_spill] sm:$0xff] %v13679_v32  ;;  %v16776_v32 = vld [vmem:[#allocation23_spill] sm:$0xff] }
 0xd3a   :  { %v13660_v46 = vsel %vm6734_vm0, -1e+30, %v13142_v23  ;;  %v5585_v23 = vcombine.high %v12878_v26, %v16704_v34 }
 0xd3b   :  { %16733 = vst [vmem:[#allocation141_spill] sm:$0xff] %v13660_v46  ;;  %v13662_v48 = vadd.s32 %v6592_v51, %v6590_v63  ;;  %v7000_v5 = vsel %vm5832_vm7, %v13660_v46, -inf }
 0xd3c   :  { %7001 = vmax.xlane.f32.xlu0 %v7000_v5  ;;  %v13682_v3 = vpop.permute.xlu1 %5772 }
 0xd3d   :  { %vm16028_vm5 = vcmp.eq.s32.totalorder %v16654_v35, %v13662_v48 }
 0xd3e   :  { %v13672_v24 = vsel %vm16028_vm5, -1e+30, %v13152_v20 }
 0xd3f   :  { %16734 = vst [vmem:[#allocation142_spill] sm:$0xff] %v13672_v24  ;;  %v7003_v56 = vsel %vm5832_vm7, %v13672_v24, -inf }
 0xd40   :  { %7004 = vmax.xlane.f32.xlu1 %v7003_v56 }
 0xd51   :  { %5776 = vrot.lane.b32.xlu1 %v5585_v23, %s8798_s17 }
 0xd69   :  { %v6604_v62 = vpop.xlane.xlu0 %6603 }
 0xd6a   :  { %v6605_v55 = vcvt.f32.s32 %v6604_v62 }
 0xd6c   :  { %v13684_v20 = vadd.s32 %v6607_v60, %v6605_v55  ;;  %v5619_v60 = vcombine.high %v12888_v49, %v16704_v34 }
 0xd6d   :  { %v13686_v45 = vpop.xlane.xlu1 %7010 }
 0xd6e   :  { %16736 = vst [vmem:[#allocation144_spill] sm:$0xff] %v13686_v45  ;;  %vm7041_vm5 = vcmp.eq.f32.partialorder %v13492_v38, %v13686_v45  ;;  %vm6736_vm8 = vcmp.eq.s32.totalorder %v16654_v35, %v13684_v20 }
 0xd6f   :  { %v7057_v26 = vsel %vm7041_vm5, %v16654_v35, 16  ;;  %v13697_v40 = vsel %vm6736_vm8, -1e+30, %v13183_v53 }
 0xd70   :  { %16737 = vst [vmem:[#allocation145_spill] sm:$0xff] %v13697_v40  ;;  %v7006_v8 = vsel %vm5832_vm7, %v13697_v40, -inf  ;;  %v13702_v58 = vsel %vm5832_vm7, %v7057_v26, 2147483647 }
 0xd71   :  { %7007 = vmax.xlane.f32.xlu0 %v7006_v8  ;;  %v7187_v33 = vshra.s32 %v13702_v58, 16  ;;  %v13751_v8 = vpop.xlane.xlu0 %7013 }
 0xd72   :  { %16742 = vst [vmem:[#allocation150_spill] sm:$0xff] %v13751_v8 }
 0xd73   :  { %v13705_v4 = vcvt.s32.f32 %v7187_v33 }
 0xd74   :  { %v13707_v28 = vpop.xlane.xlu1 %7016 }
 0xd75   :  { %16738 = vst [vmem:[#allocation146_spill] sm:$0xff] %v13707_v28  ;;  %vm7043_vm5 = vcmp.eq.f32.partialorder %v13518_v19, %v13707_v28  ;;  %7190 = vmin.xlane.f32.xlu1 %v13705_v4 }
 0xd76   :  { %v7059_v53 = vsel %vm7043_vm5, %v16654_v35, 16 }
 0xd77   :  { %v13714_v16 = vsel %vm5832_vm7, %v7059_v53, 2147483647 }
 0xd78   :  { %v7217_v7 = vshra.s32 %v13714_v16, 16 }
 0xd7a   :  { %v13717_v0 = vcvt.s32.f32 %v7217_v7 }
 0xd7c   :  { %7220 = vmin.xlane.f32.xlu1 %v13717_v0  ;;  %v13720_v12 = vpop.xlane.xlu1 %7022 }
 0xd7d   :  { %16739 = vst [vmem:[#allocation147_spill] sm:$0xff] %v13720_v12  ;;  %vm7045_vm14 = vcmp.eq.f32.partialorder %v13545_v2, %v13720_v12  ;;  %v16754_v2 = vld [vmem:[#allocation88_spill] sm:$0xff] }
 0xd7e   :  { %v7061_v17 = vsel %vm7045_vm14, %v16654_v35, 16 }
 0xd7f   :  { %v13726_v51 = vsel %vm5832_vm7, %v7061_v17, 2147483647  ;;  %v13762_v17 = vpop.xlane.xlu0 %7019 }
 0xd80   :  { %v13728_v63 = vpop.xlane.xlu1 %7028  ;;  %v7247_v5 = vshra.s32 %v13726_v51, 16  ;;  %16744 = vst [vmem:[#allocation152_spill] sm:$0xff] %v13762_v17 }
 0xd81   :  { %16740 = vst [vmem:[#allocation148_spill] sm:$0xff] %v13728_v63  ;;  %vm7047_vm5 = vcmp.eq.f32.partialorder %v13562_v50, %v13728_v63  ;;  %v5653_v50 = vcombine.high %v13160_v15, %v16704_v34 }
 0xd82   :  { %v7063_v56 = vsel %vm7047_vm5, %v16654_v35, 16  ;;  %v13734_v23 = vcvt.s32.f32 %v7247_v5 }
 0xd83   :  { %v13737_v43 = vsel %vm5832_vm7, %v7063_v56, 2147483647 }
 0xd84   :  { %7250 = vmin.xlane.f32.xlu1 %v13734_v23  ;;  %v7277_v62 = vshra.s32 %v13737_v43, 16 }
 0xd86   :  { %v13743_v55 = vcvt.s32.f32 %v7277_v62 }
 0xd87   :  { %5778 = vrot.lane.b32.xlu0 %v5619_v60, %s8798_s17 }
 0xd88   :  { %7280 = vmin.xlane.f32.xlu1 %v13743_v55 }
 0xd8c   :  { %v13747_v26 = vpop.xlane.xlu1 %6989 }
 0xd8d   :  { %16741 = vst [vmem:[#allocation149_spill] sm:$0xff] %v13747_v26  ;;  %vm7034_vm14 = vcmp.eq.f32.partialorder %v13610_v30, %v13747_v26 }
 0xd8e   :  { %v7050_v33 = vsel %vm7034_vm14, %v16654_v35, 16  ;;  %vm7042_vm14 = vcmp.eq.f32.partialorder %v13505_v44, %v13751_v8 }
 0xd8f   :  { %v13755_v53 = vsel %vm5832_vm7, %v7050_v33, 2147483647  ;;  %v13772_v33 = vpop.xlane.xlu0 %7025 }
 0xd90   :  { %v13757_v7 = vpop.xlane.xlu1 %6998  ;;  %v7082_v49 = vshra.s32 %v13755_v53, 16  ;;  %16745 = vst [vmem:[#allocation153_spill] sm:$0xff] %v13772_v33  ;;  %vm7046_vm11 = vcmp.eq.f32.partialorder %v13568_v59, %v13772_v33 }
 0xd91   :  { %16743 = vst [vmem:[#allocation151_spill] sm:$0xff] %v13757_v7  ;;  %vm7037_vm5 = vcmp.eq.f32.partialorder %v13626_v37, %v13757_v7  ;;  %v7058_v7 = vsel %vm7042_vm14, %v16654_v35, 16  ;;  %v7062_v28 = vsel %vm7046_vm11, %v16654_v35, 16 }
 0xd92   :  { %v7053_v5 = vsel %vm7037_vm5, %v16654_v35, 16  ;;  %v13765_v56 = vcvt.s32.f32 %v7082_v49  ;;  %vm7044_vm5 = vcmp.eq.f32.partialorder %v13532_v61, %v13762_v17  ;;  %v13803_v45 = vsel %vm5832_vm7, %v7062_v28, 2147483647 }
 0xd93   :  { %v13768_v62 = vsel %vm5832_vm7, %v7053_v5, 2147483647  ;;  %v13782_v49 = vpop.xlane.xlu0 %7031  ;;  %v13785_v5 = vsel %vm5832_vm7, %v7058_v7, 2147483647  ;;  %v7060_v63 = vsel %vm7044_vm5, %v16654_v35, 16 }
 0xd94   :  { %7085 = vmin.xlane.f32.xlu1 %v13765_v56  ;;  %v7127_v60 = vshra.s32 %v13768_v62, 16  ;;  %16746 = vst [vmem:[#allocation154_spill] sm:$0xff] %v13782_v49  ;;  %v13792_v12 = vsel %vm5832_vm7, %v7060_v63, 2147483647  ;;  %vm7048_vm14 = vcmp.eq.f32.partialorder %v13583_v57, %v13782_v49  ;;  %v7262_v49 = vshra.s32 %v13803_v45, 16 }
 0xd95   :  { %v7232_v7 = vshra.s32 %v13792_v12, 16  ;;  %v7064_v33 = vsel %vm7048_vm14, %v16654_v35, 16 }
 0xd96   :  { %v13774_v26 = vcvt.s32.f32 %v7127_v60  ;;  %v7202_v60 = vshra.s32 %v13785_v5, 16  ;;  %v13823_v13 = vcvt.s32.f32 %v7262_v49 }
 0xd97   :  { %v13795_v8 = vpop.xlane.xlu0 %6986  ;;  %v13811_v63 = vcvt.s32.f32 %v7232_v7 }
 0xd98   :  { %7130 = vmin.xlane.f32.xlu1 %v13774_v26  ;;  %16747 = vst [vmem:[#allocation155_spill] sm:$0xff] %v13795_v8  ;;  %v13799_v17 = vcvt.s32.f32 %v7202_v60  ;;  %vm7033_vm11 = vcmp.eq.f32.partialorder %v13597_v9, %v13795_v8  ;;  %v13815_v60 = vsel %vm5832_vm7, %v7064_v33, 2147483647 }
 0xd99   :  { %v7049_v47 = vsel %vm7033_vm11, %v16654_v35, 16  ;;  %v7292_v8 = vshra.s32 %v13815_v60, 16 }
 0xd9a   :  { %v13827_v7 = vsel %vm5832_vm7, %v7049_v47, 2147483647 }
 0xd9b   :  { %v13806_v1 = vpop.xlane.xlu0 %6992  ;;  %v13833_v33 = vcvt.s32.f32 %v7292_v8 }
 0xd9c   :  { %16748 = vst [vmem:[#allocation156_spill] sm:$0xff] %v13806_v1  ;;  %vm7035_vm5 = vcmp.eq.f32.partialorder %v13632_v10, %v13806_v1  ;;  %v7067_v1 = vshra.s32 %v13827_v7, 16 }
 0xd9d   :  { %v7051_v31 = vsel %vm7035_vm5, %v16654_v35, 16 }
 0xd9e   :  { %v13837_v6 = vsel %vm5832_vm7, %v7051_v31, 2147483647  ;;  %v13841_v47 = vcvt.s32.f32 %v7067_v1 }
 0xd9f   :  { %v13821_v28 = vpop.xlane.xlu0 %6995  ;;  %v7097_v52 = vshra.s32 %v13837_v6, 16 }
 0xda0   :  { %16749 = vst [vmem:[#allocation157_spill] sm:$0xff] %v13821_v28  ;;  %vm7036_vm14 = vcmp.eq.f32.partialorder %v13646_v29, %v13821_v28 }
 0xda1   :  { %v7052_v49 = vsel %vm7036_vm14, %v16654_v35, 16  ;;  %v13848_v8 = vcvt.s32.f32 %v7097_v52 }
 0xda2   :  { %v13845_v54 = vsel %vm5832_vm7, %v7052_v49, 2147483647 }
 0xda3   :  { %v7112_v28 = vshra.s32 %v13845_v54, 16 }
 0xda5   :  { %v13852_v31 = vcvt.s32.f32 %v7112_v28 }
 0xda6   :  { %7205 = vmin.xlane.f32.xlu0 %v13799_v17 }
 0xdaa   :  { %7235 = vmin.xlane.f32.xlu0 %v13811_v63 }
 0xdae   :  { %7265 = vmin.xlane.f32.xlu0 %v13823_v13 }
 0xdb2   :  { %7295 = vmin.xlane.f32.xlu0 %v13833_v33 }
 0xdb6   :  { %7070 = vmin.xlane.f32.xlu0 %v13841_v47 }
 0xdba   :  { %7100 = vmin.xlane.f32.xlu0 %v13848_v8 }
 0xdbe   :  { %7115 = vmin.xlane.f32.xlu0 %v13852_v31 }
 0xdc9   :  { %v13855_v37 = vpop.xlane.xlu0 %7001 }
 0xdca   :  { %16750 = vst [vmem:[#allocation158_spill] sm:$0xff] %v13855_v37  ;;  %vm7038_vm11 = vcmp.eq.f32.partialorder %v13660_v46, %v13855_v37  ;;  %v16755_v46 = vld [vmem:[#allocation51_spill] sm:$0xff] }
 0xdcb   :  { %v7054_v1 = vsel %vm7038_vm11, %v16654_v35, 16  ;;  %v5787_v19 = vsel %vm16085_vm3, %v16755_v46, %v16754_v2  ;;  %v16761_v2 = vld [vmem:[#allocation95_spill] sm:$0xff]  ;;  %v16762_v46 = vld [vmem:[#allocation82_spill] sm:$0xff] }
 0xdcc   :  { %v13861_v49 = vsel %vm5832_vm7, %v7054_v1, 2147483647 }
 0xdcd   :  { %v13863_v52 = vpop.xlane.xlu1 %7004  ;;  %v7142_v36 = vshra.s32 %v13861_v49, 16 }
 0xdce   :  { %16751 = vst [vmem:[#allocation159_spill] sm:$0xff] %v13863_v52  ;;  %vm7039_vm5 = vcmp.eq.f32.partialorder %v13672_v24, %v13863_v52  ;;  %v16752_v52 = vld [vmem:[#allocation65_spill] sm:$0xff]  ;;  %v16753_v24 = vld [vmem:[#allocation27_spill] sm:$0xff] }
 0xdcf   :  { %v7055_v28 = vsel %vm7039_vm5, %v16654_v35, 16  ;;  %v13869_v10 = vcvt.s32.f32 %v7142_v36  ;;  %v5784_v36 = vsel %vm16085_vm3, %v16752_v52, %v12929_v41  ;;  %v16760_v41 = vld [vmem:[#allocation43_spill] sm:$0xff]  ;;  %vm16809_vm5 = vcmp.eq.s32.totalorder %v16654_v35, %v13612_v27 }
 0xdd0   :  { %v13872_v30 = vsel %vm5832_vm7, %v7055_v28, 2147483647  ;;  %v5800_v28 = vsel %vm16084_vm4, %v5784_v36, %v16753_v24  ;;  %v5803_v24 = vsel %vm16084_vm4, %v5787_v19, %v16760_v41  ;;  %v5789_v36 = vsel %vm16085_vm3, %v16762_v46, %v16761_v2 }
 0xdd1   :  { %7145 = vmin.xlane.f32.xlu0 %v13869_v10  ;;  %v7157_v37 = vshra.s32 %v13872_v30, 16 }
 0xdd3   :  { %v13876_v1 = vcvt.s32.f32 %v7157_v37  ;;  %v16756_v37 = vld [vmem:[#allocation37_spill] sm:$0xff] }
 0xdd4   :  { %v13892_v38 = vsel %vm16083_vm6, %v5800_v28, %v16756_v37  ;;  %v16763_v28 = vld [vmem:[#allocation97_spill] sm:$0xff] }
 0xdd5   :  { %7160 = vmin.xlane.f32.xlu1 %v13876_v1  ;;  %16757 = vst [vmem:[#allocation65_spill] sm:$0xff] %v13892_v38  ;;  %v13910_v37 = vsel %vm16083_vm6, %v5803_v24, %v16763_v28  ;;  %v16768_v28 = vld [vmem:[#allocation91_spill] sm:$0xff] }
 0xdd6   :  { %16764 = vst [vmem:[#allocation88_spill] sm:$0xff] %v13910_v37  ;;  %v6172_v19 = vsel %vm6156_vm10, %v13910_v37, 0 }
 0xde6   :  { %5780 = vrot.lane.b32.xlu1 %v5653_v50, %s8798_s17  ;;  %v6169_v50 = vsel %vm6153_vm1, %v13892_v38, 0 }
 0xde7   :  { %v13916_v9 = vsel %vm5832_vm7, %v6169_v50, 0  ;;  %v16770_v50 = vld [vmem:[#allocation99_spill] sm:$0xff] }
 0xde8   :  { %v6187_v24 = vshrl.u32 %v13916_v9, 16 }
 0xdea   :  { %v6189_v44 = vcvt.s32.f32 %v6187_v24 }
 0xdfe   :  { %v13898_v29 = vpop.xlane.xlu0 %7007 }
 0xdff   :  { %16759 = vst [vmem:[#allocation27_spill] sm:$0xff] %v13898_v29  ;;  %vm7040_vm14 = vcmp.eq.f32.partialorder %v13697_v40, %v13898_v29  ;;  %v16766_v40 = vld [vmem:[#allocation92_spill] sm:$0xff]  ;;  %v13936_v29 = vsel %vm5832_vm7, %v6172_v19, 0 }
 0xe00   :  { %v7056_v52 = vsel %vm7040_vm14, %v16654_v35, 16  ;;  %v5805_v2 = vsel %vm16084_vm4, %v5789_v36, %v16766_v40  ;;  %16772 = vst [vmem:[#allocation71_spill] sm:$0xff] %v13936_v29  ;;  %v16774_v36 = vld [vmem:[#allocation34_spill] sm:$0xff]  ;;  %vm16810_vm14 = vcmp.eq.s32.totalorder %v16654_v35, %v13662_v48 }
 0xe01   :  { %v13913_v15 = vsel %vm5832_vm7, %v7056_v52, 2147483647  ;;  %v16769_v52 = vld [vmem:[#allocation79_spill] sm:$0xff]  ;;  %v13933_v59 = vsel %vm16083_vm6, %v5805_v2, %v16770_v50  ;;  %v16777_v50 = vld [vmem:[#allocation101_spill] sm:$0xff] }
 0xe02   :  { %v7172_v41 = vshra.s32 %v13913_v15, 16  ;;  %v5791_v57 = vsel %vm16085_vm3, %v16769_v52, %v16768_v28  ;;  %16771 = vst [vmem:[#allocation37_spill] sm:$0xff] %v13933_v59  ;;  %v6174_v40 = vsel %vm6158_vm12, %v13933_v59, 0  ;;  %v6226_v28 = vshrl.u32 %v13936_v29, 16  ;;  %v16775_v52 = vld [vmem:[#allocation55_spill] sm:$0xff] }
 0xe03   :  { %v5785_v2 = vsel %vm16085_vm3, %v16776_v32, %v16775_v52  ;;  %v13954_v21 = vsel %vm5832_vm7, %v6174_v40, 0  ;;  %v16781_v32 = vld [vmem:[#allocation56_spill] sm:$0xff]  ;;  %v6750_v14 = vsel %vm6734_vm0, %v13933_v59, 0  ;;  %vm16807_vm12 = vcmp.eq.s32.totalorder %v16654_v35, %v13585_v11 }
 0xe04   :  { %v13925_v46 = vcvt.s32.f32 %v7172_v41  ;;  %v5807_v41 = vsel %vm16084_vm4, %v5791_v57, %v16774_v36  ;;  %v16780_v57 = vld [vmem:[#allocation66_spill] sm:$0xff]  ;;  %v6228_v36 = vcvt.s32.f32 %v6226_v28  ;;  %v6252_v29 = vshrl.u32 %v13954_v21, 16 }
 0xe05   :  { %v13951_v19 = vsel %vm16083_vm6, %v5807_v41, %v16777_v50  ;;  %v5801_v24 = vsel %vm16084_vm4, %v5785_v2, %v16780_v57  ;;  %v6748_v2 = vsel %vm6732_vm13, %v13910_v37, 0 }
 0xe06   :  { %16767 = vst [vmem:[#allocation51_spill] sm:$0xff] %v13925_v46  ;;  %7175 = vmin.xlane.f32.xlu0 %v13925_v46  ;;  %16778 = vst [vmem:[#allocation43_spill] sm:$0xff] %v13951_v19  ;;  %v6176_v46 = vsel %vm6160_vm2, %v13951_v19, 0  ;;  %v13965_v52 = vsel %vm16083_vm6, %v5801_v24, %v16781_v32  ;;  %v13984_v57 = vsel %vm5832_vm7, %v6748_v2, 0  ;;  %v5687_v32 = vcombine.high %v16783_v25, %v16704_v34  ;;  %v14013_v25 = vpop.permute.xlu0 %5778 }
 0xe07   :  { %16782 = vst [vmem:[#allocation95_spill] sm:$0xff] %v13965_v52  ;;  %v13968_v41 = vsel %vm5832_vm7, %v6176_v46, 0  ;;  %v6746_v40 = vsel %vm6730_vm9, %v13965_v52, 0  ;;  %v6802_v24 = vshrl.u32 %v13984_v57, 16  ;;  %vm16808_vm9 = vcmp.eq.s32.totalorder %v16654_v35, %v13614_v22 }
 0xe08   :  { %v6278_v50 = vshrl.u32 %v13968_v41, 16  ;;  %v13976_v28 = vsel %vm5832_vm7, %v6746_v40, 0  ;;  %v6752_v40 = vsel %vm6736_vm8, %v13951_v19, 0 }
 0xe09   :  { %v6776_v61 = vshrl.u32 %v13976_v28, 16  ;;  %v6804_v18 = vcvt.s32.f32 %v6802_v24  ;;  %v6170_v24 = vsel %vm6154_vm15, %v13965_v52, 0 }
 0xe0a   :  { %6192 = vadd.xlane.f32.xlu1 %v6189_v44  ;;  %v6254_v44 = vcvt.s32.f32 %v6252_v29  ;;  %v6280_v46 = vcvt.s32.f32 %v6278_v50  ;;  %v14003_v50 = vsel %vm5832_vm7, %v6752_v40, 0  ;;  %v16788_v40 = vld [vmem:[#allocation90_spill] sm:$0xff] }
 0xe0b   :  { %v6778_v29 = vcvt.s32.f32 %v6776_v61  ;;  %16784 = vst [vmem:[#allocation82_spill] sm:$0xff] %v14003_v50  ;;  %v16785_v61 = vld [vmem:[#allocation36_spill] sm:$0xff] }
 0xe0e   :  { %6231 = vadd.xlane.f32.xlu1 %v6228_v36  ;;  %v13992_v36 = vsel %vm5832_vm7, %v6750_v14, 0  ;;  %v16786_v14 = vld [vmem:[#allocation78_spill] sm:$0xff] }
 0xe0f   :  { %v5786_v20 = vsel %vm16085_vm3, %v16786_v14, %v16785_v61  ;;  %v14026_v61 = vsel %vm5832_vm7, %v6170_v24, 0  ;;  %v16793_v14 = vld [vmem:[#allocation45_spill] sm:$0xff] }
 0xe10   :  { %vm16794_vm1 = vcmp.eq.s32.totalorder %v16654_v35, %v16793_v14  ;;  %v6200_v24 = vshrl.u32 %v14026_v61, 16  ;;  %v16798_v14 = vld [vmem:[#allocation98_spill] sm:$0xff] }
 0xe12   :  { %6257 = vadd.xlane.f32.xlu1 %v6254_v44  ;;  %v6828_v44 = vshrl.u32 %v13992_v36, 16 }
 0xe14   :  { %v6830_v2 = vcvt.s32.f32 %v6828_v44  ;;  %v16789_v44 = vld [vmem:[#allocation57_spill] sm:$0xff] }
 0xe16   :  { %6283 = vadd.xlane.f32.xlu1 %v6280_v46  ;;  %v6854_v46 = vshrl.u32 %v14003_v50, 16 }
 0xe18   :  { %v6856_v34 = vcvt.s32.f32 %v6854_v46 }
 0xe1a   :  { %6781 = vadd.xlane.f32.xlu1 %v6778_v29 }
 0xe1c   :  { %5782 = vrot.lane.b32.xlu0 %v5687_v32, %s8798_s17  ;;  %v7201_v32 = vand.u32 65535, %v13785_v5 }
 0xe1e   :  { %6807 = vadd.xlane.f32.xlu1 %v6804_v18  ;;  %v5802_v18 = vsel %vm16084_vm4, %v5786_v20, %v16788_v40  ;;  %v7203_v59 = vcvt.s32.f32 %v7201_v32  ;;  %v7231_v20 = vand.u32 65535, %v13792_v12  ;;  %v16795_v40 = vld [vmem:[#allocation25_spill] sm:$0xff] }
 0xe22   :  { %6833 = vadd.xlane.f32.xlu1 %v6830_v2  ;;  %v16790_v2 = vld [vmem:[#allocation80_spill] sm:$0xff] }
 0xe23   :  { %v5788_v46 = vsel %vm16085_vm3, %v16790_v2, %v16789_v44  ;;  %v16796_v2 = vld [vmem:[#allocation94_spill] sm:$0xff] }
 0xe26   :  { %6859 = vadd.xlane.f32.xlu1 %v6856_v34  ;;  %v16791_v34 = vld [vmem:[#allocation59_spill] sm:$0xff] }
 0xe27   :  { %v14023_v19 = vsel %vm16083_vm6, %v5802_v18, %v16791_v34  ;;  %v5804_v18 = vsel %vm16084_vm4, %v5788_v46, %v16795_v40  ;;  %v16797_v34 = vld [vmem:[#allocation22_spill] sm:$0xff]  ;;  %v7233_v46 = vcvt.s32.f32 %v7231_v20  ;;  %v7261_v40 = vand.u32 65535, %v13803_v45  ;;  %v16805_v45 = vld [vmem:[#allocation32_spill] sm:$0xff] }
 0xe28   :  { %16792 = vst [vmem:[#allocation97_spill] sm:$0xff] %v14023_v19  ;;  %v6171_v29 = vsel %vm16794_vm1, %v14023_v19, 0  ;;  %v5790_v37 = vsel %vm16085_vm3, %v16797_v34, %v16796_v2  ;;  %v14045_v52 = vsel %vm16083_vm6, %v5804_v18, %v16798_v14  ;;  %v16802_v2 = vld [vmem:[#allocation54_spill] sm:$0xff]  ;;  %v6202_v34 = vcvt.s32.f32 %v6200_v24  ;;  %v16803_v14 = vld [vmem:[#allocation100_spill] sm:$0xff] }
 0xe29   :  { %16799 = vst [vmem:[#allocation28_spill] sm:$0xff] %v14045_v52  ;;  %v14048_v12 = vsel %vm5832_vm7, %v6171_v29, 0  ;;  %v5806_v18 = vsel %vm16084_vm4, %v5790_v37, %v16802_v2  ;;  %vm16806_vm2 = vcmp.eq.s32.totalorder %v16654_v35, %v16805_v45  ;;  %v7263_v37 = vcvt.s32.f32 %v7261_v40 }
 0xe2a   :  { %v6213_v29 = vshrl.u32 %v14048_v12, 16  ;;  %v14064_v50 = vsel %vm16083_vm6, %v5806_v18, %v16803_v14  ;;  %v7291_v24 = vand.u32 65535, %v13815_v60  ;;  %v6747_v11 = vsel %vm16808_vm9, %v14023_v19, 0 }
 0xe2b   :  { %16804 = vst [vmem:[#allocation92_spill] sm:$0xff] %v14064_v50  ;;  %v6749_v22 = vsel %vm16809_vm5, %v14045_v52, 0 }
 0xe2c   :  { %v6215_v2 = vcvt.s32.f32 %v6213_v29  ;;  %v7293_v60 = vcvt.s32.f32 %v7291_v24 }
 0xe33   :  { %v14032_v5 = vpop.xlane.xlu0 %7205 }
 0xe34   :  { %vm7207_vm10 = vcmp.eq.f32.partialorder %v13799_v17, %v14032_v5  ;;  %v16800_v17 = vld [vmem:[#allocation14_spill] sm:$0xff] }
 0xe35   :  { %v7208_v44 = vsel %vm7207_vm10, %v7203_v59, inf  ;;  %vm16801_vm15 = vcmp.eq.s32.totalorder %v16654_v35, %v16800_v17 }
 0xe36   :  { %7209 = vmin.xlane.f32.xlu1 %v7208_v44  ;;  %v6173_v32 = vsel %vm16801_vm15, %v14045_v52, 0 }
 0xe37   :  { %v14054_v59 = vpop.xlane.xlu0 %7235  ;;  %v14067_v17 = vsel %vm5832_vm7, %v6173_v32, 0 }
 0xe38   :  { %vm7237_vm0 = vcmp.eq.f32.partialorder %v13811_v63, %v14054_v59  ;;  %v6175_v63 = vsel %vm16806_vm2, %v14064_v50, 0  ;;  %v6239_v18 = vshrl.u32 %v14067_v17, 16 }
 0xe39   :  { %v7238_v44 = vsel %vm7237_vm0, %v7233_v46, inf  ;;  %v14080_v32 = vsel %vm5832_vm7, %v6175_v63, 0 }
 0xe3a   :  { %7239 = vmin.xlane.f32.xlu1 %v7238_v44  ;;  %v6745_v44 = vsel %vm16807_vm12, %v13892_v38, 0  ;;  %v6241_v29 = vcvt.s32.f32 %v6239_v18  ;;  %v6265_v14 = vshrl.u32 %v14080_v32, 16  ;;  %v7111_v18 = vand.u32 65535, %v13845_v54 }
 0xe3b   :  { %6205 = vadd.xlane.f32.xlu0 %v6202_v34  ;;  %v14073_v20 = vpop.xlane.xlu0 %7265  ;;  %v7066_v34 = vand.u32 65535, %v13827_v7  ;;  %v14093_v45 = vsel %vm5832_vm7, %v6745_v44, 0 }
 0xe3c   :  { %vm7267_vm8 = vcmp.eq.f32.partialorder %v13823_v13, %v14073_v20  ;;  %v6763_v24 = vshrl.u32 %v14093_v45, 16  ;;  %v7113_v27 = vcvt.s32.f32 %v7111_v18 }
 0xe3d   :  { %v7268_v46 = vsel %vm7267_vm8, %v7263_v37, inf  ;;  %v7068_v7 = vcvt.s32.f32 %v7066_v34  ;;  %v6267_v37 = vcvt.s32.f32 %v6265_v14  ;;  %v6751_v34 = vsel %vm16810_vm14, %v14064_v50, 0 }
 0xe3e   :  { %7269 = vmin.xlane.f32.xlu1 %v7268_v46  ;;  %v14105_v46 = vsel %vm5832_vm7, %v6747_v11, 0  ;;  %v6765_v44 = vcvt.s32.f32 %v6763_v24  ;;  %v14127_v11 = vpop.permute.xlu1 %5776  ;;  %v7186_v24 = vand.u32 65535, %v13702_v58 }
 0xe3f   :  { %6218 = vadd.xlane.f32.xlu0 %v6215_v2  ;;  %v14086_v40 = vpop.xlane.xlu0 %7295 }
 0xe40   :  { %vm7297_vm13 = vcmp.eq.f32.partialorder %v13833_v33, %v14086_v40  ;;  %v7188_v18 = vcvt.s32.f32 %v7186_v24 }
 0xe41   :  { %v7298_v13 = vsel %vm7297_vm13, %v7293_v60, inf  ;;  %v14116_v60 = vsel %vm5832_vm7, %v6749_v22, 0 }
 0xe42   :  { %7299 = vmin.xlane.f32.xlu1 %v7298_v13  ;;  %v6815_v14 = vshrl.u32 %v14116_v60, 16 }
 0xe43   :  { %6244 = vadd.xlane.f32.xlu0 %v6241_v29  ;;  %v14099_v63 = vpop.xlane.xlu0 %7070 }
 0xe44   :  { %vm7072_vm11 = vcmp.eq.f32.partialorder %v13841_v47, %v14099_v63  ;;  %v6789_v47 = vshrl.u32 %v14105_v46, 16  ;;  %v6817_v48 = vcvt.s32.f32 %v6815_v14 }
 0xe45   :  { %v7073_v33 = vsel %vm7072_vm11, %v7068_v7, inf  ;;  %v14130_v7 = vsel %vm5832_vm7, %v6751_v34, 0 }
 0xe46   :  { %7074 = vmin.xlane.f32.xlu1 %v7073_v33  ;;  %v6791_v54 = vcvt.s32.f32 %v6789_v47  ;;  %v6841_v33 = vshrl.u32 %v14130_v7, 16 }
 0xe47   :  { %6270 = vadd.xlane.f32.xlu0 %v6267_v37  ;;  %v14111_v2 = vpop.xlane.xlu0 %7100  ;;  %v14133_v37 = vpop.xlane.xlu1 %7190 }
 0xe48   :  { %vm7192_vm10 = vcmp.eq.f32.partialorder %v13705_v4, %v14133_v37  ;;  %vm7102_vm13 = vcmp.eq.f32.partialorder %v13848_v8, %v14111_v2 }
 0xe49   :  { %v7193_v34 = vsel %vm7192_vm10, %v7188_v18, inf  ;;  %v7096_v18 = vand.u32 65535, %v13837_v6  ;;  %v7156_v6 = vand.u32 65535, %v13872_v30 }
 0xe4b   :  { %6768 = vadd.xlane.f32.xlu0 %v6765_v44  ;;  %v14122_v13 = vpop.xlane.xlu0 %7115  ;;  %v14136_v22 = vpop.xlane.xlu1 %7220  ;;  %v7216_v44 = vand.u32 65535, %v13714_v16  ;;  %v7158_v8 = vcvt.s32.f32 %v7156_v6 }
 0xe4c   :  { %vm7117_vm1 = vcmp.eq.f32.partialorder %v13852_v31, %v14122_v13  ;;  %v6843_v31 = vcvt.s32.f32 %v6841_v33  ;;  %vm7222_vm15 = vcmp.eq.f32.partialorder %v13717_v0, %v14136_v22  ;;  %v7276_v0 = vand.u32 65535, %v13737_v43 }
 0xe4d   :  { %v7118_v29 = vsel %vm7117_vm1, %v7113_v27, inf  ;;  %v7141_v27 = vand.u32 65535, %v13861_v49  ;;  %v7218_v58 = vcvt.s32.f32 %v7216_v44 }
 0xe4e   :  { %7119 = vmin.xlane.f32.xlu1 %v7118_v29  ;;  %v7246_v29 = vand.u32 65535, %v13726_v51  ;;  %v7278_v24 = vcvt.s32.f32 %v7276_v0  ;;  %v16813_v0 = vld [vmem:[#allocation52_spill] sm:$0xff] }
 0xe4f   :  { %6794 = vadd.xlane.f32.xlu0 %v6791_v54  ;;  %v14141_v47 = vpop.xlane.xlu1 %7250  ;;  %v7223_v14 = vsel %vm7222_vm15, %v7218_v58, inf }
 0xe50   :  { %vm7252_vm2 = vcmp.eq.f32.partialorder %v13734_v23, %v14141_v47  ;;  %v7248_v49 = vcvt.s32.f32 %v7246_v29  ;;  %v6186_v29 = vand.u32 65535, %v13916_v9 }
 0xe52   :  { %v7253_v33 = vsel %vm7252_vm2, %v7248_v49, inf  ;;  %v6212_v49 = vand.u32 65535, %v14048_v12 }
 0xe53   :  { %6820 = vadd.xlane.f32.xlu0 %v6817_v48  ;;  %v7143_v48 = vcvt.s32.f32 %v7141_v27  ;;  %v14153_v4 = vpop.xlane.xlu1 %7280 }
 0xe54   :  { %vm7282_vm8 = vcmp.eq.f32.partialorder %v13743_v55, %v14153_v4  ;;  %v7098_v55 = vcvt.s32.f32 %v7096_v18  ;;  %v16819_v18 = vld [vmem:[#allocation60_spill] sm:$0xff] }
 0xe56   :  { %v7103_v27 = vsel %vm7102_vm13, %v7098_v55, inf }
 0xe57   :  { %6846 = vadd.xlane.f32.xlu0 %v6843_v31  ;;  %v14158_v51 = vpop.xlane.xlu1 %7085  ;;  %v7283_v31 = vsel %vm7282_vm8, %v7278_v24, inf  ;;  %v16815_v24 = vld [vmem:[#allocation38_spill] sm:$0xff] }
 0xe58   :  { %vm7087_vm12 = vcmp.eq.f32.partialorder %v13765_v56, %v14158_v51 }
 0xe5b   :  { %7194 = vmin.xlane.f32.xlu0 %v7193_v34  ;;  %v14166_v44 = vpop.xlane.xlu1 %7130  ;;  %v7126_v34 = vand.u32 65535, %v13768_v62  ;;  %v16811_v62 = vld [vmem:[#allocation53_spill] sm:$0xff] }
 0xe5c   :  { %vm7132_vm9 = vcmp.eq.f32.partialorder %v13774_v26, %v14166_v44  ;;  %v6188_v26 = vcvt.s32.f32 %v6186_v29  ;;  %v16824_v29 = vld [vmem:[#allocation44_spill] sm:$0xff] }
 0xe5d   :  { %v7128_v56 = vcvt.s32.f32 %v7126_v34  ;;  %vm16825_vm14 = vcmp.eq.s32.totalorder %v16654_v35, %v16824_v29 }
 0xe5e   :  { %v14147_v54 = vpop.xlane.xlu0 %7145 }
 0xe5f   :  { %7224 = vmin.xlane.f32.xlu0 %v7223_v14  ;;  %vm7147_vm0 = vcmp.eq.f32.partialorder %v13869_v10, %v14147_v54  ;;  %v7081_v10 = vand.u32 65535, %v13755_v53  ;;  %v7133_v58 = vsel %vm7132_vm9, %v7128_v56, inf  ;;  %v16822_v56 = vld [vmem:[#allocation62_spill] sm:$0xff] }
 0xe60   :  { %v7148_v16 = vsel %vm7147_vm0, %v7143_v48, inf  ;;  %v16812_v48 = vld [vmem:[#allocation96_spill] sm:$0xff] }
 0xe61   :  { %7149 = vmin.xlane.f32.xlu1 %v7148_v16  ;;  %v7083_v23 = vcvt.s32.f32 %v7081_v10  ;;  %v5792_v16 = vsel %vm16085_vm3, %v16812_v48, %v16811_v62  ;;  %v6214_v10 = vcvt.s32.f32 %v6212_v49 }
 0xe62   :  { %v14171_v53 = vpop.xlane.xlu1 %7160  ;;  %v5808_v30 = vsel %vm16084_vm4, %v5792_v16, %v16813_v0  ;;  %v16827_v16 = vld [vmem:[#allocation89_spill] sm:$0xff] }
 0xe63   :  { %7254 = vmin.xlane.f32.xlu0 %v7253_v33  ;;  %v7088_v43 = vsel %vm7087_vm12, %v7083_v23, inf  ;;  %vm7162_vm11 = vcmp.eq.f32.partialorder %v13876_v1, %v14171_v53  ;;  %v16814_v33 = vld [vmem:[#allocation29_spill] sm:$0xff]  ;;  %v14188_v9 = vsel %vm16083_vm6, %v5808_v30, %v13474_v42  ;;  %v16817_v23 = vld [vmem:[#allocation102_spill] sm:$0xff]  ;;  %v6264_v42 = vand.u32 65535, %v14080_v32 }
 0xe64   :  { %v7163_v14 = vsel %vm7162_vm11, %v7158_v8, inf  ;;  %v5794_v1 = vsel %vm16085_vm3, %v16815_v24, %v16814_v33  ;;  %16816 = vst [vmem:[#allocation91_spill] sm:$0xff] %v14188_v9  ;;  %vm16818_vm5 = vcmp.eq.s32.totalorder %v16654_v35, %v16817_v23  ;;  %v16829_v33 = vld [vmem:[#allocation68_spill] sm:$0xff]  ;;  %v16832_v23 = vld [vmem:[#allocation70_spill] sm:$0xff] }
 0xe65   :  { %v6177_v12 = vsel %vm16818_vm5, %v14188_v9, 0  ;;  %v6266_v62 = vcvt.s32.f32 %v6264_v42  ;;  %vm16830_vm1 = vcmp.eq.s32.totalorder %v16654_v35, %v16829_v33  ;;  %vm16833_vm10 = vcmp.eq.s32.totalorder %v16654_v35, %v16832_v23 }
 0xe66   :  { %v14206_v6 = vsel %vm5832_vm7, %v6177_v12, 0  ;;  %v5781_v32 = vpop.permute.xlu1 %5780 }
 0xe67   :  { %7284 = vmin.xlane.f32.xlu0 %v7283_v31  ;;  %v6238_v31 = vand.u32 65535, %v14067_v17  ;;  %v6291_v48 = vshrl.u32 %v14206_v6, 16 }
 0xe69   :  { %v6240_v34 = vcvt.s32.f32 %v6238_v31 }
 0xe6b   :  { %7089 = vmin.xlane.f32.xlu0 %v7088_v43  ;;  %v5810_v43 = vsel %vm16084_vm4, %v5794_v1, %v16819_v18  ;;  %v6293_v1 = vcvt.s32.f32 %v6291_v48  ;;  %v16836_v48 = vld [vmem:[#allocation61_spill] sm:$0xff] }
 0xe6c   :  { %v14199_v55 = vsel %vm16083_vm6, %v5810_v43, %v13682_v3 }
 0xe6d   :  { %16820 = vst [vmem:[#allocation79_spill] sm:$0xff] %v14199_v55 }
 0xe6f   :  { %7104 = vmin.xlane.f32.xlu0 %v7103_v27  ;;  %v16821_v27 = vld [vmem:[#allocation85_spill] sm:$0xff] }
 0xe70   :  { %v5796_v17 = vsel %vm16085_vm3, %v16822_v56, %v16821_v27 }
 0xe73   :  { %7134 = vmin.xlane.f32.xlu0 %v7133_v58  ;;  %v16823_v58 = vld [vmem:[#allocation47_spill] sm:$0xff] }
 0xe74   :  { %v5812_v8 = vsel %vm16084_vm4, %v5796_v17, %v16823_v58  ;;  %v16834_v58 = vld [vmem:[#allocation51_spill] sm:$0xff] }
 0xe75   :  { %v14216_v3 = vsel %vm16083_vm6, %v5812_v8, %v14127_v11  ;;  %v6199_v8 = vand.u32 65535, %v14026_v61 }
 0xe76   :  { %16826 = vst [vmem:[#allocation99_spill] sm:$0xff] %v14216_v3  ;;  %v6181_v11 = vsel %vm16830_vm1, %v14216_v3, 0 }
 0xe77   :  { %7164 = vmin.xlane.f32.xlu0 %v7163_v14  ;;  %v6179_v14 = vsel %vm16825_vm14, %v14199_v55, 0  ;;  %v14236_v31 = vsel %vm5832_vm7, %v6181_v11, 0  ;;  %v6788_v11 = vand.u32 65535, %v14105_v46  ;;  %v6814_v46 = vand.u32 65535, %v14116_v60 }
 0xe78   :  { %v14223_v0 = vsel %vm5832_vm7, %v6179_v14, 0  ;;  %v6343_v18 = vshrl.u32 %v14236_v31, 16 }
 0xe7a   :  { %v6345_v42 = vcvt.s32.f32 %v6343_v18 }
 0xe7b   :  { %6190 = vadd.xlane.f32.xlu0 %v6188_v26  ;;  %v16828_v26 = vld [vmem:[#allocation64_spill] sm:$0xff] }
 0xe7c   :  { %v5798_v49 = vsel %vm16085_vm3, %v16828_v26, %v16827_v16  ;;  %v6201_v26 = vcvt.s32.f32 %v6199_v8  ;;  %v16846_v8 = vld [vmem:[#allocation83_spill] sm:$0xff] }
 0xe7d   :  { %v5814_v30 = vsel %vm16084_vm4, %v5798_v49, %v13405_v39  ;;  %v16838_v49 = vld [vmem:[#allocation71_spill] sm:$0xff] }
 0xe7e   :  { %v14232_v24 = vsel %vm16083_vm6, %v5814_v30, %v5781_v32  ;;  %v6762_v32 = vand.u32 65535, %v14093_v45  ;;  %v6225_v30 = vand.u32 65535, %v16838_v49  ;;  %v16841_v45 = vld [vmem:[#allocation39_spill] sm:$0xff]  ;;  %v6816_v49 = vcvt.s32.f32 %v6814_v46 }
 0xe7f   :  { %6216 = vadd.xlane.f32.xlu0 %v6214_v10  ;;  %16831 = vst [vmem:[#allocation31_spill] sm:$0xff] %v14232_v24  ;;  %v6317_v10 = vshrl.u32 %v14223_v0, 16  ;;  %v6183_v39 = vsel %vm16833_vm10, %v14232_v24, 0 }
 0xe80   :  { %v14244_v43 = vsel %vm5832_vm7, %v6183_v39, 0  ;;  %v6764_v33 = vcvt.s32.f32 %v6762_v32  ;;  %v16842_v39 = vld [vmem:[#allocation120_spill] sm:$0xff] }
 0xe81   :  { %v6319_v12 = vcvt.s32.f32 %v6317_v10  ;;  %v6369_v27 = vshrl.u32 %v14244_v43, 16  ;;  %v16840_v10 = vld [vmem:[#allocation42_spill] sm:$0xff] }
 0xe82   :  { %v5795_v23 = vsel %vm16085_vm3, %v16841_v45, %v16840_v10 }
 0xe83   :  { %6242 = vadd.xlane.f32.xlu0 %v6240_v34  ;;  %v7171_v34 = vand.u32 65535, %v13913_v15  ;;  %v6371_v14 = vcvt.s32.f32 %v6369_v27  ;;  %v6790_v27 = vcvt.s32.f32 %v6788_v11  ;;  %v16851_v11 = vld [vmem:[#allocation46_spill] sm:$0xff] }
 0xe85   :  { %v7173_v17 = vcvt.s32.f32 %v7171_v34  ;;  %v6227_v34 = vcvt.s32.f32 %v6225_v30  ;;  %v6840_v30 = vand.u32 65535, %v14130_v7 }
 0xe87   :  { %6268 = vadd.xlane.f32.xlu0 %v6266_v62  ;;  %v16835_v62 = vld [vmem:[#allocation67_spill] sm:$0xff] }
 0xe88   :  { %v5793_v15 = vsel %vm16085_vm3, %v16836_v48, %v16835_v62  ;;  %v16848_v48 = vld [vmem:[#allocation35_spill] sm:$0xff] }
 0xe8b   :  { %6296 = vadd.xlane.f32.xlu0 %v6293_v1  ;;  %v16839_v1 = vld [vmem:[#allocation84_spill] sm:$0xff] }
 0xe8c   :  { %v5809_v61 = vsel %vm16084_vm4, %v5793_v15, %v16839_v1  ;;  %v16849_v15 = vld [vmem:[#allocation63_spill] sm:$0xff] }
 0xe8d   :  { %v5797_v60 = vsel %vm16085_vm3, %v16849_v15, %v16848_v48  ;;  %v16862_v15 = vld [vmem:[#allocation73_spill] sm:$0xff] }
 0xe8e   :  { %v5813_v1 = vsel %vm16084_vm4, %v5797_v60, %v16851_v11  ;;  %vm16863_vm12 = vcmp.eq.s32.totalorder %v16654_v35, %v16862_v15 }
 0xe8f   :  { %6322 = vadd.xlane.f32.xlu0 %v6319_v12  ;;  %v14268_v12 = vsel %vm16083_vm6, %v5809_v61, %v16842_v39  ;;  %v16852_v61 = vld [vmem:[#allocation72_spill] sm:$0xff]  ;;  %v14302_v10 = vsel %vm16083_vm6, %v5813_v1, %v14013_v25  ;;  %v16854_v39 = vld [vmem:[#allocation93_spill] sm:$0xff]  ;;  %v16858_v25 = vld [vmem:[#allocation74_spill] sm:$0xff] }
 0xe90   :  { %vm16853_vm2 = vcmp.eq.s32.totalorder %v16654_v35, %v16852_v61  ;;  %vm16859_vm8 = vcmp.eq.s32.totalorder %v16654_v35, %v16858_v25  ;;  %v7212_v25 = vcvt.f32.s32 %v14032_v5  ;;  %v16871_v5 = vld [vmem:[#allocation123_spill] sm:$0xff] }
 0xe92   :  { %v7213_v15 = vshll.u32 %v7212_v25, 16 }
 0xe93   :  { %6348 = vadd.xlane.f32.xlu0 %v6345_v42  ;;  %v14248_v56 = vpop.xlane.xlu0 %7175  ;;  %v6251_v42 = vand.u32 65535, %v13954_v21  ;;  %v6277_v21 = vand.u32 65535, %v13968_v41 }
 0xe94   :  { %vm7177_vm15 = vcmp.eq.f32.partialorder %v16834_v58, %v14248_v56 }
 0xe95   :  { %v7178_v29 = vsel %vm7177_vm15, %v7173_v17, inf  ;;  %v16844_v17 = vld [vmem:[#allocation17_spill] sm:$0xff]  ;;  %v6253_v62 = vcvt.s32.f32 %v6251_v42 }
 0xe96   :  { %7179 = vmin.xlane.f32.xlu1 %v7178_v29  ;;  %vm16845_vm0 = vcmp.eq.s32.totalorder %v16654_v35, %v16844_v17  ;;  %v5811_v29 = vsel %vm16084_vm4, %v5795_v23, %v16846_v8  ;;  %v6279_v23 = vcvt.s32.f32 %v6277_v21  ;;  %v16857_v17 = vld [vmem:[#allocation118_spill] sm:$0xff]  ;;  %v6182_v8 = vsel %vm16859_vm8, %v14302_v10, 0 }
 0xe97   :  { %v14257_v16 = vpop.xlane.xlu1 %6192  ;;  %6374 = vadd.xlane.f32.xlu0 %v6371_v14  ;;  %v6178_v58 = vsel %vm16845_vm0, %v14268_v12, 0  ;;  %v16847_v14 = vld [vmem:[#allocation143_spill] sm:$0xff]  ;;  %v5783_v45 = vpop.permute.xlu0 %5782  ;;  %v14324_v48 = vsel %vm5832_vm7, %v6182_v8, 0 }
 0xe98   :  { %16837 = vst [vmem:[#allocation34_spill] sm:$0xff] %v14257_v16  ;;  %v14282_v32 = vsel %vm16083_vm6, %v5811_v29, %v16847_v14  ;;  %16861 = vst [vmem:[#allocation66_spill] sm:$0xff] %v14324_v48 }
 0xe99   :  { %v6180_v41 = vsel %vm16853_vm2, %v14282_v32, 0 }
 0xe9a   :  { %6203 = vadd.xlane.f32.xlu1 %v6201_v26  ;;  %v14309_v46 = vsel %vm5832_vm7, %v6180_v41, 0 }
 0xe9b   :  { %v14270_v18 = vpop.xlane.xlu1 %6231  ;;  %6766 = vadd.xlane.f32.xlu0 %v6764_v33  ;;  %v14292_v33 = vsel %vm5832_vm7, %v6178_v58, 0  ;;  %16856 = vst [vmem:[#allocation101_spill] sm:$0xff] %v14309_v46  ;;  %v6330_v21 = vshrl.u32 %v14309_v46, 16  ;;  %v16985_v46 = vld [vmem:[#allocation146_spill] sm:$0xff] }
 0xe9c   :  { %16843 = vst [vmem:[#allocation55_spill] sm:$0xff] %v14270_v18  ;;  %v6304_v7 = vshrl.u32 %v14292_v33, 16  ;;  %v16900_v18 = vld [vmem:[#allocation130_spill] sm:$0xff] }
 0xe9e   :  { %6229 = vadd.xlane.f32.xlu1 %v6227_v34  ;;  %v16855_v34 = vld [vmem:[#allocation40_spill] sm:$0xff] }
 0xe9f   :  { %6792 = vadd.xlane.f32.xlu0 %v6790_v27  ;;  %v14288_v26 = vpop.xlane.xlu1 %6257  ;;  %v5799_v42 = vsel %vm16085_vm3, %v16855_v34, %v16854_v39  ;;  %v6842_v27 = vcvt.s32.f32 %v6840_v30  ;;  %v6356_v30 = vshrl.u32 %v14324_v48, 16  ;;  %v6801_v34 = vand.u32 65535, %v13984_v57 }
 0xea0   :  { %16850 = vst [vmem:[#allocation23_spill] sm:$0xff] %v14288_v26  ;;  %v5815_v58 = vsel %vm16084_vm4, %v5799_v42, %v16857_v17  ;;  %v6827_v17 = vand.u32 65535, %v13992_v36 }
 0xea1   :  { %v14318_v29 = vsel %vm16083_vm6, %v5815_v58, %v5783_v45  ;;  %v6358_v61 = vcvt.s32.f32 %v6356_v30 }
 0xea2   :  { %6255 = vadd.xlane.f32.xlu1 %v6253_v62  ;;  %v6306_v62 = vcvt.s32.f32 %v6304_v7  ;;  %v6184_v60 = vsel %vm16863_vm12, %v14318_v29, 0  ;;  %v6775_v7 = vand.u32 65535, %v13976_v28  ;;  %v6829_v8 = vcvt.s32.f32 %v6827_v17 }
 0xea3   :  { %6818 = vadd.xlane.f32.xlu0 %v6816_v49  ;;  %v14320_v14 = vpop.xlane.xlu1 %6283  ;;  %v6332_v49 = vcvt.s32.f32 %v6330_v21  ;;  %v14334_v1 = vsel %vm5832_vm7, %v6184_v60, 0  ;;  %v7242_v60 = vcvt.f32.s32 %v14054_v59  ;;  %v7302_v17 = vcvt.f32.s32 %v14086_v40 }
 0xea4   :  { %16860 = vst [vmem:[#allocation103_spill] sm:$0xff] %v14320_v14  ;;  %16865 = vst [vmem:[#allocation77_spill] sm:$0xff] %v14334_v1  ;;  %v6382_v41 = vshrl.u32 %v14334_v1, 16  ;;  %v6777_v39 = vcvt.s32.f32 %v6775_v7 }
 0xea5   :  { %v7243_v36 = vshll.u32 %v7242_v60, 16  ;;  %v7303_v40 = vshll.u32 %v7302_v17, 16  ;;  %v16877_v17 = vld [vmem:[#allocation135_spill] sm:$0xff] }
 0xea6   :  { %6281 = vadd.xlane.f32.xlu1 %v6279_v23  ;;  %v6384_v23 = vcvt.s32.f32 %v6382_v41  ;;  %v7272_v41 = vcvt.f32.s32 %v14073_v20 }
 0xea7   :  { %6844 = vadd.xlane.f32.xlu0 %v6842_v27  ;;  %v14331_v11 = vpop.xlane.xlu1 %6781  ;;  %v6803_v27 = vcvt.s32.f32 %v6801_v34 }
 0xea8   :  { %16864 = vst [vmem:[#allocation56_spill] sm:$0xff] %v14331_v11  ;;  %v7273_v20 = vshll.u32 %v7272_v41, 16 }
 0xeaa   :  { %6309 = vadd.xlane.f32.xlu1 %v6306_v62  ;;  %v16869_v62 = vld [vmem:[#allocation82_spill] sm:$0xff] }
 0xeab   :  { %v14337_v45 = vpop.xlane.xlu1 %6807  ;;  %v6853_v21 = vand.u32 65535, %v16869_v62  ;;  %v16873_v62 = vld [vmem:[#allocation127_spill] sm:$0xff] }
 0xeac   :  { %16866 = vst [vmem:[#allocation36_spill] sm:$0xff] %v14337_v45 }
 0xeae   :  { %6335 = vadd.xlane.f32.xlu1 %v6332_v49  ;;  %v6855_v49 = vcvt.s32.f32 %v6853_v21 }
 0xeaf   :  { %v14341_v42 = vpop.xlane.xlu1 %6833 }
 0xeb0   :  { %16867 = vst [vmem:[#allocation78_spill] sm:$0xff] %v14341_v42 }
 0xeb2   :  { %6361 = vadd.xlane.f32.xlu1 %v6358_v61 }
 0xeb3   :  { %v14344_v58 = vpop.xlane.xlu1 %6859 }
 0xeb4   :  { %16868 = vst [vmem:[#allocation76_spill] sm:$0xff] %v14344_v58  ;;  %v16889_v58 = vld [vmem:[#allocation137_spill] sm:$0xff] }
 0xeb6   :  { %6387 = vadd.xlane.f32.xlu1 %v6384_v23 }
 0xeba   :  { %6779 = vadd.xlane.f32.xlu1 %v6777_v39 }
 0xebe   :  { %6805 = vadd.xlane.f32.xlu1 %v6803_v27 }
 0xec2   :  { %6831 = vadd.xlane.f32.xlu1 %v6829_v8 }
 0xec3   :  { %v7210_v28 = vpop.xlane.xlu1 %7209 }
 0xec4   :  { %v7211_v57 = vcvt.f32.s32 %v7210_v28 }
 0xec6   :  { %v14349_v30 = vadd.s32 %v7213_v15, %v7211_v57  ;;  %6857 = vadd.xlane.f32.xlu1 %v6855_v49  ;;  %v7077_v57 = vcvt.f32.s32 %v14099_v63 }
 0xec7   :  { %v7240_v61 = vpop.xlane.xlu1 %7239 }
 0xec8   :  { %v7241_v23 = vcvt.f32.s32 %v7240_v61  ;;  %v14352_v7 = vpop.xlane.xlu0 %6205  ;;  %vm7314_vm13 = vcmp.eq.s32.totalorder %v16654_v35, %v14349_v30  ;;  %v7078_v63 = vshll.u32 %v7077_v57, 16  ;;  %v16879_v57 = vld [vmem:[#allocation136_spill] sm:$0xff] }
 0xec9   :  { %16870 = vst [vmem:[#allocation90_spill] sm:$0xff] %v14352_v7  ;;  %v14360_v59 = vsel %vm7314_vm13, -1e+30, %v16871_v5 }
 0xeca   :  { %v14362_v39 = vadd.s32 %v7243_v36, %v7241_v23  ;;  %v7588_v34 = vsel %vm5832_vm7, %v14360_v59, -inf  ;;  %v16875_v36 = vld [vmem:[#allocation133_spill] sm:$0xff] }
 0xecb   :  { %v7270_v27 = vpop.xlane.xlu1 %7269  ;;  %7589 = vmax.xlane.f32.xlu1 %v7588_v34 }
 0xecc   :  { %v7271_v25 = vcvt.f32.s32 %v7270_v27  ;;  %v14367_v8 = vpop.xlane.xlu0 %6218  ;;  %vm7316_vm9 = vcmp.eq.s32.totalorder %v16654_v35, %v14362_v39 }
 0xecd   :  { %16872 = vst [vmem:[#allocation57_spill] sm:$0xff] %v14367_v8  ;;  %v14375_v21 = vsel %vm7316_vm9, -1e+30, %v16873_v62  ;;  %v7257_v8 = vcvt.f32.s32 %v14141_v47  ;;  %v7287_v47 = vcvt.f32.s32 %v14153_v4 }
 0xece   :  { %v14377_v28 = vadd.s32 %v7273_v20, %v7271_v25  ;;  %v7594_v15 = vsel %vm5832_vm7, %v14375_v21, -inf }
 0xecf   :  { %v7300_v60 = vpop.xlane.xlu1 %7299  ;;  %7595 = vmax.xlane.f32.xlu1 %v7594_v15 }
 0xed0   :  { %v7301_v49 = vcvt.f32.s32 %v7300_v60  ;;  %v14382_v61 = vpop.xlane.xlu0 %6244  ;;  %vm16087_vm11 = vcmp.eq.s32.totalorder %v16654_v35, %v14377_v28  ;;  %v7122_v60 = vcvt.f32.s32 %v14122_v13 }
 0xed1   :  { %16874 = vst [vmem:[#allocation80_spill] sm:$0xff] %v14382_v61  ;;  %v14390_v41 = vsel %vm16087_vm11, -1e+30, %v16875_v36  ;;  %vm16901_vm11 = vcmp.eq.s32.totalorder %v16654_v35, %v16900_v18 }
 0xed2   :  { %v14392_v23 = vadd.s32 %v7303_v40, %v7301_v49  ;;  %v7600_v5 = vsel %vm5832_vm7, %v14390_v41, -inf  ;;  %v6759_v16 = vsel %vm16901_vm11, %v14232_v24, 0 }
 0xed3   :  { %v7075_v34 = vpop.xlane.xlu1 %7074  ;;  %7601 = vmax.xlane.f32.xlu1 %v7600_v5  ;;  %v14575_v48 = vsel %vm5832_vm7, %v6759_v16, 0 }
 0xed4   :  { %v7076_v27 = vcvt.f32.s32 %v7075_v34  ;;  %v14396_v20 = vpop.xlane.xlu0 %6270  ;;  %vm16086_vm5 = vcmp.eq.s32.totalorder %v16654_v35, %v14392_v23  ;;  %v7123_v34 = vshll.u32 %v7122_v60, 16  ;;  %16902 = vst [vmem:[#allocation14_spill] sm:$0xff] %v14575_v48 }
 0xed5   :  { %16876 = vst [vmem:[#allocation59_spill] sm:$0xff] %v14396_v20  ;;  %v14404_v25 = vsel %vm16086_vm5, -1e+30, %v16877_v17 }
 0xed6   :  { %v14406_v62 = vadd.s32 %v7078_v63, %v7076_v27  ;;  %v7606_v15 = vsel %vm5832_vm7, %v14404_v25, -inf }
 0xed7   :  { %7607 = vmax.xlane.f32.xlu1 %v7606_v15  ;;  %v16882_v15 = vld [vmem:[#allocation140_spill] sm:$0xff] }
 0xed8   :  { %v14411_v40 = vpop.xlane.xlu0 %6768  ;;  %vm7305_vm14 = vcmp.eq.s32.totalorder %v16654_v35, %v14406_v62 }
 0xed9   :  { %16878 = vst [vmem:[#allocation45_spill] sm:$0xff] %v14411_v40  ;;  %v14419_v49 = vsel %vm7305_vm14, -1e+30, %v16879_v57  ;;  %v7152_v40 = vcvt.f32.s32 %v14147_v54 }
 0xeda   :  { %v7561_v36 = vsel %vm5832_vm7, %v14419_v49, -inf }
 0xedb   :  { %v7120_v5 = vpop.xlane.xlu1 %7119  ;;  %7562 = vmax.xlane.f32.xlu1 %v7561_v36 }
 0xedc   :  { %v7121_v63 = vcvt.f32.s32 %v7120_v5  ;;  %v14423_v27 = vpop.xlane.xlu0 %6794  ;;  %v7197_v5 = vcvt.f32.s32 %v14133_v37 }
 0xedd   :  { %16880 = vst [vmem:[#allocation25_spill] sm:$0xff] %v14423_v27 }
 0xede   :  { %v14425_v13 = vadd.s32 %v7123_v34, %v7121_v63  ;;  %v7198_v63 = vshll.u32 %v7197_v5, 16 }
 0xee0   :  { %v14427_v17 = vpop.xlane.xlu0 %6820  ;;  %vm7308_vm1 = vcmp.eq.s32.totalorder %v16654_v35, %v14425_v13 }
 0xee1   :  { %16881 = vst [vmem:[#allocation94_spill] sm:$0xff] %v14427_v17  ;;  %v14435_v57 = vsel %vm7308_vm1, -1e+30, %v16882_v15  ;;  %v7227_v17 = vcvt.f32.s32 %v14136_v22  ;;  %v7153_v22 = vshll.u32 %v7152_v40, 16 }
 0xee2   :  { %v7570_v36 = vsel %vm5832_vm7, %v14435_v57, -inf }
 0xee3   :  { %7571 = vmax.xlane.f32.xlu1 %v7570_v36  ;;  %v7228_v15 = vshll.u32 %v7227_v17, 16  ;;  %v7258_v17 = vshll.u32 %v7257_v8, 16  ;;  %v7288_v8 = vshll.u32 %v7287_v47, 16 }
 0xee4   :  { %v14439_v60 = vpop.xlane.xlu0 %6846 }
 0xee5   :  { %16883 = vst [vmem:[#allocation22_spill] sm:$0xff] %v14439_v60  ;;  %v16884_v60 = vld [vmem:[#allocation121_spill] sm:$0xff] }
 0xee8   :  { %v7195_v34 = vpop.xlane.xlu0 %7194 }
 0xee9   :  { %v7196_v27 = vcvt.f32.s32 %v7195_v34 }
 0xeeb   :  { %v14444_v20 = vadd.s32 %v7198_v63, %v7196_v27 }
 0xeec   :  { %v7225_v61 = vpop.xlane.xlu0 %7224 }
 0xeed   :  { %v7226_v7 = vcvt.f32.s32 %v7225_v61  ;;  %vm7313_vm10 = vcmp.eq.s32.totalorder %v16654_v35, %v14444_v20 }
 0xeee   :  { %v7150_v36 = vpop.xlane.xlu1 %7149  ;;  %v14453_v37 = vsel %vm7313_vm10, -1e+30, %v16884_v60  ;;  %v16885_v60 = vld [vmem:[#allocation125_spill] sm:$0xff] }
 0xeef   :  { %v14455_v5 = vadd.s32 %v7228_v15, %v7226_v7  ;;  %v7151_v54 = vcvt.f32.s32 %v7150_v36  ;;  %v7585_v27 = vsel %vm5832_vm7, %v14453_v37, -inf  ;;  %v16886_v36 = vld [vmem:[#allocation141_spill] sm:$0xff] }
 0xef0   :  { %7586 = vmax.xlane.f32.xlu0 %v7585_v27  ;;  %v7255_v61 = vpop.xlane.xlu0 %7254 }
 0xef1   :  { %v14460_v34 = vadd.s32 %v7153_v22, %v7151_v54  ;;  %v7256_v63 = vcvt.f32.s32 %v7255_v61  ;;  %vm7315_vm15 = vcmp.eq.s32.totalorder %v16654_v35, %v14455_v5  ;;  %v7092_v54 = vcvt.f32.s32 %v14158_v51 }
 0xef2   :  { %v14468_v7 = vsel %vm7315_vm15, -1e+30, %v16885_v60 }
 0xef3   :  { %v14470_v40 = vadd.s32 %v7258_v17, %v7256_v63  ;;  %v7591_v4 = vsel %vm5832_vm7, %v14468_v7, -inf  ;;  %vm7310_vm0 = vcmp.eq.s32.totalorder %v16654_v35, %v14460_v34  ;;  %v16887_v17 = vld [vmem:[#allocation129_spill] sm:$0xff] }
 0xef4   :  { %7592 = vmax.xlane.f32.xlu0 %v7591_v4  ;;  %v7285_v15 = vpop.xlane.xlu0 %7284  ;;  %v14480_v22 = vsel %vm7310_vm0, -1e+30, %v16886_v36  ;;  %v7093_v4 = vshll.u32 %v7092_v54, 16  ;;  %v7137_v54 = vcvt.f32.s32 %v14166_v44  ;;  %v7167_v44 = vcvt.f32.s32 %v14171_v53 }
 0xef5   :  { %v7286_v27 = vcvt.f32.s32 %v7285_v15  ;;  %v7576_v61 = vsel %vm5832_vm7, %v14480_v22, -inf  ;;  %vm7317_vm2 = vcmp.eq.s32.totalorder %v16654_v35, %v14470_v40  ;;  %v7107_v15 = vcvt.f32.s32 %v14111_v2 }
 0xef6   :  { %7577 = vmax.xlane.f32.xlu1 %v7576_v61  ;;  %v14491_v47 = vsel %vm7317_vm2, -1e+30, %v16887_v17  ;;  %v16888_v61 = vld [vmem:[#allocation132_spill] sm:$0xff]  ;;  %v7138_v42 = vshll.u32 %v7137_v54, 16  ;;  %v7168_v53 = vshll.u32 %v7167_v44, 16 }
 0xef7   :  { %v14493_v63 = vadd.s32 %v7288_v8, %v7286_v27  ;;  %v7597_v60 = vsel %vm5832_vm7, %v14491_v47, -inf  ;;  %v7108_v2 = vshll.u32 %v7107_v15, 16 }
 0xef8   :  { %7598 = vmax.xlane.f32.xlu0 %v7597_v60  ;;  %v7090_v51 = vpop.xlane.xlu0 %7089 }
 0xef9   :  { %v7091_v36 = vcvt.f32.s32 %v7090_v51  ;;  %vm7319_vm8 = vcmp.eq.s32.totalorder %v16654_v35, %v14493_v63  ;;  %v17018_v63 = vld [vmem:[#allocation112_spill] sm:$0xff] }
 0xefa   :  { %v14504_v17 = vsel %vm7319_vm8, -1e+30, %v16888_v61 }
 0xefb   :  { %v14506_v8 = vadd.s32 %v7093_v4, %v7091_v36  ;;  %v7603_v27 = vsel %vm5832_vm7, %v14504_v17, -inf }
 0xefc   :  { %7604 = vmax.xlane.f32.xlu0 %v7603_v27  ;;  %v7105_v60 = vpop.xlane.xlu0 %7104 }
 0xefd   :  { %v7106_v51 = vcvt.f32.s32 %v7105_v60  ;;  %vm7306_vm12 = vcmp.eq.s32.totalorder %v16654_v35, %v14506_v8  ;;  %v16890_v60 = vld [vmem:[#allocation139_spill] sm:$0xff] }
 0xefe   :  { %v14517_v61 = vsel %vm7306_vm12, -1e+30, %v16889_v58 }
 0xeff   :  { %v7109_v4 = vadd.s32 %v7108_v2, %v7106_v51  ;;  %v7564_v36 = vsel %vm5832_vm7, %v14517_v61, -inf  ;;  %v16891_v2 = vld [vmem:[#allocation69_spill] sm:$0xff] }
 0xf00   :  { %7565 = vmax.xlane.f32.xlu0 %v7564_v36  ;;  %v7135_v27 = vpop.xlane.xlu0 %7134  ;;  %vm16892_vm4 = vcmp.eq.s32.totalorder %v16654_v35, %v16891_v2  ;;  %v16896_v2 = vld [vmem:[#allocation142_spill] sm:$0xff] }
 0xf01   :  { %v7136_v15 = vcvt.f32.s32 %v7135_v27  ;;  %vm7307_vm6 = vcmp.eq.s32.totalorder %v16654_v35, %v7109_v4  ;;  %v6753_v51 = vsel %vm16892_vm4, %v14188_v9, 0  ;;  %v16893_v27 = vld [vmem:[#allocation138_spill] sm:$0xff] }
 0xf02   :  { %v14526_v45 = vsel %vm7307_vm6, -1e+30, %v16890_v60  ;;  %v14543_v14 = vsel %vm5832_vm7, %v6753_v51, 0  ;;  %v7323_v18 = vsel %vm7307_vm6, %v14023_v19, 0 }
 0xf03   :  { %v7139_v11 = vadd.s32 %v7138_v42, %v7136_v15  ;;  %v7567_v58 = vsel %vm5832_vm7, %v14526_v45, -inf  ;;  %v7363_v16 = vsel %vm5832_vm7, %v7323_v18, 0  ;;  %v16903_v18 = vld [vmem:[#allocation122_spill] sm:$0xff] }
 0xf04   :  { %7568 = vmax.xlane.f32.xlu0 %v7567_v58  ;;  %v7165_v54 = vpop.xlane.xlu0 %7164  ;;  %v16894_v58 = vld [vmem:[#allocation124_spill] sm:$0xff]  ;;  %vm16904_vm6 = vcmp.eq.s32.totalorder %v16654_v35, %v16903_v18 }
 0xf05   :  { %v7166_v36 = vcvt.f32.s32 %v7165_v54  ;;  %vm7309_vm3 = vcmp.eq.s32.totalorder %v16654_v35, %v7139_v11  ;;  %vm16895_vm4 = vcmp.eq.s32.totalorder %v16654_v35, %v16894_v58  ;;  %v6754_v11 = vsel %vm16904_vm6, %v14268_v12, 0 }
 0xf06   :  { %v14538_v60 = vsel %vm7309_vm3, -1e+30, %v16893_v27  ;;  %v6755_v44 = vsel %vm16895_vm4, %v14199_v55, 0  ;;  %v16897_v27 = vld [vmem:[#allocation128_spill] sm:$0xff]  ;;  %v7325_v62 = vsel %vm7309_vm3, %v14045_v52, 0 }
 0xf07   :  { %v7169_v42 = vadd.s32 %v7168_v53, %v7166_v36  ;;  %v7573_v15 = vsel %vm5832_vm7, %v14538_v60, -inf  ;;  %v6867_v53 = vshrl.u32 %v14543_v14, 16  ;;  %v14559_v51 = vsel %vm5832_vm7, %v6755_v44, 0 }
 0xf08   :  { %7574 = vmax.xlane.f32.xlu0 %v7573_v15  ;;  %vm16898_vm4 = vcmp.eq.s32.totalorder %v16654_v35, %v16897_v27  ;;  %v6893_v26 = vshrl.u32 %v14559_v51, 16  ;;  %v6945_v27 = vshrl.u32 %v14575_v48, 16 }
 0xf09   :  { %vm7311_vm5 = vcmp.eq.s32.totalorder %v16654_v35, %v7169_v42  ;;  %v6757_v15 = vsel %vm16898_vm4, %v14216_v3, 0  ;;  %v6869_v58 = vcvt.s32.f32 %v6867_v53  ;;  %v7321_v53 = vsel %vm7305_vm14, %v13892_v38, 0 }
 0xf0a   :  { %v14553_v54 = vsel %vm7311_vm5, -1e+30, %v16896_v2  ;;  %v14567_v2 = vsel %vm5832_vm7, %v6757_v15, 0  ;;  %v6895_v44 = vcvt.s32.f32 %v6893_v26  ;;  %v7337_v15 = vsel %vm5832_vm7, %v7321_v53, 0 }
 0xf0b   :  { %v7579_v36 = vsel %vm5832_vm7, %v14553_v54, -inf  ;;  %16899 = vst [vmem:[#allocation98_spill] sm:$0xff] %v14567_v2  ;;  %v6919_v1 = vshrl.u32 %v14567_v2, 16  ;;  %v6947_v26 = vcvt.s32.f32 %v6945_v27  ;;  %v7389_v38 = vsel %vm5832_vm7, %v7325_v62, 0 }
 0xf0c   :  { %7580 = vmax.xlane.f32.xlu0 %v7579_v36  ;;  %v7182_v53 = vcvt.f32.s32 %v14248_v56  ;;  %v7327_v4 = vsel %vm7311_vm5, %v14064_v50, 0  ;;  %v7391_v27 = vshrl.u32 %v7389_v38, 16  ;;  %v7364_v2 = vand.u32 65535, %v7363_v16 }
 0xf0d   :  { %v6921_v36 = vcvt.s32.f32 %v6919_v1  ;;  %v7365_v1 = vshrl.u32 %v7363_v16, 16  ;;  %v16919_v16 = vld [vmem:[#allocation95_spill] sm:$0xff] }
 0xf0e   :  { %v7393_v19 = vcvt.s32.f32 %v7391_v27 }
 0xf10   :  { %6872 = vadd.xlane.f32.xlu0 %v6869_v58  ;;  %v7339_v58 = vshrl.u32 %v7337_v15, 16 }
 0xf14   :  { %6898 = vadd.xlane.f32.xlu0 %v6895_v44  ;;  %v7341_v44 = vcvt.s32.f32 %v7339_v58  ;;  %v7183_v58 = vshll.u32 %v7182_v53, 16  ;;  %v16909_v53 = vld [vmem:[#allocation145_spill] sm:$0xff] }
 0xf18   :  { %6924 = vadd.xlane.f32.xlu0 %v6921_v36  ;;  %v7367_v36 = vcvt.s32.f32 %v7365_v1  ;;  %v16906_v1 = vld [vmem:[#allocation126_spill] sm:$0xff] }
 0xf19   :  { %vm16907_vm3 = vcmp.eq.s32.totalorder %v16654_v35, %v16906_v1 }
 0xf1a   :  { %v6756_v18 = vsel %vm16907_vm3, %v14282_v32, 0 }
 0xf1c   :  { %6950 = vadd.xlane.f32.xlu0 %v6947_v26  ;;  %v14600_v26 = vsel %vm5832_vm7, %v7327_v4, 0 }
 0xf1d   :  { %v7417_v42 = vshrl.u32 %v14600_v26, 16 }
 0xf1f   :  { %v7419_v27 = vcvt.s32.f32 %v7417_v42 }
 0xf20   :  { %7344 = vadd.xlane.f32.xlu0 %v7341_v44  ;;  %v14604_v44 = vsel %vm5832_vm7, %v6754_v11, 0  ;;  %v7338_v11 = vand.u32 65535, %v7337_v15  ;;  %v16915_v15 = vld [vmem:[#allocation134_spill] sm:$0xff] }
 0xf21   :  { %16905 = vst [vmem:[#allocation54_spill] sm:$0xff] %v14604_v44  ;;  %v6880_v4 = vshrl.u32 %v14604_v44, 16  ;;  %vm16916_vm14 = vcmp.eq.s32.totalorder %v16654_v35, %v16915_v15 }
 0xf22   :  { %v7340_v48 = vcvt.s32.f32 %v7338_v11 }
 0xf23   :  { %v7180_v52 = vpop.xlane.xlu1 %7179 }
 0xf24   :  { %v7181_v62 = vcvt.f32.s32 %v7180_v52  ;;  %7370 = vadd.xlane.f32.xlu0 %v7367_v36 }
 0xf26   :  { %v7184_v56 = vadd.s32 %v7183_v58, %v7181_v62  ;;  %v14622_v58 = vsel %vm5832_vm7, %v6756_v18, 0  ;;  %v6760_v18 = vsel %vm16916_vm14, %v14318_v29, 0 }
 0xf27   :  { %v14610_v50 = vpop.xlane.xlu1 %6203  ;;  %16910 = vst [vmem:[#allocation32_spill] sm:$0xff] %v14622_v58  ;;  %v14642_v11 = vsel %vm5832_vm7, %v6760_v18, 0  ;;  %v14656_v18 = vpop.xlane.xlu0 %6190 }
 0xf28   :  { %16908 = vst [vmem:[#allocation100_spill] sm:$0xff] %v14610_v50  ;;  %7396 = vadd.xlane.f32.xlu0 %v7393_v19  ;;  %vm7312_vm11 = vcmp.eq.s32.totalorder %v16654_v35, %v7184_v56  ;;  %v16911_v19 = vld [vmem:[#allocation131_spill] sm:$0xff]  ;;  %v6906_v50 = vshrl.u32 %v14622_v58, 16  ;;  %16918 = vst [vmem:[#allocation29_spill] sm:$0xff] %v14642_v11  ;;  %v16981_v58 = vld [vmem:[#allocation144_spill] sm:$0xff] }
 0xf29   :  { %v14616_v52 = vsel %vm7312_vm11, -1e+30, %v16909_v53  ;;  %vm16912_vm5 = vcmp.eq.s32.totalorder %v16654_v35, %v16911_v19  ;;  %v6882_v53 = vcvt.s32.f32 %v6880_v4  ;;  %v7366_v4 = vcvt.s32.f32 %v7364_v2  ;;  %v16921_v2 = vld [vmem:[#allocation88_spill] sm:$0xff]  ;;  %16922 = vst [vmem:[#allocation102_spill] sm:$0xff] %v14656_v18 }
 0xf2a   :  { %v7582_v36 = vsel %vm5832_vm7, %v14616_v52, -inf  ;;  %v6758_v62 = vsel %vm16912_vm5, %v14302_v10, 0  ;;  %v6908_v19 = vcvt.s32.f32 %v6906_v50  ;;  %vm16958_vm5 = vcmask 7168  }
 0xf2b   :  { %v14628_v1 = vpop.xlane.xlu1 %6229  ;;  %7583 = vmax.xlane.f32.xlu1 %v7582_v36  ;;  %v14632_v42 = vsel %vm5832_vm7, %v6758_v62, 0  ;;  %v7322_v62 = vsel %vm7306_vm12, %v16919_v16, 0  ;;  %v14667_v13 = vpop.xlane.xlu0 %6216  ;;  %vm16961_vm14 = vmmov %vm16958_vm5 }
 0xf2c   :  { %16913 = vst [vmem:[#allocation53_spill] sm:$0xff] %v14628_v1  ;;  %7422 = vadd.xlane.f32.xlu0 %v7419_v27  ;;  %16914 = vst [vmem:[#allocation96_spill] sm:$0xff] %v14632_v42  ;;  %v6932_v36 = vshrl.u32 %v14632_v42, 16  ;;  %v7390_v27 = vand.u32 65535, %v7389_v38  ;;  %v7324_v38 = vsel %vm7308_vm1, %v16921_v2, 0 }
 0xf2d   :  { %16926 = vst [vmem:[#allocation62_spill] sm:$0xff] %v14667_v13 }
 0xf2e   :  { %v6934_v15 = vcvt.s32.f32 %v6932_v36  ;;  %v7392_v50 = vcvt.s32.f32 %v7390_v27  ;;  %v7376_v36 = vsel %vm5832_vm7, %v7324_v38, 0 }
 0xf2f   :  { %v14638_v44 = vpop.xlane.xlu1 %6255  ;;  %6885 = vadd.xlane.f32.xlu1 %v6882_v53  ;;  %v7350_v53 = vsel %vm5832_vm7, %v7322_v62, 0  ;;  %v7378_v18 = vshrl.u32 %v7376_v36, 16 }
 0xf30   :  { %16917 = vst [vmem:[#allocation52_spill] sm:$0xff] %v14638_v44  ;;  %7342 = vadd.xlane.f32.xlu0 %v7340_v48  ;;  %v6958_v48 = vshrl.u32 %v14642_v11, 16  ;;  %v16956_v11 = vld [vmem:[#allocation104_spill] sm:$0xff] }
 0xf31   :  { %v7380_v38 = vcvt.s32.f32 %v7378_v18 }
 0xf32   :  { %v6960_v8 = vcvt.s32.f32 %v6958_v48 }
 0xf33   :  { %v14648_v1 = vpop.xlane.xlu1 %6281  ;;  %6911 = vadd.xlane.f32.xlu1 %v6908_v19  ;;  %v7352_v19 = vshrl.u32 %v7350_v53, 16 }
 0xf34   :  { %16920 = vst [vmem:[#allocation38_spill] sm:$0xff] %v14648_v1  ;;  %7368 = vadd.xlane.f32.xlu0 %v7366_v4  ;;  %v16924_v4 = vld [vmem:[#allocation37_spill] sm:$0xff] }
 0xf35   :  { %v7326_v27 = vsel %vm7310_vm0, %v16924_v4, 0  ;;  %v7354_v1 = vcvt.s32.f32 %v7352_v19  ;;  %v14678_v4 = vpop.xlane.xlu0 %6242 }
 0xf36   :  { %v7402_v16 = vsel %vm5832_vm7, %v7326_v27, 0  ;;  %16929 = vst [vmem:[#allocation44_spill] sm:$0xff] %v14678_v4 }
 0xf37   :  { %v14658_v44 = vpop.xlane.xlu1 %6309  ;;  %6937 = vadd.xlane.f32.xlu1 %v6934_v15  ;;  %v16927_v15 = vld [vmem:[#allocation43_spill] sm:$0xff]  ;;  %v7404_v2 = vshrl.u32 %v7402_v16, 16 }
 0xf38   :  { %16923 = vst [vmem:[#allocation60_spill] sm:$0xff] %v14658_v44  ;;  %7394 = vadd.xlane.f32.xlu0 %v7392_v50  ;;  %v7328_v48 = vsel %vm7312_vm11, %v16927_v15, 0 }
 0xf39   :  { %v14676_v34 = vsel %vm5832_vm7, %v7328_v48, 0  ;;  %v7406_v19 = vcvt.s32.f32 %v7404_v2  ;;  %v14685_v56 = vpop.xlane.xlu0 %6268 }
 0xf3a   :  { %v7430_v27 = vshrl.u32 %v14676_v34, 16  ;;  %16932 = vst [vmem:[#allocation68_spill] sm:$0xff] %v14685_v56  ;;  %v7429_v30 = vand.u32 65535, %v14676_v34 }
 0xf3b   :  { %v14665_v62 = vpop.xlane.xlu1 %6335  ;;  %6963 = vadd.xlane.f32.xlu1 %v6960_v8 }
 0xf3c   :  { %16925 = vst [vmem:[#allocation85_spill] sm:$0xff] %v14665_v62  ;;  %v7432_v15 = vcvt.s32.f32 %v7430_v27 }
 0xf3d   :  { %v14689_v62 = vpop.xlane.xlu0 %6296 }
 0xf3e   :  { %16934 = vst [vmem:[#allocation51_spill] sm:$0xff] %v14689_v62 }
 0xf3f   :  { %v14673_v50 = vpop.xlane.xlu1 %6361  ;;  %7357 = vadd.xlane.f32.xlu1 %v7354_v1  ;;  %v7351_v1 = vand.u32 65535, %v7350_v53 }
 0xf40   :  { %16928 = vst [vmem:[#allocation47_spill] sm:$0xff] %v14673_v50  ;;  %v7377_v50 = vand.u32 65535, %v7376_v36 }
 0xf41   :  { %v7353_v48 = vcvt.s32.f32 %v7351_v1 }
 0xf42   :  { %v7379_v2 = vcvt.s32.f32 %v7377_v50 }
 0xf43   :  { %v14680_v8 = vpop.xlane.xlu1 %6387  ;;  %7383 = vadd.xlane.f32.xlu1 %v7380_v38  ;;  %v7403_v38 = vand.u32 65535, %v7402_v16 }
 0xf44   :  { %16930 = vst [vmem:[#allocation89_spill] sm:$0xff] %v14680_v8 }
 0xf45   :  { %v7405_v56 = vcvt.s32.f32 %v7403_v38 }
 0xf47   :  { %v14683_v13 = vpop.xlane.xlu1 %6779  ;;  %7409 = vadd.xlane.f32.xlu1 %v7406_v19  ;;  %v14695_v19 = vpop.xlane.xlu0 %6322 }
 0xf48   :  { %16931 = vst [vmem:[#allocation64_spill] sm:$0xff] %v14683_v13  ;;  %16937 = vst [vmem:[#allocation71_spill] sm:$0xff] %v14695_v19 }
 0xf4b   :  { %v14687_v18 = vpop.xlane.xlu1 %6805  ;;  %7435 = vadd.xlane.f32.xlu1 %v7432_v15  ;;  %v14702_v15 = vpop.xlane.xlu0 %6348 }
 0xf4c   :  { %16933 = vst [vmem:[#allocation70_spill] sm:$0xff] %v14687_v18  ;;  %16938 = vst [vmem:[#allocation84_spill] sm:$0xff] %v14702_v15 }
 0xf4f   :  { %v14691_v4 = vpop.xlane.xlu1 %6831  ;;  %7355 = vadd.xlane.f32.xlu1 %v7353_v48  ;;  %v14722_v38 = vpop.xlane.xlu0 %6374 }
 0xf50   :  { %16935 = vst [vmem:[#allocation67_spill] sm:$0xff] %v14691_v4  ;;  %16942 = vst [vmem:[#allocation17_spill] sm:$0xff] %v14722_v38 }
 0xf53   :  { %v14693_v8 = vpop.xlane.xlu1 %6857  ;;  %7381 = vadd.xlane.f32.xlu1 %v7379_v2 }
 0xf54   :  { %16936 = vst [vmem:[#allocation61_spill] sm:$0xff] %v14693_v8 }
 0xf57   :  { %7407 = vadd.xlane.f32.xlu1 %v7405_v56 }
 0xf58   :  { %v14697_v53 = vpop.xlane.xlu1 %7589 }
 0xf59   :  { %vm7618_vm1 = vcmp.eq.f32.partialorder %v14360_v59, %v14697_v53 }
 0xf5a   :  { %v7634_v36 = vsel %vm7618_vm1, %v16654_v35, 16  ;;  %vm16964_vm1 = vmmov %vm16958_vm5 }
 0xf5b   :  { %v14705_v27 = vsel %vm5832_vm7, %v7634_v36, 2147483647 }
 0xf5c   :  { %16939 = vst [vmem:[#allocation42_spill] sm:$0xff] %v14705_v27  ;;  %v14707_v16 = vpop.xlane.xlu1 %7595  ;;  %v7778_v50 = vshra.s32 %v14705_v27, 16 }
 0xf5d   :  { %vm7620_vm0 = vcmp.eq.f32.partialorder %v14375_v21, %v14707_v16 }
 0xf5e   :  { %v7636_v56 = vsel %vm7620_vm0, %v16654_v35, 16  ;;  %v14713_v1 = vcvt.s32.f32 %v7778_v50  ;;  %vm16967_vm0 = vmmov %vm16964_vm1 }
 0xf5f   :  { %v14716_v59 = vsel %vm5832_vm7, %v7636_v56, 2147483647 }
 0xf60   :  { %16940 = vst [vmem:[#allocation39_spill] sm:$0xff] %v14713_v1  ;;  %16941 = vst [vmem:[#allocation120_spill] sm:$0xff] %v14716_v59  ;;  %v14718_v48 = vpop.xlane.xlu1 %7601  ;;  %7781 = vmin.xlane.f32.xlu1 %v14713_v1  ;;  %v7808_v2 = vshra.s32 %v14716_v59, 16  ;;  %v16976_v1 = vld [vmem:[#allocation30_spill] sm:$0xff] }
 0xf61   :  { %vm7622_vm12 = vcmp.eq.f32.partialorder %v14390_v41, %v14718_v48  ;;  %v14741_v41 = vpop.xlane.xlu0 %6766 }
 0xf62   :  { %v7638_v21 = vsel %vm7622_vm12, %v16654_v35, 16  ;;  %v14727_v36 = vcvt.s32.f32 %v7808_v2  ;;  %16946 = vst [vmem:[#allocation63_spill] sm:$0xff] %v14741_v41  ;;  %vm16970_vm12 = vmmov %vm16967_vm0 }
 0xf63   :  { %v14730_v50 = vsel %vm5832_vm7, %v7638_v21, 2147483647 }
 0xf64   :  { %16943 = vst [vmem:[#allocation83_spill] sm:$0xff] %v14727_v36  ;;  %16944 = vst [vmem:[#allocation143_spill] sm:$0xff] %v14730_v50  ;;  %v14732_v56 = vpop.xlane.xlu1 %7607  ;;  %7811 = vmin.xlane.f32.xlu1 %v14727_v36  ;;  %v7838_v8 = vshra.s32 %v14730_v50, 16  ;;  %v16973_v50 = vld [vmem:[#allocation19_spill] sm:$0xff] }
 0xf65   :  { %vm7624_vm4 = vcmp.eq.f32.partialorder %v14404_v25, %v14732_v56  ;;  %v14760_v41 = vpop.xlane.xlu0 %6792 }
 0xf66   :  { %v7640_v4 = vsel %vm7624_vm4, %v16654_v35, 16  ;;  %v14739_v18 = vcvt.s32.f32 %v7838_v8  ;;  %16950 = vst [vmem:[#allocation40_spill] sm:$0xff] %v14760_v41  ;;  %vm16974_vm4 = vmmov %vm16967_vm0 }
 0xf67   :  { %v14744_v2 = vsel %vm5832_vm7, %v7640_v4, 2147483647 }
 0xf68   :  { %16945 = vst [vmem:[#allocation35_spill] sm:$0xff] %v14739_v18  ;;  %16947 = vst [vmem:[#allocation46_spill] sm:$0xff] %v14744_v2  ;;  %v14746_v21 = vpop.xlane.xlu1 %7562  ;;  %7841 = vmin.xlane.f32.xlu1 %v14739_v18  ;;  %v7868_v13 = vshra.s32 %v14744_v2, 16  ;;  %v16966_v18 = vld [vmem:[#allocation50_spill] sm:$0xff]  ;;  %v16968_v2 = vld [vmem:[#allocation108_spill] sm:$0xff] }
 0xf69   :  { %vm7609_vm6 = vcmp.eq.f32.partialorder %v14419_v49, %v14746_v21 }
 0xf6a   :  { %v7625_v25 = vsel %vm7609_vm6, %v16654_v35, 16  ;;  %v14753_v19 = vcvt.s32.f32 %v7868_v13  ;;  %v14770_v13 = vpop.xlane.xlu0 %6818  ;;  %vm16977_vm6 = vmmov %vm16967_vm0 }
 0xf6b   :  { %v14756_v8 = vsel %vm5832_vm7, %v7625_v25, 2147483647  ;;  %16952 = vst [vmem:[#allocation74_spill] sm:$0xff] %v14770_v13  ;;  %v16960_v13 = vld [vmem:[#allocation75_spill] sm:$0xff] }
 0xf6c   :  { %16948 = vst [vmem:[#allocation72_spill] sm:$0xff] %v14753_v19  ;;  %16949 = vst [vmem:[#allocation93_spill] sm:$0xff] %v14756_v8  ;;  %7871 = vmin.xlane.f32.xlu1 %v14753_v19  ;;  %v7643_v4 = vshra.s32 %v14756_v8, 16 }
 0xf6e   :  { %v14762_v38 = vcvt.s32.f32 %v7643_v4  ;;  %v14779_v4 = vpop.xlane.xlu0 %6844 }
 0xf6f   :  { %16955 = vst [vmem:[#allocation123_spill] sm:$0xff] %v14779_v4 }
 0xf70   :  { %16951 = vst [vmem:[#allocation118_spill] sm:$0xff] %v14762_v38  ;;  %v14764_v15 = vpop.xlane.xlu1 %7571  ;;  %7646 = vmin.xlane.f32.xlu1 %v14762_v38  ;;  %v16959_v38 = vld [vmem:[#allocation105_spill] sm:$0xff] }
 0xf71   :  { %vm7612_vm3 = vcmp.eq.f32.partialorder %v14435_v57, %v14764_v15  ;;  %v16957_v57 = vld [vmem:[#allocation18_spill] sm:$0xff] }
 0xf72   :  { %v7628_v49 = vsel %vm7612_vm3, %v16654_v35, 16  ;;  %v8129_v42 = vsel %vm16958_vm5, %v16957_v57, %v16956_v11  ;;  %v16972_v57 = vld [vmem:[#allocation109_spill] sm:$0xff]  ;;  %vm16980_vm3 = vmmov %vm16967_vm0 }
 0xf73   :  { %v14773_v25 = vsel %vm5832_vm7, %v7628_v49, 2147483647  ;;  %v8130_v49 = vsel %vm16961_vm14, %v16960_v13, %v16959_v38  ;;  %v8134_v38 = vsel %vm16974_vm4, %v16973_v50, %v16972_v57  ;;  %v16975_v13 = vld [vmem:[#allocation110_spill] sm:$0xff]  ;;  %v16987_v57 = vld [vmem:[#allocation152_spill] sm:$0xff] }
 0xf74   :  { %16953 = vst [vmem:[#allocation73_spill] sm:$0xff] %v14773_v25  ;;  %v7688_v44 = vshra.s32 %v14773_v25, 16  ;;  %v16962_v25 = vld [vmem:[#allocation106_spill] sm:$0xff]  ;;  %v8135_v59 = vsel %vm16977_vm6, %v16976_v1, %v16975_v13 }
 0xf76   :  { %v14776_v62 = vcvt.s32.f32 %v7688_v44  ;;  %v16963_v44 = vld [vmem:[#allocation24_spill] sm:$0xff] }
 0xf77   :  { %v8131_v8 = vsel %vm16964_vm1, %v16963_v44, %v16962_v25  ;;  %v16978_v25 = vld [vmem:[#allocation111_spill] sm:$0xff]  ;;  %v16979_v44 = vld [vmem:[#allocation26_spill] sm:$0xff] }
 0xf78   :  { %16954 = vst [vmem:[#allocation82_spill] sm:$0xff] %v14776_v62  ;;  %7691 = vmin.xlane.f32.xlu1 %v14776_v62  ;;  %v16965_v62 = vld [vmem:[#allocation107_spill] sm:$0xff]  ;;  %v8136_v27 = vsel %vm16980_vm3, %v16979_v44, %v16978_v25 }
 0xf79   :  { %v8132_v4 = vsel %vm16967_vm0, %v16966_v18, %v16965_v62 }
 0xf7d   :  { %v7587_v41 = vpop.xlane.xlu0 %7586 }
 0xf7e   :  { %vm7617_vm11 = vcmp.eq.f32.partialorder %v14453_v37, %v7587_v41  ;;  %v16969_v37 = vld [vmem:[#allocation86_spill] sm:$0xff] }
 0xf7f   :  { %v7633_v19 = vsel %vm7617_vm11, %v16654_v35, 16  ;;  %v8133_v36 = vsel %vm16970_vm12, %v16969_v37, %v16968_v2  ;;  %vm16982_vm11 = vcmask 15360   ;;  %vm16989_vm12 = vcmask 23552  }
 0xf80   :  { %v14799_v11 = vsel %vm5832_vm7, %v7633_v19, 2147483647  ;;  %v8145_v2 = vsel %vm16982_vm11, %v8129_v42, %v16981_v58  ;;  %v16983_v19 = vld [vmem:[#allocation150_spill] sm:$0xff]  ;;  %vm16984_vm5 = vmmov %vm16982_vm11  ;;  %v16990_v58 = vld [vmem:[#allocation153_spill] sm:$0xff] }
 0xf81   :  { %16971 = vst [vmem:[#allocation127_spill] sm:$0xff] %v14799_v11  ;;  %v7593_v62 = vpop.xlane.xlu0 %7592  ;;  %v7763_v18 = vshra.s32 %v14799_v11, 16  ;;  %v8146_v37 = vsel %vm16984_vm5, %v8130_v49, %v16983_v19  ;;  %vm16986_vm14 = vmmov %vm16984_vm5  ;;  %v16992_v49 = vld [vmem:[#allocation154_spill] sm:$0xff] }
 0xf82   :  { %v8147_v50 = vsel %vm16986_vm14, %v8131_v8, %v16985_v46  ;;  %vm7619_vm1 = vcmp.eq.f32.partialorder %v14468_v7, %v7593_v62  ;;  %vm16988_vm0 = vmmov %vm16984_vm5 }
 0xf83   :  { %v8148_v1 = vsel %vm16988_vm0, %v8132_v4, %v16987_v57  ;;  %v7635_v13 = vsel %vm7619_vm1, %v16654_v35, 16  ;;  %v8163_v25 = vsel %vm16989_vm12, %v8147_v50, %v7593_v62  ;;  %v14822_v44 = vpop.xlane.xlu1 %7577  ;;  %v14824_v11 = vcvt.s32.f32 %v7763_v18  ;;  %vm16991_vm4 = vmmov %vm16988_vm0  ;;  %v16998_v57 = vld [vmem:[#allocation147_spill] sm:$0xff] }
 0xf84   :  { %v8150_v42 = vsel %vm16991_vm4, %v8134_v38, %v16990_v58  ;;  %vm16993_vm6 = vmmov %vm16988_vm0  ;;  %vm7614_vm3 = vcmp.eq.f32.partialorder %v14480_v22, %v14822_v44  ;;  %v14833_v46 = vsel %vm5832_vm7, %v7635_v13, 2147483647 }
 0xf85   :  { %v8152_v19 = vsel %vm16993_vm6, %v8136_v27, %v16992_v49  ;;  %vm16994_vm11 = vmmov %vm16989_vm12  ;;  %v7630_v4 = vsel %vm7614_vm3, %v16654_v35, 16  ;;  %7766 = vmin.xlane.f32.xlu0 %v14824_v11  ;;  %v7599_v62 = vpop.xlane.xlu0 %7598  ;;  %v7793_v38 = vshra.s32 %v14833_v46, 16 }
 0xf86   :  { %v8164_v7 = vsel %vm16994_vm11, %v8148_v1, %v14707_v16  ;;  %vm16995_vm5 = vmmov %vm16994_vm11  ;;  %vm7621_vm1 = vcmp.eq.f32.partialorder %v14491_v47, %v7599_v62  ;;  %v14845_v22 = vsel %vm5832_vm7, %v7630_v4, 2147483647 }
 0xf87   :  { %v8161_v8 = vsel %vm16995_vm5, %v8145_v2, %v7587_v41  ;;  %vm16996_vm14 = vmmov %vm16995_vm5  ;;  %v7637_v41 = vsel %vm7621_vm1, %v16654_v35, 16  ;;  %v14850_v2 = vcvt.s32.f32 %v7793_v38  ;;  %v7718_v50 = vshra.s32 %v14845_v22, 16 }
 0xf88   :  { %v8168_v27 = vsel %vm16996_vm14, %v8152_v19, %v14732_v56  ;;  %v8285_v18 = vcombine.low %v8161_v8, %v8163_v25  ;;  %vm16997_vm0 = vmmov %vm16995_vm5  ;;  %v14858_v47 = vsel %vm5832_vm7, %v7637_v41, 2147483647  ;;  %v17001_v25 = vld [vmem:[#allocation148_spill] sm:$0xff]  ;;  %v17002_v8 = vld [vmem:[#allocation15_spill] sm:$0xff] }
 0xf89   :  { %v8162_v16 = vsel %vm16997_vm0, %v8146_v37, %v14697_v53  ;;  %vm16999_vm12 = vmmov %vm16991_vm4  ;;  %v8151_v58 = vsel %vm16993_vm6, %v8135_v59, %v17001_v25  ;;  %7796 = vmin.xlane.f32.xlu0 %v14850_v2  ;;  %v7605_v37 = vpop.xlane.xlu0 %7604  ;;  %v14863_v49 = vcvt.s32.f32 %v7718_v50  ;;  %v7823_v19 = vshra.s32 %v14858_v47, 16 }
 0xf8a   :  { %v8149_v1 = vsel %vm16999_vm12, %v8133_v36, %v16998_v57  ;;  %v8293_v13 = vcombine.low %v8162_v16, %v8164_v7  ;;  %vm17000_vm4 = vmmov %vm16997_vm0  ;;  %v8292_v36 = vrot.slane %v8285_v18, %v17002_v8  ;;  %vm7623_vm11 = vcmp.eq.f32.partialorder %v14504_v17, %v7605_v37 }
 0xf8b   :  { %v8166_v56 = vsel %vm17000_vm4, %v8150_v42, %v14718_v48  ;;  %vm17003_vm3 = vmmov %vm16997_vm0  ;;  %v7639_v42 = vsel %vm7623_vm11, %v16654_v35, 16  ;;  %7721 = vmin.xlane.f32.xlu1 %v14863_v49  ;;  %v14872_v59 = vcvt.s32.f32 %v7823_v19 }
 0xf8c   :  { %v8309_v53 = vcombine.low %v8166_v56, %v8168_v27  ;;  %v8165_v7 = vsel %vm17003_vm3, %v8149_v1, %v7599_v62  ;;  %vm17004_vm5 = vmmov %vm16997_vm0  ;;  %v8300_v38 = vrot.slane %v8293_v13, %v17002_v8  ;;  %v14876_v27 = vsel %vm5832_vm7, %v7639_v42, 2147483647 }
 0xf8d   :  { %v8167_v48 = vsel %vm17004_vm5, %v8151_v58, %v7605_v37  ;;  %7826 = vmin.xlane.f32.xlu0 %v14872_v59  ;;  %v14881_v17 = vpop.xlane.xlu0 %7565  ;;  %v7853_v16 = vshra.s32 %v14876_v27, 16  ;;  %v17005_v37 = vld [vmem:[#allocation16_spill] sm:$0xff] }
 0xf8e   :  { %v8301_v4 = vcombine.low %v8165_v7, %v8167_v48  ;;  %v8316_v18 = vrot.slane %v8309_v53, %v17002_v8  ;;  %v8317_v41 = vcombine.low %v8292_v36, %v8300_v38  ;;  %vm7610_vm14 = vcmp.eq.f32.partialorder %v14517_v61, %v14881_v17 }
 0xf8f   :  { %v7626_v57 = vsel %vm7610_vm14, %v16654_v35, 16  ;;  %v14887_v1 = vcvt.s32.f32 %v7853_v16  ;;  %v8318_v13 = vcombine.high %v8292_v36, %v8300_v38 }
 0xf90   :  { %v8308_v62 = vrot.slane %v8301_v4, %v17002_v8  ;;  %v14890_v56 = vsel %vm5832_vm7, %v7626_v57, 2147483647  ;;  %v14899_v61 = vrot.slane %v8317_v41, %v17005_v37 }
 0xf91   :  { %7856 = vmin.xlane.f32.xlu0 %v14887_v1  ;;  %v7569_v58 = vpop.xlane.xlu0 %7568  ;;  %v7658_v53 = vshra.s32 %v14890_v56, 16  ;;  %v14908_v42 = vrot.slane %v8318_v13, %v17005_v37 }
 0xf92   :  { %v8333_v50 = vcombine.low %v8308_v62, %v8316_v18  ;;  %v8334_v25 = vcombine.high %v8308_v62, %v8316_v18  ;;  %vm7611_vm1 = vcmp.eq.f32.partialorder %v14526_v45, %v7569_v58  ;;  %17007 = vst [vmem:[#allocation135_spill] sm:$0xff] %v14899_v61  ;;  %v17014_v61 = vld [vmem:[#allocation87_spill] sm:$0xff] }
 0xf93   :  { %v7627_v36 = vsel %vm7611_vm1, %v16654_v35, 16  ;;  %v14905_v48 = vcvt.s32.f32 %v7658_v53  ;;  %17009 = vst [vmem:[#allocation140_spill] sm:$0xff] %v14908_v42 }
 0xf94   :  { %v14895_v19 = vrot.slane %v8333_v50, %v17005_v37  ;;  %v14902_v7 = vrot.slane %v8334_v25, %v17005_v37  ;;  %v14911_v4 = vsel %vm5832_vm7, %v7627_v36, 2147483647  ;;  %v7329_v36 = vsel %vm7313_vm10, %v14188_v9, 0 }
 0xf95   :  { %7661 = vmin.xlane.f32.xlu0 %v14905_v48  ;;  %v14916_v45 = vpop.xlane.xlu0 %7574  ;;  %v7673_v18 = vshra.s32 %v14911_v4, 16  ;;  %v14948_v38 = vsel %vm5832_vm7, %v7329_v36, 0  ;;  %vm17015_vm10 = vcmask 7168  }
 0xf96   :  { %17006 = vst [vmem:[#allocation133_spill] sm:$0xff] %v14895_v19  ;;  %17008 = vst [vmem:[#allocation136_spill] sm:$0xff] %v14902_v7  ;;  %vm7613_vm0 = vcmp.eq.f32.partialorder %v14538_v60, %v14916_v45  ;;  %v17016_v19 = vld [vmem:[#allocation156_spill] sm:$0xff] }
 0xf97   :  { %v7629_v16 = vsel %vm7613_vm0, %v16654_v35, 16  ;;  %v14924_v41 = vcvt.s32.f32 %v7673_v18 }
 0xf98   :  { %v14927_v50 = vsel %vm5832_vm7, %v7629_v16, 2147483647 }
 0xf99   :  { %7676 = vmin.xlane.f32.xlu0 %v14924_v41  ;;  %v7581_v57 = vpop.xlane.xlu0 %7580  ;;  %v7703_v13 = vshra.s32 %v14927_v50, 16 }
 0xf9a   :  { %vm7615_vm12 = vcmp.eq.f32.partialorder %v14553_v54, %v7581_v57  ;;  %v7416_v54 = vand.u32 65535, %v14600_v26  ;;  %v7333_v26 = vsel %vm7317_vm2, %v14216_v3, 0  ;;  %vm17020_vm2 = vmmov %vm17015_vm10 }
 0xf9b   :  { %v7631_v25 = vsel %vm7615_vm12, %v16654_v35, 16  ;;  %v14933_v53 = vcvt.s32.f32 %v7703_v13  ;;  %v7331_v13 = vsel %vm7315_vm15, %v14199_v55, 0  ;;  %v14965_v5 = vsel %vm5832_vm7, %v7333_v26, 0  ;;  %vm17017_vm15 = vmmov %vm16993_vm6  ;;  %v17022_v55 = vld [vmem:[#allocation33_spill] sm:$0xff] }
 0xf9c   :  { %v14936_v60 = vsel %vm5832_vm7, %v7631_v25, 2147483647  ;;  %v7418_v20 = vcvt.s32.f32 %v7416_v54  ;;  %v7443_v25 = vshrl.u32 %v14948_v38, 16  ;;  %v14957_v62 = vsel %vm5832_vm7, %v7331_v13, 0  ;;  %17011 = vst [vmem:[#allocation125_spill] sm:$0xff] %v14965_v5  ;;  %vm17026_vm4 = vmmov %vm17020_vm2 }
 0xf9d   :  { %7706 = vmin.xlane.f32.xlu0 %v14933_v53  ;;  %v7733_v18 = vshra.s32 %v14936_v60, 16  ;;  %17010 = vst [vmem:[#allocation121_spill] sm:$0xff] %v14957_v62  ;;  %v7335_v54 = vsel %vm7319_vm8, %v14232_v24, 0  ;;  %v7495_v42 = vshrl.u32 %v14965_v5, 16  ;;  %v17021_v24 = vld [vmem:[#allocation114_spill] sm:$0xff]  ;;  %vm17023_vm8 = vmmov %vm17020_vm2  ;;  %v17028_v5 = vld [vmem:[#allocation155_spill] sm:$0xff] }
 0xf9e   :  { %v7445_v36 = vcvt.s32.f32 %v7443_v25  ;;  %v14973_v7 = vsel %vm5832_vm7, %v7335_v54, 0  ;;  %v17013_v25 = vld [vmem:[#allocation113_spill] sm:$0xff]  ;;  %v8122_v54 = vsel %vm17023_vm8, %v17022_v55, %v17021_v24  ;;  %vm17027_vm6 = vmmov %vm17003_vm3  ;;  %v17035_v55 = vld [vmem:[#allocation159_spill] sm:$0xff] }
 0xf9f   :  { %v14944_v16 = vcvt.s32.f32 %v7733_v18  ;;  %v7469_v18 = vshrl.u32 %v14957_v62, 16  ;;  %17012 = vst [vmem:[#allocation141_spill] sm:$0xff] %v14973_v7  ;;  %v7497_v40 = vcvt.s32.f32 %v7495_v42  ;;  %v8123_v26 = vsel %vm17015_vm10, %v17014_v61, %v17013_v25  ;;  %v17025_v42 = vld [vmem:[#allocation48_spill] sm:$0xff]  ;;  %vm17029_vm3 = vmmov %vm17017_vm15  ;;  %v17030_v25 = vld [vmem:[#allocation149_spill] sm:$0xff] }
 0xfa0   :  { %v8139_v3 = vsel %vm17017_vm15, %v8123_v26, %v17016_v19  ;;  %vm17031_vm11 = vmmov %vm17029_vm3  ;;  %v6290_v26 = vand.u32 65535, %v14206_v6 }
 0xfa1   :  { %7736 = vmin.xlane.f32.xlu0 %v14944_v16  ;;  %v7471_v13 = vcvt.s32.f32 %v7469_v18  ;;  %v8138_v19 = vsel %vm17031_vm11, %v8122_v54, %v17030_v25  ;;  %vm17034_vm5 = vmmov %vm17020_vm2  ;;  %v17045_v25 = vld [vmem:[#allocation41_spill] sm:$0xff] }
 0xfa2   :  { %vm17036_vm14 = vmmov %vm17029_vm3 }
 0xfa3   :  { %vm17037_vm1 = vmmov %vm17027_vm6 }
 0xfa4   :  { %vm17038_vm0 = vmmov %vm17037_vm1 }
 0xfa5   :  { %7420 = vadd.xlane.f32.xlu0 %v7418_v20  ;;  %v7521_v20 = vshrl.u32 %v14973_v7, 16  ;;  %v8155_v7 = vsel %vm17027_vm6, %v8139_v3, %v7569_v58  ;;  %v8154_v3 = vsel %vm17038_vm0, %v8138_v19, %v14881_v17  ;;  %v17039_v58 = vld [vmem:[#allocation115_spill] sm:$0xff]  ;;  %vm17041_vm12 = vmmov %vm17020_vm2 }
 0xfa6   :  { %vm17043_vm10 = vmmov %vm17029_vm3  ;;  %v17050_v17 = vld [vmem:[#allocation151_spill] sm:$0xff] }
 0xfa7   :  { %vm17044_vm15 = vmmov %vm17038_vm0 }
 0xfa8   :  { %vm17049_vm8 = vmmov %vm17020_vm2 }
 0xfa9   :  { %7448 = vadd.xlane.f32.xlu0 %v7445_v36  ;;  %v17019_v36 = vld [vmem:[#allocation58_spill] sm:$0xff]  ;;  %vm17052_vm6 = vmmov %vm17038_vm0 }
 0xfaa   :  { %v8121_v18 = vsel %vm17020_vm2, %v17019_v36, %v17018_v63  ;;  %v17032_v63 = vld [vmem:[#allocation116_spill] sm:$0xff]  ;;  %v17033_v36 = vld [vmem:[#allocation21_spill] sm:$0xff] }
 0xfab   :  { %v8137_v61 = vsel %vm17029_vm3, %v8121_v18, %v17028_v5  ;;  %v8124_v62 = vsel %vm17034_vm5, %v17033_v36, %v17032_v63  ;;  %v17040_v5 = vld [vmem:[#allocation20_spill] sm:$0xff]  ;;  %v17046_v63 = vld [vmem:[#allocation49_spill] sm:$0xff]  ;;  %v17047_v36 = vld [vmem:[#allocation119_spill] sm:$0xff] }
 0xfac   :  { %v8125_v18 = vsel %vm17041_vm12, %v17040_v5, %v17039_v58 }
 0xfad   :  { %7474 = vadd.xlane.f32.xlu0 %v7471_v13  ;;  %v17024_v13 = vld [vmem:[#allocation117_spill] sm:$0xff] }
 0xfae   :  { %v8127_v9 = vsel %vm17026_vm4, %v17025_v42, %v17024_v13  ;;  %v8153_v13 = vsel %vm17037_vm1, %v8137_v61, %v14746_v21  ;;  %v17048_v21 = vld [vmem:[#allocation81_spill] sm:$0xff]  ;;  %vm17051_vm4 = vmmov %vm17029_vm3 }
 0xfaf   :  { %v8143_v24 = vsel %vm17036_vm14, %v8127_v9, %v17035_v55  ;;  %v8217_v54 = vcombine.low %v8153_v13, %v8155_v7  ;;  %v8126_v9 = vsel %vm17020_vm2, %v17046_v63, %v17045_v25  ;;  %v8128_v61 = vsel %vm17049_vm8, %v17048_v21, %v17047_v36  ;;  %vm17053_vm3 = vmmov %vm17038_vm0  ;;  %v17056_v13 = vld [vmem:[#allocation27_spill] sm:$0xff] }
 0xfb0   :  { %v8159_v42 = vsel %vm17044_vm15, %v8143_v24, %v7581_v57  ;;  %v8141_v19 = vsel %vm17051_vm4, %v8125_v18, %v17050_v17  ;;  %v6316_v57 = vand.u32 65535, %v14223_v0  ;;  %vm17055_vm11 = vmmov %vm17051_vm4 }
 0xfb1   :  { %7500 = vadd.xlane.f32.xlu0 %v7497_v40  ;;  %v7523_v40 = vcvt.s32.f32 %v7521_v20  ;;  %v17042_v20 = vld [vmem:[#allocation157_spill] sm:$0xff]  ;;  %v8157_v7 = vsel %vm17053_vm3, %v8141_v19, %v14916_v45  ;;  %vm17057_vm5 = vmmov %vm17051_vm4  ;;  %v6368_v19 = vand.u32 65535, %v14244_v43  ;;  %v7431_v43 = vcvt.s32.f32 %v7429_v30  ;;  %v15113_v30 = vpop.xlane.xlu0 %6872 }
 0xfb2   :  { %v8140_v6 = vsel %vm17043_vm10, %v8124_v62, %v17042_v20  ;;  %v6292_v62 = vcvt.s32.f32 %v6290_v26  ;;  %v8144_v5 = vsel %vm17057_vm5, %v8128_v61, %v17056_v13  ;;  %v8233_v20 = vcombine.low %v8157_v7, %v8159_v42  ;;  %vm17058_vm14 = vmmov %vm17038_vm0 }
 0xfb3   :  { %v8156_v55 = vsel %vm17052_vm6, %v8140_v6, %v14764_v15  ;;  %v15031_v15 = vrot.slane %v8217_v54, %v17002_v8  ;;  %v6318_v6 = vcvt.s32.f32 %v6316_v57 }
 0xfb4   :  { %v8225_v58 = vcombine.low %v8154_v3, %v8156_v55  ;;  %v15048_v54 = vrot.slane %v8233_v20, %v17002_v8 }
 0xfb5   :  { %7526 = vadd.xlane.f32.xlu0 %v7523_v40  ;;  %v17054_v40 = vld [vmem:[#allocation158_spill] sm:$0xff]  ;;  %17059 = vst [vmem:[#allocation129_spill] sm:$0xff] %v15031_v15 }
 0xfb6   :  { %v8142_v24 = vsel %vm17055_vm11, %v8126_v9, %v17054_v40  ;;  %v15037_v3 = vrot.slane %v8225_v58, %v17002_v8  ;;  %17061 = vst [vmem:[#allocation137_spill] sm:$0xff] %v15048_v54  ;;  %v7332_v58 = vsel %vm7316_vm9, %v14282_v32, 0  ;;  %v6370_v40 = vcvt.s32.f32 %v6368_v19 }
 0xfb7   :  { %v8158_v18 = vsel %vm17058_vm14, %v8142_v24, %v14822_v44  ;;  %v6342_v44 = vand.u32 65535, %v14236_v31  ;;  %v6866_v24 = vand.u32 65535, %v14543_v14  ;;  %v15083_v39 = vsel %vm5832_vm7, %v7332_v58, 0 }
 0xfb8   :  { %v7584_v25 = vpop.xlane.xlu1 %7583  ;;  %17060 = vst [vmem:[#allocation132_spill] sm:$0xff] %v15037_v3  ;;  %v8249_v21 = vcombine.low %v15031_v15, %v15037_v3  ;;  %v6892_v14 = vand.u32 65535, %v14559_v51  ;;  %vm17065_vm9 = vcmp.eq.s32.totalorder %v16654_v35, %v14392_v23  ;;  %v6303_v19 = vand.u32 65535, %v14292_v33 }
 0xfb9   :  { %vm7616_vm1 = vcmp.eq.f32.partialorder %v14616_v52, %v7584_v25  ;;  %v8160_v45 = vsel %vm17038_vm0, %v8144_v5, %v7584_v25  ;;  %6294 = vadd.xlane.f32.xlu0 %v6292_v62  ;;  %v7330_v52 = vsel %vm7314_vm13, %v14268_v12, 0  ;;  %v6344_v17 = vcvt.s32.f32 %v6342_v44 }
 0xfba   :  { %v7632_v0 = vsel %vm7616_vm1, %v16654_v35, 16  ;;  %v8241_v26 = vcombine.low %v8158_v18, %v8160_v45  ;;  %v15065_v55 = vsel %vm5832_vm7, %v7330_v52, 0  ;;  %v15078_v34 = vrot.slane %v8249_v21, %v17005_v37 }
 0xfbb   :  { %v15040_v42 = vsel %vm5832_vm7, %v7632_v0, 2147483647  ;;  %v7456_v57 = vshrl.u32 %v15065_v55, 16  ;;  %vm17064_vm13 = vcmp.eq.s32.totalorder %v16654_v35, %v14377_v28  ;;  %v7482_v18 = vshrl.u32 %v15083_v39, 16 }
 0xfbc   :  { %v15051_v63 = vrot.slane %v8241_v26, %v17002_v8  ;;  %v15053_v9 = vpop.xlane.xlu1 %6885  ;;  %v7748_v36 = vshra.s32 %v15040_v42, 16  ;;  %17063 = vst [vmem:[#allocation69_spill] sm:$0xff] %v15078_v34  ;;  %v7334_v5 = vsel %vm17064_vm13, %v14302_v10, 0  ;;  %v6868_v45 = vcvt.s32.f32 %v6866_v24  ;;  %v15119_v24 = vpop.xlane.xlu0 %6898 }
 0xfbd   :  { %6320 = vadd.xlane.f32.xlu0 %v6318_v6  ;;  %v7458_v25 = vcvt.s32.f32 %v7456_v57  ;;  %v15096_v0 = vsel %vm5832_vm7, %v7334_v5, 0  ;;  %v7336_v26 = vsel %vm17065_vm9, %v14318_v29, 0  ;;  %v7484_v6 = vcvt.s32.f32 %v7482_v18  ;;  %v17069_v57 = vld [vmem:[#allocation101_spill] sm:$0xff]  ;;  %v17071_v18 = vld [vmem:[#allocation66_spill] sm:$0xff] }
 0xfbe   :  { %v8265_v31 = vcombine.low %v15048_v54, %v15051_v63  ;;  %v15060_v61 = vcvt.s32.f32 %v7748_v36  ;;  %v7508_v44 = vshrl.u32 %v15096_v0, 16  ;;  %v6894_v52 = vcvt.s32.f32 %v6892_v14 }
 0xfbf   :  { %v15106_v36 = vsel %vm5832_vm7, %v7336_v26, 0 }
 0xfc0   :  { %v15071_v7 = vpop.xlane.xlu1 %6911  ;;  %7751 = vmin.xlane.f32.xlu1 %v15060_v61  ;;  %v15075_v62 = vrot.slane %v8265_v31, %v17005_v37  ;;  %v7510_v21 = vcvt.s32.f32 %v7508_v44  ;;  %v7534_v31 = vshrl.u32 %v15106_v36, 16  ;;  %v15126_v26 = vpop.xlane.xlu0 %6924 }
 0xfc1   :  { %6346 = vadd.xlane.f32.xlu0 %v6344_v17 }
 0xfc2   :  { %17062 = vst [vmem:[#allocation139_spill] sm:$0xff] %v15075_v62  ;;  %v7536_v17 = vcvt.s32.f32 %v7534_v31 }
 0xfc4   :  { %v15091_v20 = vpop.xlane.xlu1 %6937  ;;  %7433 = vadd.xlane.f32.xlu1 %v7431_v43  ;;  %v6305_v43 = vcvt.s32.f32 %v6303_v19  ;;  %v15132_v19 = vpop.xlane.xlu0 %6950 }
 0xfc5   :  { %6372 = vadd.xlane.f32.xlu0 %v6370_v40  ;;  %v6329_v40 = vand.u32 65535, %v17069_v57  ;;  %v17076_v57 = vld [vmem:[#allocation32_spill] sm:$0xff] }
 0xfc8   :  { %v15102_v28 = vpop.xlane.xlu1 %6963  ;;  %7461 = vadd.xlane.f32.xlu1 %v7458_v25  ;;  %v6331_v25 = vcvt.s32.f32 %v6329_v40  ;;  %v6905_v40 = vand.u32 65535, %v17076_v57 }
 0xfc9   :  { %6870 = vadd.xlane.f32.xlu0 %v6868_v45  ;;  %v6355_v45 = vand.u32 65535, %v17071_v18  ;;  %v17078_v18 = vld [vmem:[#allocation42_spill] sm:$0xff] }
 0xfca   :  { %v7777_v13 = vand.u32 65535, %v17078_v18  ;;  %v17083_v18 = vld [vmem:[#allocation143_spill] sm:$0xff] }
 0xfcb   :  { %v6357_v33 = vcvt.s32.f32 %v6355_v45  ;;  %v15138_v45 = vpop.xlane.xlu0 %7344 }
 0xfcc   :  { %v15108_v51 = vpop.xlane.xlu1 %7357  ;;  %7487 = vadd.xlane.f32.xlu1 %v7484_v6  ;;  %v17073_v6 = vld [vmem:[#allocation77_spill] sm:$0xff]  ;;  %17079 = vst [vmem:[#allocation145_spill] sm:$0xff] %v15138_v45 }
 0xfcd   :  { %17066 = vst [vmem:[#allocation138_spill] sm:$0xff] %v15108_v51  ;;  %6896 = vadd.xlane.f32.xlu0 %v6894_v52  ;;  %v6381_v44 = vand.u32 65535, %v17073_v6  ;;  %v6907_v6 = vcvt.s32.f32 %v6905_v40  ;;  %v17084_v40 = vld [vmem:[#allocation83_spill] sm:$0xff] }
 0xfcf   :  { %v6383_v52 = vcvt.s32.f32 %v6381_v44  ;;  %v7779_v44 = vcvt.s32.f32 %v7777_v13 }
 0xfd0   :  { %v15111_v23 = vpop.xlane.xlu1 %7383  ;;  %7513 = vadd.xlane.f32.xlu1 %v7510_v21  ;;  %v17074_v21 = vld [vmem:[#allocation54_spill] sm:$0xff] }
 0xfd1   :  { %17067 = vst [vmem:[#allocation124_spill] sm:$0xff] %v15111_v23  ;;  %v6879_v31 = vand.u32 65535, %v17074_v21  ;;  %v17080_v21 = vld [vmem:[#allocation120_spill] sm:$0xff]  ;;  %v17088_v23 = vld [vmem:[#allocation93_spill] sm:$0xff] }
 0xfd2   :  { %v7642_v51 = vand.u32 65535, %v17088_v23 }
 0xfd4   :  { %v15116_v58 = vpop.xlane.xlu1 %7409  ;;  %7539 = vadd.xlane.f32.xlu1 %v7536_v17 }
 0xfd5   :  { %17068 = vst [vmem:[#allocation142_spill] sm:$0xff] %v15116_v58  ;;  %v17081_v58 = vld [vmem:[#allocation39_spill] sm:$0xff] }
 0xfd8   :  { %v15121_v5 = vpop.xlane.xlu1 %7435  ;;  %6307 = vadd.xlane.f32.xlu1 %v6305_v43  ;;  %v6881_v43 = vcvt.s32.f32 %v6879_v31  ;;  %v15145_v31 = vpop.xlane.xlu0 %7370 }
 0xfd9   :  { %17070 = vst [vmem:[#allocation128_spill] sm:$0xff] %v15121_v5  ;;  %v7807_v5 = vand.u32 65535, %v17080_v21  ;;  %17082 = vst [vmem:[#allocation131_spill] sm:$0xff] %v15145_v31 }
 0xfdb   :  { %v7809_v57 = vcvt.s32.f32 %v7807_v5 }
 0xfdc   :  { %6333 = vadd.xlane.f32.xlu1 %v6331_v25  ;;  %v15124_v14 = vpop.xlane.xlu1 %7355 }
 0xfdd   :  { %17072 = vst [vmem:[#allocation130_spill] sm:$0xff] %v15124_v14 }
 0xfe0   :  { %6359 = vadd.xlane.f32.xlu1 %v6357_v33  ;;  %v15130_v17 = vpop.xlane.xlu1 %7381 }
 0xfe1   :  { %17075 = vst [vmem:[#allocation122_spill] sm:$0xff] %v15130_v17  ;;  %v17085_v17 = vld [vmem:[#allocation46_spill] sm:$0xff] }
 0xfe2   :  { %v7867_v14 = vand.u32 65535, %v17085_v17 }
 0xfe4   :  { %6385 = vadd.xlane.f32.xlu1 %v6383_v52  ;;  %v15135_v25 = vpop.xlane.xlu1 %7407 }
 0xfe5   :  { %17077 = vst [vmem:[#allocation126_spill] sm:$0xff] %v15135_v25  ;;  %v7837_v25 = vand.u32 65535, %v17083_v18  ;;  %v7869_v18 = vcvt.s32.f32 %v7867_v14 }
 0xfe7   :  { %v7839_v21 = vcvt.s32.f32 %v7837_v25  ;;  %v7644_v25 = vcvt.s32.f32 %v7642_v51 }
 0xfe8   :  { %6883 = vadd.xlane.f32.xlu1 %v6881_v43 }
 0xfec   :  { %6909 = vadd.xlane.f32.xlu1 %v6907_v6 }
 0xfed   :  { %v15140_v33 = vpop.xlane.xlu1 %7781 }
 0xfee   :  { %vm7783_vm12 = vcmp.eq.f32.partialorder %v17081_v58, %v15140_v33  ;;  %v15155_v58 = vpop.xlane.xlu0 %7396  ;;  %v7788_v3 = vcvt.f32.s32 %v15140_v33 }
 0xfef   :  { %v7784_v52 = vsel %vm7783_vm12, %v7779_v44, inf  ;;  %17086 = vst [vmem:[#allocation134_spill] sm:$0xff] %v15155_v58  ;;  %v17087_v44 = vld [vmem:[#allocation35_spill] sm:$0xff]  ;;  %v17091_v58 = vld [vmem:[#allocation118_spill] sm:$0xff] }
 0xff0   :  { %7785 = vmin.xlane.f32.xlu1 %v7784_v52 }
 0xff1   :  { %v15147_v43 = vpop.xlane.xlu1 %7811 }
 0xff2   :  { %vm7813_vm10 = vcmp.eq.f32.partialorder %v17084_v40, %v15147_v43 }
 0xff3   :  { %v7814_v6 = vsel %vm7813_vm10, %v7809_v57, inf  ;;  %v17089_v57 = vld [vmem:[#allocation72_spill] sm:$0xff]  ;;  %vm17108_vm10 = vcmask 7168  }
 0xff4   :  { %7815 = vmin.xlane.f32.xlu1 %v7814_v6  ;;  %v15164_v6 = vpop.xlane.xlu0 %7422 }
 0xff5   :  { %v15152_v13 = vpop.xlane.xlu1 %7841  ;;  %17090 = vst [vmem:[#allocation104_spill] sm:$0xff] %v15164_v6  ;;  %v17097_v6 = vld [vmem:[#allocation127_spill] sm:$0xff] }
 0xff6   :  { %vm7843_vm15 = vcmp.eq.f32.partialorder %v17087_v44, %v15152_v13  ;;  %v17092_v44 = vld [vmem:[#allocation73_spill] sm:$0xff] }
 0xff7   :  { %v7844_v52 = vsel %vm7843_vm15, %v7839_v21, inf  ;;  %vm17111_vm15 = vmmov %vm17108_vm10 }
 0xff8   :  { %7845 = vmin.xlane.f32.xlu1 %v7844_v52  ;;  %v7687_v52 = vand.u32 65535, %v17092_v44  ;;  %v15171_v14 = vpop.xlane.xlu0 %7342  ;;  %v7792_v44 = vand.u32 65535, %v14833_v46 }
 0xff9   :  { %v15159_v5 = vpop.xlane.xlu1 %7871  ;;  %17093 = vst [vmem:[#allocation18_spill] sm:$0xff] %v15171_v14  ;;  %v7717_v14 = vand.u32 65535, %v14845_v22 }
 0xffa   :  { %vm7873_vm2 = vcmp.eq.f32.partialorder %v17089_v57, %v15159_v5  ;;  %v7689_v31 = vcvt.s32.f32 %v7687_v52 }
 0xffb   :  { %v7874_v40 = vsel %vm7873_vm2, %v7869_v18, inf  ;;  %v17094_v18 = vld [vmem:[#allocation82_spill] sm:$0xff]  ;;  %vm17112_vm2 = vmmov %vm17108_vm10 }
 0xffc   :  { %7875 = vmin.xlane.f32.xlu1 %v7874_v40  ;;  %v15177_v40 = vpop.xlane.xlu0 %7368 }
 0xffd   :  { %v15166_v17 = vpop.xlane.xlu1 %7646  ;;  %17095 = vst [vmem:[#allocation105_spill] sm:$0xff] %v15177_v40 }
 0xffe   :  { %vm7648_vm8 = vcmp.eq.f32.partialorder %v17091_v58, %v15166_v17  ;;  %v7762_v58 = vand.u32 65535, %v17097_v6 }
 0xfff   :  { %v7649_v21 = vsel %vm7648_vm8, %v7644_v25, inf }
0x1000   :  { %7650 = vmin.xlane.f32.xlu1 %v7649_v21  ;;  %v15179_v51 = vpop.xlane.xlu0 %7394  ;;  %v7764_v21 = vcvt.s32.f32 %v7762_v58 }
0x1001   :  { %17096 = vst [vmem:[#allocation75_spill] sm:$0xff] %v15179_v51  ;;  %v7719_v51 = vcvt.s32.f32 %v7717_v14  ;;  %v7657_v14 = vand.u32 65535, %v14890_v56  ;;  %v7702_v56 = vand.u32 65535, %v14927_v50  ;;  %v17098_v50 = vld [vmem:[#allocation98_spill] sm:$0xff] }
0x1005   :  { %v15173_v23 = vpop.xlane.xlu1 %7691 }
0x1006   :  { %vm7693_vm4 = vcmp.eq.f32.partialorder %v17094_v18, %v15173_v23  ;;  %v7794_v18 = vcvt.s32.f32 %v7792_v44 }
0x1007   :  { %v7694_v57 = vsel %vm7693_vm4, %v7689_v31, inf }
0x1008   :  { %7695 = vmin.xlane.f32.xlu1 %v7694_v57  ;;  %v7822_v57 = vand.u32 65535, %v14858_v47 }
0x100a   :  { %v7824_v22 = vcvt.s32.f32 %v7822_v57 }
0x1012   :  { %v15182_v25 = vpop.xlane.xlu0 %7766 }
0x1013   :  { %vm7768_vm6 = vcmp.eq.f32.partialorder %v14824_v11, %v15182_v25 }
0x1014   :  { %v7769_v52 = vsel %vm7768_vm6, %v7764_v21, inf  ;;  %v7852_v21 = vand.u32 65535, %v14876_v27  ;;  %v7672_v27 = vand.u32 65535, %v14911_v4  ;;  %v7732_v4 = vand.u32 65535, %v14936_v60 }
0x1015   :  { %7770 = vmin.xlane.f32.xlu0 %v7769_v52  ;;  %v7659_v52 = vcvt.s32.f32 %v7657_v14 }
0x1016   :  { %v15188_v31 = vpop.xlane.xlu0 %7796  ;;  %v7854_v44 = vcvt.s32.f32 %v7852_v21  ;;  %v7674_v57 = vcvt.s32.f32 %v7672_v27  ;;  %v7734_v21 = vcvt.s32.f32 %v7732_v4  ;;  %v7442_v27 = vand.u32 65535, %v14948_v38  ;;  %v17102_v4 = vld [vmem:[#allocation125_spill] sm:$0xff] }
0x1017   :  { %vm7798_vm3 = vcmp.eq.f32.partialorder %v14850_v2, %v15188_v31 }
0x1018   :  { %v15193_v6 = vpop.xlane.xlu1 %7721  ;;  %v7799_v58 = vsel %vm7798_vm3, %v7794_v18, inf }
0x1019   :  { %vm7723_vm11 = vcmp.eq.f32.partialorder %v14863_v49, %v15193_v6  ;;  %7800 = vmin.xlane.f32.xlu0 %v7799_v58 }
0x101a   :  { %v15197_v11 = vpop.xlane.xlu0 %7826  ;;  %v7724_v46 = vsel %vm7723_vm11, %v7719_v51, inf }
0x101b   :  { %7725 = vmin.xlane.f32.xlu1 %v7724_v46  ;;  %vm7828_vm5 = vcmp.eq.f32.partialorder %v14872_v59, %v15197_v11  ;;  %v7704_v46 = vcvt.s32.f32 %v7702_v56 }
0x101c   :  { %v7829_v47 = vsel %vm7828_vm5, %v7824_v22, inf }
0x101d   :  { %7830 = vmin.xlane.f32.xlu0 %v7829_v47 }
0x101e   :  { %v15202_v2 = vpop.xlane.xlu0 %7856 }
0x101f   :  { %vm7858_vm14 = vcmp.eq.f32.partialorder %v14887_v1, %v15202_v2 }
0x1020   :  { %v7859_v49 = vsel %vm7858_vm14, %v7854_v44, inf }
0x1021   :  { %7860 = vmin.xlane.f32.xlu0 %v7859_v49  ;;  %v17100_v49 = vld [vmem:[#allocation14_spill] sm:$0xff] }
0x1022   :  { %v15207_v51 = vpop.xlane.xlu0 %7661  ;;  %v6944_v60 = vand.u32 65535, %v17100_v49  ;;  %v7747_v49 = vand.u32 65535, %v15040_v42  ;;  %v17106_v42 = vld [vmem:[#allocation29_spill] sm:$0xff] }
0x1023   :  { %vm7663_vm1 = vcmp.eq.f32.partialorder %v14905_v48, %v15207_v51 }
0x1024   :  { %v7664_v59 = vsel %vm7663_vm1, %v7659_v52, inf }
0x1025   :  { %7665 = vmin.xlane.f32.xlu0 %v7664_v59 }
0x1026   :  { %v15212_v18 = vpop.xlane.xlu0 %7676 }
0x1027   :  { %vm7678_vm0 = vcmp.eq.f32.partialorder %v14924_v41, %v15212_v18  ;;  %v6918_v41 = vand.u32 65535, %v17098_v50 }
0x1028   :  { %v7679_v1 = vsel %vm7678_vm0, %v7674_v57, inf  ;;  %v7444_v57 = vcvt.s32.f32 %v7442_v27  ;;  %v7749_v27 = vcvt.s32.f32 %v7747_v49  ;;  %v6875_v49 = vcvt.f32.s32 %v15113_v30 }
0x1029   :  { %7680 = vmin.xlane.f32.xlu0 %v7679_v1  ;;  %v6920_v14 = vcvt.s32.f32 %v6918_v41  ;;  %v17103_v41 = vld [vmem:[#allocation141_spill] sm:$0xff] }
0x102a   :  { %v15217_v58 = vpop.xlane.xlu0 %7706 }
0x102b   :  { %vm7708_vm13 = vcmp.eq.f32.partialorder %v14933_v53, %v15217_v58  ;;  %v6946_v53 = vcvt.s32.f32 %v6944_v60 }
0x102c   :  { %v7709_v48 = vsel %vm7708_vm13, %v7704_v46, inf }
0x102d   :  { %7710 = vmin.xlane.f32.xlu0 %v7709_v48  ;;  %v7494_v48 = vand.u32 65535, %v17102_v4 }
0x102e   :  { %v15222_v22 = vpop.xlane.xlu0 %7736 }
0x102f   :  { %vm7738_vm9 = vcmp.eq.f32.partialorder %v14944_v16, %v15222_v22  ;;  %v17101_v16 = vld [vmem:[#allocation121_spill] sm:$0xff]  ;;  %v7496_v50 = vcvt.s32.f32 %v7494_v48 }
0x1030   :  { %v7739_v47 = vsel %vm7738_vm9, %v7734_v21, inf  ;;  %v7468_v56 = vand.u32 65535, %v17101_v16  ;;  %v17104_v16 = vld [vmem:[#allocation96_spill] sm:$0xff] }
0x1031   :  { %7740 = vmin.xlane.f32.xlu0 %v7739_v47  ;;  %v7520_v47 = vand.u32 65535, %v17103_v41  ;;  %v6957_v41 = vand.u32 65535, %v17106_v42 }
0x1032   :  { %v15227_v44 = vpop.xlane.xlu0 %7420  ;;  %v7470_v46 = vcvt.s32.f32 %v7468_v56  ;;  %v6931_v56 = vand.u32 65535, %v17104_v16 }
0x1033   :  { %17099 = vst [vmem:[#allocation106_spill] sm:$0xff] %v15227_v44  ;;  %v6959_v45 = vcvt.s32.f32 %v6957_v41 }
0x1035   :  { %6922 = vadd.xlane.f32.xlu0 %v6920_v14  ;;  %v7522_v14 = vcvt.s32.f32 %v7520_v47  ;;  %v17107_v47 = vld [vmem:[#allocation51_spill] sm:$0xff] }
0x1036   :  { %v15230_v52 = vpop.xlane.xlu0 %7448 }
0x1039   :  { %6948 = vadd.xlane.f32.xlu0 %v6946_v53 }
0x103a   :  { %v15233_v59 = vpop.xlane.xlu0 %7474 }
0x103d   :  { %7446 = vadd.xlane.f32.xlu0 %v7444_v57 }
0x103e   :  { %v15236_v1 = vpop.xlane.xlu0 %7500 }
0x1041   :  { %7472 = vadd.xlane.f32.xlu0 %v7470_v46 }
0x1042   :  { %v15239_v21 = vpop.xlane.xlu0 %7526 }
0x1045   :  { %7498 = vadd.xlane.f32.xlu0 %v7496_v50  ;;  %v6933_v50 = vcvt.s32.f32 %v6931_v56 }
0x1046   :  { %v6295_v38 = vpop.xlane.xlu0 %6294 }
0x1047   :  { %v6298_v44 = vcvt.f32.s32 %v6295_v38 }
0x1049   :  { %7524 = vadd.xlane.f32.xlu0 %v7522_v14  ;;  %v6299_v14 = vcvt.f32.s32 %v17107_v47  ;;  %v7481_v47 = vand.u32 65535, %v15083_v39 }
0x104a   :  { %v15243_v60 = vpop.xlane.xlu0 %6320 }
0x104b   :  { %v6300_v16 = vshll.u32 %v6299_v14, 16 }
0x104d   :  { %v15245_v53 = vpop.xlane.xlu1 %7751  ;;  %v6301_v8 = vadd.s32 %v6300_v16, %v6298_v44  ;;  %v7533_v44 = vand.u32 65535, %v15106_v36  ;;  %v6888_v16 = vcvt.f32.s32 %v15053_v9  ;;  %v6914_v36 = vcvt.f32.s32 %v15071_v7 }
0x104e   :  { %v15247_v57 = vpop.xlane.xlu0 %6346  ;;  %vm7753_vm12 = vcmp.eq.f32.partialorder %v15060_v61, %v15245_v53 }
0x104f   :  { %v7754_v46 = vsel %vm7753_vm12, %v7749_v27, inf  ;;  %v7455_v27 = vand.u32 65535, %v15065_v55  ;;  %v7507_v55 = vand.u32 65535, %v15096_v0  ;;  %v7535_v14 = vcvt.s32.f32 %v7533_v44 }
0x1050   :  { %7755 = vmin.xlane.f32.xlu1 %v7754_v46  ;;  %v6876_v46 = vshll.u32 %v6875_v49, 16  ;;  %v6915_v15 = vshll.u32 %v6914_v36, 16  ;;  %v7878_v36 = vcvt.f32.s32 %v15159_v5 }
0x1051   :  { %v15252_v4 = vpop.xlane.xlu1 %7433  ;;  %v7457_v42 = vcvt.s32.f32 %v7455_v27 }
0x1052   :  { %17105 = vst [vmem:[#allocation24_spill] sm:$0xff] %v15252_v4  ;;  %v15254_v48 = vpop.xlane.xlu0 %6372 }
0x1054   :  { %6935 = vadd.xlane.f32.xlu1 %v6933_v50  ;;  %v7483_v50 = vcvt.s32.f32 %v7481_v47 }
0x1055   :  { %v15259_v40 = vpop.xlane.xlu1 %7461 }
0x1056   :  { %v6871_v61 = vpop.xlane.xlu0 %6870 }
0x1057   :  { %v6874_v4 = vcvt.f32.s32 %v6871_v61  ;;  %v17109_v61 = vld [vmem:[#allocation60_spill] sm:$0xff] }
0x1058   :  { %6961 = vadd.xlane.f32.xlu1 %v6959_v45  ;;  %v7509_v45 = vcvt.s32.f32 %v7507_v55  ;;  %v6312_v27 = vcvt.f32.s32 %v17109_v61 }
0x1059   :  { %v6877_v56 = vadd.s32 %v6876_v46, %v6874_v4  ;;  %v15262_v37 = vpop.xlane.xlu1 %7487  ;;  %v17110_v46 = vld [vmem:[#allocation85_spill] sm:$0xff] }
0x105a   :  { %v6313_v47 = vshll.u32 %v6312_v27, 16  ;;  %v7789_v27 = vshll.u32 %v7788_v3, 16 }
0x105b   :  { %v15266_v30 = vsel %vm17108_vm10, %v6301_v8, %v6877_v56  ;;  %v6338_v56 = vcvt.f32.s32 %v17110_v46 }
0x105c   :  { %7459 = vadd.xlane.f32.xlu1 %v7457_v42 }
0x105d   :  { %v15268_v38 = vpop.xlane.xlu1 %7513  ;;  %v6339_v34 = vshll.u32 %v6338_v56, 16 }
0x1060   :  { %7485 = vadd.xlane.f32.xlu1 %v7483_v50  ;;  %v6889_v50 = vshll.u32 %v6888_v16, 16  ;;  %v7818_v16 = vcvt.f32.s32 %v15147_v43 }
0x1061   :  { %v15271_v41 = vpop.xlane.xlu1 %7539 }
0x1064   :  { %7511 = vadd.xlane.f32.xlu1 %v7509_v45 }
0x1065   :  { %v6308_v4 = vpop.xlane.xlu1 %6307 }
0x1066   :  { %v6311_v0 = vcvt.f32.s32 %v6308_v4 }
0x1068   :  { %7537 = vadd.xlane.f32.xlu1 %v7535_v14  ;;  %v6314_v45 = vadd.s32 %v6313_v47, %v6311_v0  ;;  %v7848_v47 = vcvt.f32.s32 %v15152_v13 }
0x1069   :  { %v6334_v39 = vpop.xlane.xlu1 %6333 }
0x106a   :  { %v6337_v44 = vcvt.f32.s32 %v6334_v39  ;;  %v7849_v43 = vshll.u32 %v7848_v47, 16 }
0x106c   :  { %v6340_v4 = vadd.s32 %v6339_v34, %v6337_v44 }
0x106d   :  { %v15274_v49 = vpop.xlane.xlu1 %6359 }
0x1071   :  { %v15276_v8 = vpop.xlane.xlu1 %6385 }
0x1075   :  { %v6884_v42 = vpop.xlane.xlu1 %6883 }
0x1076   :  { %v6887_v55 = vcvt.f32.s32 %v6884_v42  ;;  %v7819_v42 = vshll.u32 %v7818_v16, 16 }
0x1078   :  { %v6890_v14 = vadd.s32 %v6889_v50, %v6887_v55 }
0x1079   :  { %v6910_v62 = vpop.xlane.xlu1 %6909 }
0x107a   :  { %v15284_v61 = vsel %vm17111_vm15, %v6314_v45, %v6890_v14  ;;  %v6913_v9 = vcvt.f32.s32 %v6910_v62 }
0x107c   :  { %v6916_v46 = vadd.s32 %v6915_v15, %v6913_v9  ;;  %v7879_v9 = vshll.u32 %v7878_v36, 16 }
0x107d   :  { %v7786_v54 = vpop.xlane.xlu1 %7785 }
0x107e   :  { %v15288_v7 = vsel %vm17112_vm2, %v6340_v4, %v6916_v46  ;;  %v7787_v39 = vcvt.f32.s32 %v7786_v54 }
0x1080   :  { %v7790_v0 = vadd.s32 %v7789_v27, %v7787_v39 }
0x1081   :  { %v7816_v56 = vpop.xlane.xlu1 %7815 }
0x1082   :  { %vm7890_vm8 = vcmp.eq.s32.totalorder %v16654_v35, %v7790_v0  ;;  %v7817_v33 = vcvt.f32.s32 %v7816_v56 }
0x1083   :  { %v7906_v62 = vsel %vm7890_vm8, %v14268_v12, 0  ;;  %vm17125_vm8 = vcmask 7168  }
0x1084   :  { %v7820_v34 = vadd.s32 %v7819_v42, %v7817_v33  ;;  %v8030_v15 = vsel %vm5832_vm7, %v7906_v62, 0 }
0x1085   :  { %v7846_v3 = vpop.xlane.xlu1 %7845  ;;  %v8032_v50 = vshrl.u32 %v8030_v15, 16  ;;  %v8031_v33 = vand.u32 65535, %v8030_v15 }
0x1086   :  { %vm7892_vm4 = vcmp.eq.s32.totalorder %v16654_v35, %v7820_v34  ;;  %v7847_v54 = vcvt.f32.s32 %v7846_v3 }
0x1087   :  { %v7908_v55 = vsel %vm7892_vm4, %v14282_v32, 0  ;;  %v8034_v45 = vcvt.s32.f32 %v8032_v50  ;;  %v15307_v50 = vpop.xlane.xlu0 %6896  ;;  %vm17128_vm4 = vmmov %vm17125_vm8 }
0x1088   :  { %v7850_v13 = vadd.s32 %v7849_v43, %v7847_v54  ;;  %v8056_v44 = vsel %vm5832_vm7, %v7908_v55, 0  ;;  %v7803_v55 = vcvt.f32.s32 %v15188_v31  ;;  %v7863_v31 = vcvt.f32.s32 %v15202_v2 }
0x1089   :  { %8037 = vadd.xlane.f32.xlu1 %v8034_v45  ;;  %v7876_v14 = vpop.xlane.xlu1 %7875  ;;  %v8058_v12 = vshrl.u32 %v8056_v44, 16  ;;  %v8057_v62 = vand.u32 65535, %v8056_v44  ;;  %v7833_v44 = vcvt.f32.s32 %v15197_v11 }
0x108a   :  { %vm7894_vm6 = vcmp.eq.s32.totalorder %v16654_v35, %v7850_v13  ;;  %v7877_v4 = vcvt.f32.s32 %v7876_v14  ;;  %v7864_v2 = vshll.u32 %v7863_v31, 16 }
0x108b   :  { %v7910_v46 = vsel %vm7894_vm6, %v14302_v10, 0  ;;  %v8060_v27 = vcvt.s32.f32 %v8058_v12  ;;  %v8033_v10 = vcvt.s32.f32 %v8031_v33  ;;  %v8059_v34 = vcvt.s32.f32 %v8057_v62 }
0x108c   :  { %v7880_v5 = vadd.s32 %v7879_v9, %v7877_v4  ;;  %v8082_v16 = vsel %vm5832_vm7, %v7910_v46, 0  ;;  %v7804_v12 = vshll.u32 %v7803_v55, 16  ;;  %v17113_v46 = vld [vmem:[#allocation91_spill] sm:$0xff]  ;;  %vm17129_vm6 = vcmask 15360  }
0x108d   :  { %8063 = vadd.xlane.f32.xlu1 %v8060_v27  ;;  %v8084_v39 = vshrl.u32 %v8082_v16, 16  ;;  %v8083_v3 = vand.u32 65535, %v8082_v16  ;;  %v7651_v13 = vpop.xlane.xlu1 %7650 }
0x108e   :  { %vm7896_vm3 = vcmp.eq.s32.totalorder %v16654_v35, %v7880_v5 }
0x108f   :  { %v7912_v32 = vsel %vm7896_vm3, %v14318_v29, 0  ;;  %v8086_v0 = vcvt.s32.f32 %v8084_v39  ;;  %v7773_v29 = vcvt.f32.s32 %v15182_v25  ;;  %v8085_v43 = vcvt.s32.f32 %v8083_v3  ;;  %vm17130_vm3 = vmmov %vm17128_vm4 }
0x1090   :  { %v15304_v56 = vsel %vm5832_vm7, %v7912_v32, 0  ;;  %v7698_v25 = vcvt.f32.s32 %v15173_v23  ;;  %v7728_v23 = vcvt.f32.s32 %v15193_v6  ;;  %v7653_v6 = vcvt.f32.s32 %v15166_v17 }
0x1091   :  { %8089 = vadd.xlane.f32.xlu1 %v8086_v0  ;;  %v8110_v42 = vshrl.u32 %v15304_v56, 16  ;;  %v7774_v54 = vshll.u32 %v7773_v29, 16  ;;  %v7834_v0 = vshll.u32 %v7833_v44, 16 }
0x1093   :  { %v8112_v47 = vcvt.s32.f32 %v8110_v42 }
0x1095   :  { %8115 = vadd.xlane.f32.xlu1 %v8112_v47  ;;  %v7696_v4 = vpop.xlane.xlu1 %7695  ;;  %v17114_v47 = vld [vmem:[#allocation79_spill] sm:$0xff] }
0x1096   :  { %v7697_v42 = vcvt.f32.s32 %v7696_v4 }
0x1099   :  { %8035 = vadd.xlane.f32.xlu1 %v8033_v10 }
0x109d   :  { %8061 = vadd.xlane.f32.xlu1 %v8059_v34  ;;  %v7699_v34 = vshll.u32 %v7698_v25, 16 }
0x109f   :  { %v7700_v55 = vadd.s32 %v7699_v34, %v7697_v42  ;;  %v7654_v42 = vshll.u32 %v7653_v6, 16 }
0x10a1   :  { %8087 = vadd.xlane.f32.xlu1 %v8085_v43  ;;  %v7668_v43 = vcvt.f32.s32 %v15207_v51  ;;  %vm7884_vm1 = vcmp.eq.s32.totalorder %v16654_v35, %v7700_v55  ;;  %v7713_v55 = vcvt.f32.s32 %v15217_v58 }
0x10a2   :  { %v7771_v36 = vpop.xlane.xlu0 %7770 }
0x10a3   :  { %v7772_v45 = vcvt.f32.s32 %v7771_v36  ;;  %v7669_v51 = vshll.u32 %v7668_v43, 16 }
0x10a5   :  { %v7775_v15 = vadd.s32 %v7774_v54, %v7772_v45 }
0x10a6   :  { %v7801_v14 = vpop.xlane.xlu0 %7800 }
0x10a7   :  { %vm7889_vm11 = vcmp.eq.s32.totalorder %v16654_v35, %v7775_v15  ;;  %v7802_v9 = vcvt.f32.s32 %v7801_v14  ;;  %v17115_v14 = vld [vmem:[#allocation99_spill] sm:$0xff] }
0x10a8   :  { %v7905_v27 = vsel %vm7889_vm11, %v17113_v46, 0  ;;  %v7726_v10 = vpop.xlane.xlu1 %7725  ;;  %vm17131_vm11 = vmmov %vm17129_vm6 }
0x10a9   :  { %v7805_v5 = vadd.s32 %v7804_v12, %v7802_v9  ;;  %v15316_v16 = vsel %vm5832_vm7, %v7905_v27, 0  ;;  %v7727_v45 = vcvt.f32.s32 %v7726_v10  ;;  %v7729_v9 = vshll.u32 %v7728_v23, 16 }
0x10aa   :  { %v7831_v39 = vpop.xlane.xlu0 %7830  ;;  %v8019_v32 = vshrl.u32 %v15316_v16, 16  ;;  %v7652_v27 = vcvt.f32.s32 %v7651_v13  ;;  %v17117_v13 = vld [vmem:[#allocation88_spill] sm:$0xff] }
0x10ab   :  { %vm7891_vm5 = vcmp.eq.s32.totalorder %v16654_v35, %v7805_v5  ;;  %v7832_v11 = vcvt.f32.s32 %v7831_v39  ;;  %v7730_v31 = vadd.s32 %v7729_v9, %v7727_v45  ;;  %v7900_v10 = vsel %vm7884_vm1, %v17117_v13, 0 }
0x10ac   :  { %v7907_v33 = vsel %vm7891_vm5, %v17114_v47, 0  ;;  %v8021_v62 = vcvt.s32.f32 %v8019_v32  ;;  %v17116_v32 = vld [vmem:[#allocation31_spill] sm:$0xff]  ;;  %v7655_v23 = vadd.s32 %v7654_v42, %v7652_v27  ;;  %vm17132_vm5 = vmmov %vm17129_vm6 }
0x10ad   :  { %v7835_v3 = vadd.s32 %v7834_v0, %v7832_v11  ;;  %v15324_v29 = vsel %vm5832_vm7, %v7907_v33, 0  ;;  %v7683_v11 = vcvt.f32.s32 %v15212_v18  ;;  %vm7886_vm13 = vcmp.eq.s32.totalorder %v16654_v35, %v7730_v31 }
0x10ae   :  { %8024 = vadd.xlane.f32.xlu0 %v8021_v62  ;;  %v7861_v36 = vpop.xlane.xlu0 %7860  ;;  %v8045_v54 = vshrl.u32 %v15324_v29, 16  ;;  %v8018_v18 = vand.u32 65535, %v15316_v16  ;;  %vm7881_vm12 = vcmp.eq.s32.totalorder %v16654_v35, %v7655_v23  ;;  %v8044_v58 = vand.u32 65535, %v15324_v29 }
0x10af   :  { %vm7893_vm14 = vcmp.eq.s32.totalorder %v16654_v35, %v7835_v3  ;;  %v7862_v15 = vcvt.f32.s32 %v7861_v36  ;;  %v6350_v23 = vcvt.f32.s32 %v15247_v57 }
0x10b0   :  { %v7909_v12 = vsel %vm7893_vm14, %v17115_v14, 0  ;;  %v8047_v44 = vcvt.s32.f32 %v8045_v54  ;;  %v7684_v54 = vshll.u32 %v7683_v11, 16  ;;  %v17119_v14 = vld [vmem:[#allocation37_spill] sm:$0xff]  ;;  %v8020_v16 = vcvt.s32.f32 %v8018_v18  ;;  %vm17133_vm14 = vmmov %vm17132_vm5 }
0x10b1   :  { %v7865_v4 = vadd.s32 %v7864_v2, %v7862_v15  ;;  %v15332_v46 = vsel %vm5832_vm7, %v7909_v12, 0  ;;  %v17118_v2 = vld [vmem:[#allocation95_spill] sm:$0xff]  ;;  %v15353_v15 = vsel %vm5832_vm7, %v7900_v10, 0  ;;  %v7902_v12 = vsel %vm7886_vm13, %v17119_v14, 0  ;;  %v17123_v18 = vld [vmem:[#allocation97_spill] sm:$0xff]  ;;  %vm17139_vm13 = vmmov %vm17132_vm5 }
0x10b2   :  { %8050 = vadd.xlane.f32.xlu0 %v8047_v44  ;;  %v7666_v25 = vpop.xlane.xlu0 %7665  ;;  %v8071_v5 = vshrl.u32 %v15332_v46, 16  ;;  %v7954_v27 = vshrl.u32 %v15353_v15, 16  ;;  %v15362_v31 = vsel %vm5832_vm7, %v7902_v12, 0  ;;  %v6927_v11 = vcvt.f32.s32 %v15126_v26 }
0x10b3   :  { %vm7895_vm0 = vcmp.eq.s32.totalorder %v16654_v35, %v7865_v4  ;;  %v7667_v39 = vcvt.f32.s32 %v7666_v25  ;;  %v7714_v25 = vshll.u32 %v7713_v55, 16  ;;  %v8046_v13 = vcvt.s32.f32 %v8044_v58 }
0x10b4   :  { %v7911_v0 = vsel %vm7895_vm0, %v17116_v32, 0  ;;  %v8073_v17 = vcvt.s32.f32 %v8071_v5  ;;  %v7743_v5 = vcvt.f32.s32 %v15222_v22  ;;  %v7956_v10 = vcvt.s32.f32 %v7954_v27  ;;  %v17124_v27 = vld [vmem:[#allocation28_spill] sm:$0xff]  ;;  %vm17137_vm0 = vmmov %vm17130_vm3 }
0x10b5   :  { %v7670_v47 = vadd.s32 %v7669_v51, %v7667_v39  ;;  %v15340_v33 = vsel %vm5832_vm7, %v7911_v0, 0  ;;  %v17120_v39 = vld [vmem:[#allocation84_spill] sm:$0xff]  ;;  %v17121_v0 = vld [vmem:[#allocation65_spill] sm:$0xff]  ;;  %v8070_v22 = vand.u32 65535, %v15332_v46  ;;  %v6953_v26 = vcvt.f32.s32 %v15132_v19 }
0x10b6   :  { %8076 = vadd.xlane.f32.xlu0 %v8073_v17  ;;  %v7681_v62 = vpop.xlane.xlu0 %7680  ;;  %v8097_v34 = vshrl.u32 %v15340_v33, 16  ;;  %v6351_v32 = vcvt.f32.s32 %v17120_v39  ;;  %v7897_v17 = vsel %vm7881_vm12, %v17121_v0, 0  ;;  %v6928_v14 = vshll.u32 %v6927_v11, 16  ;;  %vm17141_vm12 = vmmov %vm17132_vm5 }
0x10b7   :  { %vm7882_vm9 = vcmp.eq.s32.totalorder %v16654_v35, %v7670_v47  ;;  %v7682_v3 = vcvt.f32.s32 %v7681_v62  ;;  %v7980_v62 = vshrl.u32 %v15362_v31, 16  ;;  %v6954_v58 = vshll.u32 %v6953_v26, 16 }
0x10b8   :  { %v7898_v43 = vsel %vm7882_vm9, %v17118_v2, 0  ;;  %v8099_v36 = vcvt.s32.f32 %v8097_v34  ;;  %v7744_v34 = vshll.u32 %v7743_v5, 16  ;;  %v6352_v2 = vshll.u32 %v6351_v32, 16  ;;  %vm17140_vm9 = vmmov %vm17132_vm5 }
0x10b9   :  { %v15350_v45 = vsel %vm5832_vm7, %v7898_v43, 0  ;;  %v7685_v9 = vadd.s32 %v7684_v54, %v7682_v3  ;;  %v15372_v3 = vsel %vm5832_vm7, %v7897_v17, 0  ;;  %v17122_v43 = vld [vmem:[#allocation17_spill] sm:$0xff]  ;;  %v7982_v57 = vcvt.s32.f32 %v7980_v62  ;;  %v17127_v62 = vld [vmem:[#allocation92_spill] sm:$0xff] }
0x10ba   :  { %8102 = vadd.xlane.f32.xlu0 %v8099_v36  ;;  %v7711_v44 = vpop.xlane.xlu0 %7710  ;;  %v7928_v6 = vshrl.u32 %v15350_v45, 16  ;;  %v6377_v36 = vcvt.f32.s32 %v17122_v43  ;;  %v7451_v39 = vcvt.f32.s32 %v15230_v52  ;;  %v6324_v26 = vcvt.f32.s32 %v15243_v60 }
0x10bb   :  { %v7712_v4 = vcvt.f32.s32 %v7711_v44  ;;  %vm7883_vm10 = vcmp.eq.s32.totalorder %v16654_v35, %v7685_v9  ;;  %v8072_v44 = vcvt.s32.f32 %v8070_v22  ;;  %v6353_v9 = vadd.s32 %v6352_v2, %v6350_v23 }
0x10bc   :  { %v7930_v51 = vcvt.s32.f32 %v7928_v6  ;;  %v7899_v54 = vsel %vm7883_vm10, %v17123_v18, 0  ;;  %v7915_v6 = vshrl.u32 %v15372_v3, 16  ;;  %v6900_v22 = vcvt.f32.s32 %v15307_v50  ;;  %vm17143_vm10 = vmmov %vm17132_vm5 }
0x10bd   :  { %v7715_v29 = vadd.s32 %v7714_v25, %v7712_v4  ;;  %v6376_v4 = vcvt.f32.s32 %v15254_v48  ;;  %v15381_v19 = vsel %vm5832_vm7, %v7899_v54, 0  ;;  %v6901_v48 = vcvt.f32.s32 %v15119_v24 }
0x10be   :  { %8022 = vadd.xlane.f32.xlu0 %v8020_v16  ;;  %7933 = vadd.xlane.f32.xlu1 %v7930_v51  ;;  %v7741_v42 = vpop.xlane.xlu0 %7740  ;;  %v6378_v51 = vshll.u32 %v6377_v36, 16  ;;  %v7917_v17 = vcvt.s32.f32 %v7915_v6  ;;  %v7452_v23 = vshll.u32 %v7451_v39, 16  ;;  %v7477_v2 = vcvt.f32.s32 %v15233_v59 }
0x10bf   :  { %v7742_v47 = vcvt.f32.s32 %v7741_v42  ;;  %vm7885_vm15 = vcmp.eq.s32.totalorder %v16654_v35, %v7715_v29  ;;  %v7941_v42 = vshrl.u32 %v15381_v19, 16  ;;  %v6902_v36 = vshll.u32 %v6901_v48, 16 }
0x10c0   :  { %v7901_v25 = vsel %vm7885_vm15, %v17124_v27, 0  ;;  %v6379_v11 = vadd.s32 %v6378_v51, %v6376_v4  ;;  %vm17153_vm15 = vcmask 23552  }
0x10c1   :  { %v7745_v46 = vadd.s32 %v7744_v34, %v7742_v47  ;;  %v7965_v47 = vsel %vm5832_vm7, %v7901_v25, 0  ;;  %v7943_v18 = vcvt.s32.f32 %v7941_v42  ;;  %v6903_v50 = vadd.s32 %v6902_v36, %v6900_v22 }
0x10c2   :  { %8048 = vadd.xlane.f32.xlu0 %v8046_v13  ;;  %7959 = vadd.xlane.f32.xlu1 %v7956_v10  ;;  %v6923_v55 = vpop.xlane.xlu0 %6922  ;;  %v17126_v13 = vld [vmem:[#allocation71_spill] sm:$0xff]  ;;  %v7967_v54 = vshrl.u32 %v7965_v47, 16  ;;  %v7529_v25 = vcvt.f32.s32 %v15239_v21  ;;  %v7758_v21 = vcvt.f32.s32 %v15245_v53  ;;  %v6363_v36 = vcvt.f32.s32 %v15274_v49 }
0x10c3   :  { %v6926_v12 = vcvt.f32.s32 %v6923_v55  ;;  %vm7887_vm2 = vcmp.eq.s32.totalorder %v16654_v35, %v7745_v46  ;;  %v6325_v10 = vcvt.f32.s32 %v17126_v13  ;;  %v7940_v13 = vand.u32 65535, %v15381_v19 }
0x10c4   :  { %v7903_v52 = vsel %vm7887_vm2, %v17127_v62, 0  ;;  %v7969_v4 = vcvt.s32.f32 %v7967_v54  ;;  %v17135_v54 = vld [vmem:[#allocation89_spill] sm:$0xff]  ;;  %vm17154_vm2 = vmmov %vm17153_vm15 }
0x10c5   :  { %v6929_v16 = vadd.s32 %v6928_v14, %v6926_v12  ;;  %v7991_v14 = vsel %vm5832_vm7, %v7903_v52, 0  ;;  %v6326_v46 = vshll.u32 %v6325_v10, 16  ;;  %v7942_v62 = vcvt.s32.f32 %v7940_v13  ;;  %v17134_v52 = vld [vmem:[#allocation47_spill] sm:$0xff] }
0x10c6   :  { %8074 = vadd.xlane.f32.xlu0 %v8072_v44  ;;  %7985 = vadd.xlane.f32.xlu1 %v7982_v57  ;;  %v6949_v5 = vpop.xlane.xlu0 %6948  ;;  %v7478_v44 = vshll.u32 %v7477_v2, 16  ;;  %v7503_v57 = vcvt.f32.s32 %v15236_v1  ;;  %v7993_v60 = vshrl.u32 %v7991_v14, 16  ;;  %v6940_v2 = vcvt.f32.s32 %v15091_v20 }
0x10c7   :  { %v8181_v32 = vsel %vm17125_vm8, %v6353_v9, %v6929_v16  ;;  %v6952_v0 = vcvt.f32.s32 %v6949_v5  ;;  %v6327_v9 = vadd.s32 %v6326_v46, %v6324_v26  ;;  %vm17155_vm8 = vmmov %vm17154_vm2 }
0x10c8   :  { %v7504_v27 = vshll.u32 %v7503_v57, 16  ;;  %v7995_v39 = vcvt.s32.f32 %v7993_v60  ;;  %v6941_v46 = vshll.u32 %v6940_v2, 16  ;;  %v7542_v2 = vcvt.f32.s32 %v15271_v41  ;;  %v17142_v41 = vld [vmem:[#allocation137_spill] sm:$0xff] }
0x10c9   :  { %v6955_v29 = vadd.s32 %v6954_v58, %v6952_v0  ;;  %v8179_v51 = vsel %vm17130_vm3, %v6327_v9, %v6903_v50  ;;  %v8096_v9 = vand.u32 65535, %v15340_v33  ;;  %v7490_v33 = vcvt.f32.s32 %v15262_v37  ;;  %vm17193_vm3 = vmmov %vm17137_vm0 }
0x10ca   :  { %7920 = vadd.xlane.f32.xlu0 %v7917_v17  ;;  %v7447_v34 = vpop.xlane.xlu0 %7446  ;;  %v7530_v17 = vshll.u32 %v7529_v25, 16  ;;  %v7979_v37 = vand.u32 65535, %v15362_v31 }
0x10cb   :  { %v8183_v24 = vsel %vm17128_vm4, %v6379_v11, %v6955_v29  ;;  %v7450_v43 = vcvt.f32.s32 %v7447_v34  ;;  %v6364_v34 = vcvt.f32.s32 %v17134_v52  ;;  %vm17156_vm4 = vmmov %vm17154_vm2 }
0x10cd   :  { %v7453_v55 = vadd.s32 %v7452_v23, %v7450_v43  ;;  %v6365_v53 = vshll.u32 %v6364_v34, 16 }
0x10ce   :  { %7946 = vadd.xlane.f32.xlu0 %v7943_v18  ;;  %v7473_v12 = vpop.xlane.xlu0 %7472  ;;  %v7992_v18 = vand.u32 65535, %v7991_v14 }
0x10cf   :  { %v15400_v59 = vsel %vm17129_vm6, %v15266_v30, %v7453_v55  ;;  %v7476_v6 = vcvt.f32.s32 %v7473_v12  ;;  %v7914_v30 = vand.u32 65535, %v15372_v3  ;;  %v7966_v3 = vand.u32 65535, %v7965_v47  ;;  %vm17191_vm6 = vmmov %vm17137_vm0 }
0x10d0   :  { %v6390_v55 = vcvt.f32.s32 %v17135_v54  ;;  %v6966_v47 = vcvt.f32.s32 %v15102_v28  ;;  %v6366_v20 = vadd.s32 %v6365_v53, %v6363_v36  ;;  %v6389_v12 = vcvt.f32.s32 %v15276_v8 }
0x10d1   :  { %v7479_v16 = vadd.s32 %v7478_v44, %v7476_v6  ;;  %v7916_v29 = vcvt.s32.f32 %v7914_v30  ;;  %v7968_v26 = vcvt.s32.f32 %v7966_v3  ;;  %v17136_v44 = vld [vmem:[#allocation43_spill] sm:$0xff]  ;;  %v7994_v6 = vcvt.s32.f32 %v7992_v18 }
0x10d2   :  { %7972 = vadd.xlane.f32.xlu0 %v7969_v4  ;;  %v7499_v58 = vpop.xlane.xlu0 %7498  ;;  %v6391_v4 = vshll.u32 %v6390_v55, 16  ;;  %v7464_v28 = vcvt.f32.s32 %v15259_v40  ;;  %v7927_v8 = vand.u32 65535, %v15350_v45  ;;  %v7516_v45 = vcvt.f32.s32 %v15268_v38 }
0x10d3   :  { %v15405_v5 = vsel %vm17131_vm11, %v8179_v51, %v7479_v16  ;;  %v7502_v1 = vcvt.f32.s32 %v7499_v58  ;;  %v6967_v51 = vshll.u32 %v6966_v47, 16  ;;  %v8109_v53 = vand.u32 65535, %v15304_v56  ;;  %v17145_v47 = vld [vmem:[#allocation129_spill] sm:$0xff]  ;;  %vm17194_vm11 = vmmov %vm17137_vm0 }
0x10d4   :  { %v6392_v25 = vadd.s32 %v6391_v4, %v6389_v12  ;;  %v7929_v40 = vcvt.s32.f32 %v7927_v8  ;;  %v8266_v55 = vcombine.high %v17142_v41, %v15051_v63  ;;  %v17147_v12 = vld [vmem:[#allocation69_spill] sm:$0xff] }
0x10d5   :  { %v7505_v0 = vadd.s32 %v7504_v27, %v7502_v1 }
0x10d6   :  { %7998 = vadd.xlane.f32.xlu0 %v7995_v39  ;;  %v7525_v48 = vpop.xlane.xlu0 %7524  ;;  %v8098_v39 = vcvt.s32.f32 %v8096_v9  ;;  %v17150_v9 = vld [vmem:[#allocation135_spill] sm:$0xff] }
0x10d7   :  { %v15409_v42 = vsel %vm17132_vm5, %v8181_v32, %v7505_v0  ;;  %v7528_v11 = vcvt.f32.s32 %v7525_v48  ;;  %v7759_v32 = vshll.u32 %v7758_v21, 16  ;;  %v7465_v0 = vshll.u32 %v7464_v28, 16  ;;  %vm17196_vm5 = vmmov %vm17137_vm0 }
0x10d9   :  { %v7531_v10 = vadd.s32 %v7530_v17, %v7528_v11  ;;  %v7953_v11 = vand.u32 65535, %v15353_v15 }
0x10da   :  { %7918 = vadd.xlane.f32.xlu0 %v7916_v29 }
0x10db   :  { %v15414_v22 = vsel %vm17133_vm14, %v8183_v24, %v7531_v10  ;;  %v7491_v10 = vshll.u32 %v7490_v33, 16  ;;  %v7955_v3 = vcvt.s32.f32 %v7953_v11  ;;  %vm17197_vm14 = vmmov %vm17137_vm0 }
0x10dd   :  { %v7756_v23 = vpop.xlane.xlu1 %7755 }
0x10de   :  { %v7757_v43 = vcvt.f32.s32 %v7756_v23  ;;  %7944 = vadd.xlane.f32.xlu0 %v7942_v62  ;;  %v7517_v23 = vshll.u32 %v7516_v45, 16 }
0x10e0   :  { %v7760_v19 = vadd.s32 %v7759_v32, %v7757_v43  ;;  %v7981_v43 = vcvt.s32.f32 %v7979_v37 }
0x10e1   :  { %v6936_v24 = vpop.xlane.xlu1 %6935 }
0x10e2   :  { %vm7888_vm1 = vcmp.eq.s32.totalorder %v16654_v35, %v7760_v19  ;;  %v6939_v50 = vcvt.f32.s32 %v6936_v24  ;;  %7970 = vadd.xlane.f32.xlu0 %v7968_v26  ;;  %v8111_v24 = vcvt.s32.f32 %v8109_v53  ;;  %v17157_v53 = vld [vmem:[#allocation15_spill] sm:$0xff] }
0x10e3   :  { %v7904_v57 = vsel %vm7888_vm1, %v17136_v44, 0  ;;  %vm17199_vm1 = vmmov %vm17137_vm0 }
0x10e4   :  { %v6942_v49 = vadd.s32 %v6941_v46, %v6939_v50  ;;  %v8004_v14 = vsel %vm5832_vm7, %v7904_v57, 0  ;;  %vm17138_vm7 = vmmov %vm17137_vm0  ;;  %v17144_v46 = vld [vmem:[#allocation132_spill] sm:$0xff] }
0x10e5   :  { %v6962_v60 = vpop.xlane.xlu1 %6961  ;;  %v8006_v16 = vshrl.u32 %v8004_v14, 16  ;;  %v8005_v36 = vand.u32 65535, %v8004_v14  ;;  %v8250_v50 = vcombine.high %v17145_v47, %v17144_v46  ;;  %v17148_v57 = vld [vmem:[#allocation16_spill] sm:$0xff]  ;;  %v17149_v14 = vld [vmem:[#allocation133_spill] sm:$0xff] }
0x10e6   :  { %v8182_v35 = vsel %vm17137_vm0, %v6366_v20, %v6942_v49  ;;  %v6965_v58 = vcvt.f32.s32 %v6962_v60  ;;  %7996 = vadd.xlane.f32.xlu0 %v7994_v6  ;;  %v17146_v20 = vld [vmem:[#allocation139_spill] sm:$0xff]  ;;  %v8280_v49 = vrot.slane %v8266_v55, %v17148_v57  ;;  %v8350_v4 = vcombine.high %v17150_v9, %v17149_v14  ;;  %v17151_v60 = vld [vmem:[#allocation136_spill] sm:$0xff] }
0x10e7   :  { %v8008_v27 = vcvt.s32.f32 %v8006_v16  ;;  %v8007_v18 = vcvt.s32.f32 %v8005_v36  ;;  %v8282_v44 = vcombine.high %v17147_v12, %v17146_v20  ;;  %v8264_v56 = vrot.slane %v8250_v50, %v17148_v57  ;;  %v17152_v16 = vld [vmem:[#allocation140_spill] sm:$0xff]  ;;  %v17161_v50 = vld [vmem:[#allocation55_spill] sm:$0xff] }
0x10e8   :  { %v6968_v1 = vadd.s32 %v6967_v51, %v6965_v58  ;;  %v8351_v51 = vcombine.low %v17152_v16, %v17151_v60  ;;  %v17187_v14 = vld [vmem:[#allocation100_spill] sm:$0xff]  ;;  %v17190_v16 = vld [vmem:[#allocation38_spill] sm:$0xff] }
0x10e9   :  { %v7460_v30 = vpop.xlane.xlu1 %7459  ;;  %8011 = vadd.xlane.f32.xlu1 %v8008_v27  ;;  %v8284_v6 = vcombine.high %v8264_v56, %v8280_v49  ;;  %v8283_v63 = vcombine.low %v8264_v56, %v8280_v49  ;;  %v17162_v49 = vld [vmem:[#allocation23_spill] sm:$0xff]  ;;  %v17189_v12 = vld [vmem:[#allocation52_spill] sm:$0xff] }
0x10ea   :  { %v8184_v48 = vsel %vm17138_vm7, %v6392_v25, %v6968_v1  ;;  %v7463_v17 = vcvt.f32.s32 %v7460_v30  ;;  %8100 = vadd.xlane.f32.xlu0 %v8098_v39  ;;  %v6260_v56 = vcvt.f32.s32 %v17162_v49  ;;  %vm17211_vm7 = vmmov %vm17140_vm9 }
0x10ec   :  { %v7466_v29 = vadd.s32 %v7465_v0, %v7463_v17 }
0x10ed   :  { %v7486_v13 = vpop.xlane.xlu1 %7485  ;;  %7931 = vadd.xlane.f32.xlu1 %v7929_v40 }
0x10ee   :  { %v8194_v21 = vsel %vm17139_vm13, %v15284_v61, %v7466_v29  ;;  %v7489_v62 = vcvt.f32.s32 %v7486_v13  ;;  %v7543_v61 = vshll.u32 %v7542_v2, 16  ;;  %vm17212_vm13 = vmmov %vm17211_vm7 }
0x10f0   :  { %v7492_v52 = vadd.s32 %v7491_v10, %v7489_v62 }
0x10f1   :  { %v7512_v34 = vpop.xlane.xlu1 %7511  ;;  %7957 = vadd.xlane.f32.xlu1 %v7955_v3 }
0x10f2   :  { %v8196_v15 = vsel %vm17140_vm9, %v15288_v7, %v7492_v52  ;;  %v7515_v32 = vcvt.f32.s32 %v7512_v34  ;;  %vm17214_vm9 = vmmov %vm17154_vm2 }
0x10f4   :  { %v7518_v38 = vadd.s32 %v7517_v23, %v7515_v32 }
0x10f5   :  { %v7538_v19 = vpop.xlane.xlu1 %7537  ;;  %7983 = vadd.xlane.f32.xlu1 %v7981_v43 }
0x10f6   :  { %v15440_v26 = vsel %vm17141_vm12, %v8182_v35, %v7518_v38  ;;  %v7541_v31 = vcvt.f32.s32 %v7538_v19  ;;  %vm17215_vm12 = vmmov %vm17154_vm2 }
0x10f8   :  { %v7544_v54 = vadd.s32 %v7543_v61, %v7541_v31 }
0x10f9   :  { %8009 = vadd.xlane.f32.xlu1 %v8007_v18 }
0x10fa   :  { %v15446_v7 = vsel %vm17143_vm10, %v8184_v48, %v7544_v54  ;;  %vm17216_vm10 = vmmov %vm17211_vm7 }
0x10fd   :  { %8113 = vadd.xlane.f32.xlu1 %v8111_v24 }
0x1100   :  { %8355 = vrot.lane.b32.xlu0 %v8282_v44, %s8797_s16  ;;  %v6234_v44 = vcvt.f32.s32 %v17161_v50 }
0x1104   :  { %8371 = vrot.lane.b32.xlu0 %v8284_v6, %s8798_s17  ;;  %v17163_v6 = vld [vmem:[#allocation103_spill] sm:$0xff] }
0x110e   :  { %8363 = vrot.lane.b32.xlu1 %v8283_v63, %s8784_s23  ;;  %v6286_v63 = vcvt.f32.s32 %v17163_v6 }
0x1112   :  { %8357 = vrot.lane.b32.xlu1 %v8350_v4, %s8797_s16  ;;  %v17164_v4 = vld [vmem:[#allocation56_spill] sm:$0xff] }
0x1116   :  { %v8038_v28 = vpop.xlane.xlu1 %8037  ;;  %8365 = vrot.lane.b32.xlu1 %v8351_v51, %s8784_s23  ;;  %v6784_v51 = vcvt.f32.s32 %v17164_v4 }
0x1117   :  { %v8040_v8 = vcvt.f32.s32 %v8038_v28  ;;  %v17165_v28 = vld [vmem:[#allocation36_spill] sm:$0xff] }
0x1119   :  { %v8041_v30 = vshll.u32 %v8040_v8, 16  ;;  %v17166_v8 = vld [vmem:[#allocation78_spill] sm:$0xff] }
0x111a   :  { %v8064_v35 = vpop.xlane.xlu1 %8063 }
0x111b   :  { %v8066_v1 = vcvt.f32.s32 %v8064_v35  ;;  %v6810_v35 = vcvt.f32.s32 %v17165_v28  ;;  %v17175_v28 = vld [vmem:[#allocation22_spill] sm:$0xff] }
0x111d   :  { %v8067_v33 = vshll.u32 %v8066_v1, 16  ;;  %v17167_v1 = vld [vmem:[#allocation76_spill] sm:$0xff] }
0x111e   :  { %v15463_v58 = vpop.xlane.xlu1 %8089 }
0x1122   :  { %v15465_v27 = vpop.xlane.xlu1 %8115 }
0x1126   :  { %v8036_v25 = vpop.xlane.xlu1 %8035 }
0x1127   :  { %v8039_v39 = vcvt.f32.s32 %v8036_v25  ;;  %v6836_v25 = vcvt.f32.s32 %v17166_v8 }
0x1129   :  { %v8042_v48 = vadd.s32 %v8041_v30, %v8039_v39  ;;  %v6862_v39 = vcvt.f32.s32 %v17167_v1  ;;  %v17168_v30 = vld [vmem:[#allocation90_spill] sm:$0xff]  ;;  %v17178_v1 = vld [vmem:[#allocation40_spill] sm:$0xff] }
0x112a   :  { %v8062_v0 = vpop.xlane.xlu1 %8061 }
0x112b   :  { %v8065_v17 = vcvt.f32.s32 %v8062_v0  ;;  %v8210_v11 = vsel %vm17153_vm15, %v8194_v21, %v8042_v48  ;;  %v6208_v0 = vcvt.f32.s32 %v17168_v30  ;;  %v6796_v30 = vcvt.f32.s32 %v17178_v1  ;;  %vm17217_vm15 = vmmov %vm17211_vm7 }
0x112c   :  { %v6207_v1 = vcvt.f32.s32 %v17187_v14 }
0x112d   :  { %v8068_v40 = vadd.s32 %v8067_v33, %v8065_v17  ;;  %v17169_v33 = vld [vmem:[#allocation57_spill] sm:$0xff]  ;;  %v17170_v17 = vld [vmem:[#allocation80_spill] sm:$0xff] }
0x112e   :  { %v6221_v48 = vcvt.f32.s32 %v17169_v33 }
0x112f   :  { %v8212_v29 = vsel %vm17154_vm2, %v8196_v15, %v8068_v40  ;;  %v6247_v40 = vcvt.f32.s32 %v17170_v17  ;;  %vm17220_vm2 = vmmov %vm17211_vm7 }
0x1130   :  { %v8493_v13 = vcombine.low %v8210_v11, %v8212_v29  ;;  %v15506_v11 = vpop.xlane.xlu1 %8087 }
0x1131   :  { %v6248_v50 = vshll.u32 %v6247_v40, 16  ;;  %v17181_v40 = vld [vmem:[#allocation123_spill] sm:$0xff] }
0x1132   :  { %v15485_v41 = vrot.slane %v8493_v13, %v17157_v53  ;;  %v17171_v13 = vld [vmem:[#allocation59_spill] sm:$0xff] }
0x1134   :  { %17159 = vst [vmem:[#allocation50_spill] sm:$0xff] %v15485_v41 }
0x113b   :  { %v8025_v10 = vpop.xlane.xlu0 %8024 }
0x113c   :  { %v8027_v37 = vcvt.f32.s32 %v8025_v10  ;;  %v6273_v10 = vcvt.f32.s32 %v17171_v13  ;;  %v6848_v13 = vcvt.f32.s32 %v17181_v40 }
0x113e   :  { %v8028_v2 = vshll.u32 %v8027_v37, 16  ;;  %v6274_v6 = vshll.u32 %v6273_v10, 16  ;;  %v17182_v10 = vld [vmem:[#allocation64_spill] sm:$0xff] }
0x113f   :  { %v8051_v45 = vpop.xlane.xlu0 %8050 }
0x1140   :  { %v8053_v34 = vcvt.f32.s32 %v8051_v45  ;;  %v17172_v45 = vld [vmem:[#allocation45_spill] sm:$0xff] }
0x1141   :  { %v6771_v37 = vcvt.f32.s32 %v17172_v45  ;;  %v6783_v45 = vcvt.f32.s32 %v17182_v10  ;;  %v6259_v10 = vcvt.f32.s32 %v17189_v12 }
0x1142   :  { %v8054_v43 = vshll.u32 %v8053_v34, 16  ;;  %v6235_v34 = vshll.u32 %v6234_v44, 16  ;;  %v6849_v44 = vcvt.f32.s32 %v17175_v28 }
0x1143   :  { %v15469_v62 = vpop.xlane.xlu0 %8076  ;;  %v6772_v4 = vshll.u32 %v6771_v37, 16  ;;  %v17183_v37 = vld [vmem:[#allocation44_spill] sm:$0xff] }
0x1147   :  { %v15471_v3 = vpop.xlane.xlu0 %8102 }
0x114b   :  { %v8023_v52 = vpop.xlane.xlu0 %8022  ;;  %v15516_v49 = vpop.xlane.xlu1 %7933 }
0x114c   :  { %v8026_v23 = vcvt.f32.s32 %v8023_v52 }
0x114e   :  { %v8029_v36 = vadd.s32 %v8028_v2, %v8026_v23  ;;  %v6261_v23 = vshll.u32 %v6260_v56, 16  ;;  %v6287_v2 = vshll.u32 %v6286_v63, 16  ;;  %v17176_v56 = vld [vmem:[#allocation63_spill] sm:$0xff] }
0x114f   :  { %v8049_v32 = vpop.xlane.xlu0 %8048  ;;  %v6770_v63 = vcvt.f32.s32 %v17176_v56  ;;  %v17185_v56 = vld [vmem:[#allocation70_spill] sm:$0xff] }
0x1150   :  { %v8052_v38 = vcvt.f32.s32 %v8049_v32  ;;  %v8209_v15 = vsel %vm17155_vm8, %v15400_v59, %v8029_v36  ;;  %v17160_v59 = vld [vmem:[#allocation34_spill] sm:$0xff]  ;;  %v17173_v32 = vld [vmem:[#allocation25_spill] sm:$0xff]  ;;  %v6785_v36 = vshll.u32 %v6784_v51, 16  ;;  %v6809_v24 = vcvt.f32.s32 %v17185_v56  ;;  %vm17221_vm8 = vmmov %vm17156_vm4 }
0x1151   :  { %v6195_v47 = vcvt.f32.s32 %v17160_v59  ;;  %v6209_v59 = vshll.u32 %v6208_v0, 16  ;;  %v6773_v9 = vadd.s32 %v6772_v4, %v6770_v63  ;;  %v6285_v56 = vcvt.f32.s32 %v17190_v16  ;;  %v17195_v16 = vld [vmem:[#allocation131_spill] sm:$0xff] }
0x1152   :  { %v8055_v19 = vadd.s32 %v8054_v43, %v8052_v38  ;;  %v6797_v43 = vcvt.f32.s32 %v17173_v32  ;;  %v6811_v38 = vshll.u32 %v6810_v35, 16  ;;  %v17177_v35 = vld [vmem:[#allocation102_spill] sm:$0xff]  ;;  %v6246_v32 = vcvt.f32.s32 %v17183_v37  ;;  %v15537_v37 = vpop.xlane.xlu1 %7959 }
0x1153   :  { %v15473_v21 = vpop.xlane.xlu0 %8074  ;;  %v6196_v29 = vshll.u32 %v6195_v47, 16  ;;  %v6222_v47 = vshll.u32 %v6221_v48, 16  ;;  %v17180_v48 = vld [vmem:[#allocation62_spill] sm:$0xff]  ;;  %v6210_v63 = vadd.s32 %v6209_v59, %v6207_v1 }
0x1154   :  { %v8211_v61 = vsel %vm17156_vm4, %v15405_v5, %v8055_v19  ;;  %v6837_v19 = vshll.u32 %v6836_v25, 16  ;;  %v6798_v51 = vshll.u32 %v6797_v43, 16  ;;  %v6194_v25 = vcvt.f32.s32 %v17177_v35  ;;  %v17186_v43 = vld [vmem:[#allocation67_spill] sm:$0xff] }
0x1155   :  { %v8485_v31 = vcombine.low %v8209_v15, %v8211_v61  ;;  %v17174_v15 = vld [vmem:[#allocation94_spill] sm:$0xff]  ;;  %v6220_v17 = vcvt.f32.s32 %v17180_v48  ;;  %v6835_v55 = vcvt.f32.s32 %v17186_v43  ;;  %v6850_v35 = vshll.u32 %v6849_v44, 16 }
0x1156   :  { %v6823_v61 = vcvt.f32.s32 %v17174_v15  ;;  %v17184_v15 = vld [vmem:[#allocation68_spill] sm:$0xff]  ;;  %v6197_v48 = vadd.s32 %v6196_v29, %v6194_v25  ;;  %v6799_v40 = vadd.s32 %v6798_v51, %v6796_v30  ;;  %v6786_v43 = vadd.s32 %v6785_v36, %v6783_v45  ;;  %v17192_v29 = vld [vmem:[#allocation145_spill] sm:$0xff] }
0x1157   :  { %v15479_v18 = vpop.xlane.xlu0 %7920  ;;  %v15482_v54 = vrot.slane %v8485_v31, %v17157_v53  ;;  %v15514_v31 = vshll.u32 %v6862_v39, 16  ;;  %v17179_v39 = vld [vmem:[#allocation74_spill] sm:$0xff]  ;;  %v6272_v28 = vcvt.f32.s32 %v17184_v15  ;;  %v6223_v15 = vadd.s32 %v6222_v47, %v6220_v17  ;;  %v17203_v17 = vld [vmem:[#allocation124_spill] sm:$0xff] }
0x1158   :  { %v6822_v33 = vcvt.f32.s32 %v17179_v39  ;;  %v6824_v0 = vshll.u32 %v6823_v61, 16  ;;  %v17188_v39 = vld [vmem:[#allocation53_spill] sm:$0xff]  ;;  %v6851_v41 = vadd.s32 %v6850_v35, %v6848_v13  ;;  %v6249_v44 = vadd.s32 %v6248_v50, %v6246_v32 }
0x1159   :  { %17158 = vst [vmem:[#allocation107_spill] sm:$0xff] %v15482_v54  ;;  %v6233_v61 = vcvt.f32.s32 %v17188_v39  ;;  %v6275_v54 = vadd.s32 %v6274_v6, %v6272_v28  ;;  %v6812_v14 = vadd.s32 %v6811_v38, %v6809_v24  ;;  %v6838_v4 = vadd.s32 %v6837_v19, %v6835_v55  ;;  %v17198_v24 = vld [vmem:[#allocation18_spill] sm:$0xff]  ;;  %v15562_v6 = vpop.xlane.xlu1 %7985 }
0x115a   :  { %v6825_v60 = vadd.s32 %v6824_v0, %v6822_v33  ;;  %v8169_v39 = vsel %vm17191_vm6, %v6197_v48, %v6773_v9  ;;  %v7347_v51 = vcvt.f32.s32 %v17192_v29  ;;  %v8171_v12 = vsel %vm17193_vm3, %v6223_v15, %v6799_v40  ;;  %v17206_v40 = vld [vmem:[#allocation130_spill] sm:$0xff]  ;;  %vm17222_vm6 = vmmov %vm17156_vm4 }
0x115b   :  { %v15491_v46 = vpop.xlane.xlu0 %7946  ;;  %v6236_v57 = vadd.s32 %v6235_v34, %v6233_v61  ;;  %v6262_v30 = vadd.s32 %v6261_v23, %v6259_v10  ;;  %v7373_v36 = vcvt.f32.s32 %v17195_v16  ;;  %v15549_v50 = vadd.s32 %v6287_v2, %v6285_v56  ;;  %v17200_v23 = vld [vmem:[#allocation105_spill] sm:$0xff]  ;;  %v17205_v61 = vld [vmem:[#allocation104_spill] sm:$0xff]  ;;  %v17207_v15 = vld [vmem:[#allocation122_spill] sm:$0xff] }
0x115c   :  { %v15546_v47 = vsel %vm17194_vm11, %v6249_v44, %v6825_v60  ;;  %v15552_v55 = vsel %vm17196_vm5, %v6275_v54, %v6851_v41  ;;  %v8170_v9 = vsel %vm17197_vm14, %v6210_v63, %v6786_v43  ;;  %v7346_v34 = vcvt.f32.s32 %v17198_v24  ;;  %v17201_v2 = vld [vmem:[#allocation61_spill] sm:$0xff]  ;;  %v17202_v54 = vld [vmem:[#allocation138_spill] sm:$0xff]  ;;  %v17208_v44 = vld [vmem:[#allocation75_spill] sm:$0xff] }
0x115d   :  { %v8172_v38 = vsel %vm17199_vm1, %v6236_v57, %v6812_v14  ;;  %v15558_v19 = vsel %vm17137_vm0, %v6262_v30, %v6838_v4  ;;  %v7372_v59 = vcvt.f32.s32 %v17200_v23  ;;  %v8079_v60 = vcvt.f32.s32 %v15469_v62  ;;  %v17204_v57 = vld [vmem:[#allocation134_spill] sm:$0xff]  ;;  %v17210_v16 = vld [vmem:[#allocation128_spill] sm:$0xff]  ;;  %vm17223_vm3 = vmmov %vm17156_vm4 }
0x115e   :  { %v6861_v33 = vcvt.f32.s32 %v17201_v2  ;;  %v7348_v0 = vshll.u32 %v7347_v51, 16  ;;  %v7360_v41 = vcvt.f32.s32 %v17202_v54  ;;  %v7386_v13 = vcvt.f32.s32 %v17203_v17  ;;  %v17209_v4 = vld [vmem:[#allocation142_spill] sm:$0xff]  ;;  %vm17224_vm11 = vmmov %vm17137_vm0 }
0x115f   :  { %v15494_v5 = vpop.xlane.xlu0 %7972  ;;  %v7374_v32 = vshll.u32 %v7373_v36, 16  ;;  %v7399_v28 = vcvt.f32.s32 %v17204_v57  ;;  %v8105_v35 = vcvt.f32.s32 %v15471_v3  ;;  %v8078_v1 = vcvt.f32.s32 %v15473_v21  ;;  %vm17225_vm5 = vmmov %vm17220_vm2 }
0x1160   :  { %v7425_v62 = vcvt.f32.s32 %v17205_v61  ;;  %v7349_v48 = vadd.s32 %v7348_v0, %v7346_v34  ;;  %v7359_v10 = vcvt.f32.s32 %v17206_v40  ;;  %v7385_v56 = vcvt.f32.s32 %v17207_v15  ;;  %v17213_v61 = vld [vmem:[#allocation106_spill] sm:$0xff]  ;;  %vm17226_vm14 = vmmov %vm17223_vm3 }
0x1161   :  { %v7375_v43 = vadd.s32 %v7374_v32, %v7372_v59  ;;  %v7398_v14 = vcvt.f32.s32 %v17208_v44  ;;  %v7412_v63 = vcvt.f32.s32 %v17209_v4  ;;  %v8080_v29 = vshll.u32 %v8079_v60, 16  ;;  %v17218_v15 = vld [vmem:[#allocation126_spill] sm:$0xff]  ;;  %vm17227_vm1 = vmmov %vm17220_vm2 }
0x1162   :  { %v15580_v30 = vadd.s32 %v15514_v31, %v6861_v33  ;;  %v7361_v3 = vshll.u32 %v7360_v41, 16  ;;  %v7387_v21 = vshll.u32 %v7386_v13, 16  ;;  %v7438_v36 = vcvt.f32.s32 %v17210_v16  ;;  %vm17228_vm0 = vmmov %vm17223_vm3 }
0x1163   :  { %v15510_v52 = vpop.xlane.xlu0 %7998  ;;  %v7400_v34 = vshll.u32 %v7399_v28, 16  ;;  %v8106_v23 = vshll.u32 %v8105_v35, 16  ;;  %v8081_v2 = vadd.s32 %v8080_v29, %v8078_v1  ;;  %v7426_v59 = vshll.u32 %v7425_v62, 16 }
0x1164   :  { %v15584_v54 = vsel %vm17211_vm7, %v8169_v39, %v7349_v48  ;;  %v7362_v17 = vadd.s32 %v7361_v3, %v7359_v10  ;;  %v7388_v60 = vadd.s32 %v7387_v21, %v7385_v56  ;;  %v8187_v32 = vsel %vm17212_vm13, %v8171_v12, %v7375_v43  ;;  %v17219_v3 = vld [vmem:[#allocation24_spill] sm:$0xff]  ;;  %vm17229_vm7 = vmmov %vm17227_vm1 }
0x1165   :  { %v7401_v57 = vadd.s32 %v7400_v34, %v7398_v14  ;;  %v7413_v31 = vshll.u32 %v7412_v63, 16  ;;  %v7439_v13 = vshll.u32 %v7438_v36, 16  ;;  %v7424_v40 = vcvt.f32.s32 %v17213_v61  ;;  %vm17230_vm13 = vmmov %vm17228_vm0 }
0x1166   :  { %v7936_v28 = vcvt.f32.s32 %v15516_v49  ;;  %v7962_v35 = vcvt.f32.s32 %v15537_v37  ;;  %v15592_v1 = vsel %vm17214_vm9, %v15409_v42, %v8081_v2  ;;  %v7949_v39 = vcvt.f32.s32 %v15491_v46  ;;  %vm17231_vm9 = vmmov %vm17228_vm0 }
0x1167   :  { %v15520_v8 = vpop.xlane.xlu0 %7918  ;;  %v8001_v62 = vcvt.f32.s32 %v15510_v52  ;;  %v8186_v48 = vsel %vm17216_vm10, %v8170_v9, %v7362_v17  ;;  %v8188_v10 = vsel %vm17217_vm15, %v8172_v38, %v7388_v60  ;;  %v7411_v49 = vcvt.f32.s32 %v17218_v15  ;;  %vm17233_vm10 = vmmov %vm17228_vm0 }
0x1168   :  { %v7923_v42 = vcvt.f32.s32 %v15479_v18  ;;  %v7427_v44 = vadd.s32 %v7426_v59, %v7424_v40  ;;  %v7975_v14 = vcvt.f32.s32 %v15494_v5  ;;  %v7937_v4 = vshll.u32 %v7936_v28, 16 }
0x1169   :  { %v7950_v38 = vshll.u32 %v7949_v39, 16  ;;  %v8002_v63 = vshll.u32 %v8001_v62, 16  ;;  %v7922_v29 = vcvt.f32.s32 %v15520_v8  ;;  %v7437_v21 = vcvt.f32.s32 %v17219_v3 }
0x116a   :  { %v7988_v18 = vcvt.f32.s32 %v15562_v6  ;;  %v7414_v2 = vadd.s32 %v7413_v31, %v7411_v49  ;;  %v7976_v5 = vshll.u32 %v7975_v14, 16  ;;  %v8191_v8 = vsel %vm17220_vm2, %v15552_v55, %v7427_v44 }
0x116b   :  { %v15534_v20 = vpop.xlane.xlu0 %7944  ;;  %v8092_v17 = vcvt.f32.s32 %v15463_v58  ;;  %v8091_v40 = vcvt.f32.s32 %v15506_v11  ;;  %vm17245_vm15 = vcmask 31744   ;;  %vm17246_vm2 = vcmask 64512  }
0x116c   :  { %v7948_v56 = vcvt.f32.s32 %v15534_v20 }
0x116e   :  { %v7951_v36 = vadd.s32 %v7950_v38, %v7948_v56 }
0x116f   :  { %v15542_v25 = vpop.xlane.xlu0 %7970 }
0x1170   :  { %v7974_v20 = vcvt.f32.s32 %v15542_v25  ;;  %v7440_v25 = vadd.s32 %v7439_v13, %v7437_v21  ;;  %v8203_v31 = vsel %vm17156_vm4, %v8187_v32, %v7951_v36  ;;  %v8176_v13 = vsel %vm17224_vm11, %v15549_v50, %v15580_v30  ;;  %vm17248_vm4 = vmmov %vm17245_vm15 }
0x1171   :  { %v8190_v32 = vsel %vm17227_vm1, %v15558_v19, %v7414_v2  ;;  %vm17254_vm11 = vmmov %vm17246_vm2 }
0x1172   :  { %v7977_v61 = vadd.s32 %v7976_v5, %v7974_v20  ;;  %v17234_v20 = vld [vmem:[#allocation16_spill] sm:$0xff] }
0x1173   :  { %v15567_v45 = vpop.xlane.xlu0 %7996 }
0x1174   :  { %v8000_v46 = vcvt.f32.s32 %v15567_v45  ;;  %v7924_v45 = vshll.u32 %v7923_v42, 16  ;;  %v8192_v42 = vsel %vm17229_vm7, %v8176_v13, %v7440_v25 }
0x1176   :  { %v15577_v51 = vpop.xlane.xlu1 %8011  ;;  %v7925_v60 = vadd.s32 %v7924_v45, %v7922_v29 }
0x1177   :  { %v8101_v24 = vpop.xlane.xlu0 %8100 }
0x1178   :  { %v8104_v0 = vcvt.f32.s32 %v8101_v24  ;;  %v8003_v24 = vadd.s32 %v8002_v63, %v8000_v46  ;;  %v8201_v11 = vsel %vm17226_vm14, %v15584_v54, %v7925_v60 }
0x117a   :  { %v8107_v33 = vadd.s32 %v8106_v23, %v8104_v0  ;;  %v7932_v41 = vpop.xlane.xlu1 %7931  ;;  %v8014_v0 = vcvt.f32.s32 %v15577_v51  ;;  %v8207_v51 = vsel %vm17222_vm6, %v8191_v8, %v8003_v24  ;;  %v17235_v24 = vld [vmem:[#allocation107_spill] sm:$0xff]  ;;  %vm17252_vm6 = vmmov %vm17248_vm4 }
0x117b   :  { %v7935_v52 = vcvt.f32.s32 %v7932_v41  ;;  %v7989_v41 = vshll.u32 %v7988_v18, 16 }
0x117c   :  { %v15598_v12 = vsel %vm17215_vm12, %v15414_v22, %v8107_v33  ;;  %v7963_v22 = vshll.u32 %v7962_v35, 16  ;;  %v8118_v33 = vcvt.f32.s32 %v15465_v27  ;;  %v8015_v55 = vshll.u32 %v8014_v0, 16  ;;  %vm17232_vm12 = vmmov %vm17228_vm0 }
0x117d   :  { %v8501_v37 = vcombine.low %v15592_v1, %v15598_v12  ;;  %v7938_v34 = vadd.s32 %v7937_v4, %v7935_v52  ;;  %v8189_v27 = vsel %vm17225_vm5, %v15546_v47, %v7401_v57  ;;  %vm17255_vm5 = vmmov %vm17248_vm4 }
0x117e   :  { %v7958_v43 = vpop.xlane.xlu1 %7957  ;;  %v8205_v15 = vsel %vm17228_vm0, %v8189_v27, %v7977_v61  ;;  %v8119_v56 = vshll.u32 %v8118_v33, 16  ;;  %v17239_v61 = vld [vmem:[#allocation140_spill] sm:$0xff]  ;;  %vm17258_vm0 = vmmov %vm17246_vm2 }
0x117f   :  { %v7961_v9 = vcvt.f32.s32 %v7958_v43  ;;  %v8202_v28 = vsel %vm17223_vm3, %v8186_v48, %v7938_v34  ;;  %v8417_v48 = vcombine.low %v8201_v11, %v8203_v31  ;;  %v8433_v52 = vcombine.low %v8205_v15, %v8207_v51  ;;  %v8356_v51 = vpop.permute.xlu0 %8355  ;;  %vm17253_vm3 = vmmov %vm17246_vm2 }
0x1180   :  { %v8508_v21 = vrot.slane %v8501_v37, %v17157_v53 }
0x1181   :  { %v7964_v16 = vadd.s32 %v7963_v22, %v7961_v9  ;;  %v8424_v19 = vrot.slane %v8417_v48, %v17157_v53  ;;  %v8440_v22 = vrot.slane %v8433_v52, %v17157_v53 }
0x1182   :  { %v7984_v23 = vpop.xlane.xlu1 %7983 }
0x1183   :  { %v7987_v59 = vcvt.f32.s32 %v7984_v23  ;;  %v8204_v6 = vsel %vm17221_vm8, %v8188_v10, %v7964_v16  ;;  %v8093_v10 = vshll.u32 %v8092_v17, 16  ;;  %v8372_v13 = vpop.permute.xlu0 %8371  ;;  %vm17247_vm8 = vcmask 97280  }
0x1184   :  { %v8425_v39 = vcombine.low %v8202_v28, %v8204_v6  ;;  %vm17256_vm14 = vmmov %vm17247_vm8 }
0x1185   :  { %v7990_v58 = vadd.s32 %v7989_v41, %v7987_v59  ;;  %v8094_v46 = vadd.s32 %v8093_v10, %v8091_v40  ;;  %v17240_v40 = vld [vmem:[#allocation136_spill] sm:$0xff]  ;;  %vm17257_vm1 = vmmov %vm17247_vm8 }
0x1186   :  { %v8010_v35 = vpop.xlane.xlu1 %8009  ;;  %v8432_v54 = vrot.slane %v8425_v39, %v17157_v53  ;;  %v17241_v31 = vcombine.high %v17239_v61, %v17240_v40  ;;  %vm17259_vm7 = vmmov %vm17257_vm1 }
0x1187   :  { %v8013_v62 = vcvt.f32.s32 %v8010_v35  ;;  %v8206_v30 = vsel %vm17230_vm13, %v8190_v32, %v7990_v58  ;;  %v8214_v9 = vsel %vm17232_vm12, %v15440_v26, %v8094_v46  ;;  %v17242_v35 = vld [vmem:[#allocation69_spill] sm:$0xff]  ;;  %vm17260_vm13 = vcmask 130048  }
0x1188   :  { %v8449_v38 = vcombine.low %v8424_v19, %v8432_v54  ;;  %v8450_v37 = vcombine.high %v8424_v19, %v8432_v54  ;;  %v17250_v46 = vld [vmem:[#allocation133_spill] sm:$0xff] }
0x1189   :  { %v8016_v49 = vadd.s32 %v8015_v55, %v8013_v62  ;;  %v17243_v55 = vld [vmem:[#allocation139_spill] sm:$0xff] }
0x118a   :  { %v8114_v50 = vpop.xlane.xlu1 %8113  ;;  %v8457_v45 = vrot.slane %v8449_v38, %v17234_v20  ;;  %v8464_v6 = vrot.slane %v8450_v37, %v17234_v20  ;;  %v17244_v39 = vcombine.low %v17242_v35, %v17243_v55 }
0x118b   :  { %v8208_v47 = vsel %vm17231_vm9, %v8192_v42, %v8016_v49  ;;  %v8117_v57 = vcvt.f32.s32 %v8114_v50  ;;  %vm17261_vm9 = vmmov %vm17260_vm13 }
0x118c   :  { %v8441_v43 = vcombine.low %v8206_v30, %v8208_v47  ;;  %v8377_v58 = vsel %vm17245_vm15, %v17244_v39, %v8356_v51  ;;  %vm17262_vm12 = vmmov %vm17261_vm9 }
0x118d   :  { %v8120_v44 = vadd.s32 %v8119_v56, %v8117_v57  ;;  %v17249_v56 = vld [vmem:[#allocation135_spill] sm:$0xff] }
0x118e   :  { %v8448_v14 = vrot.slane %v8441_v43, %v17157_v53  ;;  %v8364_v28 = vpop.permute.xlu1 %8363  ;;  %v17251_v52 = vcombine.low %v17249_v56, %v17250_v46 }
0x118f   :  { %v8216_v4 = vsel %vm17233_vm10, %v15446_v7, %v8120_v44  ;;  %v17236_v7 = vld [vmem:[#allocation50_spill] sm:$0xff]  ;;  %v8379_v62 = vsel %vm17246_vm2, %v8377_v58, %v8364_v28 }
0x1190   :  { %v8509_v63 = vcombine.low %v8214_v9, %v8216_v4  ;;  %v8466_v29 = vcombine.high %v8440_v22, %v8448_v14  ;;  %v8465_v3 = vcombine.low %v8440_v22, %v8448_v14  ;;  %v17237_v34 = vcombine.high %v17235_v24, %v17236_v7 }
0x1191   :  { %v17238_v1 = vcombine.low %v17235_v24, %v17236_v7  ;;  %v8381_v27 = vsel %vm17247_vm8, %v8379_v62, %v8372_v13 }
0x1192   :  { %v8516_v18 = vrot.slane %v8509_v63, %v17157_v53  ;;  %v8473_v16 = vrot.slane %v8465_v3, %v17234_v20  ;;  %v8532_v23 = vrot.slane %v17237_v34, %v17234_v20  ;;  %v8480_v0 = vrot.slane %v8466_v29, %v17234_v20  ;;  %v8358_v10 = vpop.permute.xlu1 %8357 }
0x1193   :  { %v8525_v12 = vrot.slane %v17238_v1, %v17234_v20  ;;  %v8378_v50 = vsel %vm17252_vm6, %v17251_v52, %v8358_v10 }
0x1194   :  { %v8534_v36 = vcombine.high %v8508_v21, %v8516_v18  ;;  %v8533_v26 = vcombine.low %v8508_v21, %v8516_v18  ;;  %v8481_v2 = vcombine.low %v8457_v45, %v8473_v16  ;;  %v8483_v25 = vcombine.low %v8464_v6, %v8480_v0 }
0x1195   :  { %v8482_v33 = vcombine.high %v8457_v45, %v8473_v16  ;;  %v8484_v41 = vcombine.high %v8464_v6, %v8480_v0 }
0x1196   :  { %v8548_v5 = vrot.slane %v8534_v36, %v17234_v20  ;;  %v8541_v53 = vrot.slane %v8533_v26, %v17234_v20  ;;  %v8366_v11 = vpop.permute.xlu1 %8365 }
0x1197   :  { %v8380_v30 = vsel %vm17253_vm3, %v8378_v50, %v8366_v11 }
0x1198   :  { %v8551_v59 = vcombine.low %v8532_v23, %v8548_v5  ;;  %v8550_v8 = vcombine.high %v8525_v12, %v8541_v53  ;;  %v8552_v17 = vcombine.high %v8532_v23, %v8548_v5  ;;  %v8549_v60 = vcombine.low %v8525_v12, %v8541_v53 }
0x119a   :  { %8559 = vrot.lane.b32.xlu0 %v8551_v59, %s8784_s23  ;;  %8555 = vrot.lane.b32.xlu1 %v8550_v8, %s8797_s16 }
0x119e   :  { %8557 = vrot.lane.b32.xlu0 %v8483_v25, %s8784_s23  ;;  %8553 = vrot.lane.b32.xlu1 %v8482_v33, %s8797_s16 }
0x11a2   :  { %8561 = vrot.lane.b32.xlu0 %v8484_v41, %s8798_s17  ;;  %8373 = vrot.lane.b32.xlu1 %v17241_v31, %s8798_s17 }
0x11a6   :  { %8563 = vrot.lane.b32.xlu0 %v8552_v17, %s8798_s17 }
0x11cb   :  { %8383 = vxpose.xlu1.b32.start [1/2] (short) (narrow) %v8381_v27, 16 }
0x120c   :  { %v8556_v32 = vpop.permute.xlu1 %8555  ;;  %v8560_v48 = vpop.permute.xlu0 %8559 }
0x120d   :  { %v8566_v43 = vsel %vm17255_vm5, %v8549_v60, %v8556_v32 }
0x120e   :  { %v8568_v22 = vsel %vm17258_vm0, %v8566_v43, %v8560_v48 }
0x1210   :  { %v8554_v15 = vpop.permute.xlu1 %8553  ;;  %v8558_v49 = vpop.permute.xlu0 %8557 }
0x1211   :  { %v8565_v42 = vsel %vm17248_vm4, %v8481_v2, %v8554_v15 }
0x1212   :  { %v8567_v47 = vsel %vm17254_vm11, %v8565_v42, %v8558_v49 }
0x1214   :  { %v8374_v57 = vpop.permute.xlu1 %8373  ;;  %v8562_v54 = vpop.permute.xlu0 %8561 }
0x1215   :  { %v8382_v44 = vsel %vm17256_vm14, %v8380_v30, %v8374_v57  ;;  %v8569_v19 = vsel %vm17257_vm1, %v8567_v47, %v8562_v54 }
0x1216   :  { %8384 = vxpose.xlu1.b32.end [2/2] (short) (narrow) %v8382_v44, 16  ;;  %8571 = vxpose.xlu0.b32.start [1/2] (short) (narrow) %v8569_v19, 16 }
0x1218   :  { %v8564_v14 = vpop.permute.xlu0 %8563 }
0x1219   :  { %v8570_v9 = vsel %vm17259_vm7, %v8568_v22, %v8564_v14 }
0x121a   :  { %8572 = vxpose.xlu0.b32.end [2/2] (short) (narrow) %v8570_v9, 16 }
0x1292   :  { %v8399_v4 = vpop.trf.xlu1 }
0x1293   :  { %8415 = vst.msk [vmem:[#allocation7] sm:$0xff] %vm17260_vm13, %v8399_v4 }
0x1296   :  { %v8587_v38 = vpop.trf.xlu0  ;;  %v8400_v63 = vpop.trf.xlu1 }
0x1297   :  { %8603 = vst.msk [vmem:[#allocation8] sm:$0xff] %vm17261_vm9, %v8587_v38 }
0x1298   :  { %8416 = vst.msk [vmem:[#allocation7 + $0x8] sm:$0xff] %vm17262_vm12, %v8400_v63 }
0x1299   :  { %8741 = shalt.err (!%p8738_p6)
}
0x129a   :  { %s8742_s27 = scalar_lea.hbm %s15727_s2, 256 }
0x129b   :  { %p8743_p7 = scmp.ne.s32.totalorder %s15727_s2, %s8742_s27  ;;  %p8746_p8 = scmp.lt.u32.totalorder %s8742_s27, %s15727_s2 }
0x129d   :  { %p8748_p9 = pnand %p8746_p8, %p8743_p7 }
0x129f   :  { %8751 = shalt.err (!%p8748_p9)
}
0x12a0   :  { %8616 = dma.vmem_to_hbm [thread:$0]  %s8611_s19, 256, %s15727_s2, [#allocation4], %s8783_s22, %s8783_s22, %s8784_s23   ;;  %v8588_v29 = vpop.trf.xlu0  ;;  %vm17263_vm10 = vmmov %vm17261_vm9 }
0x12a1   :  { %8604 = vst.msk [vmem:[#allocation8 + $0x8] sm:$0xff] %vm17263_vm10, %v8588_v29  ;;  %s8752_s7 = scalar_lea.vmem %s8623_s21, 256  ;;  %p8757_p11 = scmp.lt.s32.totalorder %s8623_s21, %s8623_s21 }
0x12a2   :  { %p8753_p10 = scmp.ne.s32.totalorder %s8623_s21, %s8752_s7  ;;  %p8758_p12 = scmp.lt.s32.totalorder %s8752_s7, %s8752_s7 }
0x12a4   :  { %p8759_p13 = por %p8758_p12, %p8757_p11 }
0x12a6   :  { %p8760_p0 = pnand %p8759_p13, %p8753_p10 }
0x12a8   :  { %8763 = shalt.err (!%p8760_p0)
}
0x12a9   :  { %s8764_s9 = scalar_lea.hbm %s15728_s3, 256 }
0x12aa   :  { %p8765_p1 = scmp.ne.s32.totalorder %s15728_s3, %s8764_s9  ;;  %p8768_p2 = scmp.lt.u32.totalorder %s8764_s9, %s15728_s3 }
0x12ac   :  { %p8770_p3 = pnand %p8768_p2, %p8765_p1 }
0x12ae   :  { %8773 = shalt.err (!%p8770_p3)
}
0x12af   :  { %8628 = dma.vmem_to_hbm [thread:$0]  %s8623_s21, 256, %s15728_s3, [#allocation9], %s8783_s22, %s8783_s22, %s8784_s23  }
0x12b0   :  { %8778 = dma.done.wait [#allocation4], 256  }
0x12b1   :  { %8779 = vsyncadd [#allocation4], 4294967040 }
0x12b2   :  { %8780 = dma.done.wait [#allocation9], 256  }
0x12b3   :  { %8781 = vsyncadd [#allocation9], 4294967040 }
0x12b4   :  { %8635 = vsyncpa [#allocation3], 1 }
0x12b5   :  { %8636 = vsyncpa [#allocation6], 1 }
0x12b6   :  { %8637 = vsyncpa [#allocation4], 1 }
0x12b7   :  { %8638 = vsyncpa [#allocation9], 1 }

</bundles_post_ra>
